<compile_context>
chip_gen: v5e
topology: v5e:2x2
jax: 0.10.0
libtpu: 0.0.40
codegen_flags: <defaults>
</compile_context>

<pallas_src>
import jax
import jax.numpy as jnp
from jax.experimental import pallas as pl
from jax.experimental.pallas import tpu as pltpu


# ---------------------------------------------------------------------------
# Pallas kernel: fused  out = relu(x @ w + b)   (bf16 x bf16 -> f32 acc)
# ---------------------------------------------------------------------------
def _linear_relu_kernel(a_ref, b_ref, bias_ref, o_ref, acc_ref):
    @pl.when(pl.program_id(2) == 0)
    def _():
        acc_ref[...] = jnp.zeros_like(acc_ref)

    acc_ref[...] += jnp.dot(
        a_ref[...], b_ref[...], preferred_element_type=jnp.float32
    )

    @pl.when(pl.program_id(2) == pl.num_programs(2) - 1)
    def _():
        o_ref[...] = jnp.maximum(acc_ref[...] + bias_ref[...], 0.0).astype(
            o_ref.dtype
        )


def _round_up(x, m):
    return ((x + m - 1) // m) * m


def _pad_to(x, mult, axis):
    size = x.shape[axis]
    pad = (-size) % mult
    if pad == 0:
        return x
    pads = [(0, 0)] * x.ndim
    pads[axis] = (0, pad)
    return jnp.pad(x, pads)


def prepare_linear(w, b, *, tk_cap=2048, tn_cap=1024):
    """One-time prep of a linear layer: choose K/N tiles, pad, cast to bf16.

    w: (K_in, N_out) float32  (transpose of torch nn.Linear's (out, in))
    b: (N_out,)      float32
    Returns (w_padded_bf16, bias_padded_f32_row, (tk, tn, n_out)).
    """
    K, N = w.shape
    tk = min(_round_up(K, 256), tk_cap)
    # tn cap of 1024 keeps >= 2 parallel N blocks for N=4096 (dual-TC megacore).
    tn = min(_round_up(N, 128), tn_cap)
    wp = _pad_to(_pad_to(w, tk, 0), tn, 1).astype(jnp.bfloat16)
    bp = _pad_to(b.reshape(1, -1).astype(jnp.float32), tn, 1)
    return wp, bp, (tk, tn, N)


def linear_relu(x, wp, bp, tk, tn, n_out, *, tm_cap=512, out_dtype=jnp.float32):
    """relu(x @ w + b) with a tiled Pallas matmul. Weights pre-padded (bf16)."""
    M, K = x.shape
    Kp, Np = wp.shape
    assert Kp == _round_up(K, tk)

    # M tile: multiple of 16 (bf16 sublane pack); cap so weights still stream
    # from HBM only once per (few) M blocks at large RoI counts.
    tm = min(_round_up(max(M, 1), 16), tm_cap)
    xp = _pad_to(_pad_to(x, tm, 0), tk, 1).astype(jnp.bfloat16)
    Mp = xp.shape[0]
    grid = (Mp // tm, Np // tn, Kp // tk)

    # Explicit VMEM budget: 2x (A + B + O) double-buffers + persistent f32 acc + bias.
    out_itemsize = jnp.dtype(out_dtype).itemsize
    vmem_bytes = (
        2 * (tm * tk * 2 + tk * tn * 2 + tm * tn * out_itemsize)
        + tm * tn * 4
        + 2 * tn * 4
    )
    vmem_limit = int(min(max(int(vmem_bytes * 1.25), 32 * 1024 * 1024),
                         64 * 1024 * 1024))

    out = pl.pallas_call(
        _linear_relu_kernel,
        out_shape=jax.ShapeDtypeStruct((Mp, Np), out_dtype),
        grid_spec=pltpu.PrefetchScalarGridSpec(
            num_scalar_prefetch=0,
            grid=grid,
            in_specs=[
                pl.BlockSpec((tm, tk), lambda i, j, k: (i, k)),
                pl.BlockSpec((tk, tn), lambda i, j, k: (k, j)),
                pl.BlockSpec((1, tn), lambda i, j, k: (0, j)),
            ],
            out_specs=pl.BlockSpec((tm, tn), lambda i, j, k: (i, j)),
            scratch_shapes=[pltpu.VMEM((tm, tn), jnp.float32)],
        ),
        compiler_params=pltpu.CompilerParams(
            dimension_semantics=("parallel", "parallel", "arbitrary"),
            vmem_limit_bytes=vmem_limit,
        ),
    )(xp, wp, bp)
    return out[:M, :n_out]


# ---------------------------------------------------------------------------
# RoI-align glue (plain JAX, matmul-based bilinear sampling instead of gathers).
# TODO(synk): cfg.FAST_RCNN.ROI_XFORM_METHOD / SAMPLING_RATIO selection is not
# replicated; fixed to Detectron-style RoIAlign with sampling_ratio=2.
# ---------------------------------------------------------------------------
def _interp_pool_matrix(coords, size, resolution, sampling_ratio):
    """Bilinear interpolation matrix with the r-sample average pooling folded in.

    coords: (resolution * sampling_ratio,) sample coordinates along one axis.
    Returns (resolution, size) such that  pooled = M @ signal.
    """
    c = jnp.clip(coords, 0.0, size - 1.0)
    c0 = jnp.floor(c)
    c1 = jnp.minimum(c0 + 1.0, size - 1.0)
    frac = c - c0
    grid = jnp.arange(size, dtype=jnp.float32)[None, :]
    w = ((grid == c0[:, None]).astype(jnp.float32) * (1.0 - frac)[:, None]
         + (grid == c1[:, None]).astype(jnp.float32) * frac[:, None])
    # Fold average pooling over the sampling_ratio sub-samples of each bin.
    return w.reshape(resolution, sampling_ratio, size).mean(axis=1)


def roi_align(feat, rois, *, resolution=7, spatial_scale=1.0, sampling_ratio=2):
    """feat: (N, C, H, W); rois: (R, 5) = [batch_idx, x1, y1, x2, y2] -> (R, C, 7, 7)."""
    _, _, H, W = feat.shape
    r = sampling_ratio
    idx = jnp.arange(resolution * r, dtype=jnp.float32)
    frac = (idx % r + 0.5) / r + idx // r  # sub-bin sample positions per bin

    def one_roi(roi):
        b = roi[0].astype(jnp.int32)
        x1 = roi[1] * spatial_scale
        y1 = roi[2] * spatial_scale
        x2 = roi[3] * spatial_scale
        y2 = roi[4] * spatial_scale
        roi_w = jnp.maximum(x2 - x1, 1.0)
        roi_h = jnp.maximum(y2 - y1, 1.0)
        ys = y1 + frac * (roi_h / resolution)
        xs = x1 + frac * (roi_w / resolution)
        wy = _interp_pool_matrix(ys, H, resolution, r)  # (res, H)
        wx = _interp_pool_matrix(xs, W, resolution, r)  # (res, W)
        img = jnp.take(feat, b, axis=0)                 # (C, H, W)
        # pooled[c, i, j] = sum_{h,w} wy[i,h] * img[c,h,w] * wx[j,w]
        return jnp.einsum(
            "ih,chw,jw->cij", wy, img, wx, preferred_element_type=jnp.float32
        )

    return jax.vmap(one_roi)(rois)  # (R, C, res, res)


# ---------------------------------------------------------------------------
# VGG16_roi_fc_head
# ---------------------------------------------------------------------------
class VGG16RoiFcHead:
    def __init__(self, dim_in, spatial_scale, key):
        self.dim_in = dim_in
        self.spatial_scale = spatial_scale
        self.dim_out = 4096
        k1, k2, k3, k4 = jax.random.split(key, 4)
        fan6 = dim_in * 7 * 7
        # Deterministic synthetic init. Weights are (K_in, N_out), i.e. the
        # transpose of torch nn.Linear's (out, in) layout.
        fc6_w = jax.random.normal(k1, (fan6, 4096), jnp.float32) * 0.01
        fc6_b = jax.random.normal(k2, (4096,), jnp.float32) * 0.01
        fc7_w = jax.random.normal(k3, (4096, 4096), jnp.float32) * 0.01
        fc7_b = jax.random.normal(k4, (4096,), jnp.float32) * 0.01
        # Pad + cast once at construction (never per forward call).
        self.fc6_w, self.fc6_b, fc6_cfg = prepare_linear(fc6_w, fc6_b)
        self.fc7_w, self.fc7_b, fc7_cfg = prepare_linear(fc7_w, fc7_b)

        ss = float(spatial_scale)

        def fwd(fc6_w_, fc6_b_, fc7_w_, fc7_b_, x, rois):
            # RoI transform (glue, matmul-based bilinear sampling, fused by XLA).
            pooled = roi_align(
                x, rois, resolution=7, spatial_scale=ss, sampling_ratio=2,
            )  # (R, C, 7, 7)
            flat = pooled.reshape(pooled.shape[0], -1)  # matches torch NCHW flatten
            # fc6 + relu, fc7 + relu (Pallas hot path); intermediate kept in bf16.
            h = linear_relu(flat, fc6_w_, fc6_b_, *fc6_cfg, out_dtype=jnp.bfloat16)
            h = linear_relu(h, fc7_w_, fc7_b_, *fc7_cfg, out_dtype=jnp.float32)
            return h  # (R, 4096)

        # One jit boundary around the whole forward: glue + both pallas_calls.
        self._fwd = jax.jit(fwd)

    def __call__(self, x, rois):
        return self._fwd(self.fc6_w, self.fc6_b, self.fc7_w, self.fc7_b, x, rois)


if __name__ == "__main__":
    key = jax.random.PRNGKey(0)
    k_feat, k_roi, k_params = jax.random.split(key, 3)

    N, C, H, W = 2, 4, 16, 16
    R = 8

    feat = jax.random.normal(k_feat, (N, C, H, W), jnp.float32)

    # rois: [batch_idx, x1, y1, x2, y2] in feature coords (spatial_scale=1.0)
    batch_idx = (jnp.arange(R) % N).astype(jnp.float32)[:, None]
    box_raw = jax.random.uniform(k_roi, (R, 4), minval=0.0, maxval=float(W - 1))
    x1 = jnp.minimum(box_raw[:, 0], box_raw[:, 2])
    x2 = jnp.maximum(box_raw[:, 0], box_raw[:, 2])
    y1 = jnp.minimum(box_raw[:, 1], box_raw[:, 3])
    y2 = jnp.maximum(box_raw[:, 1], box_raw[:, 3])
    rois = jnp.concatenate(
        [batch_idx, x1[:, None], y1[:, None], x2[:, None], y2[:, None]], axis=1
    )

    head = VGG16RoiFcHead(dim_in=C, spatial_scale=1.0, key=k_params)
    out = head(feat, rois)
    out = jax.block_until_ready(out)

    assert out.shape == (R, 4096), out.shape
    assert bool(jnp.all(out >= 0.0))  # relu output
    print("KERNEL_OK")
</pallas_src>

<mosaic_0001>
module attributes {stable_mosaic.version = 11 : i64} {
  func.func @_linear_relu_kernel(%arg0: i32, %arg1: i32, %arg2: i32, %arg3: memref<16x256xbf16, #tpu.memory_space<vmem>>, %arg4: memref<256x1024xbf16, #tpu.memory_space<vmem>>, %arg5: memref<1x1024xf32, #tpu.memory_space<vmem>>, %arg6: memref<16x1024xbf16, #tpu.memory_space<vmem>>, %arg7: memref<16x1024xf32, #tpu.memory_space<vmem>>) attributes {dimension_semantics = [#tpu.dimension_semantics<parallel>, #tpu.dimension_semantics<parallel>, #tpu.dimension_semantics<arbitrary>], iteration_bounds = array<i64: 1, 4, 1>, scalar_prefetch = 0 : i64, scratch_operands = 1 : i64, tpu.core_type = #tpu.core_type<tc>, window_params = [{transform_indices = @transform_0, window_bounds = array<i64: 16, 256>}, {transform_indices = @transform_1, window_bounds = array<i64: 256, 1024>}, {transform_indices = @transform_2, window_bounds = array<i64: 1, 1024>}, {transform_indices = @transform_3, window_bounds = array<i64: 16, 1024>}]} {
    %c0_i32 = arith.constant 0 : i32
    %0 = arith.cmpi eq, %arg2, %c0_i32 : i32
    %1 = arith.extui %0 : i1 to i32
    %c0_i32_0 = arith.constant 0 : i32
    %2 = arith.cmpi ne, %1, %c0_i32_0 : i32
    scf.if %2 {
      %cst_10 = arith.constant 0.000000e+00 : f32
      %12 = vector.broadcast %cst_10 : f32 to vector<16x1024xf32>
      %c0_11 = arith.constant 0 : index
      %c0_12 = arith.constant 0 : index
      %13 = vector.load %arg7[%c0_11, %c0_12] : memref<16x1024xf32, #tpu.memory_space<vmem>>, vector<16x1024xf32>
      tpu.vector_store %arg7[%c0_11, %c0_12], %12 {strides = array<i32>} : memref<16x1024xf32, #tpu.memory_space<vmem>>, vector<16x1024xf32>,
    } else {
    }
    %c0 = arith.constant 0 : index
    %c0_1 = arith.constant 0 : index
    %3 = vector.load %arg7[%c0, %c0_1] : memref<16x1024xf32, #tpu.memory_space<vmem>>, vector<16x1024xf32>
    %c0_2 = arith.constant 0 : index
    %c0_3 = arith.constant 0 : index
    %4 = vector.load %arg3[%c0_2, %c0_3] : memref<16x256xbf16, #tpu.memory_space<vmem>>, vector<16x256xbf16>
    %c0_4 = arith.constant 0 : index
    %c0_5 = arith.constant 0 : index
    %5 = vector.load %arg4[%c0_4, %c0_5] : memref<256x1024xbf16, #tpu.memory_space<vmem>>, vector<256x1024xbf16>
    %cst = arith.constant dense<0.000000e+00> : vector<16x1024xf32>
    %6 = tpu.matmul %4, %5, %cst {dimension_numbers = #tpu.dot_dimension_numbers<[1], [0], [0], [1], [0, 0, 1, 1], [], []>} : vector<16x256xbf16>, vector<256x1024xbf16>, vector<16x1024xf32> -> vector<16x1024xf32>
    %7 = arith.addf %3, %6 : vector<16x1024xf32>
    %c0_6 = arith.constant 0 : index
    %c0_7 = arith.constant 0 : index
    %8 = vector.load %arg7[%c0_6, %c0_7] : memref<16x1024xf32, #tpu.memory_space<vmem>>, vector<16x1024xf32>
    tpu.vector_store %arg7[%c0_6, %c0_7], %7 {strides = array<i32>} : memref<16x1024xf32, #tpu.memory_space<vmem>>, vector<16x1024xf32>,
    %c0_i32_8 = arith.constant 0 : i32
    %9 = arith.cmpi eq, %arg2, %c0_i32_8 : i32
    %10 = arith.extui %9 : i1 to i32
    %c0_i32_9 = arith.constant 0 : i32
    %11 = arith.cmpi ne, %10, %c0_i32_9 : i32
    scf.if %11 {
      %c0_10 = arith.constant 0 : index
      %c0_11 = arith.constant 0 : index
      %12 = vector.load %arg7[%c0_10, %c0_11] : memref<16x1024xf32, #tpu.memory_space<vmem>>, vector<16x1024xf32>
      %c0_12 = arith.constant 0 : index
      %c0_13 = arith.constant 0 : index
      %13 = vector.load %arg5[%c0_12, %c0_13] : memref<1x1024xf32, #tpu.memory_space<vmem>>, vector<1x1024xf32>
      %14 = vector.broadcast %13 : vector<1x1024xf32> to vector<16x1024xf32>
      %15 = arith.addf %12, %14 : vector<16x1024xf32>
      %cst_14 = arith.constant 0.000000e+00 : f32
      %16 = vector.broadcast %cst_14 : f32 to vector<16x1024xf32>
      %17 = arith.maximumf %15, %16 : vector<16x1024xf32>
      %18 = arith.truncf %17 : vector<16x1024xf32> to vector<16x1024xbf16>
      %c0_15 = arith.constant 0 : index
      %c0_16 = arith.constant 0 : index
      %19 = vector.load %arg6[%c0_15, %c0_16] : memref<16x1024xbf16, #tpu.memory_space<vmem>>, vector<16x1024xbf16>
      tpu.vector_store %arg6[%c0_15, %c0_16], %18 {strides = array<i32>} : memref<16x1024xbf16, #tpu.memory_space<vmem>>, vector<16x1024xbf16>,
    } else {
    }
    return
  }
  func.func @transform_0(%arg0: i32, %arg1: i32, %arg2: i32) -> (i32, i32) {
    %c0_i32 = arith.constant 0 : i32
    return %arg0, %arg2 : i32, i32
  }
  func.func @transform_1(%arg0: i32, %arg1: i32, %arg2: i32) -> (i32, i32) {
    %c0_i32 = arith.constant 0 : i32
    return %arg2, %arg1 : i32, i32
  }
  func.func @transform_2(%arg0: i32, %arg1: i32, %arg2: i32) -> (i32, i32) {
    %c0_i32 = arith.constant 0 : i32
    %c0_i32_0 = arith.constant 0 : i32
    return %c0_i32, %arg1 : i32, i32
  }
  func.func @transform_3(%arg0: i32, %arg1: i32, %arg2: i32) -> (i32, i32) {
    %c0_i32 = arith.constant 0 : i32
    return %arg0, %arg1 : i32, i32
  }
}

module attributes {stable_mosaic.version = 11 : i64} {
  func.func @_linear_relu_kernel(%arg0: i32, %arg1: i32, %arg2: i32, %arg3: memref<16x2048xbf16, #tpu.memory_space<vmem>>, %arg4: memref<2048x1024xbf16, #tpu.memory_space<vmem>>, %arg5: memref<1x1024xf32, #tpu.memory_space<vmem>>, %arg6: memref<16x1024xf32, #tpu.memory_space<vmem>>, %arg7: memref<16x1024xf32, #tpu.memory_space<vmem>>) attributes {dimension_semantics = [#tpu.dimension_semantics<parallel>, #tpu.dimension_semantics<parallel>, #tpu.dimension_semantics<arbitrary>], iteration_bounds = array<i64: 1, 4, 2>, scalar_prefetch = 0 : i64, scratch_operands = 1 : i64, tpu.core_type = #tpu.core_type<tc>, window_params = [{transform_indices = @transform_0, window_bounds = array<i64: 16, 2048>}, {transform_indices = @transform_1, window_bounds = array<i64: 2048, 1024>}, {transform_indices = @transform_2, window_bounds = array<i64: 1, 1024>}, {transform_indices = @transform_3, window_bounds = array<i64: 16, 1024>}]} {
    %c0_i32 = arith.constant 0 : i32
    %0 = arith.cmpi eq, %arg2, %c0_i32 : i32
    %1 = arith.extui %0 : i1 to i32
    %c0_i32_0 = arith.constant 0 : i32
    %2 = arith.cmpi ne, %1, %c0_i32_0 : i32
    scf.if %2 {
      %cst_9 = arith.constant 0.000000e+00 : f32
      %12 = vector.broadcast %cst_9 : f32 to vector<16x1024xf32>
      %c0_10 = arith.constant 0 : index
      %c0_11 = arith.constant 0 : index
      %13 = vector.load %arg7[%c0_10, %c0_11] : memref<16x1024xf32, #tpu.memory_space<vmem>>, vector<16x1024xf32>
      tpu.vector_store %arg7[%c0_10, %c0_11], %12 {strides = array<i32>} : memref<16x1024xf32, #tpu.memory_space<vmem>>, vector<16x1024xf32>,
    } else {
    }
    %c0 = arith.constant 0 : index
    %c0_1 = arith.constant 0 : index
    %3 = vector.load %arg7[%c0, %c0_1] : memref<16x1024xf32, #tpu.memory_space<vmem>>, vector<16x1024xf32>
    %c0_2 = arith.constant 0 : index
    %c0_3 = arith.constant 0 : index
    %4 = vector.load %arg3[%c0_2, %c0_3] : memref<16x2048xbf16, #tpu.memory_space<vmem>>, vector<16x2048xbf16>
    %c0_4 = arith.constant 0 : index
    %c0_5 = arith.constant 0 : index
    %5 = vector.load %arg4[%c0_4, %c0_5] : memref<2048x1024xbf16, #tpu.memory_space<vmem>>, vector<2048x1024xbf16>
    %cst = arith.constant dense<0.000000e+00> : vector<16x1024xf32>
    %6 = tpu.matmul %4, %5, %cst {dimension_numbers = #tpu.dot_dimension_numbers<[1], [0], [0], [1], [0, 0, 1, 1], [], []>} : vector<16x2048xbf16>, vector<2048x1024xbf16>, vector<16x1024xf32> -> vector<16x1024xf32>
    %7 = arith.addf %3, %6 : vector<16x1024xf32>
    %c0_6 = arith.constant 0 : index
    %c0_7 = arith.constant 0 : index
    %8 = vector.load %arg7[%c0_6, %c0_7] : memref<16x1024xf32, #tpu.memory_space<vmem>>, vector<16x1024xf32>
    tpu.vector_store %arg7[%c0_6, %c0_7], %7 {strides = array<i32>} : memref<16x1024xf32, #tpu.memory_space<vmem>>, vector<16x1024xf32>,
    %c1_i32 = arith.constant 1 : i32
    %9 = arith.cmpi eq, %arg2, %c1_i32 : i32
    %10 = arith.extui %9 : i1 to i32
    %c0_i32_8 = arith.constant 0 : i32
    %11 = arith.cmpi ne, %10, %c0_i32_8 : i32
    scf.if %11 {
      %c0_9 = arith.constant 0 : index
      %c0_10 = arith.constant 0 : index
      %12 = vector.load %arg7[%c0_9, %c0_10] : memref<16x1024xf32, #tpu.memory_space<vmem>>, vector<16x1024xf32>
      %c0_11 = arith.constant 0 : index
      %c0_12 = arith.constant 0 : index
      %13 = vector.load %arg5[%c0_11, %c0_12] : memref<1x1024xf32, #tpu.memory_space<vmem>>, vector<1x1024xf32>
      %14 = vector.broadcast %13 : vector<1x1024xf32> to vector<16x1024xf32>
      %15 = arith.addf %12, %14 : vector<16x1024xf32>
      %cst_13 = arith.constant 0.000000e+00 : f32
      %16 = vector.broadcast %cst_13 : f32 to vector<16x1024xf32>
      %17 = arith.maximumf %15, %16 : vector<16x1024xf32>
      %c0_14 = arith.constant 0 : index
      %c0_15 = arith.constant 0 : index
      %18 = vector.load %arg6[%c0_14, %c0_15] : memref<16x1024xf32, #tpu.memory_space<vmem>>, vector<16x1024xf32>
      tpu.vector_store %arg6[%c0_14, %c0_15], %17 {strides = array<i32>} : memref<16x1024xf32, #tpu.memory_space<vmem>>, vector<16x1024xf32>,
    } else {
    }
    return
  }
  func.func @transform_0(%arg0: i32, %arg1: i32, %arg2: i32) -> (i32, i32) {
    %c0_i32 = arith.constant 0 : i32
    return %arg0, %arg2 : i32, i32
  }
  func.func @transform_1(%arg0: i32, %arg1: i32, %arg2: i32) -> (i32, i32) {
    %c0_i32 = arith.constant 0 : i32
    return %arg2, %arg1 : i32, i32
  }
  func.func @transform_2(%arg0: i32, %arg1: i32, %arg2: i32) -> (i32, i32) {
    %c0_i32 = arith.constant 0 : i32
    %c0_i32_0 = arith.constant 0 : i32
    return %c0_i32, %arg1 : i32, i32
  }
  func.func @transform_3(%arg0: i32, %arg1: i32, %arg2: i32) -> (i32, i32) {
    %c0_i32 = arith.constant 0 : i32
    return %arg0, %arg1 : i32, i32
  }
}

</mosaic_0001>

<bundles_post_ra>
// kernel: fwd.2
= control target key start
LH: loop header
LB: loop body
LE: loop exit
PB: predicated region body
PF: predicated region fallthrough
CT: control target
= control target key end

     0   :  { %8 = vsyncpa [#allocation4], 0  ;;  %s2938_s0 = inlined_call_operand.vmem [shape: bf16[16,256], index: 0, kind: input, shape index: {}]   ;;  %s2939_s1 = inlined_call_operand.hbm [shape: bf16[256,4096], index: 1, kind: input, shape index: {}]   ;;  %s2940_s2 = inlined_call_operand.hbm [shape: f32[1,4096], index: 2, kind: input, shape index: {}]   ;;  %s2941_s3 = inlined_call_operand.vmem [shape: bf16[16,4096], index: 3, kind: output, shape index: {}]  }
   0x1   :  { %10 = vsyncpa [#allocation4 + $0x1], 0 }
   0x2   :  { %11 = vsyncpa [#allocation6], 0 }
   0x3   :  { %13 = vsyncpa [#allocation6 + $0x1], 0  ;;  %s2495_s12 = smov 0   ;;  %s2497_s13 = smov 0  }
   0x4   :  { %s2499_s14 = smov 0   ;;  %s2501_s15 = smov 0  }
   0x5   :  { %s2503_s16 = smov 0   ;;  %s2505_s17 = smov 0  }
   0x6 LB: > { %s1622_s18 = sadd.s32 4294967295, %s2470_s17   ;;  %s34_s19 = sadd.s32 1, %s2466_s16  ;;  %s2470_s17 = sphi %s2505_s17, %s19_s17   ;;  %s2466_s16 = sphi %s2503_s16, %s2950_s16   ;;  %s2462_s15 = sphi %s2501_s15, %s2949_s15   ;;  %s2458_s14 = sphi %s2499_s14, %s2948_s14   ;;  %s2454_s13 = sphi %s2497_s13, %s2947_s13   ;;  %s2450_s12 = sphi %s2495_s12, %s2946_s12  }
   0x7   : > { %p36_p0 = scmp.ge.s32.totalorder %s34_s19, 4  ;;  %s75_s20 = sadd.s32 1, %s2458_s14 }
   0x8   : > { %p82_p1 = scmp.ne.s32.totalorder %s2458_s14, %s2454_s13  ;;  %p83_p2 = scmp.eq.s32.totalorder %s2470_s17, 0 }
   0x9   : > { %s2952_s19 = smov (%p36_p0, %s34_s19), 0  ;;  %p88_p4 = scmp.ne.s32.totalorder %s2454_s13, %s2450_s12 }
   0xa   : > { %p2531_p3 = por %p83_p2, %p82_p1  ;;  %s71_s22 = ssub.s32 %s2466_s16, %s2952_s19 }
   0xb   : > { %p89_p5 = scmp.eq.s32.totalorder %s1622_s18, 0  ;;  %p73_p6 = scmp.eq.s32.totalorder %s71_s22, 0 }
   0xc   : > { %p140_p7 = scmp.eq.s32.totalorder %s1622_s18, 3  ;;  %p2304_p10 = scmp.lt.s32.totalorder %s2470_s17, 4 }
   0xd   : > { %p2538_p8 = por %p89_p5, %p88_p4  ;;  %s2551_s26 = sand.u32 1, %s2458_s14  }
   0xe   : > { %s2543_s24 = scalar_select %p73_p6, %s2458_s14, %s75_s20  }
   0xf   : > { %p2545_p9 = por %p140_p7, %p82_p1  ;;  %s2161_s27 = sshll.u32 %s2466_s16, 5 }
  0x10   : > { %s1627_s28 = sshll.u32 %s2551_s26, 10  ;;  %s193_s4 = scalar_lea.hbm %s2939_s1, %s2161_s27 }
  0x11   : > { %s194_s5 = sshll.u32 %s193_s4, 4  ;;  %s185_s6 = scalar_lea.vmem [#allocation3], %s1627_s28  ;;  %s195_s5 = int_to_ptr.hbm [resolvable:$true] %s194_s5 }
  0x12   : > { %s196_s7 = sshll.u32 %s185_s6, 4  ;;  %p2560_p11 = pnand %p2304_p10, %p2531_p3  ;;  %s197_s7 = int_to_ptr.vmem [resolvable:$true] %s196_s7 }
  0x13   : > { %p1632_p12 = scmp.ge.s32.totalorder %s2470_s17, 1  ;;  %s182_s9 = scalar_lea.sflag [#allocation4], %s2551_s26 }
  0x14   : > { %s2472_s10 = smov 2048   ;;  %s2473_s11 = smov 512  }
  0x15   : > { %s2474_s12 = smov 32   ;;  %p223_p13 = scmp.lt.s32.totalorder %s2470_s17, 5 }
  0x16   : > { %2300 = dma.hbm_to_vmem [thread:$0]  (!%p2560_p11), %s195_s5, 16384, %s197_s7, %s182_s9, %s2472_s10, %s2473_s11, %s2474_s12  }
  0x17   : > { %s1630_s18 = sshll.u32 %s2551_s26, 3  ;;  %s1631_s20 = sshll.u32 %s2466_s16, 3 }
  0x18   : > { %p224_p0 = pnand %p1632_p12, %p223_p13  ;;  %s214_s27 = scalar_lea.hbm %s2940_s2, %s1631_s20 }
  0x19   : > { %s210_s28 = scalar_lea.vmem [#allocation5], %s1630_s18  ;;  %s216_s30 = sshll.u32 %s214_s27, 4  ;;  %s217_s30 = int_to_ptr.hbm [resolvable:$true] %s216_s30 }
  0x1a   : > { %s218_s29 = sshll.u32 %s210_s28, 4  ;;  %s207_s4 = scalar_lea.sflag [#allocation6], %s2551_s26  ;;  %s219_s29 = int_to_ptr.vmem [resolvable:$true] %s218_s29 }
  0x1b   : > { %2303 = dma.hbm_to_vmem [thread:$0]  (!%p2560_p11), %s217_s30, 128, %s219_s29, %s207_s4  }
  0x1c   : > { %227 = sbr.rel (%p224_p0) target bundleno = 327 (0x147), region = 32  ;;  %s2578_s5 = sand.u32 (!%p224_p0), 1, %s2454_s13  }
  0x1d   : > { %s1633_s6 = sshll.u32 (!%p224_p0), %s2578_s5, 10  ;;  %s230_s7 = scalar_lea.sflag (!%p224_p0), [#allocation4], %s2578_s5 }
  0x1e   : > { %s2582_s9 = scalar_lea.vmem (!%p224_p0), [#allocation3], %s1633_s6 }
  0x21   : > { %2441 = dma.done.wait (%p2538_p8), %s230_s7, 16384  }
  0x22   : > { %2443 = vsyncadd (%p2538_p8), %s230_s7, 4294950912  ;;  %s1634_s26 = sshll.u32 %s2578_s5, 3  ;;  %s240_s8 = scalar_lea.sflag [#allocation6], %s2578_s5 }
  0x23   : > { %s2590_s10 = scalar_lea.vmem [#allocation5], %s1634_s26 }
  0x24   : > { %2445 = dma.done.wait (%p2538_p8), %s240_s8, 128  }
  0x25   : > { %2447 = vsyncadd (%p2538_p8), %s240_s8, 4294967168  ;;  %v1870_v0 = vld [vmem:[%s2582_s9 + $0x1c0] sm:$0xf]  ;;  %v2220_v5 = vld [vmem:[%s2582_s9 + $0x1c4] sm:$0xf]  ;;  %s1635_s28 = sshll.u32 %s2578_s5, 6 }
  0x26   : > { %v2224_v1 = vld [vmem:[%s2582_s9 + $0x1dc] sm:$0xf0]  ;;  %v1872_v6 = vld [vmem:[%s2582_s9 + $0x1e0] sm:$0xf0]  ;;  %s2890_s29 = scalar_lea.vmem [#allocation7], %s1635_s28  ;;  %s2292_s30 = sshll.u32 (%p2545_p9), %s2462_s15, 5 }
  0x27   : > { %v2126_v2 = vld [vmem:[%s2582_s9 + $0x3c0] sm:$0xf]  ;;  %v1871_v3 = vor.u32 %v2224_v1, %v1870_v0  ;;  %v1875_v8 = vor.u32 %v2220_v5, %v1872_v6  ;;  %v2284_v9 = vld [vmem:[%s2582_s9 + $0x3c4] sm:$0xf]  ;;  %s1467_s6 = scalar_lea.vmem (%p2545_p9), %s2941_s3, %s2292_s30 }
  0x28   : > { %v2288_v4 = vld [vmem:[%s2582_s9 + $0x3dc] sm:$0xf0]  ;;  %v2128_v10 = vld [vmem:[%s2582_s9 + $0x3e0] sm:$0xf0] }
  0x29   : > { %v2127_v7 = vor.u32 %v2288_v4, %v2126_v2  ;;  %v1838_v11 = vld [vmem:[%s2582_s9 + $0x180] sm:$0xf]  ;;  %1114 = vmatpush.bf16.msra.mxu0 %v1871_v3  ;;  %v2131_v12 = vor.u32 %v2284_v9, %v2128_v10  ;;  %1142 = vmatpush.bf16.msra.mxu2 %v1875_v8  ;;  %v2212_v18 = vld [vmem:[%s2582_s9 + $0x184] sm:$0xf] }
  0x2a   : > { %v2216_v13 = vld [vmem:[%s2582_s9 + $0x19c] sm:$0xf0]  ;;  %v1840_v19 = vld [vmem:[%s2582_s9 + $0x1a0] sm:$0xf0] }
  0x2b   : > { %v2094_v14 = vld [vmem:[%s2582_s9 + $0x380] sm:$0xf]  ;;  %1128 = vmatpush.bf16.msra.mxu1 %v2127_v7  ;;  %v1839_v16 = vor.u32 %v2216_v13, %v1838_v11  ;;  %v2276_v20 = vld [vmem:[%s2582_s9 + $0x384] sm:$0xf]  ;;  %1156 = vmatpush.bf16.msra.mxu3 %v2131_v12  ;;  %v1843_v21 = vor.u32 %v2212_v18, %v1840_v19 }
  0x2c   : > { %v2280_v15 = vld [vmem:[%s2582_s9 + $0x39c] sm:$0xf0]  ;;  %v2096_v22 = vld [vmem:[%s2582_s9 + $0x3a0] sm:$0xf0] }
  0x2d   : > { %v2095_v17 = vor.u32 %v2280_v15, %v2094_v14  ;;  %v1806_v23 = vld [vmem:[%s2582_s9 + $0x140] sm:$0xf]  ;;  %v2099_v25 = vor.u32 %v2276_v20, %v2096_v22  ;;  %v2204_v28 = vld [vmem:[%s2582_s9 + $0x144] sm:$0xf]  ;;  %1115 = vmatpush.bf16.msra.mxu0 %v1839_v16  ;;  %1143 = vmatpush.bf16.msra.mxu2 %v1843_v21 }
  0x2e   : > { %v2208_v24 = vld [vmem:[%s2582_s9 + $0x15c] sm:$0xf0]  ;;  %v1808_v30 = vld [vmem:[%s2582_s9 + $0x160] sm:$0xf0] }
  0x2f   : > { %v2062_v26 = vld [vmem:[%s2582_s9 + $0x340] sm:$0xf]  ;;  %v1807_v29 = vor.u32 %v2208_v24, %v1806_v23  ;;  %v2268_v31 = vld [vmem:[%s2582_s9 + $0x344] sm:$0xf]  ;;  %1129 = vmatpush.bf16.msra.mxu1 %v2095_v17  ;;  %v1811_v34 = vor.u32 %v2204_v28, %v1808_v30  ;;  %1157 = vmatpush.bf16.msra.mxu3 %v2099_v25  ;;  %v1878_v28 = vld [vmem:[%s2582_s9 + $0x1c8] sm:$0xf] }
  0x30   : > { %v2272_v27 = vld [vmem:[%s2582_s9 + $0x35c] sm:$0xf0]  ;;  %v2064_v32 = vld [vmem:[%s2582_s9 + $0x360] sm:$0xf0]  ;;  %v2134_v30 = vld [vmem:[%s2582_s9 + $0x3c8] sm:$0xf] }
  0x31   : > { %v2063_v33 = vor.u32 %v2272_v27, %v2062_v26  ;;  %v1774_v35 = vld [vmem:[%s2582_s9 + $0x100] sm:$0xf]  ;;  %v2067_v38 = vor.u32 %v2268_v31, %v2064_v32  ;;  %v2196_v40 = vld [vmem:[%s2582_s9 + $0x104] sm:$0xf]  ;;  %1116 = vmatpush.bf16.msra.mxu0 %v1807_v29  ;;  %1144 = vmatpush.bf16.msra.mxu2 %v1811_v34  ;;  %v2225_v29 = vld [vmem:[%s2582_s9 + $0x1e4] sm:$0xf0] }
  0x32   : > { %v2200_v36 = vld [vmem:[%s2582_s9 + $0x11c] sm:$0xf0]  ;;  %v1776_v41 = vld [vmem:[%s2582_s9 + $0x120] sm:$0xf0]  ;;  %v2289_v32 = vld [vmem:[%s2582_s9 + $0x3e4] sm:$0xf0] }
  0x33   : > { %v2030_v37 = vld [vmem:[%s2582_s9 + $0x300] sm:$0xf]  ;;  %v2260_v42 = vld [vmem:[%s2582_s9 + $0x304] sm:$0xf]  ;;  %v1775_v44 = vor.u32 %v2200_v36, %v1774_v35  ;;  %1130 = vmatpush.bf16.msra.mxu1 %v2063_v33  ;;  %v1779_v46 = vor.u32 %v2196_v40, %v1776_v41  ;;  %1158 = vmatpush.bf16.msra.mxu3 %v2067_v38  ;;  %v2221_v33 = vld [vmem:[%s2582_s9 + $0x1cc] sm:$0xf]  ;;  %v1879_v40 = vor.u32 %v2225_v29, %v1878_v28 }
  0x34   : > { %v2264_v39 = vld [vmem:[%s2582_s9 + $0x31c] sm:$0xf0]  ;;  %v2032_v43 = vld [vmem:[%s2582_s9 + $0x320] sm:$0xf0]  ;;  %v1880_v34 = vld [vmem:[%s2582_s9 + $0x1e8] sm:$0xf0]  ;;  %v2135_v41 = vor.u32 %v2289_v32, %v2134_v30 }
  0x35   : > { %v2031_v45 = vor.u32 %v2264_v39, %v2030_v37  ;;  %v1742_v47 = vld [vmem:[%s2582_s9 + $0xc0] sm:$0xf]  ;;  %v2035_v50 = vor.u32 %v2260_v42, %v2032_v43  ;;  %v2188_v52 = vld [vmem:[%s2582_s9 + $0xc4] sm:$0xf]  ;;  %1117 = vmatpush.bf16.msra.mxu0 %v1775_v44  ;;  %1145 = vmatpush.bf16.msra.mxu2 %v1779_v46  ;;  %v2285_v37 = vld [vmem:[%s2582_s9 + $0x3cc] sm:$0xf]  ;;  %v1883_v42 = vor.u32 %v2221_v33, %v1880_v34 }
  0x36   : > { %v2192_v48 = vld [vmem:[%s2582_s9 + $0xdc] sm:$0xf0]  ;;  %v1744_v53 = vld [vmem:[%s2582_s9 + $0xe0] sm:$0xf0]  ;;  %v2136_v38 = vld [vmem:[%s2582_s9 + $0x3e8] sm:$0xf0] }
  0x37   : > { %v1998_v49 = vld [vmem:[%s2582_s9 + $0x2c0] sm:$0xf]  ;;  %v2252_v54 = vld [vmem:[%s2582_s9 + $0x2c4] sm:$0xf]  ;;  %v1743_v56 = vor.u32 %v2192_v48, %v1742_v47  ;;  %1131 = vmatpush.bf16.msra.mxu1 %v2031_v45  ;;  %v1747_v58 = vor.u32 %v2188_v52, %v1744_v53  ;;  %1159 = vmatpush.bf16.msra.mxu3 %v2035_v50  ;;  %v1846_v43 = vld [vmem:[%s2582_s9 + $0x188] sm:$0xf]  ;;  %v2139_v46 = vor.u32 %v2285_v37, %v2136_v38 }
  0x38   : > { %v2256_v51 = vld [vmem:[%s2582_s9 + $0x2dc] sm:$0xf0]  ;;  %v2000_v55 = vld [vmem:[%s2582_s9 + $0x2e0] sm:$0xf0]  ;;  %v2217_v44 = vld [vmem:[%s2582_s9 + $0x1a4] sm:$0xf0] }
  0x39   : > { %v1999_v57 = vor.u32 %v2256_v51, %v1998_v49  ;;  %v1710_v59 = vld [vmem:[%s2582_s9 + $0x80] sm:$0xf]  ;;  %v2003_v62 = vor.u32 %v2252_v54, %v2000_v55  ;;  %v2180_v0 = vld [vmem:[%s2582_s9 + $0x84] sm:$0xf]  ;;  %1118 = vmatpush.bf16.msra.mxu0 %v1743_v56  ;;  %1146 = vmatpush.bf16.msra.mxu2 %v1747_v58  ;;  %v2102_v45 = vld [vmem:[%s2582_s9 + $0x388] sm:$0xf]  ;;  %v1847_v52 = vor.u32 %v2217_v44, %v1846_v43 }
  0x3a   : > { %v2184_v60 = vld [vmem:[%s2582_s9 + $0x9c] sm:$0xf0]  ;;  %v1712_v1 = vld [vmem:[%s2582_s9 + $0xa0] sm:$0xf0]  ;;  %v2281_v47 = vld [vmem:[%s2582_s9 + $0x3a4] sm:$0xf0] }
  0x3b   : > { %v1966_v61 = vld [vmem:[%s2582_s9 + $0x280] sm:$0xf]  ;;  %v2244_v2 = vld [vmem:[%s2582_s9 + $0x284] sm:$0xf]  ;;  %v1711_v4 = vor.u32 %v2184_v60, %v1710_v59  ;;  %1132 = vmatpush.bf16.msra.mxu1 %v1999_v57  ;;  %v1715_v6 = vor.u32 %v2180_v0, %v1712_v1  ;;  %1160 = vmatpush.bf16.msra.mxu3 %v2003_v62  ;;  %v2213_v48 = vld [vmem:[%s2582_s9 + $0x18c] sm:$0xf]  ;;  %v2103_v53 = vor.u32 %v2281_v47, %v2102_v45 }
  0x3c   : > { %v2248_v63 = vld [vmem:[%s2582_s9 + $0x29c] sm:$0xf0]  ;;  %v1968_v3 = vld [vmem:[%s2582_s9 + $0x2a0] sm:$0xf0]  ;;  %v1848_v49 = vld [vmem:[%s2582_s9 + $0x1a8] sm:$0xf0] }
  0x3d   : > { %v1967_v5 = vor.u32 %v2248_v63, %v1966_v61  ;;  %v1678_v7 = vld [vmem:[%s2582_s9 + $0x40] sm:$0xf]  ;;  %v1971_v10 = vor.u32 %v2244_v2, %v1968_v3  ;;  %v2172_v12 = vld [vmem:[%s2582_s9 + $0x44] sm:$0xf]  ;;  %1119 = vmatpush.bf16.msra.mxu0 %v1711_v4  ;;  %1147 = vmatpush.bf16.msra.mxu2 %v1715_v6  ;;  %v2277_v50 = vld [vmem:[%s2582_s9 + $0x38c] sm:$0xf]  ;;  %v1851_v54 = vor.u32 %v2213_v48, %v1848_v49 }
  0x3e   : > { %v2176_v8 = vld [vmem:[%s2582_s9 + $0x5c] sm:$0xf0]  ;;  %v1680_v13 = vld [vmem:[%s2582_s9 + $0x60] sm:$0xf0]  ;;  %v2104_v51 = vld [vmem:[%s2582_s9 + $0x3a8] sm:$0xf0] }
  0x3f   : > { %v1934_v9 = vld [vmem:[%s2582_s9 + $0x240] sm:$0xf]  ;;  %v2236_v14 = vld [vmem:[%s2582_s9 + $0x244] sm:$0xf]  ;;  %v1679_v16 = vor.u32 %v2176_v8, %v1678_v7  ;;  %1133 = vmatpush.bf16.msra.mxu1 %v1967_v5  ;;  %v1683_v20 = vor.u32 %v2172_v12, %v1680_v13  ;;  %1161 = vmatpush.bf16.msra.mxu3 %v1971_v10  ;;  %v1814_v55 = vld [vmem:[%s2582_s9 + $0x148] sm:$0xf]  ;;  %v2107_v58 = vor.u32 %v2277_v50, %v2104_v51 }
  0x40   : > { %v2240_v11 = vld [vmem:[%s2582_s9 + $0x25c] sm:$0xf0]  ;;  %v1936_v15 = vld [vmem:[%s2582_s9 + $0x260] sm:$0xf0]  ;;  %v2209_v56 = vld [vmem:[%s2582_s9 + $0x164] sm:$0xf0] }
  0x41   : > { %v1646_v17 = vld [vmem:[%s2582_s9] sm:$0xf]  ;;  %v1935_v19 = vor.u32 %v2240_v11, %v1934_v9  ;;  %v2164_v23 = vld [vmem:[%s2582_s9 + $0x4] sm:$0xf]  ;;  %v1939_v24 = vor.u32 %v2236_v14, %v1936_v15  ;;  %1120 = vmatpush.bf16.msra.mxu0 %v1679_v16  ;;  %1148 = vmatpush.bf16.msra.mxu2 %v1683_v20  ;;  %v2070_v57 = vld [vmem:[%s2582_s9 + $0x348] sm:$0xf]  ;;  %v1815_v1 = vor.u32 %v2209_v56, %v1814_v55 }
  0x42   : > { %v2168_v18 = vld [vmem:[%s2582_s9 + $0x1c] sm:$0xf0]  ;;  %v1648_v25 = vld [vmem:[%s2582_s9 + $0x20] sm:$0xf0]  ;;  %v2273_v59 = vld [vmem:[%s2582_s9 + $0x364] sm:$0xf0] }
  0x43   : > { %v1902_v21 = vld [vmem:[%s2582_s9 + $0x200] sm:$0xf]  ;;  %v2228_v26 = vld [vmem:[%s2582_s9 + $0x204] sm:$0xf]  ;;  %v1647_v31 = vor.u32 %v2168_v18, %v1646_v17  ;;  %1134 = vmatpush.bf16.msra.mxu1 %v1935_v19  ;;  %v1651_v36 = vor.u32 %v2164_v23, %v1648_v25  ;;  %1162 = vmatpush.bf16.msra.mxu3 %v1939_v24  ;;  %v2205_v60 = vld [vmem:[%s2582_s9 + $0x14c] sm:$0xf]  ;;  %v2071_v5 = vor.u32 %v2273_v59, %v2070_v57 }
  0x44   : > { %v2232_v22 = vld [vmem:[%s2582_s9 + $0x21c] sm:$0xf0]  ;;  %v1904_v27 = vld [vmem:[%s2582_s9 + $0x220] sm:$0xf0]  ;;  %v1816_v61 = vld [vmem:[%s2582_s9 + $0x168] sm:$0xf0] }
  0x45   : > { %v1903_v35 = vor.u32 %v2232_v22, %v1902_v21  ;;  %v1907_v39 = vor.u32 %v2228_v26, %v1904_v27  ;;  %1121 = vmatpush.bf16.msra.mxu0 %v1647_v31  ;;  %1149 = vmatpush.bf16.msra.mxu2 %v1651_v36  ;;  %v2269_v62 = vld [vmem:[%s2582_s9 + $0x34c] sm:$0xf]  ;;  %v1782_v0 = vld [vmem:[%s2582_s9 + $0x108] sm:$0xf]  ;;  %v1638_v3 = vld [vmem:[%s2938_s0] sm:$0xf]  ;;  %v1819_v6 = vor.u32 %v2205_v60, %v1816_v61 }
  0x46   : > { %v2072_v63 = vld [vmem:[%s2582_s9 + $0x368] sm:$0xf0]  ;;  %v2201_v2 = vld [vmem:[%s2582_s9 + $0x124] sm:$0xf0]  ;;  %v2162_v9 = vld [vmem:[%s2938_s0 + $0x4] sm:$0xf] }
  0x47   : > { %1135 = vmatpush.bf16.msra.mxu1 %v1903_v35  ;;  %1163 = vmatpush.bf16.msra.mxu3 %v1907_v39  ;;  %v2163_v4 = vld [vmem:[%s2938_s0 + $0x4] sm:$0xf0]  ;;  %v1640_v10 = vld [vmem:[%s2938_s0 + $0x8] sm:$0xf0]  ;;  %v2075_v11 = vor.u32 %v2269_v62, %v2072_v63  ;;  %v1783_v18 = vor.u32 %v2201_v2, %v1782_v0  ;;  %v1886_v2 = vld [vmem:[%s2582_s9 + $0x1d0] sm:$0xf] }
  0x48   : > { %v2038_v7 = vld [vmem:[%s2582_s9 + $0x308] sm:$0xf]  ;;  %v2693_v8 = vor.u32 %v2163_v4, %v1638_v3  ;;  %v2197_v13 = vld [vmem:[%s2582_s9 + $0x10c] sm:$0xf]  ;;  %v2704_v15 = vor.u32 %v2162_v9, %v1640_v10  ;;  %v2226_v3 = vld [vmem:[%s2582_s9 + $0x1ec] sm:$0xf0] }
  0x49   : > { %1170 = vmatpush.bf16.msrb.mxu0 %v1879_v40  ;;  %1198 = vmatpush.bf16.msrb.mxu2 %v1883_v42  ;;  %v2265_v12 = vld [vmem:[%s2582_s9 + $0x324] sm:$0xf0]  ;;  %v1784_v14 = vld [vmem:[%s2582_s9 + $0x128] sm:$0xf0]  ;;  %v2142_v4 = vld [vmem:[%s2582_s9 + $0x3d0] sm:$0xf] }
  0x4a   : > { %v2261_v16 = vld [vmem:[%s2582_s9 + $0x30c] sm:$0xf]  ;;  %1150 = vmatmul.bf16.vlgmr.msra.gmra.mxu2 %v2693_v8  ;;  %1122 = vmatmul.bf16.vlgmr.msra.gmra.mxu0 %v2693_v8  ;;  %v2039_v19 = vor.u32 %v2265_v12, %v2038_v7  ;;  %v1787_v20 = vor.u32 %v2197_v13, %v1784_v14  ;;  %v1750_v21 = vld [vmem:[%s2582_s9 + $0xc8] sm:$0xf]  ;;  %v2222_v7 = vld [vmem:[%s2582_s9 + $0x1d4] sm:$0xf] }
  0x4b   : > { %1184 = vmatpush.bf16.msrb.mxu1 %v2135_v41  ;;  %1212 = vmatpush.bf16.msrb.mxu3 %v2139_v46  ;;  %v2040_v17 = vld [vmem:[%s2582_s9 + $0x328] sm:$0xf0]  ;;  %v2193_v22 = vld [vmem:[%s2582_s9 + $0xe4] sm:$0xf0]  ;;  %v1888_v9 = vld [vmem:[%s2582_s9 + $0x1f0] sm:$0xf0] }
  0x4c   : > { %1164 = vmatmul.bf16.vlgmr.msra.gmra.mxu3 %v2704_v15  ;;  %v2006_v23 = vld [vmem:[%s2582_s9 + $0x2c8] sm:$0xf]  ;;  %v2043_v24 = vor.u32 %v2261_v16, %v2040_v17  ;;  %v2189_v26 = vld [vmem:[%s2582_s9 + $0xcc] sm:$0xf]  ;;  %1136 = vmatmul.bf16.vlgmr.msra.gmra.mxu1 %v2704_v15  ;;  %v1751_v30 = vor.u32 %v2193_v22, %v1750_v21  ;;  %v2286_v12 = vld [vmem:[%s2582_s9 + $0x3d4] sm:$0xf]  ;;  %v1887_v16 = vor.u32 %v2226_v3, %v1886_v2 }
  0x4d   : > { %1171 = vmatpush.bf16.msrb.mxu0 %v1847_v52  ;;  %1199 = vmatpush.bf16.msrb.mxu2 %v1851_v54  ;;  %v2257_v25 = vld [vmem:[%s2582_s9 + $0x2e4] sm:$0xf0]  ;;  %v1752_v27 = vld [vmem:[%s2582_s9 + $0xe8] sm:$0xf0]  ;;  %v2144_v13 = vld [vmem:[%s2582_s9 + $0x3f0] sm:$0xf0] }
  0x4e   : > { %v2253_v28 = vld [vmem:[%s2582_s9 + $0x2cc] sm:$0xf]  ;;  %v2007_v31 = vor.u32 %v2257_v25, %v2006_v23  ;;  %v1755_v32 = vor.u32 %v2189_v26, %v1752_v27  ;;  %v1718_v33 = vld [vmem:[%s2582_s9 + $0x88] sm:$0xf]  ;;  %v2110_v21 = vld [vmem:[%s2582_s9 + $0x390] sm:$0xf]  ;;  %v2147_v22 = vor.u32 %v2286_v12, %v2144_v13 }
  0x4f   : > { %1185 = vmatpush.bf16.msrb.mxu1 %v2103_v53  ;;  %1213 = vmatpush.bf16.msrb.mxu3 %v2107_v58  ;;  %v2008_v29 = vld [vmem:[%s2582_s9 + $0x2e8] sm:$0xf0]  ;;  %v2185_v34 = vld [vmem:[%s2582_s9 + $0xa4] sm:$0xf0]  ;;  %v2282_v23 = vld [vmem:[%s2582_s9 + $0x3ac] sm:$0xf0] }
  0x50   : > { %v1974_v35 = vld [vmem:[%s2582_s9 + $0x288] sm:$0xf]  ;;  %v2011_v36 = vor.u32 %v2253_v28, %v2008_v29  ;;  %v2181_v38 = vld [vmem:[%s2582_s9 + $0x8c] sm:$0xf]  ;;  %v1719_v42 = vor.u32 %v2185_v34, %v1718_v33  ;;  %v1856_v25 = vld [vmem:[%s2582_s9 + $0x1b0] sm:$0xf0]  ;;  %v2111_v29 = vor.u32 %v2282_v23, %v2110_v21 }
  0x51   : > { %1172 = vmatpush.bf16.msrb.mxu0 %v1815_v1  ;;  %1200 = vmatpush.bf16.msrb.mxu2 %v1819_v6  ;;  %v2249_v37 = vld [vmem:[%s2582_s9 + $0x2a4] sm:$0xf0]  ;;  %v1720_v39 = vld [vmem:[%s2582_s9 + $0xa8] sm:$0xf0]  ;;  %v2290_v6 = vld [vmem:[%s2582_s9 + $0x3ec] sm:$0xf0] }
  0x52   : > { %v2245_v40 = vld [vmem:[%s2582_s9 + $0x28c] sm:$0xf]  ;;  %v1975_v43 = vor.u32 %v2249_v37, %v1974_v35  ;;  %v1723_v44 = vor.u32 %v2181_v38, %v1720_v39  ;;  %v1686_v45 = vld [vmem:[%s2582_s9 + $0x48] sm:$0xf]  ;;  %v2143_v17 = vor.u32 %v2290_v6, %v2142_v4  ;;  %v2278_v26 = vld [vmem:[%s2582_s9 + $0x394] sm:$0xf] }
  0x53   : > { %1186 = vmatpush.bf16.msrb.mxu1 %v2071_v5  ;;  %1214 = vmatpush.bf16.msrb.mxu3 %v2075_v11  ;;  %v1976_v41 = vld [vmem:[%s2582_s9 + $0x2a8] sm:$0xf0]  ;;  %v2177_v46 = vld [vmem:[%s2582_s9 + $0x64] sm:$0xf0]  ;;  %v2112_v27 = vld [vmem:[%s2582_s9 + $0x3b0] sm:$0xf0] }
  0x54   : > { %v1942_v47 = vld [vmem:[%s2582_s9 + $0x248] sm:$0xf]  ;;  %v1979_v48 = vor.u32 %v2245_v40, %v1976_v41  ;;  %v2173_v50 = vld [vmem:[%s2582_s9 + $0x4c] sm:$0xf]  ;;  %v1687_v54 = vor.u32 %v2177_v46, %v1686_v45  ;;  %v2078_v33 = vld [vmem:[%s2582_s9 + $0x350] sm:$0xf]  ;;  %v2115_v34 = vor.u32 %v2278_v26, %v2112_v27 }
  0x55   : > { %1173 = vmatpush.bf16.msrb.mxu0 %v1783_v18  ;;  %1201 = vmatpush.bf16.msrb.mxu2 %v1787_v20  ;;  %v2241_v49 = vld [vmem:[%s2582_s9 + $0x264] sm:$0xf0]  ;;  %v1688_v51 = vld [vmem:[%s2582_s9 + $0x68] sm:$0xf0]  ;;  %v1891_v18 = vor.u32 %v2222_v7, %v1888_v9  ;;  %v2218_v20 = vld [vmem:[%s2582_s9 + $0x1ac] sm:$0xf0] }
  0x56   : > { %v2237_v52 = vld [vmem:[%s2582_s9 + $0x24c] sm:$0xf]  ;;  %v1654_v55 = vld [vmem:[%s2582_s9 + $0x8] sm:$0xf]  ;;  %v1943_v57 = vor.u32 %v2241_v49, %v1942_v47  ;;  %v1691_v58 = vor.u32 %v2173_v50, %v1688_v51  ;;  %v2274_v35 = vld [vmem:[%s2582_s9 + $0x36c] sm:$0xf0] }
  0x57   : > { %1187 = vmatpush.bf16.msrb.mxu1 %v2039_v19  ;;  %1215 = vmatpush.bf16.msrb.mxu3 %v2043_v24  ;;  %v1944_v53 = vld [vmem:[%s2582_s9 + $0x268] sm:$0xf0]  ;;  %v2169_v56 = vld [vmem:[%s2582_s9 + $0x24] sm:$0xf0]  ;;  %v1854_v19 = vld [vmem:[%s2582_s9 + $0x190] sm:$0xf]  ;;  %v2079_v41 = vor.u32 %v2274_v35, %v2078_v33 }
  0x58   : > { %v1910_v59 = vld [vmem:[%s2582_s9 + $0x208] sm:$0xf]  ;;  %v2165_v61 = vld [vmem:[%s2582_s9 + $0xc] sm:$0xf]  ;;  %v1947_v62 = vor.u32 %v2237_v52, %v1944_v53  ;;  %v1655_v5 = vor.u32 %v2169_v56, %v1654_v55  ;;  %v2214_v24 = vld [vmem:[%s2582_s9 + $0x194] sm:$0xf]  ;;  %v1855_v28 = vor.u32 %v2218_v20, %v1854_v19 }
  0x59   : > { %1174 = vmatpush.bf16.msrb.mxu0 %v1751_v30  ;;  %1202 = vmatpush.bf16.msrb.mxu2 %v1755_v32  ;;  %v2233_v60 = vld [vmem:[%s2582_s9 + $0x224] sm:$0xf0]  ;;  %v1656_v63 = vld [vmem:[%s2582_s9 + $0x28] sm:$0xf0]  ;;  %v1859_v30 = vor.u32 %v2214_v24, %v1856_v25  ;;  %v2210_v32 = vld [vmem:[%s2582_s9 + $0x16c] sm:$0xf0] }
  0x5a   : > { %v2229_v0 = vld [vmem:[%s2582_s9 + $0x20c] sm:$0xf]  ;;  %v1911_v10 = vor.u32 %v2233_v60, %v1910_v59  ;;  %v1659_v11 = vor.u32 %v2165_v61, %v1656_v63  ;;  %v1824_v37 = vld [vmem:[%s2582_s9 + $0x170] sm:$0xf0]  ;;  %v2046_v45 = vld [vmem:[%s2582_s9 + $0x310] sm:$0xf] }
  0x5b   : > { %1188 = vmatpush.bf16.msrb.mxu1 %v2007_v31  ;;  %1216 = vmatpush.bf16.msrb.mxu3 %v2011_v36  ;;  %v1912_v1 = vld [vmem:[%s2582_s9 + $0x228] sm:$0xf0]  ;;  %v1822_v31 = vld [vmem:[%s2582_s9 + $0x150] sm:$0xf]  ;;  %v2206_v36 = vld [vmem:[%s2582_s9 + $0x154] sm:$0xf] }
  0x5c   : > { %v1915_v14 = vor.u32 %v2229_v0, %v1912_v1  ;;  %v2270_v38 = vld [vmem:[%s2582_s9 + $0x354] sm:$0xf]  ;;  %v1823_v40 = vor.u32 %v2210_v32, %v1822_v31  ;;  %v2266_v47 = vld [vmem:[%s2582_s9 + $0x32c] sm:$0xf0] }
  0x5d   : > { %1175 = vmatpush.bf16.msrb.mxu0 %v1719_v42  ;;  %1203 = vmatpush.bf16.msrb.mxu2 %v1723_v44  ;;  %v2080_v39 = vld [vmem:[%s2582_s9 + $0x370] sm:$0xf0]  ;;  %v1827_v42 = vor.u32 %v2206_v36, %v1824_v37  ;;  %v2202_v44 = vld [vmem:[%s2582_s9 + $0x12c] sm:$0xf0]  ;;  %v2047_v53 = vor.u32 %v2266_v47, %v2046_v45  ;;  %v2287_v47 = vld [vmem:[%s2582_s9 + $0x3dc] sm:$0xf] }
  0x5e   : > { %v2083_v46 = vor.u32 %v2270_v38, %v2080_v39  ;;  %v1792_v49 = vld [vmem:[%s2582_s9 + $0x130] sm:$0xf0]  ;;  %v1758_v55 = vld [vmem:[%s2582_s9 + $0xd0] sm:$0xf]  ;;  %v1894_v38 = vld [vmem:[%s2582_s9 + $0x1d8] sm:$0xf] }
  0x5f   : > { %1189 = vmatpush.bf16.msrb.mxu1 %v1975_v43  ;;  %1217 = vmatpush.bf16.msrb.mxu3 %v1979_v48  ;;  %v1790_v43 = vld [vmem:[%s2582_s9 + $0x110] sm:$0xf]  ;;  %v2198_v48 = vld [vmem:[%s2582_s9 + $0x114] sm:$0xf]  ;;  %v2227_v39 = vld [vmem:[%s2582_s9 + $0x1f4] sm:$0xf0] }
  0x60   : > { %v2262_v50 = vld [vmem:[%s2582_s9 + $0x314] sm:$0xf]  ;;  %v1791_v52 = vor.u32 %v2202_v44, %v1790_v43  ;;  %v2194_v56 = vld [vmem:[%s2582_s9 + $0xec] sm:$0xf0]  ;;  %v2223_v43 = vld [vmem:[%s2582_s9 + $0x1dc] sm:$0xf] }
  0x61   : > { %1176 = vmatpush.bf16.msrb.mxu0 %v1687_v54  ;;  %1204 = vmatpush.bf16.msrb.mxu2 %v1691_v58  ;;  %v2048_v51 = vld [vmem:[%s2582_s9 + $0x330] sm:$0xf0]  ;;  %v1795_v54 = vor.u32 %v2198_v48, %v1792_v49  ;;  %v2258_v59 = vld [vmem:[%s2582_s9 + $0x2ec] sm:$0xf0]  ;;  %v1759_v0 = vor.u32 %v2194_v56, %v1758_v55  ;;  %v1896_v44 = vld [vmem:[%s2582_s9 + $0x1f8] sm:$0xf0] }
  0x62   : > { %v2051_v58 = vor.u32 %v2262_v50, %v2048_v51  ;;  %v2190_v60 = vld [vmem:[%s2582_s9 + $0xd4] sm:$0xf]  ;;  %v1726_v3 = vld [vmem:[%s2582_s9 + $0x90] sm:$0xf]  ;;  %v2152_v48 = vld [vmem:[%s2582_s9 + $0x3f8] sm:$0xf0]  ;;  %v1895_v50 = vor.u32 %v2227_v39, %v1894_v38 }
  0x63   : > { %1190 = vmatpush.bf16.msrb.mxu1 %v1943_v57  ;;  %1218 = vmatpush.bf16.msrb.mxu3 %v1947_v62  ;;  %v2014_v57 = vld [vmem:[%s2582_s9 + $0x2d0] sm:$0xf]  ;;  %v1760_v61 = vld [vmem:[%s2582_s9 + $0xf0] sm:$0xf0]  ;;  %v2118_v55 = vld [vmem:[%s2582_s9 + $0x398] sm:$0xf]  ;;  %v2155_v56 = vor.u32 %v2287_v47, %v2152_v48 }
  0x64   : > { %v2254_v62 = vld [vmem:[%s2582_s9 + $0x2d4] sm:$0xf]  ;;  %v2015_v1 = vor.u32 %v2258_v59, %v2014_v57  ;;  %v1763_v2 = vor.u32 %v2190_v60, %v1760_v61  ;;  %v2186_v4 = vld [vmem:[%s2582_s9 + $0xac] sm:$0xf0]  ;;  %v2283_v57 = vld [vmem:[%s2582_s9 + $0x3b4] sm:$0xf0] }
  0x65   : > { %1177 = vmatpush.bf16.msrb.mxu0 %v1655_v5  ;;  %1205 = vmatpush.bf16.msrb.mxu2 %v1659_v11  ;;  %v2016_v63 = vld [vmem:[%s2582_s9 + $0x2f0] sm:$0xf0]  ;;  %v1982_v5 = vld [vmem:[%s2582_s9 + $0x290] sm:$0xf]  ;;  %v1727_v13 = vor.u32 %v2186_v4, %v1726_v3  ;;  %v1864_v59 = vld [vmem:[%s2582_s9 + $0x1b8] sm:$0xf0] }
  0x66   : > { %v2019_v6 = vor.u32 %v2254_v62, %v2016_v63  ;;  %v2250_v7 = vld [vmem:[%s2582_s9 + $0x2ac] sm:$0xf0]  ;;  %v2182_v9 = vld [vmem:[%s2582_s9 + $0x94] sm:$0xf]  ;;  %v2279_v60 = vld [vmem:[%s2582_s9 + $0x39c] sm:$0xf]  ;;  %v2119_v63 = vor.u32 %v2283_v57, %v2118_v55 }
  0x67   : > { %1191 = vmatpush.bf16.msrb.mxu1 %v1911_v10  ;;  %1219 = vmatpush.bf16.msrb.mxu3 %v1915_v14  ;;  %v1728_v10 = vld [vmem:[%s2582_s9 + $0xb0] sm:$0xf0]  ;;  %v1983_v14 = vor.u32 %v2250_v7, %v1982_v5  ;;  %v1950_v19 = vld [vmem:[%s2582_s9 + $0x250] sm:$0xf]  ;;  %v2120_v61 = vld [vmem:[%s2582_s9 + $0x3b8] sm:$0xf0] }
  0x68   : > { %1206 = vmatmul.bf16.vlgmr.msrb.gmra.mxu2 %v2693_v8  ;;  %1178 = vmatmul.bf16.vlgmr.msrb.gmra.mxu0 %v2693_v8  ;;  %v2246_v11 = vld [vmem:[%s2582_s9 + $0x294] sm:$0xf]  ;;  %v2242_v21 = vld [vmem:[%s2582_s9 + $0x26c] sm:$0xf0]  ;;  %v2086_v3 = vld [vmem:[%s2582_s9 + $0x358] sm:$0xf]  ;;  %v2123_v4 = vor.u32 %v2279_v60, %v2120_v61 }
  0x69   : > { %1226 = vmatpush.bf16.msra.mxu0 %v1887_v16  ;;  %1254 = vmatpush.bf16.msra.mxu2 %v1891_v18  ;;  %v1984_v12 = vld [vmem:[%s2582_s9 + $0x2b0] sm:$0xf0]  ;;  %v1731_v16 = vor.u32 %v2182_v9, %v1728_v10  ;;  %v2178_v18 = vld [vmem:[%s2582_s9 + $0x6c] sm:$0xf0]  ;;  %v2275_v5 = vld [vmem:[%s2582_s9 + $0x374] sm:$0xf0] }
  0x6a   : > { %1220 = vmatmul.bf16.vlgmr.msrb.gmra.mxu3 %v2704_v15  ;;  %1192 = vmatmul.bf16.vlgmr.msrb.gmra.mxu1 %v2704_v15  ;;  %v1987_v20 = vor.u32 %v2246_v11, %v1984_v12  ;;  %v1696_v23 = vld [vmem:[%s2582_s9 + $0x70] sm:$0xf0]  ;;  %v1662_v27 = vld [vmem:[%s2582_s9 + $0x10] sm:$0xf]  ;;  %v1832_v7 = vld [vmem:[%s2582_s9 + $0x178] sm:$0xf0]  ;;  %v2087_v12 = vor.u32 %v2275_v5, %v2086_v3 }
  0x6b   : > { %1240 = vmatpush.bf16.msra.mxu1 %v2143_v17  ;;  %1268 = vmatpush.bf16.msra.mxu3 %v2147_v22  ;;  %v1694_v17 = vld [vmem:[%s2582_s9 + $0x50] sm:$0xf]  ;;  %v2174_v22 = vld [vmem:[%s2582_s9 + $0x54] sm:$0xf]  ;;  %v2271_v9 = vld [vmem:[%s2582_s9 + $0x35c] sm:$0xf] }
  0x6c   : > { %v2238_v24 = vld [vmem:[%s2582_s9 + $0x254] sm:$0xf]  ;;  %v1695_v26 = vor.u32 %v2178_v18, %v1694_v17  ;;  %v1918_v31 = vld [vmem:[%s2582_s9 + $0x210] sm:$0xf]  ;;  %v2088_v10 = vld [vmem:[%s2582_s9 + $0x378] sm:$0xf0] }
  0x6d   : > { %1227 = vmatpush.bf16.msra.mxu0 %v1855_v28  ;;  %1255 = vmatpush.bf16.msra.mxu2 %v1859_v30  ;;  %v1952_v25 = vld [vmem:[%s2582_s9 + $0x270] sm:$0xf0]  ;;  %v2170_v28 = vld [vmem:[%s2582_s9 + $0x2c] sm:$0xf0]  ;;  %v1699_v30 = vor.u32 %v2174_v22, %v1696_v23  ;;  %v2054_v17 = vld [vmem:[%s2582_s9 + $0x318] sm:$0xf]  ;;  %v2091_v18 = vor.u32 %v2271_v9, %v2088_v10 }
  0x6e   : > { %v2234_v32 = vld [vmem:[%s2582_s9 + $0x22c] sm:$0xf0]  ;;  %v2166_v33 = vld [vmem:[%s2582_s9 + $0x14] sm:$0xf]  ;;  %v2263_v22 = vld [vmem:[%s2582_s9 + $0x31c] sm:$0xf] }
  0x6f   : > { %1241 = vmatpush.bf16.msra.mxu1 %v2111_v29  ;;  %1269 = vmatpush.bf16.msra.mxu3 %v2115_v34  ;;  %v1951_v29 = vor.u32 %v2242_v21, %v1950_v19  ;;  %v1955_v34 = vor.u32 %v2238_v24, %v1952_v25  ;;  %v1664_v35 = vld [vmem:[%s2582_s9 + $0x30] sm:$0xf0]  ;;  %v1919_v45 = vor.u32 %v2234_v32, %v1918_v31  ;;  %v2267_v19 = vld [vmem:[%s2582_s9 + $0x334] sm:$0xf0]  ;;  %v1800_v21 = vld [vmem:[%s2582_s9 + $0x138] sm:$0xf0] }
  0x70   : > { %v2230_v36 = vld [vmem:[%s2582_s9 + $0x214] sm:$0xf]  ;;  %v2056_v23 = vld [vmem:[%s2582_s9 + $0x338] sm:$0xf0]  ;;  %v2055_v25 = vor.u32 %v2267_v19, %v2054_v17  ;;  %v2259_v31 = vld [vmem:[%s2582_s9 + $0x2f4] sm:$0xf0] }
  0x71   : > { %1228 = vmatpush.bf16.msra.mxu0 %v1823_v40  ;;  %1256 = vmatpush.bf16.msra.mxu2 %v1827_v42  ;;  %v1920_v37 = vld [vmem:[%s2582_s9 + $0x230] sm:$0xf0]  ;;  %v2150_v40 = vld [vmem:[%s2582_s9 + $0x3d8] sm:$0xf]  ;;  %v2191_v32 = vld [vmem:[%s2582_s9 + $0xdc] sm:$0xf] }
  0x72   : > { %v2291_v42 = vld [vmem:[%s2582_s9 + $0x3f4] sm:$0xf0]  ;;  %v1923_v49 = vor.u32 %v2230_v36, %v1920_v37  ;;  %v1992_v47 = vld [vmem:[%s2582_s9 + $0x2b8] sm:$0xf0] }
  0x73   : > { %1242 = vmatpush.bf16.msra.mxu1 %v2079_v41  ;;  %1270 = vmatpush.bf16.msra.mxu3 %v2083_v46  ;;  %v1663_v41 = vor.u32 %v2170_v28, %v1662_v27  ;;  %v1667_v46 = vor.u32 %v2166_v33, %v1664_v35  ;;  %v2151_v51 = vor.u32 %v2291_v42, %v2150_v40  ;;  %v1766_v27 = vld [vmem:[%s2582_s9 + $0xd8] sm:$0xf]  ;;  %v1768_v33 = vld [vmem:[%s2582_s9 + $0xf8] sm:$0xf0] }
  0x74   : > { %v2195_v28 = vld [vmem:[%s2582_s9 + $0xf4] sm:$0xf0]  ;;  %v2024_v35 = vld [vmem:[%s2582_s9 + $0x2f8] sm:$0xf0]  ;;  %v1771_v38 = vor.u32 %v2191_v32, %v1768_v33 }
  0x75   : > { %1229 = vmatpush.bf16.msra.mxu0 %v1791_v52  ;;  %1257 = vmatpush.bf16.msra.mxu2 %v1795_v54  ;;  %v1899_v52 = vor.u32 %v2223_v43, %v1896_v44  ;;  %v2219_v54 = vld [vmem:[%s2582_s9 + $0x1b4] sm:$0xf0]  ;;  %v1767_v36 = vor.u32 %v2195_v28, %v1766_v27  ;;  %v2183_v44 = vld [vmem:[%s2582_s9 + $0x9c] sm:$0xf] }
  0x76   : > { %v1734_v39 = vld [vmem:[%s2582_s9 + $0x98] sm:$0xf]  ;;  %v1704_v57 = vld [vmem:[%s2582_s9 + $0x78] sm:$0xf0] }
  0x77   : > { %1243 = vmatpush.bf16.msra.mxu1 %v2047_v53  ;;  %1271 = vmatpush.bf16.msra.mxu3 %v2051_v58  ;;  %v1862_v53 = vld [vmem:[%s2582_s9 + $0x198] sm:$0xf]  ;;  %v2215_v58 = vld [vmem:[%s2582_s9 + $0x19c] sm:$0xf] }
  0x78   : > { %v1863_v62 = vor.u32 %v2219_v54, %v1862_v53  ;;  %v2187_v40 = vld [vmem:[%s2582_s9 + $0xb4] sm:$0xf0]  ;;  %v1672_v5 = vld [vmem:[%s2582_s9 + $0x38] sm:$0xf0] }
  0x79   : > { %1230 = vmatpush.bf16.msra.mxu0 %v1759_v0  ;;  %1258 = vmatpush.bf16.msra.mxu2 %v1763_v2  ;;  %v1867_v0 = vor.u32 %v2215_v58, %v1864_v59  ;;  %v2211_v2 = vld [vmem:[%s2582_s9 + $0x174] sm:$0xf0]  ;;  %v1735_v48 = vor.u32 %v2187_v40, %v1734_v39  ;;  %v2239_v58 = vld [vmem:[%s2582_s9 + $0x25c] sm:$0xf] }
  0x7a   : > { %v2251_v43 = vld [vmem:[%s2582_s9 + $0x2b4] sm:$0xf0]  ;;  %v1960_v59 = vld [vmem:[%s2582_s9 + $0x278] sm:$0xf0] }
  0x7b   : > { %1244 = vmatpush.bf16.msra.mxu1 %v2015_v1  ;;  %1272 = vmatpush.bf16.msra.mxu3 %v2019_v6  ;;  %v1830_v1 = vld [vmem:[%s2582_s9 + $0x158] sm:$0xf]  ;;  %v2207_v6 = vld [vmem:[%s2582_s9 + $0x15c] sm:$0xf] }
  0x7c   : > { %v1831_v11 = vor.u32 %v2211_v2, %v1830_v1  ;;  %v1958_v53 = vld [vmem:[%s2582_s9 + $0x258] sm:$0xf]  ;;  %v1963_v2 = vor.u32 %v2239_v58, %v1960_v59 }
  0x7d   : > { %1231 = vmatpush.bf16.msra.mxu0 %v1727_v13  ;;  %1259 = vmatpush.bf16.msra.mxu2 %v1731_v16  ;;  %v1835_v13 = vor.u32 %v2207_v6, %v1832_v7  ;;  %v2203_v16 = vld [vmem:[%s2582_s9 + $0x134] sm:$0xf0]  ;;  %v2231_v6 = vld [vmem:[%s2582_s9 + $0x21c] sm:$0xf] }
  0x7e   : > { %v2243_v55 = vld [vmem:[%s2582_s9 + $0x274] sm:$0xf0]  ;;  %v1928_v7 = vld [vmem:[%s2582_s9 + $0x238] sm:$0xf0] }
  0x7f   : > { %1245 = vmatpush.bf16.msra.mxu1 %v1983_v14  ;;  %1273 = vmatpush.bf16.msra.mxu3 %v1987_v20  ;;  %v1798_v14 = vld [vmem:[%s2582_s9 + $0x118] sm:$0xf]  ;;  %v2199_v20 = vld [vmem:[%s2582_s9 + $0x11c] sm:$0xf]  ;;  %v1959_v61 = vor.u32 %v2243_v55, %v1958_v53 }
  0x80   : > { %v1799_v24 = vor.u32 %v2203_v16, %v1798_v14  ;;  %v1926_v1 = vld [vmem:[%s2582_s9 + $0x218] sm:$0xf] }
  0x81   : > { %1232 = vmatpush.bf16.msra.mxu0 %v1695_v26  ;;  %1260 = vmatpush.bf16.msra.mxu2 %v1699_v30  ;;  %v1803_v26 = vor.u32 %v2199_v20, %v1800_v21  ;;  %v2059_v30 = vor.u32 %v2263_v22, %v2056_v23  ;;  %v2235_v3 = vld [vmem:[%s2582_s9 + $0x234] sm:$0xf0] }
  0x82   : > { %v1927_v10 = vor.u32 %v2235_v3, %v1926_v1 }
  0x83   : > { %1246 = vmatpush.bf16.msra.mxu1 %v1951_v29  ;;  %1274 = vmatpush.bf16.msra.mxu3 %v1955_v34  ;;  %v2022_v29 = vld [vmem:[%s2582_s9 + $0x2d8] sm:$0xf]  ;;  %v2255_v34 = vld [vmem:[%s2582_s9 + $0x2dc] sm:$0xf] }
  0x84   : > { %v2023_v37 = vor.u32 %v2259_v31, %v2022_v29  ;;  %v2027_v42 = vor.u32 %v2255_v34, %v2024_v35 }
  0x85   : > { %1233 = vmatpush.bf16.msra.mxu0 %v1663_v41  ;;  %1261 = vmatpush.bf16.msra.mxu2 %v1667_v46  ;;  %v1990_v41 = vld [vmem:[%s2582_s9 + $0x298] sm:$0xf]  ;;  %v2247_v46 = vld [vmem:[%s2582_s9 + $0x29c] sm:$0xf] }
  0x86   : > { %v1995_v54 = vor.u32 %v2247_v46, %v1992_v47 }
  0x87   : > { %1247 = vmatpush.bf16.msra.mxu1 %v1919_v45  ;;  %1275 = vmatpush.bf16.msra.mxu3 %v1923_v49  ;;  %v1736_v45 = vld [vmem:[%s2582_s9 + $0xb8] sm:$0xf0]  ;;  %v1991_v49 = vor.u32 %v2251_v43, %v1990_v41 }
  0x88   : > { %1262 = vmatmul.bf16.vlgmr.msra.gmra.mxu2 %v2693_v8  ;;  %1234 = vmatmul.bf16.vlgmr.msra.gmra.mxu0 %v2693_v8 }
  0x89   : > { %1282 = vmatpush.bf16.msrb.mxu0 %v1895_v50  ;;  %1310 = vmatpush.bf16.msrb.mxu2 %v1899_v52  ;;  %v1739_v50 = vor.u32 %v2183_v44, %v1736_v45  ;;  %v2179_v52 = vld [vmem:[%s2582_s9 + $0x74] sm:$0xf0] }
  0x8a   : > { %1276 = vmatmul.bf16.vlgmr.msra.gmra.mxu3 %v2704_v15  ;;  %1248 = vmatmul.bf16.vlgmr.msra.gmra.mxu1 %v2704_v15 }
  0x8b   : > { %1296 = vmatpush.bf16.msrb.mxu1 %v2151_v51  ;;  %1324 = vmatpush.bf16.msrb.mxu3 %v2155_v56  ;;  %v1702_v51 = vld [vmem:[%s2582_s9 + $0x58] sm:$0xf]  ;;  %v2175_v56 = vld [vmem:[%s2582_s9 + $0x5c] sm:$0xf] }
  0x8c   : > { %v1703_v60 = vor.u32 %v2179_v52, %v1702_v51 }
  0x8d   : > { %1283 = vmatpush.bf16.msrb.mxu0 %v1863_v62  ;;  %1311 = vmatpush.bf16.msrb.mxu2 %v1867_v0  ;;  %v1707_v62 = vor.u32 %v2175_v56, %v1704_v57  ;;  %v2171_v0 = vld [vmem:[%s2582_s9 + $0x34] sm:$0xf0] }
  0x8f   : > { %1297 = vmatpush.bf16.msrb.mxu1 %v2119_v63  ;;  %1325 = vmatpush.bf16.msrb.mxu3 %v2123_v4  ;;  %v1670_v63 = vld [vmem:[%s2582_s9 + $0x18] sm:$0xf]  ;;  %v2167_v4 = vld [vmem:[%s2582_s9 + $0x1c] sm:$0xf] }
  0x90   : > { %v1671_v9 = vor.u32 %v2171_v0, %v1670_v63 }
  0x91   : > { %1284 = vmatpush.bf16.msrb.mxu0 %v1831_v11  ;;  %1312 = vmatpush.bf16.msrb.mxu2 %v1835_v13  ;;  %v1675_v11 = vor.u32 %v2167_v4, %v1672_v5  ;;  %v2885_v13 = vld [vmem:[%s2590_s10] sm:$0xff] }
  0x92   : > { %v1391_v16 = vperm.slane %v2885_v13, 0  ;;  %v1392_v21 = vperm.slane %v2885_v13, 1  ;;  %v1393_v39 = vperm.slane %v2885_v13, 2  ;;  %v1394_v43 = vperm.slane %v2885_v13, 3 }
  0x93   : > { %1298 = vmatpush.bf16.msrb.mxu1 %v2087_v12  ;;  %1326 = vmatpush.bf16.msrb.mxu3 %v2091_v18  ;;  %v1931_v12 = vor.u32 %v2231_v6, %v1928_v7  ;;  %v1395_v63 = vperm.slane %v2885_v13, 4  ;;  %v1396_v3 = vperm.slane %v2885_v13, 5 }
  0x95   : > { %1285 = vmatpush.bf16.msrb.mxu0 %v1799_v24  ;;  %1313 = vmatpush.bf16.msrb.mxu2 %v1803_v26 }
  0x97   : > { %1299 = vmatpush.bf16.msrb.mxu1 %v2055_v25  ;;  %1327 = vmatpush.bf16.msrb.mxu3 %v2059_v30 }
  0x99   : > { %1286 = vmatpush.bf16.msrb.mxu0 %v1767_v36  ;;  %1314 = vmatpush.bf16.msrb.mxu2 %v1771_v38 }
  0x9b   : > { %1300 = vmatpush.bf16.msrb.mxu1 %v2023_v37  ;;  %1328 = vmatpush.bf16.msrb.mxu3 %v2027_v42 }
  0x9d   : > { %1287 = vmatpush.bf16.msrb.mxu0 %v1735_v48  ;;  %1315 = vmatpush.bf16.msrb.mxu2 %v1739_v50 }
  0x9f   : > { %1301 = vmatpush.bf16.msrb.mxu1 %v1991_v49  ;;  %1329 = vmatpush.bf16.msrb.mxu3 %v1995_v54 }
  0xa1   : > { %1288 = vmatpush.bf16.msrb.mxu0 %v1703_v60  ;;  %1316 = vmatpush.bf16.msrb.mxu2 %v1707_v62 }
  0xa3   : > { %1302 = vmatpush.bf16.msrb.mxu1 %v1959_v61  ;;  %1330 = vmatpush.bf16.msrb.mxu3 %v1963_v2 }
  0xa5   : > { %1289 = vmatpush.bf16.msrb.mxu0 %v1671_v9  ;;  %1317 = vmatpush.bf16.msrb.mxu2 %v1675_v11 }
  0xa7   : > { %1303 = vmatpush.bf16.msrb.mxu1 %v1927_v10  ;;  %1331 = vmatpush.bf16.msrb.mxu3 %v1931_v12 }
  0xa8   : > { %1290 = vmatmul.bf16.vlgmr.msrb.gmra.mxu0 %v2693_v8  ;;  %1318 = vmatmul.bf16.vlgmr.msrb.gmra.mxu2 %v2693_v8 }
  0xaa   : > { %1304 = vmatmul.bf16.vlgmr.msrb.gmra.mxu1 %v2704_v15  ;;  %1332 = vmatmul.bf16.vlgmr.msrb.gmra.mxu3 %v2704_v15 }
  0xc7   : > { %v1123_v14 = vpop.f32.mrf.mxu0 }
  0xc9   : > { %v1137_v17 = vpop.f32.mrf.mxu1 }
  0xca   : > { %v1138_v18 = vadd.f32 %v1137_v17, %v1123_v14 }
  0xcc   : > { %v1407_v19 = vadd.f32 %v1391_v16, %v1138_v18 }
  0xcd   : > { %v1151_v20 = vpop.f32.mrf.mxu2 }
  0xce   : > { %v1423_v25 = vmax.f32 %v1407_v19, 0.0 }
  0xcf   : > { %v1165_v22 = vpop.f32.mrf.mxu3  ;;  %v1125_v24 = vpop.f32.mrf.mxu0 }
  0xd0   : > { %v1166_v23 = vadd.f32 %v1165_v22, %v1151_v20 }
  0xd1   : > { %v1139_v8 = vpop.f32.mrf.mxu1 }
  0xd2   : > { %v1408_v26 = vadd.f32 %v1392_v21, %v1166_v23  ;;  %v1140_v15 = vadd.f32 %v1139_v8, %v1125_v24  ;;  %v1397_v8 = vperm.slane %v2885_v13, 6 }
  0xd4   : > { %v1424_v27 = vmax.f32 %v1408_v26, 0.0  ;;  %v1415_v29 = vadd.f32 %v1391_v16, %v1140_v15 }
  0xd5   : > { %v1153_v30 = vpop.f32.mrf.mxu2 }
  0xd6   : > { %v1439_v28 = vpack.c.bf16 %v1424_v27, %v1423_v25  ;;  %v1431_v33 = vmax.f32 %v1415_v29, 0.0 }
  0xd7   : > { %v1167_v31 = vpop.f32.mrf.mxu3 }
  0xd8   : > { %1447 = vst [vmem:[%s2890_s29] sm:$0xff] %v1439_v28  ;;  %v1168_v32 = vadd.f32 %v1167_v31, %v1153_v30  ;;  %v1398_v28 = vperm.slane %v2885_v13, 7 }
  0xda   : > { %v1416_v34 = vadd.f32 %v1392_v21, %v1168_v32 }
  0xdc   : > { %v1432_v35 = vmax.f32 %v1416_v34, 0.0 }
  0xde   : > { %v1443_v36 = vpack.c.bf16 %v1432_v35, %v1431_v33 }
  0xdf   : > { %v1480_v13 = vld [vmem:[%s2890_s29] sm:$0xff] (%p2545_p9) }
  0xe0   : > { %1451 = vst [vmem:[%s2890_s29 + $0x20] sm:$0xff] %v1443_v36 }
  0xe1   : > { %1481 = vst [vmem:[%s1467_s6] sm:$0xff] (%p2545_p9), %v1480_v13 }
  0xe5   : > { %v1179_v37 = vpop.f32.mrf.mxu0 }
  0xe7   : > { %v1193_v38 = vpop.f32.mrf.mxu1 }
  0xe8   : > { %v1194_v40 = vadd.f32 %v1193_v38, %v1179_v37 }
  0xea   : > { %v1409_v41 = vadd.f32 %v1393_v39, %v1194_v40 }
  0xeb   : > { %v1207_v42 = vpop.f32.mrf.mxu2 }
  0xec   : > { %v1425_v47 = vmax.f32 %v1409_v41, 0.0 }
  0xed   : > { %v1221_v44 = vpop.f32.mrf.mxu3  ;;  %v1181_v46 = vpop.f32.mrf.mxu0 }
  0xee   : > { %v1222_v45 = vadd.f32 %v1221_v44, %v1207_v42 }
  0xef   : > { %v1195_v49 = vpop.f32.mrf.mxu1 }
  0xf0   : > { %v1410_v48 = vadd.f32 %v1394_v43, %v1222_v45  ;;  %v1196_v50 = vadd.f32 %v1195_v49, %v1181_v46  ;;  %v1488_v49 = vld [vmem:[%s2890_s29 + $0x20] sm:$0xff] (%p2545_p9) }
  0xf1   : > { %1489 = vst [vmem:[%s1467_s6 + $0x80] sm:$0xff] (%p2545_p9), %v1488_v49 }
  0xf2   : > { %v1426_v51 = vmax.f32 %v1410_v48, 0.0  ;;  %v1417_v53 = vadd.f32 %v1393_v39, %v1196_v50 }
  0xf3   : > { %v1209_v54 = vpop.f32.mrf.mxu2 }
  0xf4   : > { %v1440_v52 = vpack.c.bf16 %v1426_v51, %v1425_v47  ;;  %v1433_v57 = vmax.f32 %v1417_v53, 0.0 }
  0xf5   : > { %v1223_v55 = vpop.f32.mrf.mxu3 }
  0xf6   : > { %1448 = vst [vmem:[%s2890_s29 + $0x8] sm:$0xff] %v1440_v52  ;;  %v1224_v56 = vadd.f32 %v1223_v55, %v1209_v54 }
  0xf8   : > { %v1418_v58 = vadd.f32 %v1394_v43, %v1224_v56 }
  0xfa   : > { %v1434_v59 = vmax.f32 %v1418_v58, 0.0 }
  0xfc   : > { %v1444_v60 = vpack.c.bf16 %v1434_v59, %v1433_v57 }
  0xfd   : > { %v1482_v46 = vld [vmem:[%s2890_s29 + $0x8] sm:$0xff] (%p2545_p9) }
  0xfe   : > { %1452 = vst [vmem:[%s2890_s29 + $0x28] sm:$0xff] %v1444_v60 }
  0xff   : > { %1483 = vst [vmem:[%s1467_s6 + $0x8] sm:$0xff] (%p2545_p9), %v1482_v46 }
 0x105   : > { %v1235_v61 = vpop.f32.mrf.mxu0  ;;  %v1490_v50 = vld [vmem:[%s2890_s29 + $0x28] sm:$0xff] (%p2545_p9) }
 0x106   : > { %1491 = vst [vmem:[%s1467_s6 + $0x88] sm:$0xff] (%p2545_p9), %v1490_v50 }
 0x107   : > { %v1249_v62 = vpop.f32.mrf.mxu1 }
 0x108   : > { %v1250_v0 = vadd.f32 %v1249_v62, %v1235_v61 }
 0x10a   : > { %v1411_v1 = vadd.f32 %v1395_v63, %v1250_v0 }
 0x10b   : > { %v1263_v2 = vpop.f32.mrf.mxu2 }
 0x10c   : > { %v1427_v7 = vmax.f32 %v1411_v1, 0.0 }
 0x10d   : > { %v1277_v4 = vpop.f32.mrf.mxu3  ;;  %v1237_v6 = vpop.f32.mrf.mxu0 }
 0x10e   : > { %v1278_v5 = vadd.f32 %v1277_v4, %v1263_v2 }
 0x10f   : > { %v1251_v10 = vpop.f32.mrf.mxu1 }
 0x110   : > { %v1412_v9 = vadd.f32 %v1396_v3, %v1278_v5  ;;  %v1252_v11 = vadd.f32 %v1251_v10, %v1237_v6 }
 0x112   : > { %v1428_v12 = vmax.f32 %v1412_v9, 0.0  ;;  %v1419_v16 = vadd.f32 %v1395_v63, %v1252_v11 }
 0x113   : > { %v1265_v17 = vpop.f32.mrf.mxu2 }
 0x114   : > { %v1441_v14 = vpack.c.bf16 %v1428_v12, %v1427_v7  ;;  %v1435_v20 = vmax.f32 %v1419_v16, 0.0 }
 0x115   : > { %v1279_v18 = vpop.f32.mrf.mxu3 }
 0x116   : > { %1449 = vst [vmem:[%s2890_s29 + $0x10] sm:$0xff] %v1441_v14  ;;  %v1280_v19 = vadd.f32 %v1279_v18, %v1265_v17 }
 0x118   : > { %v1420_v21 = vadd.f32 %v1396_v3, %v1280_v19 }
 0x11a   : > { %v1436_v22 = vmax.f32 %v1420_v21, 0.0 }
 0x11c   : > { %v1445_v23 = vpack.c.bf16 %v1436_v22, %v1435_v20 }
 0x11d   : > { %v1484_v47 = vld [vmem:[%s2890_s29 + $0x10] sm:$0xff] (%p2545_p9) }
 0x11e   : > { %1453 = vst [vmem:[%s2890_s29 + $0x30] sm:$0xff] %v1445_v23 }
 0x11f   : > { %1485 = vst [vmem:[%s1467_s6 + $0x10] sm:$0xff] (%p2545_p9), %v1484_v47 }
 0x125   : > { %v1291_v24 = vpop.f32.mrf.mxu0  ;;  %v1492_v51 = vld [vmem:[%s2890_s29 + $0x30] sm:$0xff] (%p2545_p9) }
 0x126   : > { %1493 = vst [vmem:[%s1467_s6 + $0x90] sm:$0xff] (%p2545_p9), %v1492_v51 }
 0x127   : > { %v1305_v25 = vpop.f32.mrf.mxu1 }
 0x128   : > { %v1306_v26 = vadd.f32 %v1305_v25, %v1291_v24 }
 0x12a   : > { %v1413_v27 = vadd.f32 %v1397_v8, %v1306_v26 }
 0x12b   : > { %v1319_v15 = vpop.f32.mrf.mxu2 }
 0x12c   : > { %v1429_v33 = vmax.f32 %v1413_v27, 0.0 }
 0x12d   : > { %v1333_v29 = vpop.f32.mrf.mxu3  ;;  %v1293_v31 = vpop.f32.mrf.mxu0 }
 0x12e   : > { %v1334_v30 = vadd.f32 %v1333_v29, %v1319_v15 }
 0x12f   : > { %v1307_v32 = vpop.f32.mrf.mxu1 }
 0x130   : > { %v1414_v34 = vadd.f32 %v1398_v28, %v1334_v30  ;;  %v1308_v36 = vadd.f32 %v1307_v32, %v1293_v31 }
 0x132   : > { %v1430_v35 = vmax.f32 %v1414_v34, 0.0  ;;  %v1421_v40 = vadd.f32 %v1397_v8, %v1308_v36 }
 0x133   : > { %v1321_v38 = vpop.f32.mrf.mxu2 }
 0x134   : > { %v1442_v37 = vpack.c.bf16 %v1430_v35, %v1429_v33  ;;  %v1437_v43 = vmax.f32 %v1421_v40, 0.0 }
 0x135   : > { %v1335_v39 = vpop.f32.mrf.mxu3 }
 0x136   : > { %1450 = vst [vmem:[%s2890_s29 + $0x18] sm:$0xff] %v1442_v37  ;;  %v1336_v41 = vadd.f32 %v1335_v39, %v1321_v38 }
 0x138   : > { %v1422_v42 = vadd.f32 %v1398_v28, %v1336_v41 }
 0x13a   : > { %v1438_v44 = vmax.f32 %v1422_v42, 0.0  ;;  %1461 = sbr.rel (!%p2545_p9) target bundleno = 327 (0x147), region = 52 }
 0x13c   : > { %v1446_v45 = vpack.c.bf16 %v1438_v44, %v1437_v43 }
 0x13d   : > { %v1486_v48 = vld [vmem:[%s2890_s29 + $0x18] sm:$0xff] (%p2545_p9) }
 0x13e   : > { %1454 = vst [vmem:[%s2890_s29 + $0x38] sm:$0xff] %v1446_v45 }
 0x13f   : > { %1487 = vst [vmem:[%s1467_s6 + $0x18] sm:$0xff] %v1486_v48 }
 0x145   : > { %v1494_v52 = vld [vmem:[%s2890_s29 + $0x38] sm:$0xff] }
 0x146   : > { %1495 = vst [vmem:[%s1467_s6 + $0x98] sm:$0xff] %v1494_v52 }
 0x147 PF: > { %s19_s17 = sadd.s32 1, %s2470_s17   ;;  %s2946_s12 = smov %s2454_s13 }
 0x148   : > { %p16_p1 = scmp.ge.s32.totalorder %s19_s17, 6   ;;  %s2947_s13 = smov %s2458_s14 }
 0x149   : > { %s2948_s14 = smov %s2543_s24  ;;  %s2949_s15 = smov %s2466_s16 }
 0x14a   : > { %s2950_s16 = smov %s2952_s19  ;;  %18 = sbr.rel (!%p16_p1) target bundleno = 6 (0x6), region = 119 }
 0x14f   :  { %1511 = vsyncpa [#allocation4], 1 }
 0x150   :  { %1513 = vsyncpa [#allocation4 + $0x1], 1 }
 0x151   :  { %1514 = vsyncpa [#allocation6], 1 }
 0x152   :  { %1516 = vsyncpa [#allocation6 + $0x1], 1 }

// kernel: fwd.3
= control target key start
LH: loop header
LB: loop body
LE: loop exit
PB: predicated region body
PF: predicated region fallthrough
CT: control target
= control target key end

     0   :  { %s17030_s0 = inlined_call_operand.vmem [shape: bf16[16,4096], index: 0, kind: input, shape index: {}]   ;;  %s17031_s1 = inlined_call_operand.hbm [shape: bf16[4096,4096], index: 1, kind: input, shape index: {}]   ;;  %s17032_s2 = inlined_call_operand.hbm [shape: f32[1,4096], index: 2, kind: input, shape index: {}]   ;;  %s17033_s3 = inlined_call_operand.vmem [shape: f32[16,4096], index: 3, kind: output, shape index: {}]  }
   0x1   :  { %17041 = sst [smem:[#allocation22_spill]] %s17030_s0 }
   0x2   :  { %17042 = sst [smem:[#allocation23_spill]] %s17033_s3 }
   0x3   :  { %8 = vsyncpa [#allocation5], 0 }
   0x4   :  { %10 = vsyncpa [#allocation5 + $0x1], 0 }
   0x5   :  { %11 = vsyncpa [#allocation7], 0 }
   0x6   :  { %13 = vsyncpa [#allocation7 + $0x1], 0  ;;  %s14239_s12 = smov 0   ;;  %s14241_s13 = smov 0  }
   0x7   :  { %s14243_s14 = smov 0   ;;  %s14245_s15 = smov 0  }
   0x8   :  { %s14247_s16 = smov 0   ;;  %s14249_s17 = smov 0  }
   0x9   :  { %s14251_s18 = smov 0   ;;  %s14253_s19 = smov 0  }
   0xa   :  { %s14255_s20 = smov 0   ;;  %s14257_s21 = smov 0  }
   0xb   :  { %s14259_s22 = smov 0   ;;  %s14261_s23 = smov 0  }
   0xc   :  { %s14263_s24 = smov 0  }
   0xd LB: > { %17043 = sst [smem:[#allocation11_spill]] %s14185_s17  ;;  %s8706_s25 = sadd.s32 4294967295, %s14213_s24   ;;  %s14213_s24 = sphi %s14263_s24, %s19_s24   ;;  %s14209_s23 = sphi %s14261_s23, %s17073_s23   ;;  %s14205_s22 = sphi %s14259_s22, %s17072_s22   ;;  %s14201_s21 = sphi %s14257_s21, %s17071_s21   ;;  %s14197_s20 = sphi %s14255_s20, %s17070_s20   ;;  %s14193_s19 = sphi %s14253_s19, %s17069_s19   ;;  %s14189_s18 = sphi %s14251_s18, %s17068_s18   ;;  %s14185_s17 = sphi %s14249_s17, %s17067_s17   ;;  %s14181_s16 = sphi %s14247_s16, %s17078_s16   ;;  %s14177_s15 = sphi %s14245_s15, %s17077_s15   ;;  %s14173_s14 = sphi %s14243_s14, %s17076_s14   ;;  %s14169_s13 = sphi %s14241_s13, %s17075_s13   ;;  %s14165_s12 = sphi %s14239_s12, %s17074_s12  }
   0xe   : > { %17044 = sst [smem:[#allocation12_spill]] %s14193_s19  ;;  %s31_s26 = sadd.s32 1, %s14205_s22 }
   0xf   : > { %17045 = sst [smem:[#allocation13_spill]] %s14201_s21  ;;  %p32_p0 = scmp.ge.s32.totalorder %s31_s26, 2 }
  0x10   : > { %17046 = sst [smem:[#allocation14_spill]] %s14205_s22  ;;  %s34_s27 = sadd.s32 1, %s14209_s23 }
  0x11   : > { %17047 = sst [smem:[#allocation15_spill]] %s14209_s23  ;;  %s47_s28 = sadd.s32 1, %s14193_s19 }
  0x12   : > { %p54_p1 = scmp.ne.s32.totalorder %s14193_s19, %s14189_s18  ;;  %s17080_s26 = smov (%p32_p0, %s31_s26), 0 }
  0x13   : > { %17048 = sst [smem:[#allocation16_spill]] %s17080_s26  ;;  %s17082_s27 = smov (!%p32_p0, %s34_s27), %s14209_s23 }
  0x14   : > { %s43_s29 = ssub.s32 %s14205_s22, %s17080_s26  ;;  %p55_p2 = scmp.eq.s32.totalorder %s14213_s24, 0 }
  0x15   : > { %p36_p3 = scmp.ge.s32.totalorder %s17082_s27, 4  ;;  %p45_p4 = scmp.eq.s32.totalorder %s43_s29, 0 }
  0x16   : > { %p14318_p5 = por %p55_p2, %p54_p1  ;;  %s75_s4 = sadd.s32 1, %s14185_s17 }
  0x17   : > { %s17084_s27 = smov (%p36_p3, %s17082_s27), 0  ;;  %p82_p6 = scmp.ne.s32.totalorder %s14185_s17, %s14181_s16 }
  0x18   : > { %17050 = sst [smem:[#allocation17_spill]] %s17084_s27  ;;  %s71_s6 = ssub.s32 %s14209_s23, %s17084_s27 }
  0x19   : > { %s14326_s5 = scalar_select %p45_p4, %s14193_s19, %s47_s28  }
  0x1a   : > { %s72_s7 = sor.u32 %s71_s6, %s43_s29  ;;  %p88_p7 = scmp.ne.s32.totalorder %s14181_s16, %s14177_s15 }
  0x1b   : > { %17051 = sst [smem:[#allocation18_spill]] %s14326_s5  ;;  %p73_p8 = scmp.eq.s32.totalorder %s72_s7, 0 }
  0x1c   : > { %p14336_p9 = por %p82_p6, %p55_p2  ;;  %p89_p10 = scmp.eq.s32.totalorder %s8706_s25, 0 }
  0x1d   : > { %p99_p11 = scmp.eq.s32.totalorder %s71_s6, 0  ;;  %s101_s11 = sadd.s32 1, %s14173_s14 }
  0x1e   : > { %s14343_s9 = scalar_select %p73_p8, %s14185_s17, %s75_s4  }
  0x1f   : > { %p14345_p12 = por %p89_p10, %p88_p7  ;;  %p108_p13 = scmp.ne.s32.totalorder %s14173_s14, %s14169_s13 }
  0x20   : > { %17053 = sst [smem:[#allocation19_spill]] %s14343_s9  ;;  %p114_p0 = scmp.ne.s32.totalorder %s14169_s13, %s14165_s12 }
  0x21   : > { %s14351_s28 = scalar_select %p99_p11, %s14173_s14, %s101_s11  }
  0x22   : > { %p140_p1 = scmp.eq.s32.totalorder %s8706_s25, 7  ;;  %p14361_p3 = por %p108_p13, %p55_p2 }
  0x23   : > { %17055 = sst [smem:[#allocation20_spill]] %s14351_s28  ;;  %p14365_p4 = por %p114_p0, %p89_p10 }
  0x24   : > { %p14369_p6 = por %p140_p1, %p108_p13  ;;  %p8709_p7 = scmp.ge.s32.totalorder %s14213_s24, 8 }
  0x26   : > { %s17058_s4 = scalar_select %p14369_p6, 1, 0 }
  0x27   : > { %162 = sbr.rel (%p8709_p7) target bundleno = 83 (0x53), region = 16 }
  0x28   : > { %17059 = sst [smem:[#allocation21_spill]] %s17058_s4 }
  0x2c   : > { %165 = sbr.rel (!%p14318_p5) target bundleno = 70 (0x46), region = 20  ;;  %s167_s12 = sand.u32 (%p14318_p5), 1, %s14193_s19  }
  0x2d   : > { %s12892_s25 = sshll.u32 (%p14318_p5), %s14205_s22, 6  ;;  %s8710_s6 = sshll.u32 (%p14318_p5), %s167_s12, 7 }
  0x2e   : > { %s17060_s0 = sld [smem:[#allocation22_spill]] (%p14318_p5)  ;;  %s169_s30 = scalar_lea.vmem (%p14318_p5), [#allocation3], %s8710_s6 }
  0x34   : > { %s14381_s27 = scalar_lea.vmem %s17060_s0, %s12892_s25 }
  0x35   : > { %v188_v0 = vld [vmem:[%s14381_s27] sm:$0xff]  ;;  %v190_v1 = vld [vmem:[%s14381_s27 + $0x8] sm:$0xff]  ;;  %v192_v2 = vld [vmem:[%s14381_s27 + $0x10] sm:$0xff] }
  0x36   : > { %189 = vst [vmem:[%s169_s30] sm:$0xff] %v188_v0  ;;  %v194_v3 = vld [vmem:[%s14381_s27 + $0x18] sm:$0xff]  ;;  %v196_v4 = vld [vmem:[%s14381_s27 + $0x20] sm:$0xff]  ;;  %v198_v5 = vld [vmem:[%s14381_s27 + $0x28] sm:$0xff] }
  0x37   : > { %191 = vst [vmem:[%s169_s30 + $0x8] sm:$0xff] %v190_v1  ;;  %v200_v6 = vld [vmem:[%s14381_s27 + $0x30] sm:$0xff]  ;;  %v202_v7 = vld [vmem:[%s14381_s27 + $0x38] sm:$0xff]  ;;  %v204_v8 = vld [vmem:[%s14381_s27 + $0x80] sm:$0xff] }
  0x38   : > { %193 = vst [vmem:[%s169_s30 + $0x10] sm:$0xff] %v192_v2  ;;  %v206_v9 = vld [vmem:[%s14381_s27 + $0x88] sm:$0xff]  ;;  %v208_v10 = vld [vmem:[%s14381_s27 + $0x90] sm:$0xff]  ;;  %v210_v11 = vld [vmem:[%s14381_s27 + $0x98] sm:$0xff] }
  0x39   : > { %195 = vst [vmem:[%s169_s30 + $0x18] sm:$0xff] %v194_v3  ;;  %v212_v12 = vld [vmem:[%s14381_s27 + $0xa0] sm:$0xff]  ;;  %v214_v13 = vld [vmem:[%s14381_s27 + $0xa8] sm:$0xff]  ;;  %v216_v14 = vld [vmem:[%s14381_s27 + $0xb0] sm:$0xff] }
  0x3a   : > { %197 = vst [vmem:[%s169_s30 + $0x20] sm:$0xff] %v196_v4  ;;  %v218_v15 = vld [vmem:[%s14381_s27 + $0xb8] sm:$0xff] }
  0x3b   : > { %199 = vst [vmem:[%s169_s30 + $0x28] sm:$0xff] %v198_v5 }
  0x3c   : > { %201 = vst [vmem:[%s169_s30 + $0x30] sm:$0xff] %v200_v6 }
  0x3d   : > { %203 = vst [vmem:[%s169_s30 + $0x38] sm:$0xff] %v202_v7 }
  0x3e   : > { %205 = vst [vmem:[%s169_s30 + $0x40] sm:$0xff] %v204_v8 }
  0x3f   : > { %207 = vst [vmem:[%s169_s30 + $0x48] sm:$0xff] %v206_v9 }
  0x40   : > { %209 = vst [vmem:[%s169_s30 + $0x50] sm:$0xff] %v208_v10 }
  0x41   : > { %211 = vst [vmem:[%s169_s30 + $0x58] sm:$0xff] %v210_v11 }
  0x42   : > { %213 = vst [vmem:[%s169_s30 + $0x60] sm:$0xff] %v212_v12 }
  0x43   : > { %215 = vst [vmem:[%s169_s30 + $0x68] sm:$0xff] %v214_v13 }
  0x44   : > { %217 = vst [vmem:[%s169_s30 + $0x70] sm:$0xff] %v216_v14 }
  0x45   : > { %219 = vst [vmem:[%s169_s30 + $0x78] sm:$0xff] %v218_v15 }
  0x46 PF: > { %s226_s12 = sand.u32 1, %s14185_s17   ;;  %s8715_s25 = sshll.u32 %s14209_s23, 3 }
  0x47   : > { %s8713_s6 = sshll.u32 %s226_s12, 13  ;;  %s12893_s7 = sshll.u32 %s14205_s22, 13 }
  0x48   : > { %s236_s11 = sadd.s32 %s12893_s7, %s8715_s25  ;;  %s230_s0 = scalar_lea.vmem [#allocation4], %s8713_s6 }
  0x49   : > { %s241_s26 = sshll.u32 %s230_s0, 4  ;;  %s8717_s5 = sshll.u32 %s236_s11, 2  ;;  %s242_s26 = int_to_ptr.vmem [resolvable:$true] %s241_s26 }
  0x4a   : > { %s238_s9 = scalar_lea.hbm %s17031_s1, %s8717_s5  ;;  %s227_s28 = scalar_lea.sflag [#allocation5], %s226_s12 }
  0x4b   : > { %s239_s30 = sshll.u32 %s238_s9, 4  ;;  %s14215_s3 = smov 2048   ;;  %s240_s30 = int_to_ptr.hbm [resolvable:$true] %s239_s30 }
  0x4c   : > { %s14216_s17 = smov 512   ;;  %s14217_s21 = smov 32  }
  0x4d   : > { %13935 = dma.hbm_to_vmem [thread:$0]  (%p14336_p9), %s240_s30, 131072, %s242_s26, %s227_s28, %s14215_s3, %s14216_s17, %s14217_s21  }
  0x4e   : > { %s251_s23 = sand.u32 1, %s14173_s14   ;;  %s259_s0 = scalar_lea.hbm %s17032_s2, %s8715_s25 }
  0x4f   : > { %s8718_s6 = sshll.u32 %s251_s23, 3  ;;  %s261_s11 = sshll.u32 %s259_s0, 4  ;;  %s262_s11 = int_to_ptr.hbm [resolvable:$true] %s261_s11 }
  0x50   : > { %s255_s4 = scalar_lea.vmem [#allocation6], %s8718_s6  ;;  %s252_s5 = scalar_lea.sflag [#allocation7], %s251_s23 }
  0x51   : > { %s263_s19 = sshll.u32 %s255_s4, 4  ;;  %s264_s19 = int_to_ptr.vmem [resolvable:$true] %s263_s19 }
  0x52   : > { %13936 = dma.hbm_to_vmem [thread:$0]  (%p14361_p3), %s262_s11, 128, %s264_s19, %s252_s5  }
  0x53 PF: > { %p8720_p2 = scmp.ge.s32.totalorder %s14213_s24, 1  ;;  %p268_p5 = scmp.lt.s32.totalorder %s14213_s24, 9 }
  0x55   : > { %p269_p8 = pnand %p8720_p2, %p268_p5 }
  0x56   : > { %s275_s3 = sand.u32 (!%p269_p8), 1, %s14189_s18   ;;  %s281_s17 = sand.u32 (!%p269_p8), 1, %s14181_s16  }
  0x57   : > { %272 = sbr.rel (%p269_p8) target bundleno = 2177 (0x881), region = 51  ;;  %s8721_s21 = sshll.u32 (!%p269_p8), %s275_s3, 7 }
  0x58   : > { %s8722_s22 = sshll.u32 (!%p269_p8), %s281_s17, 13  ;;  %s14417_s26 = scalar_lea.vmem (!%p269_p8), [#allocation3], %s8721_s21 }
  0x59   : > { %s282_s8 = scalar_lea.sflag (!%p269_p8), [#allocation5], %s281_s17  ;;  %s14419_s23 = scalar_lea.vmem (!%p269_p8), [#allocation4], %s8722_s22 }
  0x5c   : > { %14156 = dma.done.wait (%p14345_p12), %s282_s8, 131072  }
  0x5d   : > { %14158 = vsyncadd (%p14345_p12), %s282_s8, 4294836224  ;;  %s291_s9 = sand.u32 1, %s14169_s13  }
  0x5e   : > { %s8723_s28 = sshll.u32 %s291_s9, 3  ;;  %s292_s15 = scalar_lea.sflag [#allocation7], %s291_s9 }
  0x5f   : > { %s14426_s4 = scalar_lea.vmem [#allocation6], %s8723_s28 }
  0x60   : > { %14160 = dma.done.wait (%p14365_p4), %s292_s15, 128  }
  0x61   : > { %14162 = vsyncadd (%p14365_p4), %s292_s15, 4294967168  ;;  %s8724_s18 = sshll.u32 %s291_s9, 7  ;;  %p8725_p9 = scmp.ne.s32.totalorder %s14197_s20, 0 }
  0x62   : > { %s14432_s12 = scalar_lea.vmem [#allocation8], %s8724_s18 }
  0x63   : > { %337 = sbr.rel (%p8725_p9) target bundleno = 121 (0x79), region = 67 }
  0x68   : > { %v14218_v16 = vmov 0.0  }
  0x69   : > { %338 = vst [vmem:[#allocation2 + $0x30] sm:$0xff] %v14218_v16 }
  0x6a   : > { %339 = vst [vmem:[#allocation2] sm:$0xff] %v14218_v16 }
  0x6b   : > { %340 = vst [vmem:[#allocation2 + $0x58] sm:$0xff] %v14218_v16 }
  0x6c   : > { %341 = vst [vmem:[#allocation2 + $0x18] sm:$0xff] %v14218_v16 }
  0x6d   : > { %342 = vst [vmem:[#allocation2 + $0x50] sm:$0xff] %v14218_v16 }
  0x6e   : > { %343 = vst [vmem:[#allocation2 + $0x68] sm:$0xff] %v14218_v16 }
  0x6f   : > { %344 = vst [vmem:[#allocation2 + $0x8] sm:$0xff] %v14218_v16 }
  0x70   : > { %345 = vst [vmem:[#allocation2 + $0x48] sm:$0xff] %v14218_v16 }
  0x71   : > { %346 = vst [vmem:[#allocation2 + $0x40] sm:$0xff] %v14218_v16 }
  0x72   : > { %347 = vst [vmem:[#allocation2 + $0x20] sm:$0xff] %v14218_v16 }
  0x73   : > { %348 = vst [vmem:[#allocation2 + $0x10] sm:$0xff] %v14218_v16 }
  0x74   : > { %349 = vst [vmem:[#allocation2 + $0x38] sm:$0xff] %v14218_v16 }
  0x75   : > { %350 = vst [vmem:[#allocation2 + $0x60] sm:$0xff] %v14218_v16 }
  0x76   : > { %351 = vst [vmem:[#allocation2 + $0x70] sm:$0xff] %v14218_v16 }
  0x77   : > { %352 = vst [vmem:[#allocation2 + $0x78] sm:$0xff] %v14218_v16 }
  0x78   : > { %353 = vst [vmem:[#allocation2 + $0x28] sm:$0xff] %v14218_v16 }
  0x79 PF: > { %v9016_v17 = vld [vmem:[%s14419_s23 + $0x1c0] sm:$0xf]  ;;  %p12886_p10 = scmp.ne.s32.totalorder %s14197_s20, 1 }
  0x7a   : > { %v12970_v18 = vld [vmem:[%s14419_s23 + $0x1dc] sm:$0xf0] }
  0x7b   : > { %v9272_v19 = vld [vmem:[%s14419_s23 + $0x3c0] sm:$0xf]  ;;  %v9017_v20 = vor.u32 %v12970_v18, %v9016_v17 }
  0x7c   : > { %v13034_v21 = vld [vmem:[%s14419_s23 + $0x3dc] sm:$0xf0] }
  0x7d   : > { %v9528_v22 = vld [vmem:[%s14419_s23 + $0x5c0] sm:$0xf]  ;;  %v9273_v24 = vor.u32 %v13034_v21, %v9272_v19  ;;  %6610 = vmatpush.bf16.msra.mxu0 %v9017_v20 }
  0x7e   : > { %v13098_v23 = vld [vmem:[%s14419_s23 + $0x5dc] sm:$0xf0] }
  0x7f   : > { %v9529_v25 = vor.u32 %v13098_v23, %v9528_v22  ;;  %v9784_v26 = vld [vmem:[%s14419_s23 + $0x7c0] sm:$0xf]  ;;  %6624 = vmatpush.bf16.msra.mxu1 %v9273_v24 }
  0x80   : > { %v13162_v27 = vld [vmem:[%s14419_s23 + $0x7dc] sm:$0xf0] }
  0x81   : > { %v8984_v28 = vld [vmem:[%s14419_s23 + $0x180] sm:$0xf]  ;;  %v9785_v29 = vor.u32 %v13162_v27, %v9784_v26  ;;  %6638 = vmatpush.bf16.msra.mxu2 %v9529_v25 }
  0x82   : > { %v12962_v30 = vld [vmem:[%s14419_s23 + $0x19c] sm:$0xf0] }
  0x83   : > { %v9240_v31 = vld [vmem:[%s14419_s23 + $0x380] sm:$0xf]  ;;  %v8985_v33 = vor.u32 %v12962_v30, %v8984_v28  ;;  %6652 = vmatpush.bf16.msra.mxu3 %v9785_v29 }
  0x84   : > { %v13026_v32 = vld [vmem:[%s14419_s23 + $0x39c] sm:$0xf0] }
  0x85   : > { %v9241_v34 = vor.u32 %v13026_v32, %v9240_v31  ;;  %v9496_v35 = vld [vmem:[%s14419_s23 + $0x580] sm:$0xf]  ;;  %6611 = vmatpush.bf16.msra.mxu0 %v8985_v33 }
  0x86   : > { %v13090_v36 = vld [vmem:[%s14419_s23 + $0x59c] sm:$0xf0] }
  0x87   : > { %v9752_v37 = vld [vmem:[%s14419_s23 + $0x780] sm:$0xf]  ;;  %v9497_v38 = vor.u32 %v13090_v36, %v9496_v35  ;;  %6625 = vmatpush.bf16.msra.mxu1 %v9241_v34 }
  0x88   : > { %v13154_v39 = vld [vmem:[%s14419_s23 + $0x79c] sm:$0xf0] }
  0x89   : > { %v8952_v40 = vld [vmem:[%s14419_s23 + $0x140] sm:$0xf]  ;;  %v9753_v42 = vor.u32 %v13154_v39, %v9752_v37  ;;  %6639 = vmatpush.bf16.msra.mxu2 %v9497_v38 }
  0x8a   : > { %v12954_v41 = vld [vmem:[%s14419_s23 + $0x15c] sm:$0xf0] }
  0x8b   : > { %v9208_v43 = vld [vmem:[%s14419_s23 + $0x340] sm:$0xf]  ;;  %v8953_v46 = vor.u32 %v12954_v41, %v8952_v40  ;;  %6653 = vmatpush.bf16.msra.mxu3 %v9753_v42 }
  0x8c   : > { %v13018_v44 = vld [vmem:[%s14419_s23 + $0x35c] sm:$0xf0] }
  0x8d   : > { %v9464_v45 = vld [vmem:[%s14419_s23 + $0x540] sm:$0xf]  ;;  %v9209_v50 = vor.u32 %v13018_v44, %v9208_v43  ;;  %6612 = vmatpush.bf16.msra.mxu0 %v8953_v46 }
  0x8e   : > { %v13082_v47 = vld [vmem:[%s14419_s23 + $0x55c] sm:$0xf0] }
  0x8f   : > { %v9720_v48 = vld [vmem:[%s14419_s23 + $0x740] sm:$0xf]  ;;  %v9465_v51 = vor.u32 %v13082_v47, %v9464_v45  ;;  %6626 = vmatpush.bf16.msra.mxu1 %v9209_v50 }
  0x90   : > { %v13146_v49 = vld [vmem:[%s14419_s23 + $0x75c] sm:$0xf0] }
  0x91   : > { %v8920_v52 = vld [vmem:[%s14419_s23 + $0x100] sm:$0xf]  ;;  %v9721_v55 = vor.u32 %v13146_v49, %v9720_v48  ;;  %6640 = vmatpush.bf16.msra.mxu2 %v9465_v51 }
  0x92   : > { %v12946_v53 = vld [vmem:[%s14419_s23 + $0x11c] sm:$0xf0] }
  0x93   : > { %v9176_v54 = vld [vmem:[%s14419_s23 + $0x300] sm:$0xf]  ;;  %v8921_v61 = vor.u32 %v12946_v53, %v8920_v52  ;;  %6654 = vmatpush.bf16.msra.mxu3 %v9721_v55 }
  0x94   : > { %v13010_v56 = vld [vmem:[%s14419_s23 + $0x31c] sm:$0xf0] }
  0x95   : > { %v9432_v57 = vld [vmem:[%s14419_s23 + $0x500] sm:$0xf]  ;;  %v9177_v62 = vor.u32 %v13010_v56, %v9176_v54  ;;  %6613 = vmatpush.bf16.msra.mxu0 %v8921_v61 }
  0x96   : > { %v13074_v58 = vld [vmem:[%s14419_s23 + $0x51c] sm:$0xf0] }
  0x97   : > { %v9688_v59 = vld [vmem:[%s14419_s23 + $0x700] sm:$0xf]  ;;  %v9433_v63 = vor.u32 %v13074_v58, %v9432_v57  ;;  %6627 = vmatpush.bf16.msra.mxu1 %v9177_v62 }
  0x98   : > { %v13138_v60 = vld [vmem:[%s14419_s23 + $0x71c] sm:$0xf0] }
  0x99   : > { %v8888_v0 = vld [vmem:[%s14419_s23 + $0xc0] sm:$0xf]  ;;  %v9689_v3 = vor.u32 %v13138_v60, %v9688_v59  ;;  %6641 = vmatpush.bf16.msra.mxu2 %v9433_v63 }
  0x9a   : > { %v12938_v1 = vld [vmem:[%s14419_s23 + $0xdc] sm:$0xf0] }
  0x9b   : > { %v9144_v2 = vld [vmem:[%s14419_s23 + $0x2c0] sm:$0xf]  ;;  %v8889_v9 = vor.u32 %v12938_v1, %v8888_v0  ;;  %6655 = vmatpush.bf16.msra.mxu3 %v9689_v3 }
  0x9c   : > { %v13002_v4 = vld [vmem:[%s14419_s23 + $0x2dc] sm:$0xf0] }
  0x9d   : > { %v9400_v5 = vld [vmem:[%s14419_s23 + $0x4c0] sm:$0xf]  ;;  %v9145_v10 = vor.u32 %v13002_v4, %v9144_v2  ;;  %6614 = vmatpush.bf16.msra.mxu0 %v8889_v9 }
  0x9e   : > { %v13066_v6 = vld [vmem:[%s14419_s23 + $0x4dc] sm:$0xf0] }
  0x9f   : > { %v9656_v7 = vld [vmem:[%s14419_s23 + $0x6c0] sm:$0xf]  ;;  %v9401_v11 = vor.u32 %v13066_v6, %v9400_v5  ;;  %6628 = vmatpush.bf16.msra.mxu1 %v9145_v10 }
  0xa0   : > { %v13130_v8 = vld [vmem:[%s14419_s23 + $0x6dc] sm:$0xf0] }
  0xa1   : > { %v8856_v12 = vld [vmem:[%s14419_s23 + $0x80] sm:$0xf]  ;;  %v9657_v15 = vor.u32 %v13130_v8, %v9656_v7  ;;  %6642 = vmatpush.bf16.msra.mxu2 %v9401_v11  ;;  %v8736_v7 = vld [vmem:[%s14417_s26 + $0x8] sm:$0xf] }
  0xa2   : > { %v12930_v13 = vld [vmem:[%s14419_s23 + $0x9c] sm:$0xf0] }
  0xa3   : > { %v9112_v14 = vld [vmem:[%s14419_s23 + $0x280] sm:$0xf]  ;;  %v8857_v21 = vor.u32 %v12930_v13, %v8856_v12  ;;  %6656 = vmatpush.bf16.msra.mxu3 %v9657_v15  ;;  %v12903_v12 = vld [vmem:[%s14417_s26 + $0x44] sm:$0xf0] }
  0xa4   : > { %v12994_v16 = vld [vmem:[%s14419_s23 + $0x29c] sm:$0xf0] }
  0xa5   : > { %v9368_v17 = vld [vmem:[%s14419_s23 + $0x480] sm:$0xf]  ;;  %v9113_v22 = vor.u32 %v12994_v16, %v9112_v14  ;;  %6615 = vmatpush.bf16.msra.mxu0 %v8857_v21 }
  0xa6   : > { %v13058_v18 = vld [vmem:[%s14419_s23 + $0x49c] sm:$0xf0] }
  0xa7   : > { %v9624_v19 = vld [vmem:[%s14419_s23 + $0x680] sm:$0xf]  ;;  %v9369_v23 = vor.u32 %v13058_v18, %v9368_v17  ;;  %6629 = vmatpush.bf16.msra.mxu1 %v9113_v22  ;;  %v14526_v18 = vor.u32 %v12903_v12, %v8736_v7 }
  0xa8   : > { %v13122_v20 = vld [vmem:[%s14419_s23 + $0x69c] sm:$0xf0] }
  0xa9   : > { %v8824_v24 = vld [vmem:[%s14419_s23 + $0x40] sm:$0xf]  ;;  %v9625_v27 = vor.u32 %v13122_v20, %v9624_v19  ;;  %6643 = vmatpush.bf16.msra.mxu2 %v9369_v23  ;;  %v12894_v23 = vld [vmem:[%s14417_s26 + $0x4] sm:$0xf] }
  0xaa   : > { %v12922_v25 = vld [vmem:[%s14419_s23 + $0x5c] sm:$0xf0] }
  0xab   : > { %v9080_v26 = vld [vmem:[%s14419_s23 + $0x240] sm:$0xf]  ;;  %v8825_v33 = vor.u32 %v12922_v25, %v8824_v24  ;;  %6657 = vmatpush.bf16.msra.mxu3 %v9625_v27  ;;  %v8730_v24 = vld [vmem:[%s14417_s26 + $0x40] sm:$0xf0]  ;;  %v12895_v25 = vld [vmem:[%s14417_s26 + $0xc] sm:$0xf] }
  0xac   : > { %v12986_v28 = vld [vmem:[%s14419_s23 + $0x25c] sm:$0xf0]  ;;  %v14536_v27 = vor.u32 %v12894_v23, %v8730_v24 }
  0xad   : > { %v9336_v29 = vld [vmem:[%s14419_s23 + $0x440] sm:$0xf]  ;;  %v9081_v36 = vor.u32 %v12986_v28, %v9080_v26  ;;  %6616 = vmatpush.bf16.msra.mxu0 %v8825_v33  ;;  %v8738_v28 = vld [vmem:[%s14417_s26 + $0x48] sm:$0xf0] }
  0xae   : > { %v13050_v30 = vld [vmem:[%s14419_s23 + $0x45c] sm:$0xf0] }
  0xaf   : > { %v9592_v31 = vld [vmem:[%s14419_s23 + $0x640] sm:$0xf]  ;;  %v9337_v37 = vor.u32 %v13050_v30, %v9336_v29  ;;  %6630 = vmatpush.bf16.msra.mxu1 %v9081_v36 }
  0xb0   : > { %v13114_v32 = vld [vmem:[%s14419_s23 + $0x65c] sm:$0xf0] }
  0xb1   : > { %v8792_v34 = vld [vmem:[%s14419_s23] sm:$0xf]  ;;  %v9593_v41 = vor.u32 %v13114_v32, %v9592_v31  ;;  %6644 = vmatpush.bf16.msra.mxu2 %v9337_v37 }
  0xb2   : > { %v12914_v35 = vld [vmem:[%s14419_s23 + $0x1c] sm:$0xf0] }
  0xb3   : > { %v9048_v38 = vld [vmem:[%s14419_s23 + $0x200] sm:$0xf]  ;;  %v8793_v48 = vor.u32 %v12914_v35, %v8792_v34  ;;  %6658 = vmatpush.bf16.msra.mxu3 %v9593_v41  ;;  %v14542_v34 = vor.u32 %v12895_v25, %v8738_v28 }
  0xb4   : > { %v12978_v39 = vld [vmem:[%s14419_s23 + $0x21c] sm:$0xf0] }
  0xb5   : > { %v9304_v40 = vld [vmem:[%s14419_s23 + $0x400] sm:$0xf]  ;;  %v9049_v52 = vor.u32 %v12978_v39, %v9048_v38  ;;  %6617 = vmatpush.bf16.msra.mxu0 %v8793_v48 }
  0xb6   : > { %v13042_v42 = vld [vmem:[%s14419_s23 + $0x41c] sm:$0xf0] }
  0xb7   : > { %v9560_v43 = vld [vmem:[%s14419_s23 + $0x600] sm:$0xf]  ;;  %v9305_v53 = vor.u32 %v13042_v42, %v9304_v40  ;;  %6631 = vmatpush.bf16.msra.mxu1 %v9049_v52 }
  0xb8   : > { %v13106_v44 = vld [vmem:[%s14419_s23 + $0x61c] sm:$0xf0] }
  0xb9   : > { %v10040_v45 = vld [vmem:[%s14419_s23 + $0x9c0] sm:$0xf]  ;;  %v9561_v56 = vor.u32 %v13106_v44, %v9560_v43  ;;  %6645 = vmatpush.bf16.msra.mxu2 %v9305_v53 }
  0xba   : > { %v13226_v46 = vld [vmem:[%s14419_s23 + $0x9dc] sm:$0xf0]  ;;  %6632 = vmatmul.bf16.vlgmr.msra.gmra.mxu1 %v14536_v27 }
  0xbb   : > { %v10296_v47 = vld [vmem:[%s14419_s23 + $0xbc0] sm:$0xf]  ;;  %v10041_v57 = vor.u32 %v13226_v46, %v10040_v45  ;;  %6659 = vmatpush.bf16.msra.mxu3 %v9561_v56 }
  0xbc   : > { %v13290_v49 = vld [vmem:[%s14419_s23 + $0xbdc] sm:$0xf0]  ;;  %6646 = vmatmul.bf16.vlgmr.msra.gmra.mxu2 %v14526_v18 }
  0xbd   : > { %v10552_v50 = vld [vmem:[%s14419_s23 + $0xdc0] sm:$0xf]  ;;  %v10297_v60 = vor.u32 %v13290_v49, %v10296_v47  ;;  %6666 = vmatpush.bf16.msrb.mxu0 %v10041_v57 }
  0xbe   : > { %v13354_v51 = vld [vmem:[%s14419_s23 + $0xddc] sm:$0xf0]  ;;  %6660 = vmatmul.bf16.vlgmr.msra.gmra.mxu3 %v14542_v34 }
  0xbf   : > { %v10808_v54 = vld [vmem:[%s14419_s23 + $0xfc0] sm:$0xf]  ;;  %v10553_v61 = vor.u32 %v13354_v51, %v10552_v50  ;;  %6680 = vmatpush.bf16.msrb.mxu1 %v10297_v60 }
  0xc0   : > { %v13418_v55 = vld [vmem:[%s14419_s23 + $0xfdc] sm:$0xf0] }
  0xc1   : > { %v10008_v58 = vld [vmem:[%s14419_s23 + $0x980] sm:$0xf]  ;;  %v10809_v1 = vor.u32 %v13418_v55, %v10808_v54  ;;  %6694 = vmatpush.bf16.msrb.mxu2 %v10553_v61 }
  0xc2   : > { %v13218_v59 = vld [vmem:[%s14419_s23 + $0x99c] sm:$0xf0] }
  0xc3   : > { %v10264_v62 = vld [vmem:[%s14419_s23 + $0xb80] sm:$0xf]  ;;  %v10009_v8 = vor.u32 %v13218_v59, %v10008_v58  ;;  %6708 = vmatpush.bf16.msrb.mxu3 %v10809_v1 }
  0xc4   : > { %v13282_v63 = vld [vmem:[%s14419_s23 + $0xb9c] sm:$0xf0] }
  0xc5   : > { %v10520_v0 = vld [vmem:[%s14419_s23 + $0xd80] sm:$0xf]  ;;  %v10265_v13 = vor.u32 %v13282_v63, %v10264_v62  ;;  %6667 = vmatpush.bf16.msrb.mxu0 %v10009_v8 }
  0xc6   : > { %v13346_v2 = vld [vmem:[%s14419_s23 + $0xd9c] sm:$0xf0] }
  0xc7   : > { %v10776_v3 = vld [vmem:[%s14419_s23 + $0xf80] sm:$0xf]  ;;  %v10521_v14 = vor.u32 %v13346_v2, %v10520_v0  ;;  %6681 = vmatpush.bf16.msrb.mxu1 %v10265_v13 }
  0xc8   : > { %v13410_v4 = vld [vmem:[%s14419_s23 + $0xf9c] sm:$0xf0] }
  0xc9   : > { %v8728_v5 = vld [vmem:[%s14417_s26] sm:$0xf]  ;;  %v10777_v19 = vor.u32 %v13410_v4, %v10776_v3  ;;  %6695 = vmatpush.bf16.msrb.mxu2 %v10521_v14 }
  0xca   : > { %v12902_v6 = vld [vmem:[%s14417_s26 + $0x3c] sm:$0xf0] }
  0xcb   : > { %v9976_v9 = vld [vmem:[%s14419_s23 + $0x940] sm:$0xf]  ;;  %v14520_v11 = vor.u32 %v12902_v6, %v8728_v5  ;;  %6709 = vmatpush.bf16.msrb.mxu3 %v10777_v19 }
  0xcc   : > { %v13210_v10 = vld [vmem:[%s14419_s23 + $0x95c] sm:$0xf0] }
  0xcd   : > { %v10232_v15 = vld [vmem:[%s14419_s23 + $0xb40] sm:$0xf]  ;;  %6618 = vmatmul.bf16.vlgmr.msra.gmra.mxu0 %v14520_v11  ;;  %v9977_v26 = vor.u32 %v13210_v10, %v9976_v9 }
  0xce   : > { %v13274_v16 = vld [vmem:[%s14419_s23 + $0xb5c] sm:$0xf0] }
  0xcf   : > { %v10488_v17 = vld [vmem:[%s14419_s23 + $0xd40] sm:$0xf]  ;;  %v10233_v29 = vor.u32 %v13274_v16, %v10232_v15  ;;  %6668 = vmatpush.bf16.msrb.mxu0 %v9977_v26 }
  0xd0   : > { %v13338_v20 = vld [vmem:[%s14419_s23 + $0xd5c] sm:$0xf0] }
  0xd1   : > { %v10744_v21 = vld [vmem:[%s14419_s23 + $0xf40] sm:$0xf]  ;;  %v10489_v30 = vor.u32 %v13338_v20, %v10488_v17  ;;  %6682 = vmatpush.bf16.msrb.mxu1 %v10233_v29 }
  0xd2   : > { %v13402_v22 = vld [vmem:[%s14419_s23 + $0xf5c] sm:$0xf0] }
  0xd3   : > { %v9944_v31 = vld [vmem:[%s14419_s23 + $0x900] sm:$0xf]  ;;  %v10745_v35 = vor.u32 %v13402_v22, %v10744_v21  ;;  %6696 = vmatpush.bf16.msrb.mxu2 %v10489_v30 }
  0xd4   : > { %v13202_v32 = vld [vmem:[%s14419_s23 + $0x91c] sm:$0xf0] }
  0xd5   : > { %v10200_v33 = vld [vmem:[%s14419_s23 + $0xb00] sm:$0xf]  ;;  %v9945_v41 = vor.u32 %v13202_v32, %v9944_v31  ;;  %6710 = vmatpush.bf16.msrb.mxu3 %v10745_v35 }
  0xd6   : > { %v13266_v36 = vld [vmem:[%s14419_s23 + $0xb1c] sm:$0xf0] }
  0xd7   : > { %v10456_v37 = vld [vmem:[%s14419_s23 + $0xd00] sm:$0xf]  ;;  %v10201_v42 = vor.u32 %v13266_v36, %v10200_v33  ;;  %6669 = vmatpush.bf16.msrb.mxu0 %v9945_v41 }
  0xd8   : > { %v13330_v38 = vld [vmem:[%s14419_s23 + $0xd1c] sm:$0xf0] }
  0xd9   : > { %v10712_v39 = vld [vmem:[%s14419_s23 + $0xf00] sm:$0xf]  ;;  %v10457_v43 = vor.u32 %v13330_v38, %v10456_v37  ;;  %6683 = vmatpush.bf16.msrb.mxu1 %v10201_v42  ;;  %v8744_v38 = vld [vmem:[%s14417_s26 + $0x10] sm:$0xf]  ;;  %v8752_v42 = vld [vmem:[%s14417_s26 + $0x18] sm:$0xf] }
  0xda   : > { %v13394_v40 = vld [vmem:[%s14419_s23 + $0xf1c] sm:$0xf0] }
  0xdb   : > { %v9912_v44 = vld [vmem:[%s14419_s23 + $0x8c0] sm:$0xf]  ;;  %v10713_v47 = vor.u32 %v13394_v40, %v10712_v39  ;;  %6697 = vmatpush.bf16.msrb.mxu2 %v10457_v43  ;;  %v12904_v39 = vld [vmem:[%s14417_s26 + $0x4c] sm:$0xf0]  ;;  %v12905_v43 = vld [vmem:[%s14417_s26 + $0x54] sm:$0xf0] }
  0xdc   : > { %v13194_v45 = vld [vmem:[%s14419_s23 + $0x8dc] sm:$0xf0] }
  0xdd   : > { %v10168_v46 = vld [vmem:[%s14419_s23 + $0xac0] sm:$0xf]  ;;  %v9913_v53 = vor.u32 %v13194_v45, %v9912_v44  ;;  %6711 = vmatpush.bf16.msrb.mxu3 %v10713_v47  ;;  %v12896_v44 = vld [vmem:[%s14417_s26 + $0x14] sm:$0xf] }
  0xde   : > { %v13258_v48 = vld [vmem:[%s14419_s23 + $0xadc] sm:$0xf0]  ;;  %v8746_v47 = vld [vmem:[%s14417_s26 + $0x50] sm:$0xf0] }
  0xdf   : > { %v10424_v49 = vld [vmem:[%s14419_s23 + $0xcc0] sm:$0xf]  ;;  %v10169_v54 = vor.u32 %v13258_v48, %v10168_v46  ;;  %6670 = vmatpush.bf16.msrb.mxu0 %v9913_v53  ;;  %v12897_v48 = vld [vmem:[%s14417_s26 + $0x1c] sm:$0xf] }
  0xe0   : > { %v13322_v50 = vld [vmem:[%s14419_s23 + $0xcdc] sm:$0xf0] }
  0xe1   : > { %v10680_v51 = vld [vmem:[%s14419_s23 + $0xec0] sm:$0xf]  ;;  %v10425_v55 = vor.u32 %v13322_v50, %v10424_v49  ;;  %6684 = vmatpush.bf16.msrb.mxu1 %v10169_v54  ;;  %v8754_v49 = vld [vmem:[%s14417_s26 + $0x58] sm:$0xf0] }
  0xe2   : > { %v13386_v52 = vld [vmem:[%s14419_s23 + $0xedc] sm:$0xf0] }
  0xe3   : > { %v9880_v56 = vld [vmem:[%s14419_s23 + $0x880] sm:$0xf]  ;;  %v10681_v59 = vor.u32 %v13386_v52, %v10680_v51  ;;  %6698 = vmatpush.bf16.msrb.mxu2 %v10425_v55 }
  0xe4   : > { %v13186_v57 = vld [vmem:[%s14419_s23 + $0x89c] sm:$0xf0] }
  0xe5   : > { %v10136_v58 = vld [vmem:[%s14419_s23 + $0xa80] sm:$0xf]  ;;  %v9881_v1 = vor.u32 %v13186_v57, %v9880_v56  ;;  %6712 = vmatpush.bf16.msrb.mxu3 %v10681_v59  ;;  %v14602_v56 = vor.u32 %v12904_v39, %v8744_v38 }
  0xe6   : > { %v13250_v60 = vld [vmem:[%s14419_s23 + $0xa9c] sm:$0xf0] }
  0xe7   : > { %v10392_v61 = vld [vmem:[%s14419_s23 + $0xc80] sm:$0xf]  ;;  %v10137_v3 = vor.u32 %v13250_v60, %v10136_v58  ;;  %6671 = vmatpush.bf16.msrb.mxu0 %v9881_v1  ;;  %v14607_v60 = vor.u32 %v12905_v43, %v8752_v42 }
  0xe8   : > { %v13314_v62 = vld [vmem:[%s14419_s23 + $0xc9c] sm:$0xf0] }
  0xe9   : > { %v10648_v63 = vld [vmem:[%s14419_s23 + $0xe80] sm:$0xf]  ;;  %v10393_v4 = vor.u32 %v13314_v62, %v10392_v61  ;;  %6685 = vmatpush.bf16.msrb.mxu1 %v10137_v3  ;;  %v14609_v61 = vor.u32 %v12896_v44, %v8746_v47 }
  0xea   : > { %v13378_v0 = vld [vmem:[%s14419_s23 + $0xe9c] sm:$0xf0] }
  0xeb   : > { %v9848_v2 = vld [vmem:[%s14419_s23 + $0x840] sm:$0xf]  ;;  %v10649_v8 = vor.u32 %v13378_v0, %v10648_v63  ;;  %6699 = vmatpush.bf16.msrb.mxu2 %v10393_v4  ;;  %v14613_v0 = vor.u32 %v12897_v48, %v8754_v49 }
  0xec   : > { %v13178_v5 = vld [vmem:[%s14419_s23 + $0x85c] sm:$0xf0] }
  0xed   : > { %v10104_v6 = vld [vmem:[%s14419_s23 + $0xa40] sm:$0xf]  ;;  %v9849_v16 = vor.u32 %v13178_v5, %v9848_v2  ;;  %6713 = vmatpush.bf16.msrb.mxu3 %v10649_v8 }
  0xee   : > { %v13242_v7 = vld [vmem:[%s14419_s23 + $0xa5c] sm:$0xf0] }
  0xef   : > { %v10360_v9 = vld [vmem:[%s14419_s23 + $0xc40] sm:$0xf]  ;;  %v10105_v22 = vor.u32 %v13242_v7, %v10104_v6  ;;  %6672 = vmatpush.bf16.msrb.mxu0 %v9849_v16 }
  0xf0   : > { %v13306_v10 = vld [vmem:[%s14419_s23 + $0xc5c] sm:$0xf0] }
  0xf1   : > { %v10616_v12 = vld [vmem:[%s14419_s23 + $0xe40] sm:$0xf]  ;;  %v10361_v23 = vor.u32 %v13306_v10, %v10360_v9  ;;  %6686 = vmatpush.bf16.msrb.mxu1 %v10105_v22 }
  0xf2   : > { %v13370_v13 = vld [vmem:[%s14419_s23 + $0xe5c] sm:$0xf0] }
  0xf3   : > { %v9816_v14 = vld [vmem:[%s14419_s23 + $0x800] sm:$0xf]  ;;  %v10617_v28 = vor.u32 %v13370_v13, %v10616_v12  ;;  %6700 = vmatpush.bf16.msrb.mxu2 %v10361_v23 }
  0xf4   : > { %v13170_v15 = vld [vmem:[%s14419_s23 + $0x81c] sm:$0xf0] }
  0xf5   : > { %v10072_v17 = vld [vmem:[%s14419_s23 + $0xa00] sm:$0xf]  ;;  %v9817_v36 = vor.u32 %v13170_v15, %v9816_v14  ;;  %6714 = vmatpush.bf16.msrb.mxu3 %v10617_v28 }
  0xf6   : > { %v13234_v19 = vld [vmem:[%s14419_s23 + $0xa1c] sm:$0xf0] }
  0xf7   : > { %v10328_v20 = vld [vmem:[%s14419_s23 + $0xc00] sm:$0xf]  ;;  %v10073_v40 = vor.u32 %v13234_v19, %v10072_v17  ;;  %6673 = vmatpush.bf16.msrb.mxu0 %v9817_v36 }
  0xf8   : > { %v13298_v21 = vld [vmem:[%s14419_s23 + $0xc1c] sm:$0xf0] }
  0xf9   : > { %v10584_v24 = vld [vmem:[%s14419_s23 + $0xe00] sm:$0xf]  ;;  %v10329_v41 = vor.u32 %v13298_v21, %v10328_v20  ;;  %6687 = vmatpush.bf16.msrb.mxu1 %v10073_v40 }
  0xfa   : > { %v13362_v25 = vld [vmem:[%s14419_s23 + $0xe1c] sm:$0xf0]  ;;  %6674 = vmatmul.bf16.vlgmr.msrb.gmra.mxu0 %v14602_v56 }
  0xfb   : > { %v11064_v26 = vld [vmem:[%s14419_s23 + $0x11c0] sm:$0xf]  ;;  %v10585_v45 = vor.u32 %v13362_v25, %v10584_v24  ;;  %6701 = vmatpush.bf16.msrb.mxu2 %v10329_v41 }
  0xfc   : > { %v13482_v29 = vld [vmem:[%s14419_s23 + $0x11dc] sm:$0xf0]  ;;  %6688 = vmatmul.bf16.vlgmr.msrb.gmra.mxu1 %v14609_v61 }
  0xfd   : > { %v11320_v30 = vld [vmem:[%s14419_s23 + $0x13c0] sm:$0xf]  ;;  %v11065_v46 = vor.u32 %v13482_v29, %v11064_v26  ;;  %6715 = vmatpush.bf16.msrb.mxu3 %v10585_v45 }
  0xfe   : > { %v13546_v31 = vld [vmem:[%s14419_s23 + $0x13dc] sm:$0xf0]  ;;  %6702 = vmatmul.bf16.vlgmr.msrb.gmra.mxu2 %v14607_v60 }
  0xff   : > { %v11576_v32 = vld [vmem:[%s14419_s23 + $0x15c0] sm:$0xf]  ;;  %v11321_v50 = vor.u32 %v13546_v31, %v11320_v30  ;;  %6722 = vmatpush.bf16.msra.mxu0 %v11065_v46 }
 0x100   : > { %v13610_v33 = vld [vmem:[%s14419_s23 + $0x15dc] sm:$0xf0]  ;;  %6716 = vmatmul.bf16.vlgmr.msrb.gmra.mxu3 %v14613_v0 }
 0x101   : > { %v11832_v35 = vld [vmem:[%s14419_s23 + $0x17c0] sm:$0xf]  ;;  %v11577_v51 = vor.u32 %v13610_v33, %v11576_v32  ;;  %6736 = vmatpush.bf16.msra.mxu1 %v11321_v50 }
 0x102   : > { %v13674_v37 = vld [vmem:[%s14419_s23 + $0x17dc] sm:$0xf0] }
 0x103   : > { %v11032_v52 = vld [vmem:[%s14419_s23 + $0x1180] sm:$0xf]  ;;  %v11833_v55 = vor.u32 %v13674_v37, %v11832_v35  ;;  %6750 = vmatpush.bf16.msra.mxu2 %v11577_v51 }
 0x104   : > { %v13474_v53 = vld [vmem:[%s14419_s23 + $0x119c] sm:$0xf0] }
 0x105   : > { %v11288_v54 = vld [vmem:[%s14419_s23 + $0x1380] sm:$0xf]  ;;  %v11033_v1 = vor.u32 %v13474_v53, %v11032_v52  ;;  %6764 = vmatpush.bf16.msra.mxu3 %v11833_v55 }
 0x106   : > { %v13538_v57 = vld [vmem:[%s14419_s23 + $0x139c] sm:$0xf0] }
 0x107   : > { %v11544_v58 = vld [vmem:[%s14419_s23 + $0x1580] sm:$0xf]  ;;  %v11289_v2 = vor.u32 %v13538_v57, %v11288_v54  ;;  %6723 = vmatpush.bf16.msra.mxu0 %v11033_v1 }
 0x108   : > { %v13602_v59 = vld [vmem:[%s14419_s23 + $0x159c] sm:$0xf0] }
 0x109   : > { %v11800_v62 = vld [vmem:[%s14419_s23 + $0x1780] sm:$0xf]  ;;  %v11545_v3 = vor.u32 %v13602_v59, %v11544_v58  ;;  %6737 = vmatpush.bf16.msra.mxu1 %v11289_v2 }
 0x10a   : > { %v13666_v63 = vld [vmem:[%s14419_s23 + $0x179c] sm:$0xf0] }
 0x10b   : > { %v11000_v4 = vld [vmem:[%s14419_s23 + $0x1140] sm:$0xf]  ;;  %v11801_v7 = vor.u32 %v13666_v63, %v11800_v62  ;;  %6751 = vmatpush.bf16.msra.mxu2 %v11545_v3 }
 0x10c   : > { %v13466_v5 = vld [vmem:[%s14419_s23 + $0x115c] sm:$0xf0] }
 0x10d   : > { %v11256_v6 = vld [vmem:[%s14419_s23 + $0x1340] sm:$0xf]  ;;  %v11001_v14 = vor.u32 %v13466_v5, %v11000_v4  ;;  %6765 = vmatpush.bf16.msra.mxu3 %v11801_v7 }
 0x10e   : > { %v13530_v8 = vld [vmem:[%s14419_s23 + $0x135c] sm:$0xf0] }
 0x10f   : > { %v11512_v9 = vld [vmem:[%s14419_s23 + $0x1540] sm:$0xf]  ;;  %v11257_v15 = vor.u32 %v13530_v8, %v11256_v6  ;;  %6724 = vmatpush.bf16.msra.mxu0 %v11001_v14 }
 0x110   : > { %v13594_v10 = vld [vmem:[%s14419_s23 + $0x155c] sm:$0xf0] }
 0x111   : > { %v11768_v12 = vld [vmem:[%s14419_s23 + $0x1740] sm:$0xf]  ;;  %v11513_v16 = vor.u32 %v13594_v10, %v11512_v9  ;;  %6738 = vmatpush.bf16.msra.mxu1 %v11257_v15 }
 0x112   : > { %v13658_v13 = vld [vmem:[%s14419_s23 + $0x175c] sm:$0xf0] }
 0x113   : > { %v10968_v17 = vld [vmem:[%s14419_s23 + $0x1100] sm:$0xf]  ;;  %v11769_v21 = vor.u32 %v13658_v13, %v11768_v12  ;;  %6752 = vmatpush.bf16.msra.mxu2 %v11513_v16 }
 0x114   : > { %v13458_v19 = vld [vmem:[%s14419_s23 + $0x111c] sm:$0xf0] }
 0x115   : > { %v11224_v20 = vld [vmem:[%s14419_s23 + $0x1300] sm:$0xf]  ;;  %v10969_v28 = vor.u32 %v13458_v19, %v10968_v17  ;;  %6766 = vmatpush.bf16.msra.mxu3 %v11769_v21 }
 0x116   : > { %v13522_v22 = vld [vmem:[%s14419_s23 + $0x131c] sm:$0xf0] }
 0x117   : > { %v11480_v23 = vld [vmem:[%s14419_s23 + $0x1500] sm:$0xf]  ;;  %v11225_v29 = vor.u32 %v13522_v22, %v11224_v20  ;;  %6725 = vmatpush.bf16.msra.mxu0 %v10969_v28 }
 0x118   : > { %v13586_v24 = vld [vmem:[%s14419_s23 + $0x151c] sm:$0xf0] }
 0x119   : > { %v11736_v25 = vld [vmem:[%s14419_s23 + $0x1700] sm:$0xf]  ;;  %v11481_v30 = vor.u32 %v13586_v24, %v11480_v23  ;;  %6739 = vmatpush.bf16.msra.mxu1 %v11225_v29 }
 0x11a   : > { %v13650_v26 = vld [vmem:[%s14419_s23 + $0x171c] sm:$0xf0] }
 0x11b   : > { %v10936_v31 = vld [vmem:[%s14419_s23 + $0x10c0] sm:$0xf]  ;;  %v11737_v35 = vor.u32 %v13650_v26, %v11736_v25  ;;  %6753 = vmatpush.bf16.msra.mxu2 %v11481_v30 }
 0x11c   : > { %v13450_v32 = vld [vmem:[%s14419_s23 + $0x10dc] sm:$0xf0] }
 0x11d   : > { %v11192_v33 = vld [vmem:[%s14419_s23 + $0x12c0] sm:$0xf]  ;;  %v10937_v41 = vor.u32 %v13450_v32, %v10936_v31  ;;  %6767 = vmatpush.bf16.msra.mxu3 %v11737_v35  ;;  %v12907_v35 = vld [vmem:[%s14417_s26 + $0x64] sm:$0xf0] }
 0x11e   : > { %v13514_v36 = vld [vmem:[%s14419_s23 + $0x12dc] sm:$0xf0] }
 0x11f   : > { %v11448_v37 = vld [vmem:[%s14419_s23 + $0x14c0] sm:$0xf]  ;;  %v11193_v42 = vor.u32 %v13514_v36, %v11192_v33  ;;  %6726 = vmatpush.bf16.msra.mxu0 %v10937_v41  ;;  %v8768_v33 = vld [vmem:[%s14417_s26 + $0x28] sm:$0xf]  ;;  %v12898_v36 = vld [vmem:[%s14417_s26 + $0x24] sm:$0xf] }
 0x120   : > { %v13578_v38 = vld [vmem:[%s14419_s23 + $0x14dc] sm:$0xf0]  ;;  %v8770_v41 = vld [vmem:[%s14417_s26 + $0x68] sm:$0xf0] }
 0x121   : > { %v11704_v39 = vld [vmem:[%s14419_s23 + $0x16c0] sm:$0xf]  ;;  %v11449_v43 = vor.u32 %v13578_v38, %v11448_v37  ;;  %6740 = vmatpush.bf16.msra.mxu1 %v11193_v42 }
 0x122   : > { %v13642_v40 = vld [vmem:[%s14419_s23 + $0x16dc] sm:$0xf0] }
 0x123   : > { %v10904_v44 = vld [vmem:[%s14419_s23 + $0x1080] sm:$0xf]  ;;  %v11705_v47 = vor.u32 %v13642_v40, %v11704_v39  ;;  %6754 = vmatpush.bf16.msra.mxu2 %v11449_v43  ;;  %v8762_v39 = vld [vmem:[%s14417_s26 + $0x60] sm:$0xf0]  ;;  %v12899_v40 = vld [vmem:[%s14417_s26 + $0x2c] sm:$0xf] }
 0x124   : > { %v13442_v45 = vld [vmem:[%s14419_s23 + $0x109c] sm:$0xf0] }
 0x125   : > { %v11160_v46 = vld [vmem:[%s14419_s23 + $0x1280] sm:$0xf]  ;;  %v10905_v53 = vor.u32 %v13442_v45, %v10904_v44  ;;  %6768 = vmatpush.bf16.msra.mxu3 %v11705_v47 }
 0x126   : > { %v13506_v48 = vld [vmem:[%s14419_s23 + $0x129c] sm:$0xf0] }
 0x127   : > { %v11416_v49 = vld [vmem:[%s14419_s23 + $0x1480] sm:$0xf]  ;;  %v11161_v55 = vor.u32 %v13506_v48, %v11160_v46  ;;  %6727 = vmatpush.bf16.msra.mxu0 %v10905_v53  ;;  %v14693_v53 = vor.u32 %v12898_v36, %v8762_v39 }
 0x128   : > { %v13570_v50 = vld [vmem:[%s14419_s23 + $0x149c] sm:$0xf0] }
 0x129   : > { %v11672_v51 = vld [vmem:[%s14419_s23 + $0x1680] sm:$0xf]  ;;  %v11417_v57 = vor.u32 %v13570_v50, %v11416_v49  ;;  %6741 = vmatpush.bf16.msra.mxu1 %v11161_v55 }
 0x12a   : > { %v13634_v52 = vld [vmem:[%s14419_s23 + $0x169c] sm:$0xf0] }
 0x12b   : > { %v10872_v54 = vld [vmem:[%s14419_s23 + $0x1040] sm:$0xf]  ;;  %v11673_v63 = vor.u32 %v13634_v52, %v11672_v51  ;;  %6755 = vmatpush.bf16.msra.mxu2 %v11417_v57  ;;  %v14691_v52 = vor.u32 %v12907_v35, %v8768_v33  ;;  %v14697_v57 = vor.u32 %v12899_v40, %v8770_v41 }
 0x12c   : > { %v13434_v58 = vld [vmem:[%s14419_s23 + $0x105c] sm:$0xf0] }
 0x12d   : > { %v11128_v59 = vld [vmem:[%s14419_s23 + $0x1240] sm:$0xf]  ;;  %v10873_v7 = vor.u32 %v13434_v58, %v10872_v54  ;;  %6769 = vmatpush.bf16.msra.mxu3 %v11673_v63 }
 0x12e   : > { %v13498_v62 = vld [vmem:[%s14419_s23 + $0x125c] sm:$0xf0] }
 0x12f   : > { %v11384_v1 = vld [vmem:[%s14419_s23 + $0x1440] sm:$0xf]  ;;  %v11129_v13 = vor.u32 %v13498_v62, %v11128_v59  ;;  %6728 = vmatpush.bf16.msra.mxu0 %v10873_v7 }
 0x130   : > { %v13562_v2 = vld [vmem:[%s14419_s23 + $0x145c] sm:$0xf0] }
 0x131   : > { %v11640_v3 = vld [vmem:[%s14419_s23 + $0x1640] sm:$0xf]  ;;  %v11385_v14 = vor.u32 %v13562_v2, %v11384_v1  ;;  %6742 = vmatpush.bf16.msra.mxu1 %v11129_v13 }
 0x132   : > { %v13626_v4 = vld [vmem:[%s14419_s23 + $0x165c] sm:$0xf0] }
 0x133   : > { %v10840_v5 = vld [vmem:[%s14419_s23 + $0x1000] sm:$0xf]  ;;  %v11641_v19 = vor.u32 %v13626_v4, %v11640_v3  ;;  %6756 = vmatpush.bf16.msra.mxu2 %v11385_v14 }
 0x134   : > { %v13426_v6 = vld [vmem:[%s14419_s23 + $0x101c] sm:$0xf0] }
 0x135   : > { %v11096_v8 = vld [vmem:[%s14419_s23 + $0x1200] sm:$0xf]  ;;  %v10841_v26 = vor.u32 %v13426_v6, %v10840_v5  ;;  %6770 = vmatpush.bf16.msra.mxu3 %v11641_v19 }
 0x136   : > { %v13490_v9 = vld [vmem:[%s14419_s23 + $0x121c] sm:$0xf0] }
 0x137   : > { %v11352_v10 = vld [vmem:[%s14419_s23 + $0x1400] sm:$0xf]  ;;  %v11097_v31 = vor.u32 %v13490_v9, %v11096_v8  ;;  %6729 = vmatpush.bf16.msra.mxu0 %v10841_v26 }
 0x138   : > { %v13554_v12 = vld [vmem:[%s14419_s23 + $0x141c] sm:$0xf0] }
 0x139   : > { %v11608_v15 = vld [vmem:[%s14419_s23 + $0x1600] sm:$0xf]  ;;  %v11353_v32 = vor.u32 %v13554_v12, %v11352_v10  ;;  %6743 = vmatpush.bf16.msra.mxu1 %v11097_v31 }
 0x13a   : > { %v13618_v16 = vld [vmem:[%s14419_s23 + $0x161c] sm:$0xf0] }
 0x13b   : > { %v12088_v17 = vld [vmem:[%s14419_s23 + $0x19c0] sm:$0xf]  ;;  %v11609_v37 = vor.u32 %v13618_v16, %v11608_v15  ;;  %6757 = vmatpush.bf16.msra.mxu2 %v11353_v32 }
 0x13c   : > { %v13738_v20 = vld [vmem:[%s14419_s23 + $0x19dc] sm:$0xf0]  ;;  %6744 = vmatmul.bf16.vlgmr.msra.gmra.mxu1 %v14693_v53 }
 0x13d   : > { %v12344_v21 = vld [vmem:[%s14419_s23 + $0x1bc0] sm:$0xf]  ;;  %v12089_v38 = vor.u32 %v13738_v20, %v12088_v17  ;;  %6771 = vmatpush.bf16.msra.mxu3 %v11609_v37 }
 0x13e   : > { %v13802_v22 = vld [vmem:[%s14419_s23 + $0x1bdc] sm:$0xf0]  ;;  %6758 = vmatmul.bf16.vlgmr.msra.gmra.mxu2 %v14691_v52 }
 0x13f   : > { %v12600_v23 = vld [vmem:[%s14419_s23 + $0x1dc0] sm:$0xf]  ;;  %v12345_v42 = vor.u32 %v13802_v22, %v12344_v21  ;;  %6778 = vmatpush.bf16.msrb.mxu0 %v12089_v38 }
 0x140   : > { %v13866_v24 = vld [vmem:[%s14419_s23 + $0x1ddc] sm:$0xf0]  ;;  %6772 = vmatmul.bf16.vlgmr.msra.gmra.mxu3 %v14697_v57 }
 0x141   : > { %v12856_v25 = vld [vmem:[%s14419_s23 + $0x1fc0] sm:$0xf]  ;;  %v12601_v43 = vor.u32 %v13866_v24, %v12600_v23  ;;  %6792 = vmatpush.bf16.msrb.mxu1 %v12345_v42 }
 0x142   : > { %v13930_v28 = vld [vmem:[%s14419_s23 + $0x1fdc] sm:$0xf0] }
 0x143   : > { %v8760_v29 = vld [vmem:[%s14417_s26 + $0x20] sm:$0xf]  ;;  %v12857_v47 = vor.u32 %v13930_v28, %v12856_v25  ;;  %6806 = vmatpush.bf16.msrb.mxu2 %v12601_v43 }
 0x144   : > { %v12906_v30 = vld [vmem:[%s14417_s26 + $0x5c] sm:$0xf0] }
 0x145   : > { %v12056_v44 = vld [vmem:[%s14419_s23 + $0x1980] sm:$0xf]  ;;  %v14686_v48 = vor.u32 %v12906_v30, %v8760_v29  ;;  %6820 = vmatpush.bf16.msrb.mxu3 %v12857_v47 }
 0x146   : > { %v13730_v45 = vld [vmem:[%s14419_s23 + $0x199c] sm:$0xf0] }
 0x147   : > { %v12312_v46 = vld [vmem:[%s14419_s23 + $0x1b80] sm:$0xf]  ;;  %v12057_v58 = vor.u32 %v13730_v45, %v12056_v44  ;;  %6730 = vmatmul.bf16.vlgmr.msra.gmra.mxu0 %v14686_v48 }
 0x148   : > { %v13794_v49 = vld [vmem:[%s14419_s23 + $0x1b9c] sm:$0xf0] }
 0x149   : > { %v12568_v50 = vld [vmem:[%s14419_s23 + $0x1d80] sm:$0xf]  ;;  %v12313_v59 = vor.u32 %v13794_v49, %v12312_v46  ;;  %6779 = vmatpush.bf16.msrb.mxu0 %v12057_v58 }
 0x14a   : > { %v13858_v51 = vld [vmem:[%s14419_s23 + $0x1d9c] sm:$0xf0] }
 0x14b   : > { %v12824_v54 = vld [vmem:[%s14419_s23 + $0x1f80] sm:$0xf]  ;;  %v12569_v62 = vor.u32 %v13858_v51, %v12568_v50  ;;  %6793 = vmatpush.bf16.msrb.mxu1 %v12313_v59 }
 0x14c   : > { %v13922_v55 = vld [vmem:[%s14419_s23 + $0x1f9c] sm:$0xf0] }
 0x14d   : > { %v12024_v63 = vld [vmem:[%s14419_s23 + $0x1940] sm:$0xf]  ;;  %v12825_v3 = vor.u32 %v13922_v55, %v12824_v54  ;;  %6807 = vmatpush.bf16.msrb.mxu2 %v12569_v62 }
 0x14e   : > { %v13722_v1 = vld [vmem:[%s14419_s23 + $0x195c] sm:$0xf0] }
 0x14f   : > { %v12280_v2 = vld [vmem:[%s14419_s23 + $0x1b40] sm:$0xf]  ;;  %v12025_v9 = vor.u32 %v13722_v1, %v12024_v63  ;;  %6821 = vmatpush.bf16.msrb.mxu3 %v12825_v3 }
 0x150   : > { %v13786_v4 = vld [vmem:[%s14419_s23 + $0x1b5c] sm:$0xf0] }
 0x151   : > { %v12536_v5 = vld [vmem:[%s14419_s23 + $0x1d40] sm:$0xf]  ;;  %v12281_v10 = vor.u32 %v13786_v4, %v12280_v2  ;;  %6780 = vmatpush.bf16.msrb.mxu0 %v12025_v9 }
 0x152   : > { %v13850_v6 = vld [vmem:[%s14419_s23 + $0x1d5c] sm:$0xf0] }
 0x153   : > { %v12792_v7 = vld [vmem:[%s14419_s23 + $0x1f40] sm:$0xf]  ;;  %v12537_v12 = vor.u32 %v13850_v6, %v12536_v5  ;;  %6794 = vmatpush.bf16.msrb.mxu1 %v12281_v10 }
 0x154   : > { %v13914_v8 = vld [vmem:[%s14419_s23 + $0x1f5c] sm:$0xf0] }
 0x155   : > { %v11992_v13 = vld [vmem:[%s14419_s23 + $0x1900] sm:$0xf]  ;;  %v12793_v16 = vor.u32 %v13914_v8, %v12792_v7  ;;  %6808 = vmatpush.bf16.msrb.mxu2 %v12537_v12 }
 0x156   : > { %v13714_v14 = vld [vmem:[%s14419_s23 + $0x191c] sm:$0xf0] }
 0x157   : > { %v12248_v15 = vld [vmem:[%s14419_s23 + $0x1b00] sm:$0xf]  ;;  %v11993_v23 = vor.u32 %v13714_v14, %v11992_v13  ;;  %6822 = vmatpush.bf16.msrb.mxu3 %v12793_v16 }
 0x158   : > { %v13778_v17 = vld [vmem:[%s14419_s23 + $0x1b1c] sm:$0xf0] }
 0x159   : > { %v12504_v19 = vld [vmem:[%s14419_s23 + $0x1d00] sm:$0xf]  ;;  %v12249_v24 = vor.u32 %v13778_v17, %v12248_v15  ;;  %6781 = vmatpush.bf16.msrb.mxu0 %v11993_v23  ;;  %v12966_v17 = vld [vmem:[%s14419_s23 + $0x1c4] sm:$0xf] }
 0x15a   : > { %v13842_v20 = vld [vmem:[%s14419_s23 + $0x1d1c] sm:$0xf0]  ;;  %v13094_v23 = vld [vmem:[%s14419_s23 + $0x5c4] sm:$0xf] }
 0x15b   : > { %v12760_v21 = vld [vmem:[%s14419_s23 + $0x1f00] sm:$0xf]  ;;  %v12505_v25 = vor.u32 %v13842_v20, %v12504_v19  ;;  %6795 = vmatpush.bf16.msrb.mxu1 %v12249_v24  ;;  %v9018_v20 = vld [vmem:[%s14419_s23 + $0x1e0] sm:$0xf0] }
 0x15c   : > { %v13906_v22 = vld [vmem:[%s14419_s23 + $0x1f1c] sm:$0xf0]  ;;  %v9530_v24 = vld [vmem:[%s14419_s23 + $0x5e0] sm:$0xf0] }
 0x15d   : > { %v11960_v26 = vld [vmem:[%s14419_s23 + $0x18c0] sm:$0xf]  ;;  %v12761_v30 = vor.u32 %v13906_v22, %v12760_v21  ;;  %6809 = vmatpush.bf16.msrb.mxu2 %v12505_v25  ;;  %v13030_v21 = vld [vmem:[%s14419_s23 + $0x3c4] sm:$0xf] }
 0x15e   : > { %v13706_v28 = vld [vmem:[%s14419_s23 + $0x18dc] sm:$0xf0]  ;;  %v9274_v22 = vld [vmem:[%s14419_s23 + $0x3e0] sm:$0xf0] }
 0x15f   : > { %v12216_v29 = vld [vmem:[%s14419_s23 + $0x1ac0] sm:$0xf]  ;;  %v11961_v37 = vor.u32 %v13706_v28, %v11960_v26  ;;  %6823 = vmatpush.bf16.msrb.mxu3 %v12761_v30  ;;  %v13158_v25 = vld [vmem:[%s14419_s23 + $0x7c4] sm:$0xf]  ;;  %v12908_v30 = vld [vmem:[%s14417_s26 + $0x6c] sm:$0xf0] }
 0x160   : > { %v13770_v31 = vld [vmem:[%s14419_s23 + $0x1adc] sm:$0xf0]  ;;  %v9786_v28 = vld [vmem:[%s14419_s23 + $0x7e0] sm:$0xf0] }
 0x161   : > { %v12472_v32 = vld [vmem:[%s14419_s23 + $0x1cc0] sm:$0xf]  ;;  %v12217_v38 = vor.u32 %v13770_v31, %v12216_v29  ;;  %6782 = vmatpush.bf16.msrb.mxu0 %v11961_v37  ;;  %v8776_v29 = vld [vmem:[%s14417_s26 + $0x30] sm:$0xf] }
 0x162   : > { %v13834_v33 = vld [vmem:[%s14419_s23 + $0x1cdc] sm:$0xf0] }
 0x163   : > { %v12728_v35 = vld [vmem:[%s14419_s23 + $0x1ec0] sm:$0xf]  ;;  %v12473_v39 = vor.u32 %v13834_v33, %v12472_v32  ;;  %6796 = vmatpush.bf16.msrb.mxu1 %v12217_v38  ;;  %v8784_v33 = vld [vmem:[%s14417_s26 + $0x38] sm:$0xf]  ;;  %v9021_v38 = vor.u32 %v12966_v17, %v9018_v20  ;;  %v12942_v17 = vld [vmem:[%s14419_s23 + $0x104] sm:$0xf] }
 0x164   : > { %v13898_v36 = vld [vmem:[%s14419_s23 + $0x1edc] sm:$0xf0]  ;;  %v13006_v20 = vld [vmem:[%s14419_s23 + $0x304] sm:$0xf] }
 0x165   : > { %v11928_v40 = vld [vmem:[%s14419_s23 + $0x1880] sm:$0xf]  ;;  %v12729_v43 = vor.u32 %v13898_v36, %v12728_v35  ;;  %6810 = vmatpush.bf16.msrb.mxu2 %v12473_v39  ;;  %v12909_v35 = vld [vmem:[%s14417_s26 + $0x74] sm:$0xf0]  ;;  %v12900_v36 = vld [vmem:[%s14417_s26 + $0x34] sm:$0xf] }
 0x166   : > { %v13698_v41 = vld [vmem:[%s14419_s23 + $0x189c] sm:$0xf0]  ;;  %v8778_v39 = vld [vmem:[%s14417_s26 + $0x70] sm:$0xf0] }
 0x167   : > { %v12184_v42 = vld [vmem:[%s14419_s23 + $0x1a80] sm:$0xf]  ;;  %v11929_v50 = vor.u32 %v13698_v41, %v11928_v40  ;;  %6824 = vmatpush.bf16.msrb.mxu3 %v12729_v43  ;;  %v12901_v40 = vld [vmem:[%s14417_s26 + $0x3c] sm:$0xf]  ;;  %v9533_v43 = vor.u32 %v13094_v23, %v9530_v24  ;;  %v13070_v23 = vld [vmem:[%s14419_s23 + $0x504] sm:$0xf] }
 0x168   : > { %v13762_v44 = vld [vmem:[%s14419_s23 + $0x1a9c] sm:$0xf0]  ;;  %v8786_v41 = vld [vmem:[%s14417_s26 + $0x78] sm:$0xf0]  ;;  %v9434_v24 = vld [vmem:[%s14419_s23 + $0x520] sm:$0xf0] }
 0x169   : > { %v12440_v45 = vld [vmem:[%s14419_s23 + $0x1c80] sm:$0xf]  ;;  %v12185_v54 = vor.u32 %v13762_v44, %v12184_v42  ;;  %6783 = vmatpush.bf16.msrb.mxu0 %v11929_v50  ;;  %v9277_v42 = vor.u32 %v13030_v21, %v9274_v22  ;;  %v12958_v44 = vld [vmem:[%s14419_s23 + $0x184] sm:$0xf] }
 0x16a   : > { %v13826_v46 = vld [vmem:[%s14419_s23 + $0x1c9c] sm:$0xf0]  ;;  %v9242_v50 = vld [vmem:[%s14419_s23 + $0x3a0] sm:$0xf0] }
 0x16b   : > { %v12696_v47 = vld [vmem:[%s14419_s23 + $0x1e80] sm:$0xf]  ;;  %v12441_v55 = vor.u32 %v13826_v46, %v12440_v45  ;;  %6797 = vmatpush.bf16.msrb.mxu1 %v12185_v54  ;;  %v8986_v45 = vld [vmem:[%s14419_s23 + $0x1a0] sm:$0xf0] }
 0x16c   : > { %v13890_v49 = vld [vmem:[%s14419_s23 + $0x1e9c] sm:$0xf0]  ;;  %v13022_v46 = vld [vmem:[%s14419_s23 + $0x384] sm:$0xf] }
 0x16d   : > { %v11896_v51 = vld [vmem:[%s14419_s23 + $0x1840] sm:$0xf]  ;;  %v12697_v63 = vor.u32 %v13890_v49, %v12696_v47  ;;  %6811 = vmatpush.bf16.msrb.mxu2 %v12441_v55  ;;  %v9789_v47 = vor.u32 %v13158_v25, %v9786_v28  ;;  %v14770_v49 = vor.u32 %v12908_v30, %v8776_v29  ;;  %v9498_v54 = vld [vmem:[%s14419_s23 + $0x5a0] sm:$0xf0]  ;;  %v14775_v55 = vor.u32 %v12909_v35, %v8784_v33 }
 0x16e   : > { %v13690_v58 = vld [vmem:[%s14419_s23 + $0x185c] sm:$0xf0]  ;;  %v9178_v22 = vld [vmem:[%s14419_s23 + $0x320] sm:$0xf0]  ;;  %v9437_v30 = vor.u32 %v13070_v23, %v9434_v24 }
 0x16f   : > { %v12152_v59 = vld [vmem:[%s14419_s23 + $0x1a40] sm:$0xf]  ;;  %v11897_v7 = vor.u32 %v13690_v58, %v11896_v51  ;;  %6825 = vmatpush.bf16.msrb.mxu3 %v12697_v63  ;;  %v13086_v51 = vld [vmem:[%s14419_s23 + $0x584] sm:$0xf]  ;;  %v14777_v58 = vor.u32 %v12900_v36, %v8778_v39  ;;  %v14781_v63 = vor.u32 %v12901_v40, %v8786_v41  ;;  %v9181_v29 = vor.u32 %v13006_v20, %v9178_v22 }
 0x170   : > { %v13754_v62 = vld [vmem:[%s14419_s23 + $0x1a5c] sm:$0xf0]  ;;  %v13134_v25 = vld [vmem:[%s14419_s23 + $0x704] sm:$0xf] }
 0x171   : > { %v12408_v1 = vld [vmem:[%s14419_s23 + $0x1c40] sm:$0xf]  ;;  %v12153_v13 = vor.u32 %v13754_v62, %v12152_v59  ;;  %6784 = vmatpush.bf16.msrb.mxu0 %v11897_v7  ;;  %v13150_v59 = vld [vmem:[%s14419_s23 + $0x784] sm:$0xf] }
 0x172   : > { %v13818_v2 = vld [vmem:[%s14419_s23 + $0x1c5c] sm:$0xf0]  ;;  %v9754_v62 = vld [vmem:[%s14419_s23 + $0x7a0] sm:$0xf0] }
 0x173   : > { %v12664_v3 = vld [vmem:[%s14419_s23 + $0x1e40] sm:$0xf]  ;;  %v12409_v14 = vor.u32 %v13818_v2, %v12408_v1  ;;  %6798 = vmatpush.bf16.msrb.mxu1 %v12153_v13  ;;  %v8989_v1 = vor.u32 %v12958_v44, %v8986_v45  ;;  %v9245_v2 = vor.u32 %v13022_v46, %v9242_v50  ;;  %v9757_v7 = vor.u32 %v13150_v59, %v9754_v62  ;;  %v9722_v13 = vld [vmem:[%s14419_s23 + $0x760] sm:$0xf0] }
 0x174   : > { %v13882_v4 = vld [vmem:[%s14419_s23 + $0x1e5c] sm:$0xf0]  ;;  %v12998_v33 = vld [vmem:[%s14419_s23 + $0x2c4] sm:$0xf] }
 0x175   : > { %v11864_v5 = vld [vmem:[%s14419_s23 + $0x1800] sm:$0xf]  ;;  %v12665_v19 = vor.u32 %v13882_v4, %v12664_v3  ;;  %6812 = vmatpush.bf16.msrb.mxu2 %v12409_v14  ;;  %v9501_v3 = vor.u32 %v13086_v51, %v9498_v54  ;;  %v12950_v4 = vld [vmem:[%s14419_s23 + $0x144] sm:$0xf] }
 0x176   : > { %v13682_v6 = vld [vmem:[%s14419_s23 + $0x181c] sm:$0xf0]  ;;  %v9146_v36 = vld [vmem:[%s14419_s23 + $0x2e0] sm:$0xf0] }
 0x177   : > { %v12120_v8 = vld [vmem:[%s14419_s23 + $0x1a00] sm:$0xf]  ;;  %v11865_v26 = vor.u32 %v13682_v6, %v11864_v5  ;;  %6826 = vmatpush.bf16.msrb.mxu3 %v12665_v19  ;;  %v8954_v5 = vld [vmem:[%s14419_s23 + $0x160] sm:$0xf0] }
 0x178   : > { %v13746_v9 = vld [vmem:[%s14419_s23 + $0x1a1c] sm:$0xf0]  ;;  %v13014_v6 = vld [vmem:[%s14419_s23 + $0x344] sm:$0xf]  ;;  %v8957_v14 = vor.u32 %v12950_v4, %v8954_v5 }
 0x179   : > { %v12376_v10 = vld [vmem:[%s14419_s23 + $0x1c00] sm:$0xf]  ;;  %v12121_v31 = vor.u32 %v13746_v9, %v12120_v8  ;;  %6785 = vmatpush.bf16.msrb.mxu0 %v11865_v26  ;;  %v9210_v8 = vld [vmem:[%s14419_s23 + $0x360] sm:$0xf0] }
 0x17a   : > { %v13810_v12 = vld [vmem:[%s14419_s23 + $0x1c1c] sm:$0xf0]  ;;  %v13078_v9 = vld [vmem:[%s14419_s23 + $0x544] sm:$0xf] }
 0x17b   : > { %v12632_v15 = vld [vmem:[%s14419_s23 + $0x1e00] sm:$0xf]  ;;  %v12377_v32 = vor.u32 %v13810_v12, %v12376_v10  ;;  %6799 = vmatpush.bf16.msrb.mxu1 %v12121_v31  ;;  %v9466_v10 = vld [vmem:[%s14419_s23 + $0x560] sm:$0xf0] }
 0x17c   : > { %v13874_v16 = vld [vmem:[%s14419_s23 + $0x1e1c] sm:$0xf0]  ;;  %6786 = vmatmul.bf16.vlgmr.msrb.gmra.mxu0 %v14770_v49  ;;  %v13142_v12 = vld [vmem:[%s14419_s23 + $0x744] sm:$0xf] }
 0x17d   : > { %v12633_v37 = vor.u32 %v13874_v16, %v12632_v15  ;;  %6813 = vmatpush.bf16.msrb.mxu2 %v12377_v32  ;;  %6834 = vmatpush.bf16.msra.mxu0 %v9021_v38  ;;  %v9213_v15 = vor.u32 %v13014_v6, %v9210_v8  ;;  %v9469_v16 = vor.u32 %v13078_v9, %v9466_v10  ;;  %v8922_v19 = vld [vmem:[%s14419_s23 + $0x120] sm:$0xf0] }
 0x17e   : > { %6800 = vmatmul.bf16.vlgmr.msrb.gmra.mxu1 %v14777_v58  ;;  %v9725_v21 = vor.u32 %v13142_v12, %v9722_v13  ;;  %v9690_v26 = vld [vmem:[%s14419_s23 + $0x720] sm:$0xf0]  ;;  %v8925_v28 = vor.u32 %v12942_v17, %v8922_v19 }
 0x17f   : > { %6827 = vmatpush.bf16.msrb.mxu3 %v12633_v37  ;;  %6848 = vmatpush.bf16.msra.mxu1 %v9277_v42  ;;  %v12934_v31 = vld [vmem:[%s14419_s23 + $0xc4] sm:$0xf]  ;;  %v9693_v35 = vor.u32 %v13134_v25, %v9690_v26  ;;  %v9149_v42 = vor.u32 %v12998_v33, %v9146_v36 }
 0x180   : > { %6814 = vmatmul.bf16.vlgmr.msrb.gmra.mxu2 %v14775_v55  ;;  %v8890_v32 = vld [vmem:[%s14419_s23 + $0xe0] sm:$0xf0] }
 0x181   : > { %6862 = vmatpush.bf16.msra.mxu2 %v9533_v43  ;;  %6835 = vmatpush.bf16.msra.mxu0 %v8989_v1  ;;  %v13062_v37 = vld [vmem:[%s14419_s23 + $0x4c4] sm:$0xf]  ;;  %v8893_v41 = vor.u32 %v12934_v31, %v8890_v32 }
 0x182   : > { %6828 = vmatmul.bf16.vlgmr.msrb.gmra.mxu3 %v14781_v63  ;;  %v9402_v38 = vld [vmem:[%s14419_s23 + $0x4e0] sm:$0xf0] }
 0x183   : > { %6876 = vmatpush.bf16.msra.mxu3 %v9789_v47  ;;  %6849 = vmatpush.bf16.msra.mxu1 %v9245_v2  ;;  %v13126_v39 = vld [vmem:[%s14419_s23 + $0x6c4] sm:$0xf]  ;;  %v9405_v43 = vor.u32 %v13062_v37, %v9402_v38 }
 0x184   : > { %v9658_v40 = vld [vmem:[%s14419_s23 + $0x6e0] sm:$0xf0] }
 0x185   : > { %6863 = vmatpush.bf16.msra.mxu2 %v9501_v3  ;;  %6836 = vmatpush.bf16.msra.mxu0 %v8957_v14  ;;  %v12926_v44 = vld [vmem:[%s14419_s23 + $0x84] sm:$0xf]  ;;  %v9661_v47 = vor.u32 %v13126_v39, %v9658_v40 }
 0x186   : > { %v8858_v45 = vld [vmem:[%s14419_s23 + $0xa0] sm:$0xf0] }
 0x187   : > { %6877 = vmatpush.bf16.msra.mxu3 %v9757_v7  ;;  %6850 = vmatpush.bf16.msra.mxu1 %v9213_v15  ;;  %v12990_v46 = vld [vmem:[%s14419_s23 + $0x284] sm:$0xf]  ;;  %v8861_v1 = vor.u32 %v12926_v44, %v8858_v45 }
 0x188   : > { %v9114_v50 = vld [vmem:[%s14419_s23 + $0x2a0] sm:$0xf0] }
 0x189   : > { %6864 = vmatpush.bf16.msra.mxu2 %v9469_v16  ;;  %6837 = vmatpush.bf16.msra.mxu0 %v8925_v28  ;;  %v13054_v51 = vld [vmem:[%s14419_s23 + $0x484] sm:$0xf]  ;;  %v9117_v2 = vor.u32 %v12990_v46, %v9114_v50 }
 0x18a   : > { %v9370_v54 = vld [vmem:[%s14419_s23 + $0x4a0] sm:$0xf0] }
 0x18b   : > { %6878 = vmatpush.bf16.msra.mxu3 %v9725_v21  ;;  %6851 = vmatpush.bf16.msra.mxu1 %v9181_v29  ;;  %v13118_v59 = vld [vmem:[%s14419_s23 + $0x684] sm:$0xf]  ;;  %v9373_v3 = vor.u32 %v13054_v51, %v9370_v54 }
 0x18c   : > { %v9626_v62 = vld [vmem:[%s14419_s23 + $0x6a0] sm:$0xf0] }
 0x18d   : > { %6865 = vmatpush.bf16.msra.mxu2 %v9437_v30  ;;  %6838 = vmatpush.bf16.msra.mxu0 %v8893_v41  ;;  %v12918_v4 = vld [vmem:[%s14419_s23 + $0x44] sm:$0xf]  ;;  %v9629_v7 = vor.u32 %v13118_v59, %v9626_v62 }
 0x18e   : > { %v8826_v5 = vld [vmem:[%s14419_s23 + $0x60] sm:$0xf0] }
 0x18f   : > { %6879 = vmatpush.bf16.msra.mxu3 %v9693_v35  ;;  %6852 = vmatpush.bf16.msra.mxu1 %v9149_v42  ;;  %v12982_v6 = vld [vmem:[%s14419_s23 + $0x244] sm:$0xf]  ;;  %v8829_v14 = vor.u32 %v12918_v4, %v8826_v5 }
 0x190   : > { %v9082_v8 = vld [vmem:[%s14419_s23 + $0x260] sm:$0xf0] }
 0x191   : > { %6866 = vmatpush.bf16.msra.mxu2 %v9405_v43  ;;  %v13046_v9 = vld [vmem:[%s14419_s23 + $0x444] sm:$0xf]  ;;  %6839 = vmatpush.bf16.msra.mxu0 %v8861_v1  ;;  %v9085_v17 = vor.u32 %v12982_v6, %v9082_v8 }
 0x192   : > { %v9338_v10 = vld [vmem:[%s14419_s23 + $0x460] sm:$0xf0] }
 0x193   : > { %6880 = vmatpush.bf16.msra.mxu3 %v9661_v47  ;;  %v13110_v12 = vld [vmem:[%s14419_s23 + $0x644] sm:$0xf]  ;;  %6853 = vmatpush.bf16.msra.mxu1 %v9117_v2  ;;  %v9341_v19 = vor.u32 %v13046_v9, %v9338_v10 }
 0x194   : > { %v9594_v13 = vld [vmem:[%s14419_s23 + $0x660] sm:$0xf0] }
 0x195   : > { %v12910_v15 = vld [vmem:[%s14419_s23 + $0x4] sm:$0xf]  ;;  %6867 = vmatpush.bf16.msra.mxu2 %v9373_v3  ;;  %v9597_v23 = vor.u32 %v13110_v12, %v9594_v13  ;;  %6840 = vmatpush.bf16.msra.mxu0 %v8829_v14 }
 0x196   : > { %v8794_v16 = vld [vmem:[%s14419_s23 + $0x20] sm:$0xf0] }
 0x197   : > { %v12974_v20 = vld [vmem:[%s14419_s23 + $0x204] sm:$0xf]  ;;  %6881 = vmatpush.bf16.msra.mxu3 %v9629_v7  ;;  %v8797_v31 = vor.u32 %v12910_v15, %v8794_v16  ;;  %6854 = vmatpush.bf16.msra.mxu1 %v9085_v17 }
 0x198   : > { %v9050_v21 = vld [vmem:[%s14419_s23 + $0x220] sm:$0xf0] }
 0x199   : > { %v13038_v22 = vld [vmem:[%s14419_s23 + $0x404] sm:$0xf]  ;;  %6868 = vmatpush.bf16.msra.mxu2 %v9341_v19  ;;  %v9053_v36 = vor.u32 %v12974_v20, %v9050_v21  ;;  %6841 = vmatpush.bf16.msra.mxu0 %v8797_v31 }
 0x19a   : > { %v9306_v24 = vld [vmem:[%s14419_s23 + $0x420] sm:$0xf0] }
 0x19b   : > { %v13102_v25 = vld [vmem:[%s14419_s23 + $0x604] sm:$0xf]  ;;  %v9309_v37 = vor.u32 %v13038_v22, %v9306_v24  ;;  %6882 = vmatpush.bf16.msra.mxu3 %v9597_v23  ;;  %6855 = vmatpush.bf16.msra.mxu1 %v9053_v36 }
 0x19c   : > { %v9562_v26 = vld [vmem:[%s14419_s23 + $0x620] sm:$0xf0]  ;;  %6842 = vmatmul.bf16.vlgmr.msra.gmra.mxu0 %v14520_v11 }
 0x19d   : > { %v13222_v28 = vld [vmem:[%s14419_s23 + $0x9c4] sm:$0xf]  ;;  %v9565_v40 = vor.u32 %v13102_v25, %v9562_v26  ;;  %6869 = vmatpush.bf16.msra.mxu2 %v9309_v37 }
 0x19e   : > { %v10042_v29 = vld [vmem:[%s14419_s23 + $0x9e0] sm:$0xf0]  ;;  %6856 = vmatmul.bf16.vlgmr.msra.gmra.mxu1 %v14536_v27 }
 0x19f   : > { %v13286_v30 = vld [vmem:[%s14419_s23 + $0xbc4] sm:$0xf]  ;;  %v10045_v41 = vor.u32 %v13222_v28, %v10042_v29  ;;  %6883 = vmatpush.bf16.msra.mxu3 %v9565_v40 }
 0x1a0   : > { %v10298_v32 = vld [vmem:[%s14419_s23 + $0xbe0] sm:$0xf0]  ;;  %6870 = vmatmul.bf16.vlgmr.msra.gmra.mxu2 %v14526_v18 }
 0x1a1   : > { %v13350_v33 = vld [vmem:[%s14419_s23 + $0xdc4] sm:$0xf]  ;;  %v10301_v42 = vor.u32 %v13286_v30, %v10298_v32  ;;  %6890 = vmatpush.bf16.msrb.mxu0 %v10045_v41 }
 0x1a2   : > { %v10554_v35 = vld [vmem:[%s14419_s23 + $0xde0] sm:$0xf0]  ;;  %6884 = vmatmul.bf16.vlgmr.msra.gmra.mxu3 %v14542_v34 }
 0x1a3   : > { %v13414_v38 = vld [vmem:[%s14419_s23 + $0xfc4] sm:$0xf]  ;;  %v10557_v43 = vor.u32 %v13350_v33, %v10554_v35  ;;  %6904 = vmatpush.bf16.msrb.mxu1 %v10301_v42 }
 0x1a4   : > { %v10810_v39 = vld [vmem:[%s14419_s23 + $0xfe0] sm:$0xf0] }
 0x1a5   : > { %v13214_v44 = vld [vmem:[%s14419_s23 + $0x984] sm:$0xf]  ;;  %v10813_v47 = vor.u32 %v13414_v38, %v10810_v39  ;;  %6918 = vmatpush.bf16.msrb.mxu2 %v10557_v43 }
 0x1a6   : > { %v10010_v45 = vld [vmem:[%s14419_s23 + $0x9a0] sm:$0xf0] }
 0x1a7   : > { %v13278_v46 = vld [vmem:[%s14419_s23 + $0xb84] sm:$0xf]  ;;  %v10013_v1 = vor.u32 %v13214_v44, %v10010_v45  ;;  %6932 = vmatpush.bf16.msrb.mxu3 %v10813_v47 }
 0x1a8   : > { %v10266_v50 = vld [vmem:[%s14419_s23 + $0xba0] sm:$0xf0] }
 0x1a9   : > { %v13342_v51 = vld [vmem:[%s14419_s23 + $0xd84] sm:$0xf]  ;;  %v10269_v2 = vor.u32 %v13278_v46, %v10266_v50  ;;  %6891 = vmatpush.bf16.msrb.mxu0 %v10013_v1 }
 0x1aa   : > { %v10522_v54 = vld [vmem:[%s14419_s23 + $0xda0] sm:$0xf0] }
 0x1ab   : > { %v13406_v59 = vld [vmem:[%s14419_s23 + $0xf84] sm:$0xf]  ;;  %v10525_v3 = vor.u32 %v13342_v51, %v10522_v54  ;;  %6905 = vmatpush.bf16.msrb.mxu1 %v10269_v2 }
 0x1ac   : > { %v10778_v62 = vld [vmem:[%s14419_s23 + $0xfa0] sm:$0xf0] }
 0x1ad   : > { %v13206_v4 = vld [vmem:[%s14419_s23 + $0x944] sm:$0xf]  ;;  %v10781_v7 = vor.u32 %v13406_v59, %v10778_v62  ;;  %6919 = vmatpush.bf16.msrb.mxu2 %v10525_v3 }
 0x1ae   : > { %v9978_v5 = vld [vmem:[%s14419_s23 + $0x960] sm:$0xf0] }
 0x1af   : > { %v13270_v6 = vld [vmem:[%s14419_s23 + $0xb44] sm:$0xf]  ;;  %v9981_v14 = vor.u32 %v13206_v4, %v9978_v5  ;;  %6933 = vmatpush.bf16.msrb.mxu3 %v10781_v7 }
 0x1b0   : > { %v10234_v8 = vld [vmem:[%s14419_s23 + $0xb60] sm:$0xf0] }
 0x1b1   : > { %v13334_v9 = vld [vmem:[%s14419_s23 + $0xd44] sm:$0xf]  ;;  %v10237_v15 = vor.u32 %v13270_v6, %v10234_v8  ;;  %6892 = vmatpush.bf16.msrb.mxu0 %v9981_v14 }
 0x1b2   : > { %v10490_v10 = vld [vmem:[%s14419_s23 + $0xd60] sm:$0xf0] }
 0x1b3   : > { %v13398_v12 = vld [vmem:[%s14419_s23 + $0xf44] sm:$0xf]  ;;  %v10493_v16 = vor.u32 %v13334_v9, %v10490_v10  ;;  %6906 = vmatpush.bf16.msrb.mxu1 %v10237_v15 }
 0x1b4   : > { %v10746_v13 = vld [vmem:[%s14419_s23 + $0xf60] sm:$0xf0] }
 0x1b5   : > { %v13198_v17 = vld [vmem:[%s14419_s23 + $0x904] sm:$0xf]  ;;  %v10749_v21 = vor.u32 %v13398_v12, %v10746_v13  ;;  %6920 = vmatpush.bf16.msrb.mxu2 %v10493_v16 }
 0x1b6   : > { %v9946_v19 = vld [vmem:[%s14419_s23 + $0x920] sm:$0xf0] }
 0x1b7   : > { %v13262_v20 = vld [vmem:[%s14419_s23 + $0xb04] sm:$0xf]  ;;  %v9949_v28 = vor.u32 %v13198_v17, %v9946_v19  ;;  %6934 = vmatpush.bf16.msrb.mxu3 %v10749_v21 }
 0x1b8   : > { %v10202_v22 = vld [vmem:[%s14419_s23 + $0xb20] sm:$0xf0] }
 0x1b9   : > { %v13326_v23 = vld [vmem:[%s14419_s23 + $0xd04] sm:$0xf]  ;;  %v10205_v29 = vor.u32 %v13262_v20, %v10202_v22  ;;  %6893 = vmatpush.bf16.msrb.mxu0 %v9949_v28 }
 0x1ba   : > { %v10458_v24 = vld [vmem:[%s14419_s23 + $0xd20] sm:$0xf0] }
 0x1bb   : > { %v13390_v25 = vld [vmem:[%s14419_s23 + $0xf04] sm:$0xf]  ;;  %v10461_v30 = vor.u32 %v13326_v23, %v10458_v24  ;;  %6907 = vmatpush.bf16.msrb.mxu1 %v10205_v29 }
 0x1bc   : > { %v10714_v26 = vld [vmem:[%s14419_s23 + $0xf20] sm:$0xf0] }
 0x1bd   : > { %v13190_v31 = vld [vmem:[%s14419_s23 + $0x8c4] sm:$0xf]  ;;  %v10717_v35 = vor.u32 %v13390_v25, %v10714_v26  ;;  %6921 = vmatpush.bf16.msrb.mxu2 %v10461_v30 }
 0x1be   : > { %v9914_v32 = vld [vmem:[%s14419_s23 + $0x8e0] sm:$0xf0] }
 0x1bf   : > { %v13254_v33 = vld [vmem:[%s14419_s23 + $0xac4] sm:$0xf]  ;;  %v9917_v41 = vor.u32 %v13190_v31, %v9914_v32  ;;  %6935 = vmatpush.bf16.msrb.mxu3 %v10717_v35 }
 0x1c0   : > { %v10170_v36 = vld [vmem:[%s14419_s23 + $0xae0] sm:$0xf0] }
 0x1c1   : > { %v13318_v37 = vld [vmem:[%s14419_s23 + $0xcc4] sm:$0xf]  ;;  %v10173_v42 = vor.u32 %v13254_v33, %v10170_v36  ;;  %6894 = vmatpush.bf16.msrb.mxu0 %v9917_v41 }
 0x1c2   : > { %v10426_v38 = vld [vmem:[%s14419_s23 + $0xce0] sm:$0xf0] }
 0x1c3   : > { %v13382_v39 = vld [vmem:[%s14419_s23 + $0xec4] sm:$0xf]  ;;  %v10429_v43 = vor.u32 %v13318_v37, %v10426_v38  ;;  %6908 = vmatpush.bf16.msrb.mxu1 %v10173_v42 }
 0x1c4   : > { %v10682_v40 = vld [vmem:[%s14419_s23 + $0xee0] sm:$0xf0] }
 0x1c5   : > { %v13182_v44 = vld [vmem:[%s14419_s23 + $0x884] sm:$0xf]  ;;  %v10685_v47 = vor.u32 %v13382_v39, %v10682_v40  ;;  %6922 = vmatpush.bf16.msrb.mxu2 %v10429_v43 }
 0x1c6   : > { %v9882_v45 = vld [vmem:[%s14419_s23 + $0x8a0] sm:$0xf0] }
 0x1c7   : > { %v13246_v46 = vld [vmem:[%s14419_s23 + $0xa84] sm:$0xf]  ;;  %v9885_v1 = vor.u32 %v13182_v44, %v9882_v45  ;;  %6936 = vmatpush.bf16.msrb.mxu3 %v10685_v47 }
 0x1c8   : > { %v10138_v50 = vld [vmem:[%s14419_s23 + $0xaa0] sm:$0xf0] }
 0x1c9   : > { %v13310_v51 = vld [vmem:[%s14419_s23 + $0xc84] sm:$0xf]  ;;  %v10141_v2 = vor.u32 %v13246_v46, %v10138_v50  ;;  %6895 = vmatpush.bf16.msrb.mxu0 %v9885_v1 }
 0x1ca   : > { %v10394_v54 = vld [vmem:[%s14419_s23 + $0xca0] sm:$0xf0] }
 0x1cb   : > { %v13374_v59 = vld [vmem:[%s14419_s23 + $0xe84] sm:$0xf]  ;;  %v10397_v3 = vor.u32 %v13310_v51, %v10394_v54  ;;  %6909 = vmatpush.bf16.msrb.mxu1 %v10141_v2 }
 0x1cc   : > { %v10650_v62 = vld [vmem:[%s14419_s23 + $0xea0] sm:$0xf0] }
 0x1cd   : > { %v13174_v4 = vld [vmem:[%s14419_s23 + $0x844] sm:$0xf]  ;;  %v10653_v7 = vor.u32 %v13374_v59, %v10650_v62  ;;  %6923 = vmatpush.bf16.msrb.mxu2 %v10397_v3 }
 0x1ce   : > { %v9850_v5 = vld [vmem:[%s14419_s23 + $0x860] sm:$0xf0] }
 0x1cf   : > { %v13238_v6 = vld [vmem:[%s14419_s23 + $0xa44] sm:$0xf]  ;;  %v9853_v14 = vor.u32 %v13174_v4, %v9850_v5  ;;  %6937 = vmatpush.bf16.msrb.mxu3 %v10653_v7 }
 0x1d0   : > { %v10106_v8 = vld [vmem:[%s14419_s23 + $0xa60] sm:$0xf0] }
 0x1d1   : > { %v13302_v9 = vld [vmem:[%s14419_s23 + $0xc44] sm:$0xf]  ;;  %v10109_v17 = vor.u32 %v13238_v6, %v10106_v8  ;;  %6896 = vmatpush.bf16.msrb.mxu0 %v9853_v14 }
 0x1d2   : > { %v10362_v10 = vld [vmem:[%s14419_s23 + $0xc60] sm:$0xf0] }
 0x1d3   : > { %v13366_v12 = vld [vmem:[%s14419_s23 + $0xe44] sm:$0xf]  ;;  %v10365_v19 = vor.u32 %v13302_v9, %v10362_v10  ;;  %6910 = vmatpush.bf16.msrb.mxu1 %v10109_v17 }
 0x1d4   : > { %v10618_v13 = vld [vmem:[%s14419_s23 + $0xe60] sm:$0xf0] }
 0x1d5   : > { %v13166_v15 = vld [vmem:[%s14419_s23 + $0x804] sm:$0xf]  ;;  %v10621_v23 = vor.u32 %v13366_v12, %v10618_v13  ;;  %6924 = vmatpush.bf16.msrb.mxu2 %v10365_v19 }
 0x1d6   : > { %v9818_v16 = vld [vmem:[%s14419_s23 + $0x820] sm:$0xf0] }
 0x1d7   : > { %v13230_v20 = vld [vmem:[%s14419_s23 + $0xa04] sm:$0xf]  ;;  %v9821_v31 = vor.u32 %v13166_v15, %v9818_v16  ;;  %6938 = vmatpush.bf16.msrb.mxu3 %v10621_v23 }
 0x1d8   : > { %v10074_v21 = vld [vmem:[%s14419_s23 + $0xa20] sm:$0xf0] }
 0x1d9   : > { %v13294_v22 = vld [vmem:[%s14419_s23 + $0xc04] sm:$0xf]  ;;  %v10077_v36 = vor.u32 %v13230_v20, %v10074_v21  ;;  %6897 = vmatpush.bf16.msrb.mxu0 %v9821_v31 }
 0x1da   : > { %v10330_v24 = vld [vmem:[%s14419_s23 + $0xc20] sm:$0xf0] }
 0x1db   : > { %v13358_v25 = vld [vmem:[%s14419_s23 + $0xe04] sm:$0xf]  ;;  %v10333_v37 = vor.u32 %v13294_v22, %v10330_v24  ;;  %6911 = vmatpush.bf16.msrb.mxu1 %v10077_v36 }
 0x1dc   : > { %v10586_v26 = vld [vmem:[%s14419_s23 + $0xe20] sm:$0xf0]  ;;  %6898 = vmatmul.bf16.vlgmr.msrb.gmra.mxu0 %v14602_v56 }
 0x1dd   : > { %v13478_v28 = vld [vmem:[%s14419_s23 + $0x11c4] sm:$0xf]  ;;  %v10589_v40 = vor.u32 %v13358_v25, %v10586_v26  ;;  %6925 = vmatpush.bf16.msrb.mxu2 %v10333_v37 }
 0x1de   : > { %v11066_v29 = vld [vmem:[%s14419_s23 + $0x11e0] sm:$0xf0]  ;;  %6912 = vmatmul.bf16.vlgmr.msrb.gmra.mxu1 %v14609_v61 }
 0x1df   : > { %v13542_v30 = vld [vmem:[%s14419_s23 + $0x13c4] sm:$0xf]  ;;  %v11069_v41 = vor.u32 %v13478_v28, %v11066_v29  ;;  %6939 = vmatpush.bf16.msrb.mxu3 %v10589_v40 }
 0x1e0   : > { %v11322_v32 = vld [vmem:[%s14419_s23 + $0x13e0] sm:$0xf0]  ;;  %6926 = vmatmul.bf16.vlgmr.msrb.gmra.mxu2 %v14607_v60 }
 0x1e1   : > { %v13606_v33 = vld [vmem:[%s14419_s23 + $0x15c4] sm:$0xf]  ;;  %v11325_v42 = vor.u32 %v13542_v30, %v11322_v32  ;;  %6946 = vmatpush.bf16.msra.mxu0 %v11069_v41 }
 0x1e2   : > { %v11578_v35 = vld [vmem:[%s14419_s23 + $0x15e0] sm:$0xf0]  ;;  %6940 = vmatmul.bf16.vlgmr.msrb.gmra.mxu3 %v14613_v0 }
 0x1e3   : > { %v13670_v38 = vld [vmem:[%s14419_s23 + $0x17c4] sm:$0xf]  ;;  %v11581_v43 = vor.u32 %v13606_v33, %v11578_v35  ;;  %6960 = vmatpush.bf16.msra.mxu1 %v11325_v42  ;;  %v14949_v42 = vpop.f32.mrf.mxu1 }
 0x1e4   : > { %v11834_v39 = vld [vmem:[%s14419_s23 + $0x17e0] sm:$0xf0] }
 0x1e5   : > { %v13470_v44 = vld [vmem:[%s14419_s23 + $0x1184] sm:$0xf]  ;;  %v11837_v47 = vor.u32 %v13670_v38, %v11834_v39  ;;  %6974 = vmatpush.bf16.msra.mxu2 %v11581_v43  ;;  %v14945_v39 = vpop.f32.mrf.mxu0 }
 0x1e6   : > { %v11034_v45 = vld [vmem:[%s14419_s23 + $0x11a0] sm:$0xf0] }
 0x1e7   : > { %v13534_v46 = vld [vmem:[%s14419_s23 + $0x1384] sm:$0xf]  ;;  %v11037_v1 = vor.u32 %v13470_v44, %v11034_v45  ;;  %6988 = vmatpush.bf16.msra.mxu3 %v11837_v47 }
 0x1e8   : > { %v11290_v50 = vld [vmem:[%s14419_s23 + $0x13a0] sm:$0xf0] }
 0x1e9   : > { %v13598_v51 = vld [vmem:[%s14419_s23 + $0x1584] sm:$0xf]  ;;  %v11293_v2 = vor.u32 %v13534_v46, %v11290_v50  ;;  %6947 = vmatpush.bf16.msra.mxu0 %v11037_v1 }
 0x1ea   : > { %v11546_v54 = vld [vmem:[%s14419_s23 + $0x15a0] sm:$0xf0] }
 0x1eb   : > { %v13662_v59 = vld [vmem:[%s14419_s23 + $0x1784] sm:$0xf]  ;;  %v11549_v3 = vor.u32 %v13598_v51, %v11546_v54  ;;  %6961 = vmatpush.bf16.msra.mxu1 %v11293_v2 }
 0x1ec   : > { %v11802_v62 = vld [vmem:[%s14419_s23 + $0x17a0] sm:$0xf0] }
 0x1ed   : > { %v13462_v4 = vld [vmem:[%s14419_s23 + $0x1144] sm:$0xf]  ;;  %v11805_v7 = vor.u32 %v13662_v59, %v11802_v62  ;;  %6975 = vmatpush.bf16.msra.mxu2 %v11549_v3 }
 0x1ee   : > { %v11002_v5 = vld [vmem:[%s14419_s23 + $0x1160] sm:$0xf0] }
 0x1ef   : > { %v13526_v6 = vld [vmem:[%s14419_s23 + $0x1344] sm:$0xf]  ;;  %v11005_v14 = vor.u32 %v13462_v4, %v11002_v5  ;;  %6989 = vmatpush.bf16.msra.mxu3 %v11805_v7 }
 0x1f0   : > { %v11258_v8 = vld [vmem:[%s14419_s23 + $0x1360] sm:$0xf0] }
 0x1f1   : > { %v13590_v9 = vld [vmem:[%s14419_s23 + $0x1544] sm:$0xf]  ;;  %v11261_v15 = vor.u32 %v13526_v6, %v11258_v8  ;;  %6948 = vmatpush.bf16.msra.mxu0 %v11005_v14 }
 0x1f2   : > { %v11514_v10 = vld [vmem:[%s14419_s23 + $0x1560] sm:$0xf0] }
 0x1f3   : > { %v13654_v12 = vld [vmem:[%s14419_s23 + $0x1744] sm:$0xf]  ;;  %v11517_v16 = vor.u32 %v13590_v9, %v11514_v10  ;;  %6962 = vmatpush.bf16.msra.mxu1 %v11261_v15  ;;  %v14962_v9 = vpop.f32.mrf.mxu2  ;;  %v14967_v15 = vpop.f32.mrf.mxu3 }
 0x1f4   : > { %v11770_v13 = vld [vmem:[%s14419_s23 + $0x1760] sm:$0xf0] }
 0x1f5   : > { %v13454_v17 = vld [vmem:[%s14419_s23 + $0x1104] sm:$0xf]  ;;  %v11773_v21 = vor.u32 %v13654_v12, %v11770_v13  ;;  %6976 = vmatpush.bf16.msra.mxu2 %v11517_v16 }
 0x1f6   : > { %v10970_v19 = vld [vmem:[%s14419_s23 + $0x1120] sm:$0xf0] }
 0x1f7   : > { %v13518_v20 = vld [vmem:[%s14419_s23 + $0x1304] sm:$0xf]  ;;  %v10973_v28 = vor.u32 %v13454_v17, %v10970_v19  ;;  %6990 = vmatpush.bf16.msra.mxu3 %v11773_v21 }
 0x1f8   : > { %v11226_v22 = vld [vmem:[%s14419_s23 + $0x1320] sm:$0xf0] }
 0x1f9   : > { %v13582_v23 = vld [vmem:[%s14419_s23 + $0x1504] sm:$0xf]  ;;  %v11229_v29 = vor.u32 %v13518_v20, %v11226_v22  ;;  %6949 = vmatpush.bf16.msra.mxu0 %v10973_v28  ;;  %v14973_v22 = vpop.f32.mrf.mxu0 }
 0x1fa   : > { %v11482_v24 = vld [vmem:[%s14419_s23 + $0x1520] sm:$0xf0] }
 0x1fb   : > { %v13646_v25 = vld [vmem:[%s14419_s23 + $0x1704] sm:$0xf]  ;;  %v11485_v30 = vor.u32 %v13582_v23, %v11482_v24  ;;  %6963 = vmatpush.bf16.msra.mxu1 %v11229_v29  ;;  %v14978_v29 = vpop.f32.mrf.mxu1 }
 0x1fc   : > { %v11738_v26 = vld [vmem:[%s14419_s23 + $0x1720] sm:$0xf0] }
 0x1fd   : > { %v13446_v31 = vld [vmem:[%s14419_s23 + $0x10c4] sm:$0xf]  ;;  %v11741_v35 = vor.u32 %v13646_v25, %v11738_v26  ;;  %6977 = vmatpush.bf16.msra.mxu2 %v11485_v30 }
 0x1fe   : > { %v10938_v32 = vld [vmem:[%s14419_s23 + $0x10e0] sm:$0xf0] }
 0x1ff   : > { %v13510_v33 = vld [vmem:[%s14419_s23 + $0x12c4] sm:$0xf]  ;;  %v10941_v43 = vor.u32 %v13446_v31, %v10938_v32  ;;  %6991 = vmatpush.bf16.msra.mxu3 %v11741_v35 }
 0x200   : > { %v11194_v36 = vld [vmem:[%s14419_s23 + $0x12e0] sm:$0xf0] }
 0x201   : > { %v13574_v37 = vld [vmem:[%s14419_s23 + $0x14c4] sm:$0xf]  ;;  %v11197_v44 = vor.u32 %v13510_v33, %v11194_v36  ;;  %6950 = vmatpush.bf16.msra.mxu0 %v10941_v43 }
 0x202   : > { %v11450_v38 = vld [vmem:[%s14419_s23 + $0x14e0] sm:$0xf0] }
 0x203   : > { %v13638_v40 = vld [vmem:[%s14419_s23 + $0x16c4] sm:$0xf]  ;;  %v11453_v45 = vor.u32 %v13574_v37, %v11450_v38  ;;  %6964 = vmatpush.bf16.msra.mxu1 %v11197_v44 }
 0x204   : > { %v11706_v41 = vld [vmem:[%s14419_s23 + $0x16e0] sm:$0xf0] }
 0x205   : > { %v13438_v46 = vld [vmem:[%s14419_s23 + $0x1084] sm:$0xf]  ;;  %v11709_v51 = vor.u32 %v13638_v40, %v11706_v41  ;;  %6978 = vmatpush.bf16.msra.mxu2 %v11453_v45 }
 0x206   : > { %v10906_v47 = vld [vmem:[%s14419_s23 + $0x10a0] sm:$0xf0] }
 0x207   : > { %v13502_v50 = vld [vmem:[%s14419_s23 + $0x1284] sm:$0xf]  ;;  %v10909_v3 = vor.u32 %v13438_v46, %v10906_v47  ;;  %6992 = vmatpush.bf16.msra.mxu3 %v11709_v51 }
 0x208   : > { %v11162_v54 = vld [vmem:[%s14419_s23 + $0x12a0] sm:$0xf0] }
 0x209   : > { %v13566_v59 = vld [vmem:[%s14419_s23 + $0x1484] sm:$0xf]  ;;  %v11165_v4 = vor.u32 %v13502_v50, %v11162_v54  ;;  %6951 = vmatpush.bf16.msra.mxu0 %v10909_v3  ;;  %v14994_v3 = vpop.f32.mrf.mxu2 }
 0x20a   : > { %v11418_v62 = vld [vmem:[%s14419_s23 + $0x14a0] sm:$0xf0] }
 0x20b   : > { %v13630_v1 = vld [vmem:[%s14419_s23 + $0x1684] sm:$0xf]  ;;  %v11421_v5 = vor.u32 %v13566_v59, %v11418_v62  ;;  %6965 = vmatpush.bf16.msra.mxu1 %v11165_v4 }
 0x20c   : > { %v11674_v2 = vld [vmem:[%s14419_s23 + $0x16a0] sm:$0xf0] }
 0x20d   : > { %v13430_v6 = vld [vmem:[%s14419_s23 + $0x1044] sm:$0xf]  ;;  %v11677_v10 = vor.u32 %v13630_v1, %v11674_v2  ;;  %6979 = vmatpush.bf16.msra.mxu2 %v11421_v5 }
 0x20e   : > { %v10874_v7 = vld [vmem:[%s14419_s23 + $0x1060] sm:$0xf0] }
 0x20f   : > { %v13494_v8 = vld [vmem:[%s14419_s23 + $0x1244] sm:$0xf]  ;;  %v10877_v19 = vor.u32 %v13430_v6, %v10874_v7  ;;  %6993 = vmatpush.bf16.msra.mxu3 %v11677_v10 }
 0x210   : > { %v11130_v12 = vld [vmem:[%s14419_s23 + $0x1260] sm:$0xf0] }
 0x211   : > { %v13558_v13 = vld [vmem:[%s14419_s23 + $0x1444] sm:$0xf]  ;;  %v11133_v23 = vor.u32 %v13494_v8, %v11130_v12  ;;  %6952 = vmatpush.bf16.msra.mxu0 %v10877_v19  ;;  %v14999_v8 = vpop.f32.mrf.mxu3 }
 0x212   : > { %v11386_v14 = vld [vmem:[%s14419_s23 + $0x1460] sm:$0xf0] }
 0x213   : > { %v13622_v16 = vld [vmem:[%s14419_s23 + $0x1644] sm:$0xf]  ;;  %v11389_v24 = vor.u32 %v13558_v13, %v11386_v14  ;;  %6966 = vmatpush.bf16.msra.mxu1 %v11133_v23  ;;  %v6634_v14 = vadd.f32 %v14949_v42, %v14945_v39 }
 0x214   : > { %v11642_v17 = vld [vmem:[%s14419_s23 + $0x1660] sm:$0xf0] }
 0x215   : > { %v13422_v20 = vld [vmem:[%s14419_s23 + $0x1004] sm:$0xf]  ;;  %v11645_v30 = vor.u32 %v13622_v16, %v11642_v17  ;;  %6980 = vmatpush.bf16.msra.mxu2 %v11389_v24  ;;  %v6675_v16 = vpop.f32.mrf.mxu0  ;;  %v15008_v24 = vpop.f32.mrf.mxu1 }
 0x216   : > { %v10842_v21 = vld [vmem:[%s14419_s23 + $0x1020] sm:$0xf0] }
 0x217   : > { %v13486_v25 = vld [vmem:[%s14419_s23 + $0x1204] sm:$0xf]  ;;  %v10845_v38 = vor.u32 %v13422_v20, %v10842_v21  ;;  %6994 = vmatpush.bf16.msra.mxu3 %v11645_v30 }
 0x218   : > { %v11098_v26 = vld [vmem:[%s14419_s23 + $0x1220] sm:$0xf0] }
 0x219   : > { %v13550_v28 = vld [vmem:[%s14419_s23 + $0x1404] sm:$0xf]  ;;  %v11101_v44 = vor.u32 %v13486_v25, %v11098_v26  ;;  %6953 = vmatpush.bf16.msra.mxu0 %v10845_v38 }
 0x21a   : > { %v11354_v31 = vld [vmem:[%s14419_s23 + $0x1420] sm:$0xf0] }
 0x21b   : > { %v13614_v32 = vld [vmem:[%s14419_s23 + $0x1604] sm:$0xf]  ;;  %v11357_v45 = vor.u32 %v13550_v28, %v11354_v31  ;;  %6967 = vmatpush.bf16.msra.mxu1 %v11101_v44 }
 0x21c   : > { %v11610_v33 = vld [vmem:[%s14419_s23 + $0x1620] sm:$0xf0]  ;;  %6954 = vmatmul.bf16.vlgmr.msra.gmra.mxu0 %v14686_v48 }
 0x21d   : > { %v13734_v35 = vld [vmem:[%s14419_s23 + $0x19c4] sm:$0xf]  ;;  %v11613_v50 = vor.u32 %v13614_v32, %v11610_v33  ;;  %6981 = vmatpush.bf16.msra.mxu2 %v11357_v45  ;;  %v6648_v32 = vadd.f32 %v14962_v9, %v6634_v14  ;;  %v15028_v9 = vpop.f32.mrf.mxu2  ;;  %v15043_v14 = vpop.f32.mrf.mxu1 }
 0x21e   : > { %v12090_v36 = vld [vmem:[%s14419_s23 + $0x19e0] sm:$0xf0]  ;;  %6968 = vmatmul.bf16.vlgmr.msra.gmra.mxu1 %v14693_v53 }
 0x21f   : > { %v13798_v37 = vld [vmem:[%s14419_s23 + $0x1bc4] sm:$0xf]  ;;  %v12093_v51 = vor.u32 %v13734_v35, %v12090_v36  ;;  %6995 = vmatpush.bf16.msra.mxu3 %v11613_v50  ;;  %v6662_v50 = vadd.f32 %v14967_v15, %v6648_v32 }
 0x220   : > { %v12346_v40 = vld [vmem:[%s14419_s23 + $0x1be0] sm:$0xf0]  ;;  %6982 = vmatmul.bf16.vlgmr.msra.gmra.mxu2 %v14691_v52 }
 0x221   : > { %v13862_v41 = vld [vmem:[%s14419_s23 + $0x1dc4] sm:$0xf]  ;;  %v12349_v54 = vor.u32 %v13798_v37, %v12346_v40  ;;  %7002 = vmatpush.bf16.msrb.mxu0 %v12093_v51  ;;  %v15031_v51 = vpop.f32.mrf.mxu3 }
 0x222   : > { %v12602_v43 = vld [vmem:[%s14419_s23 + $0x1de0] sm:$0xf0]  ;;  %6996 = vmatmul.bf16.vlgmr.msra.gmra.mxu3 %v14697_v57 }
 0x223   : > { %v13926_v46 = vld [vmem:[%s14419_s23 + $0x1fc4] sm:$0xf]  ;;  %v12605_v59 = vor.u32 %v13862_v41, %v12602_v43  ;;  %7016 = vmatpush.bf16.msrb.mxu1 %v12349_v54 }
 0x224   : > { %v12858_v47 = vld [vmem:[%s14419_s23 + $0x1fe0] sm:$0xf0] }
 0x225   : > { %v13726_v62 = vld [vmem:[%s14419_s23 + $0x1984] sm:$0xf]  ;;  %v12861_v4 = vor.u32 %v13926_v46, %v12858_v47  ;;  %7030 = vmatpush.bf16.msrb.mxu2 %v12605_v59 }
 0x226   : > { %v12058_v1 = vld [vmem:[%s14419_s23 + $0x19a0] sm:$0xf0] }
 0x227   : > { %v13790_v2 = vld [vmem:[%s14419_s23 + $0x1b84] sm:$0xf]  ;;  %v12061_v13 = vor.u32 %v13726_v62, %v12058_v1  ;;  %7044 = vmatpush.bf16.msrb.mxu3 %v12861_v4 }
 0x228   : > { %v12314_v5 = vld [vmem:[%s14419_s23 + $0x1ba0] sm:$0xf0] }
 0x229   : > { %v13854_v6 = vld [vmem:[%s14419_s23 + $0x1d84] sm:$0xf]  ;;  %v12317_v17 = vor.u32 %v13790_v2, %v12314_v5  ;;  %7003 = vmatpush.bf16.msrb.mxu0 %v12061_v13  ;;  %v6636_v13 = vadd.f32 %v14978_v29, %v14973_v22 }
 0x22a   : > { %v12570_v7 = vld [vmem:[%s14419_s23 + $0x1da0] sm:$0xf0] }
 0x22b   : > { %v13918_v10 = vld [vmem:[%s14419_s23 + $0x1f84] sm:$0xf]  ;;  %v12573_v19 = vor.u32 %v13854_v6, %v12570_v7  ;;  %7017 = vmatpush.bf16.msrb.mxu1 %v12317_v17 }
 0x22c   : > { %v12826_v12 = vld [vmem:[%s14419_s23 + $0x1fa0] sm:$0xf0] }
 0x22d   : > { %v13718_v20 = vld [vmem:[%s14419_s23 + $0x1944] sm:$0xf]  ;;  %v12829_v25 = vor.u32 %v13918_v10, %v12826_v12  ;;  %7031 = vmatpush.bf16.msrb.mxu2 %v12573_v19  ;;  %v6677_v10 = vpop.f32.mrf.mxu0  ;;  %v6676_v19 = vadd.f32 %v6675_v16, %v6662_v50  ;;  %v6650_v16 = vadd.f32 %v14994_v3, %v6636_v13 }
 0x22e   : > { %v12026_v21 = vld [vmem:[%s14419_s23 + $0x1960] sm:$0xf0] }
 0x22f   : > { %v13782_v23 = vld [vmem:[%s14419_s23 + $0x1b44] sm:$0xf]  ;;  %v12029_v31 = vor.u32 %v13718_v20, %v12026_v21  ;;  %7045 = vmatpush.bf16.msrb.mxu3 %v12829_v25  ;;  %v6690_v32 = vadd.f32 %v15008_v24, %v6676_v19  ;;  %v6664_v50 = vadd.f32 %v14999_v8, %v6650_v16 }
 0x230   : > { %v12282_v26 = vld [vmem:[%s14419_s23 + $0x1b60] sm:$0xf0] }
 0x231   : > { %v13846_v39 = vld [vmem:[%s14419_s23 + $0x1d44] sm:$0xf]  ;;  %v12285_v33 = vor.u32 %v13782_v23, %v12282_v26  ;;  %7004 = vmatpush.bf16.msrb.mxu0 %v12029_v31  ;;  %v6678_v19 = vadd.f32 %v6677_v10, %v6664_v50  ;;  %v13163_v10 = vld [vmem:[%s14419_s23 + $0x7e4] sm:$0xf0] }
 0x232   : > { %v12538_v42 = vld [vmem:[%s14419_s23 + $0x1d60] sm:$0xf0] }
 0x233   : > { %v13910_v28 = vld [vmem:[%s14419_s23 + $0x1f44] sm:$0xf]  ;;  %v12541_v35 = vor.u32 %v13846_v39, %v12538_v42  ;;  %7018 = vmatpush.bf16.msrb.mxu1 %v12285_v33 }
 0x234   : > { %v12794_v30 = vld [vmem:[%s14419_s23 + $0x1f60] sm:$0xf0] }
 0x235   : > { %v13710_v36 = vld [vmem:[%s14419_s23 + $0x1904] sm:$0xf]  ;;  %v12797_v40 = vor.u32 %v13910_v28, %v12794_v30  ;;  %7032 = vmatpush.bf16.msrb.mxu2 %v12541_v35  ;;  %v6731_v24 = vpop.f32.mrf.mxu0 }
 0x236   : > { %v11994_v37 = vld [vmem:[%s14419_s23 + $0x1920] sm:$0xf0] }
 0x237   : > { %v13774_v38 = vld [vmem:[%s14419_s23 + $0x1b04] sm:$0xf]  ;;  %v11997_v47 = vor.u32 %v13710_v36, %v11994_v37  ;;  %7046 = vmatpush.bf16.msrb.mxu3 %v12797_v40  ;;  %v6705_v40 = vpop.f32.mrf.mxu2 }
 0x238   : > { %v12250_v41 = vld [vmem:[%s14419_s23 + $0x1b20] sm:$0xf0] }
 0x239   : > { %v13838_v43 = vld [vmem:[%s14419_s23 + $0x1d04] sm:$0xf]  ;;  %v12253_v54 = vor.u32 %v13774_v38, %v12250_v41  ;;  %7005 = vmatpush.bf16.msrb.mxu0 %v11997_v47 }
 0x23a   : > { %v12506_v44 = vld [vmem:[%s14419_s23 + $0x1d20] sm:$0xf0] }
 0x23b   : > { %v13902_v45 = vld [vmem:[%s14419_s23 + $0x1f04] sm:$0xf]  ;;  %v12509_v59 = vor.u32 %v13838_v43, %v12506_v44  ;;  %7019 = vmatpush.bf16.msrb.mxu1 %v12253_v54  ;;  %v6745_v54 = vpop.f32.mrf.mxu1 }
 0x23c   : > { %v12762_v46 = vld [vmem:[%s14419_s23 + $0x1f20] sm:$0xf0] }
 0x23d   : > { %v13702_v62 = vld [vmem:[%s14419_s23 + $0x18c4] sm:$0xf]  ;;  %v12765_v4 = vor.u32 %v13902_v45, %v12762_v46  ;;  %7033 = vmatpush.bf16.msrb.mxu2 %v12509_v59  ;;  %v15061_v45 = vpop.f32.mrf.mxu3  ;;  %v6733_v50 = vpop.f32.mrf.mxu0 }
 0x23e   : > { %v11962_v1 = vld [vmem:[%s14419_s23 + $0x18e0] sm:$0xf0] }
 0x23f   : > { %v13766_v2 = vld [vmem:[%s14419_s23 + $0x1ac4] sm:$0xf]  ;;  %v11965_v17 = vor.u32 %v13702_v62, %v11962_v1  ;;  %7047 = vmatpush.bf16.msrb.mxu3 %v12765_v4 }
 0x240   : > { %v12218_v5 = vld [vmem:[%s14419_s23 + $0x1ae0] sm:$0xf0] }
 0x241   : > { %v13830_v6 = vld [vmem:[%s14419_s23 + $0x1cc4] sm:$0xf]  ;;  %v12221_v20 = vor.u32 %v13766_v2, %v12218_v5  ;;  %7006 = vmatpush.bf16.msrb.mxu0 %v11965_v17  ;;  %v6704_v2 = vadd.f32 %v15028_v9, %v6690_v32  ;;  %v9024_v9 = vld [vmem:[%s14419_s23 + $0x1c8] sm:$0xf]  ;;  %v6692_v32 = vadd.f32 %v15043_v14, %v6678_v19 }
 0x242   : > { %v12474_v7 = vld [vmem:[%s14419_s23 + $0x1ce0] sm:$0xf0]  ;;  %v9760_v14 = vld [vmem:[%s14419_s23 + $0x788] sm:$0xf] }
 0x243   : > { %v13894_v15 = vld [vmem:[%s14419_s23 + $0x1ec4] sm:$0xf]  ;;  %v12477_v21 = vor.u32 %v13830_v6, %v12474_v7  ;;  %7020 = vmatpush.bf16.msrb.mxu1 %v12221_v20  ;;  %v12971_v20 = vld [vmem:[%s14419_s23 + $0x1e4] sm:$0xf0] }
 0x244   : > { %v12730_v12 = vld [vmem:[%s14419_s23 + $0x1ee0] sm:$0xf0]  ;;  %v13147_v19 = vld [vmem:[%s14419_s23 + $0x764] sm:$0xf0] }
 0x245   : > { %v13694_v23 = vld [vmem:[%s14419_s23 + $0x1884] sm:$0xf]  ;;  %v12733_v39 = vor.u32 %v13894_v15, %v12730_v12  ;;  %7034 = vmatpush.bf16.msrb.mxu2 %v12477_v21  ;;  %v9280_v21 = vld [vmem:[%s14419_s23 + $0x3c8] sm:$0xf] }
 0x246   : > { %v11930_v25 = vld [vmem:[%s14419_s23 + $0x18a0] sm:$0xf0] }
 0x247   : > { %v13758_v26 = vld [vmem:[%s14419_s23 + $0x1a84] sm:$0xf]  ;;  %v11933_v31 = vor.u32 %v13694_v23, %v11930_v25  ;;  %7048 = vmatpush.bf16.msrb.mxu3 %v12733_v39  ;;  %v13035_v25 = vld [vmem:[%s14419_s23 + $0x3e4] sm:$0xf0] }
 0x248   : > { %v12186_v22 = vld [vmem:[%s14419_s23 + $0x1aa0] sm:$0xf0]  ;;  %v13099_v39 = vld [vmem:[%s14419_s23 + $0x5e4] sm:$0xf0] }
 0x249   : > { %v13822_v29 = vld [vmem:[%s14419_s23 + $0x1c84] sm:$0xf]  ;;  %v12189_v33 = vor.u32 %v13758_v26, %v12186_v22  ;;  %7007 = vmatpush.bf16.msrb.mxu0 %v11933_v31  ;;  %v9536_v26 = vld [vmem:[%s14419_s23 + $0x5c8] sm:$0xf]  ;;  %v6718_v22 = vadd.f32 %v15031_v51, %v6704_v2  ;;  %v9025_v31 = vor.u32 %v12971_v20, %v9024_v9  ;;  %v6773_v51 = vpop.f32.mrf.mxu3 }
 0x24a   : > { %v12442_v42 = vld [vmem:[%s14419_s23 + $0x1ca0] sm:$0xf0]  ;;  %v8928_v20 = vld [vmem:[%s14419_s23 + $0x108] sm:$0xf] }
 0x24b   : > { %v13886_v28 = vld [vmem:[%s14419_s23 + $0x1e84] sm:$0xf]  ;;  %v12445_v35 = vor.u32 %v13822_v29, %v12442_v42  ;;  %7021 = vmatpush.bf16.msrb.mxu1 %v12189_v33  ;;  %v6732_v33 = vadd.f32 %v6731_v24, %v6718_v22  ;;  %v13155_v24 = vld [vmem:[%s14419_s23 + $0x7a4] sm:$0xf0] }
 0x24c   : > { %v12698_v30 = vld [vmem:[%s14419_s23 + $0x1ea0] sm:$0xf0] }
 0x24d   : > { %v13686_v36 = vld [vmem:[%s14419_s23 + $0x1844] sm:$0xf]  ;;  %v12701_v41 = vor.u32 %v13886_v28, %v12698_v30  ;;  %7035 = vmatpush.bf16.msrb.mxu2 %v12445_v35  ;;  %v9792_v28 = vld [vmem:[%s14419_s23 + $0x7c8] sm:$0xf]  ;;  %v6759_v30 = vpop.f32.mrf.mxu2  ;;  %v9281_v35 = vor.u32 %v13035_v25, %v9280_v21 }
 0x24e   : > { %v11898_v37 = vld [vmem:[%s14419_s23 + $0x1860] sm:$0xf0]  ;;  %v12947_v25 = vld [vmem:[%s14419_s23 + $0x124] sm:$0xf0] }
 0x24f   : > { %v13750_v38 = vld [vmem:[%s14419_s23 + $0x1a44] sm:$0xf]  ;;  %v11901_v59 = vor.u32 %v13686_v36, %v11898_v37  ;;  %7049 = vmatpush.bf16.msrb.mxu3 %v12701_v41  ;;  %v9537_v36 = vor.u32 %v13099_v39, %v9536_v26  ;;  %v8992_v37 = vld [vmem:[%s14419_s23 + $0x188] sm:$0xf] }
 0x250   : > { %v12154_v3 = vld [vmem:[%s14419_s23 + $0x1a60] sm:$0xf0]  ;;  %v9248_v41 = vld [vmem:[%s14419_s23 + $0x388] sm:$0xf] }
 0x251   : > { %v13814_v43 = vld [vmem:[%s14419_s23 + $0x1c44] sm:$0xf]  ;;  %v12157_v4 = vor.u32 %v13750_v38, %v12154_v3  ;;  %7008 = vmatpush.bf16.msrb.mxu0 %v11901_v59  ;;  %v12963_v38 = vld [vmem:[%s14419_s23 + $0x1a4] sm:$0xf0]  ;;  %v9793_v3 = vor.u32 %v13163_v10, %v9792_v28  ;;  %v6747_v59 = vpop.f32.mrf.mxu1 }
 0x252   : > { %v12410_v44 = vld [vmem:[%s14419_s23 + $0x1c60] sm:$0xf0]  ;;  %v9184_v26 = vld [vmem:[%s14419_s23 + $0x308] sm:$0xf] }
 0x253   : > { %v13878_v46 = vld [vmem:[%s14419_s23 + $0x1e44] sm:$0xf]  ;;  %v12413_v5 = vor.u32 %v13814_v43, %v12410_v44  ;;  %7022 = vmatpush.bf16.msrb.mxu1 %v12157_v4  ;;  %v13027_v43 = vld [vmem:[%s14419_s23 + $0x3a4] sm:$0xf0] }
 0x254   : > { %v12666_v47 = vld [vmem:[%s14419_s23 + $0x1e60] sm:$0xf0]  ;;  %v9504_v44 = vld [vmem:[%s14419_s23 + $0x588] sm:$0xf]  ;;  %v9249_v2 = vor.u32 %v13027_v43, %v9248_v41 }
 0x255   : > { %v13678_v62 = vld [vmem:[%s14419_s23 + $0x1804] sm:$0xf]  ;;  %v12669_v15 = vor.u32 %v13878_v46, %v12666_v47  ;;  %7036 = vmatpush.bf16.msrb.mxu2 %v12413_v5  ;;  %v13091_v46 = vld [vmem:[%s14419_s23 + $0x5a4] sm:$0xf0]  ;;  %v6706_v47 = vadd.f32 %v6705_v40, %v6692_v32  ;;  %v6761_v22 = vpop.f32.mrf.mxu2 }
 0x256   : > { %v11866_v1 = vld [vmem:[%s14419_s23 + $0x1820] sm:$0xf0]  ;;  %v9505_v40 = vor.u32 %v13091_v46, %v9504_v44  ;;  %v8960_v4 = vld [vmem:[%s14419_s23 + $0x148] sm:$0xf] }
 0x257   : > { %v13742_v8 = vld [vmem:[%s14419_s23 + $0x1a04] sm:$0xf]  ;;  %v11869_v23 = vor.u32 %v13678_v62, %v11866_v1  ;;  %7050 = vmatpush.bf16.msrb.mxu3 %v12669_v15  ;;  %v8993_v62 = vor.u32 %v12963_v38, %v8992_v37  ;;  %v6746_v1 = vadd.f32 %v6745_v54, %v6732_v33  ;;  %v12955_v5 = vld [vmem:[%s14419_s23 + $0x164] sm:$0xf0]  ;;  %v6720_v54 = vadd.f32 %v15061_v45, %v6706_v47 }
 0x258   : > { %v12122_v6 = vld [vmem:[%s14419_s23 + $0x1a20] sm:$0xf0]  ;;  %v9472_v15 = vld [vmem:[%s14419_s23 + $0x548] sm:$0xf]  ;;  %v8961_v9 = vor.u32 %v12955_v5, %v8960_v4  ;;  %v8929_v33 = vor.u32 %v12947_v25, %v8928_v20 }
 0x259   : > { %v13806_v7 = vld [vmem:[%s14419_s23 + $0x1c04] sm:$0xf]  ;;  %v12125_v29 = vor.u32 %v13742_v8, %v12122_v6  ;;  %7009 = vmatpush.bf16.msrb.mxu0 %v11869_v23  ;;  %v9216_v8 = vld [vmem:[%s14419_s23 + $0x348] sm:$0xf]  ;;  %v9761_v6 = vor.u32 %v13155_v24, %v9760_v14  ;;  %v6734_v21 = vadd.f32 %v6733_v50, %v6720_v54 }
 0x25a   : > { %v12378_v12 = vld [vmem:[%s14419_s23 + $0x1c20] sm:$0xf0]  ;;  %v13011_v39 = vld [vmem:[%s14419_s23 + $0x324] sm:$0xf0] }
 0x25b   : > { %v13870_v13 = vld [vmem:[%s14419_s23 + $0x1e04] sm:$0xf]  ;;  %v12381_v42 = vor.u32 %v13806_v7, %v12378_v12  ;;  %7023 = vmatpush.bf16.msrb.mxu1 %v12125_v29  ;;  %v13019_v7 = vld [vmem:[%s14419_s23 + $0x364] sm:$0xf0]  ;;  %v6748_v37 = vadd.f32 %v6747_v59, %v6734_v21 }
 0x25c   : > { %v12634_v17 = vld [vmem:[%s14419_s23 + $0x1e20] sm:$0xf0]  ;;  %7010 = vmatmul.bf16.vlgmr.msrb.gmra.mxu0 %v14770_v49  ;;  %v13083_v12 = vld [vmem:[%s14419_s23 + $0x564] sm:$0xf0]  ;;  %v9217_v45 = vor.u32 %v13019_v7, %v9216_v8 }
 0x25d   : > { %v12637_v16 = vor.u32 %v13870_v13, %v12634_v17  ;;  %7037 = vmatpush.bf16.msrb.mxu2 %v12381_v42  ;;  %7058 = vmatpush.bf16.msra.mxu0 %v9025_v31  ;;  %v6760_v13 = vadd.f32 %v6759_v30, %v6746_v1  ;;  %v9728_v17 = vld [vmem:[%s14419_s23 + $0x748] sm:$0xf]  ;;  %v9473_v23 = vor.u32 %v13083_v12, %v9472_v15  ;;  %v6775_v30 = vpop.f32.mrf.mxu3  ;;  %v6815_v15 = vpop.f32.mrf.mxu2 }
 0x25e   : > { %7024 = vmatmul.bf16.vlgmr.msrb.gmra.mxu1 %v14777_v58  ;;  %v9729_v29 = vor.u32 %v13147_v19, %v9728_v17  ;;  %v9440_v42 = vld [vmem:[%s14419_s23 + $0x508] sm:$0xf]  ;;  %v6762_v14 = vadd.f32 %v6761_v22, %v6748_v37 }
 0x25f   : > { %7051 = vmatpush.bf16.msrb.mxu3 %v12637_v16  ;;  %7072 = vmatpush.bf16.msra.mxu1 %v9281_v35  ;;  %v13075_v28 = vld [vmem:[%s14419_s23 + $0x524] sm:$0xf0]  ;;  %v6774_v10 = vadd.f32 %v6773_v51, %v6760_v13  ;;  %v6787_v16 = vpop.f32.mrf.mxu0  ;;  %v9185_v35 = vor.u32 %v13011_v39, %v9184_v26 }
 0x260   : > { %7038 = vmatmul.bf16.vlgmr.msrb.gmra.mxu2 %v14775_v55  ;;  %v9696_v31 = vld [vmem:[%s14419_s23 + $0x708] sm:$0xf]  ;;  %v9441_v51 = vor.u32 %v13075_v28, %v9440_v42  ;;  %v6776_v13 = vadd.f32 %v6775_v30, %v6762_v14 }
 0x261   : > { %7086 = vmatpush.bf16.msra.mxu2 %v9537_v36  ;;  %7059 = vmatpush.bf16.msra.mxu0 %v8993_v62  ;;  %v13139_v32 = vld [vmem:[%s14419_s23 + $0x724] sm:$0xf0]  ;;  %v6801_v36 = vpop.f32.mrf.mxu1  ;;  %v6788_v38 = vadd.f32 %v6787_v16, %v6774_v10 }
 0x262   : > { %7052 = vmatmul.bf16.vlgmr.msrb.gmra.mxu3 %v14781_v63  ;;  %v8896_v41 = vld [vmem:[%s14419_s23 + $0xc8] sm:$0xf]  ;;  %v9697_v44 = vor.u32 %v13139_v32, %v9696_v31 }
 0x263   : > { %7100 = vmatpush.bf16.msra.mxu3 %v9793_v3  ;;  %7073 = vmatpush.bf16.msra.mxu1 %v9249_v2  ;;  %v12939_v3 = vld [vmem:[%s14419_s23 + $0xe4] sm:$0xf0]  ;;  %v6802_v2 = vadd.f32 %v6801_v36, %v6788_v38 }
 0x264   : > { %v9152_v43 = vld [vmem:[%s14419_s23 + $0x2c8] sm:$0xf]  ;;  %v8897_v62 = vor.u32 %v12939_v3, %v8896_v41 }
 0x265   : > { %7087 = vmatpush.bf16.msra.mxu2 %v9505_v40  ;;  %7060 = vmatpush.bf16.msra.mxu0 %v8961_v9  ;;  %v13003_v46 = vld [vmem:[%s14419_s23 + $0x2e4] sm:$0xf0]  ;;  %v6816_v17 = vadd.f32 %v6815_v15, %v6802_v2  ;;  %v6829_v9 = vpop.f32.mrf.mxu3  ;;  %v6817_v14 = vpop.f32.mrf.mxu2 }
 0x266   : > { %v9408_v47 = vld [vmem:[%s14419_s23 + $0x4c8] sm:$0xf]  ;;  %v9153_v40 = vor.u32 %v13003_v46, %v9152_v43 }
 0x267   : > { %7101 = vmatpush.bf16.msra.mxu3 %v9761_v6  ;;  %7074 = vmatpush.bf16.msra.mxu1 %v9217_v45  ;;  %v13067_v50 = vld [vmem:[%s14419_s23 + $0x4e4] sm:$0xf0]  ;;  %v6789_v19 = vpop.f32.mrf.mxu0  ;;  %v354_v45 = vld [vmem:[#allocation2 + $0x30] sm:$0xff]  ;;  %v6830_v39 = vadd.f32 %v6829_v9, %v6816_v17 }
 0x268   : > { %v9664_v24 = vld [vmem:[%s14419_s23 + $0x6c8] sm:$0xf]  ;;  %v9409_v4 = vor.u32 %v13067_v50, %v9408_v47  ;;  %v6790_v26 = vadd.f32 %v6789_v19, %v6776_v13 }
 0x269   : > { %7088 = vmatpush.bf16.msra.mxu2 %v9473_v23  ;;  %v13131_v59 = vld [vmem:[%s14419_s23 + $0x6e4] sm:$0xf0]  ;;  %7061 = vmatpush.bf16.msra.mxu0 %v8929_v33  ;;  %v6803_v30 = vpop.f32.mrf.mxu1  ;;  %v8402_v33 = vadd.f32 %v6830_v39, %v354_v45 }
 0x26a   : > { %v8864_v1 = vld [vmem:[%s14419_s23 + $0x88] sm:$0xf]  ;;  %v9665_v7 = vor.u32 %v13131_v59, %v9664_v24  ;;  %v6804_v3 = vadd.f32 %v6803_v30, %v6790_v26  ;;  %v362_v24 = vld [vmem:[#allocation2 + $0x40] sm:$0xff] }
 0x26b   : > { %7102 = vmatpush.bf16.msra.mxu3 %v9729_v29  ;;  %7075 = vmatpush.bf16.msra.mxu1 %v9185_v35  ;;  %v12931_v5 = vld [vmem:[%s14419_s23 + $0xa4] sm:$0xf0]  ;;  %8418 = vst [vmem:[#allocation2 + $0x30] sm:$0xff] %v8402_v33 }
 0x26c   : > { %v9120_v8 = vld [vmem:[%s14419_s23 + $0x288] sm:$0xf]  ;;  %v8865_v23 = vor.u32 %v12931_v5, %v8864_v1  ;;  %v6818_v2 = vadd.f32 %v6817_v14, %v6804_v3 }
 0x26d   : > { %7089 = vmatpush.bf16.msra.mxu2 %v9441_v51  ;;  %v12995_v6 = vld [vmem:[%s14419_s23 + $0x2a4] sm:$0xf0]  ;;  %7062 = vmatpush.bf16.msra.mxu0 %v8897_v62 }
 0x26e   : > { %v9376_v12 = vld [vmem:[%s14419_s23 + $0x488] sm:$0xf]  ;;  %v9121_v25 = vor.u32 %v12995_v6, %v9120_v8 }
 0x26f   : > { %7103 = vmatpush.bf16.msra.mxu3 %v9697_v44  ;;  %v13059_v54 = vld [vmem:[%s14419_s23 + $0x4a4] sm:$0xf0]  ;;  %7076 = vmatpush.bf16.msra.mxu1 %v9153_v40  ;;  %v6831_v40 = vpop.f32.mrf.mxu3 }
 0x270   : > { %v9632_v20 = vld [vmem:[%s14419_s23 + $0x688] sm:$0xf]  ;;  %v9377_v22 = vor.u32 %v13059_v54, %v9376_v12  ;;  %v6832_v54 = vadd.f32 %v6831_v40, %v6818_v2 }
 0x271   : > { %v13123_v21 = vld [vmem:[%s14419_s23 + $0x6a4] sm:$0xf0]  ;;  %7090 = vmatpush.bf16.msra.mxu2 %v9409_v4  ;;  %7063 = vmatpush.bf16.msra.mxu0 %v8865_v23 }
 0x272   : > { %v8832_v29 = vld [vmem:[%s14419_s23 + $0x48] sm:$0xf]  ;;  %v9633_v10 = vor.u32 %v13123_v21, %v9632_v20  ;;  %v8410_v45 = vadd.f32 %v6832_v54, %v362_v24 }
 0x273   : > { %v12923_v42 = vld [vmem:[%s14419_s23 + $0x64] sm:$0xf0]  ;;  %7104 = vmatpush.bf16.msra.mxu3 %v9665_v7  ;;  %7077 = vmatpush.bf16.msra.mxu1 %v9121_v25 }
 0x274   : > { %v9088_v28 = vld [vmem:[%s14419_s23 + $0x248] sm:$0xf]  ;;  %v8833_v37 = vor.u32 %v12923_v42, %v8832_v29  ;;  %8426 = vst [vmem:[#allocation2 + $0x40] sm:$0xff] %v8410_v45 }
 0x275   : > { %v12987_v16 = vld [vmem:[%s14419_s23 + $0x264] sm:$0xf0]  ;;  %7091 = vmatpush.bf16.msra.mxu2 %v9377_v22 }
 0x276   : > { %v9344_v31 = vld [vmem:[%s14419_s23 + $0x448] sm:$0xf]  ;;  %v9089_v43 = vor.u32 %v12987_v16, %v9088_v28  ;;  %7064 = vmatpush.bf16.msra.mxu0 %v8833_v37 }
 0x277   : > { %v13051_v32 = vld [vmem:[%s14419_s23 + $0x464] sm:$0xf0]  ;;  %7105 = vmatpush.bf16.msra.mxu3 %v9633_v10 }
 0x278   : > { %v9600_v35 = vld [vmem:[%s14419_s23 + $0x648] sm:$0xf]  ;;  %v9345_v44 = vor.u32 %v13051_v32, %v9344_v31  ;;  %7078 = vmatpush.bf16.msra.mxu1 %v9089_v43 }
 0x279   : > { %v13115_v36 = vld [vmem:[%s14419_s23 + $0x664] sm:$0xf0] }
 0x27a   : > { %v8800_v38 = vld [vmem:[%s14419_s23 + $0x8] sm:$0xf]  ;;  %v9601_v50 = vor.u32 %v13115_v36, %v9600_v35  ;;  %7092 = vmatpush.bf16.msra.mxu2 %v9345_v44 }
 0x27b   : > { %v12915_v51 = vld [vmem:[%s14419_s23 + $0x24] sm:$0xf0] }
 0x27c   : > { %v9056_v41 = vld [vmem:[%s14419_s23 + $0x208] sm:$0xf]  ;;  %v8801_v6 = vor.u32 %v12915_v51, %v8800_v38  ;;  %7106 = vmatpush.bf16.msra.mxu3 %v9601_v50 }
 0x27d   : > { %v12979_v46 = vld [vmem:[%s14419_s23 + $0x224] sm:$0xf0] }
 0x27e   : > { %v9312_v47 = vld [vmem:[%s14419_s23 + $0x408] sm:$0xf]  ;;  %v9057_v13 = vor.u32 %v12979_v46, %v9056_v41  ;;  %7065 = vmatpush.bf16.msra.mxu0 %v8801_v6 }
 0x27f   : > { %v13043_v59 = vld [vmem:[%s14419_s23 + $0x424] sm:$0xf0] }
 0x280   : > { %v9568_v62 = vld [vmem:[%s14419_s23 + $0x608] sm:$0xf]  ;;  %v9313_v17 = vor.u32 %v13043_v59, %v9312_v47  ;;  %7079 = vmatpush.bf16.msra.mxu1 %v9057_v13 }
 0x281   : > { %v13107_v1 = vld [vmem:[%s14419_s23 + $0x624] sm:$0xf0]  ;;  %7066 = vmatmul.bf16.vlgmr.msra.gmra.mxu0 %v14520_v11 }
 0x282   : > { %v10048_v4 = vld [vmem:[%s14419_s23 + $0x9c8] sm:$0xf]  ;;  %v9569_v20 = vor.u32 %v13107_v1, %v9568_v62  ;;  %7093 = vmatpush.bf16.msra.mxu2 %v9313_v17 }
 0x283   : > { %v13227_v5 = vld [vmem:[%s14419_s23 + $0x9e4] sm:$0xf0]  ;;  %7080 = vmatmul.bf16.vlgmr.msra.gmra.mxu1 %v14536_v27 }
 0x284   : > { %v10304_v8 = vld [vmem:[%s14419_s23 + $0xbc8] sm:$0xf]  ;;  %v10049_v21 = vor.u32 %v13227_v5, %v10048_v4  ;;  %7107 = vmatpush.bf16.msra.mxu3 %v9569_v20 }
 0x285   : > { %v13291_v7 = vld [vmem:[%s14419_s23 + $0xbe4] sm:$0xf0]  ;;  %7094 = vmatmul.bf16.vlgmr.msra.gmra.mxu2 %v14526_v18 }
 0x286   : > { %v10560_v15 = vld [vmem:[%s14419_s23 + $0xdc8] sm:$0xf]  ;;  %v10305_v23 = vor.u32 %v13291_v7, %v10304_v8  ;;  %7114 = vmatpush.bf16.msrb.mxu0 %v10049_v21 }
 0x287   : > { %v13355_v12 = vld [vmem:[%s14419_s23 + $0xde4] sm:$0xf0]  ;;  %7108 = vmatmul.bf16.vlgmr.msra.gmra.mxu3 %v14542_v34 }
 0x288   : > { %v10816_v19 = vld [vmem:[%s14419_s23 + $0xfc8] sm:$0xf]  ;;  %v10561_v25 = vor.u32 %v13355_v12, %v10560_v15  ;;  %7128 = vmatpush.bf16.msrb.mxu1 %v10305_v23 }
 0x289   : > { %v13419_v9 = vld [vmem:[%s14419_s23 + $0xfe4] sm:$0xf0] }
 0x28a   : > { %v10016_v26 = vld [vmem:[%s14419_s23 + $0x988] sm:$0xf]  ;;  %v10817_v29 = vor.u32 %v13419_v9, %v10816_v19  ;;  %7142 = vmatpush.bf16.msrb.mxu2 %v10561_v25 }
 0x28b   : > { %v13219_v39 = vld [vmem:[%s14419_s23 + $0x9a4] sm:$0xf0] }
 0x28c   : > { %v10272_v22 = vld [vmem:[%s14419_s23 + $0xb88] sm:$0xf]  ;;  %v10017_v31 = vor.u32 %v13219_v39, %v10016_v26  ;;  %7156 = vmatpush.bf16.msrb.mxu3 %v10817_v29 }
 0x28d   : > { %v13283_v42 = vld [vmem:[%s14419_s23 + $0xba4] sm:$0xf0] }
 0x28e   : > { %v10528_v28 = vld [vmem:[%s14419_s23 + $0xd88] sm:$0xf]  ;;  %v10273_v32 = vor.u32 %v13283_v42, %v10272_v22  ;;  %7115 = vmatpush.bf16.msrb.mxu0 %v10017_v31 }
 0x28f   : > { %v13347_v10 = vld [vmem:[%s14419_s23 + $0xda4] sm:$0xf0] }
 0x290   : > { %v10784_v30 = vld [vmem:[%s14419_s23 + $0xf88] sm:$0xf]  ;;  %v10529_v33 = vor.u32 %v13347_v10, %v10528_v28  ;;  %7129 = vmatpush.bf16.msrb.mxu1 %v10273_v32 }
 0x291   : > { %v13411_v16 = vld [vmem:[%s14419_s23 + $0xfa4] sm:$0xf0] }
 0x292   : > { %v9984_v35 = vld [vmem:[%s14419_s23 + $0x948] sm:$0xf]  ;;  %v10785_v38 = vor.u32 %v13411_v16, %v10784_v30  ;;  %7143 = vmatpush.bf16.msrb.mxu2 %v10529_v33 }
 0x293   : > { %v13211_v36 = vld [vmem:[%s14419_s23 + $0x964] sm:$0xf0] }
 0x294   : > { %v10240_v37 = vld [vmem:[%s14419_s23 + $0xb48] sm:$0xf]  ;;  %v9985_v46 = vor.u32 %v13211_v36, %v9984_v35  ;;  %7157 = vmatpush.bf16.msrb.mxu3 %v10785_v38 }
 0x295   : > { %v13275_v51 = vld [vmem:[%s14419_s23 + $0xb64] sm:$0xf0] }
 0x296   : > { %v10496_v41 = vld [vmem:[%s14419_s23 + $0xd48] sm:$0xf]  ;;  %v10241_v47 = vor.u32 %v13275_v51, %v10240_v37  ;;  %7116 = vmatpush.bf16.msrb.mxu0 %v9985_v46 }
 0x297   : > { %v13339_v3 = vld [vmem:[%s14419_s23 + $0xd64] sm:$0xf0] }
 0x298   : > { %v10752_v43 = vld [vmem:[%s14419_s23 + $0xf48] sm:$0xf]  ;;  %v10497_v50 = vor.u32 %v13339_v3, %v10496_v41  ;;  %7130 = vmatpush.bf16.msrb.mxu1 %v10241_v47 }
 0x299   : > { %v13403_v44 = vld [vmem:[%s14419_s23 + $0xf64] sm:$0xf0] }
 0x29a   : > { %v9952_v14 = vld [vmem:[%s14419_s23 + $0x908] sm:$0xf]  ;;  %v10753_v62 = vor.u32 %v13403_v44, %v10752_v43  ;;  %7144 = vmatpush.bf16.msrb.mxu2 %v10497_v50 }
 0x29b   : > { %v13203_v24 = vld [vmem:[%s14419_s23 + $0x924] sm:$0xf0] }
 0x29c   : > { %v10208_v59 = vld [vmem:[%s14419_s23 + $0xb08] sm:$0xf]  ;;  %v9953_v8 = vor.u32 %v13203_v24, %v9952_v14  ;;  %7158 = vmatpush.bf16.msrb.mxu3 %v10753_v62 }
 0x29d   : > { %v13267_v1 = vld [vmem:[%s14419_s23 + $0xb24] sm:$0xf0] }
 0x29e   : > { %v10464_v2 = vld [vmem:[%s14419_s23 + $0xd08] sm:$0xf]  ;;  %v10209_v6 = vor.u32 %v13267_v1, %v10208_v59  ;;  %7117 = vmatpush.bf16.msrb.mxu0 %v9953_v8 }
 0x29f   : > { %v13331_v40 = vld [vmem:[%s14419_s23 + $0xd24] sm:$0xf0] }
 0x2a0   : > { %v10720_v4 = vld [vmem:[%s14419_s23 + $0xf08] sm:$0xf]  ;;  %v10465_v7 = vor.u32 %v13331_v40, %v10464_v2  ;;  %7131 = vmatpush.bf16.msrb.mxu1 %v10209_v6 }
 0x2a1   : > { %v13395_v5 = vld [vmem:[%s14419_s23 + $0xf24] sm:$0xf0] }
 0x2a2   : > { %v9920_v15 = vld [vmem:[%s14419_s23 + $0x8c8] sm:$0xf]  ;;  %v10721_v13 = vor.u32 %v13395_v5, %v10720_v4  ;;  %7145 = vmatpush.bf16.msrb.mxu2 %v10465_v7 }
 0x2a3   : > { %v13195_v12 = vld [vmem:[%s14419_s23 + $0x8e4] sm:$0xf0] }
 0x2a4   : > { %v10176_v54 = vld [vmem:[%s14419_s23 + $0xac8] sm:$0xf]  ;;  %v9921_v45 = vor.u32 %v13195_v12, %v9920_v15  ;;  %7159 = vmatpush.bf16.msrb.mxu3 %v10721_v13 }
 0x2a5   : > { %v13259_v17 = vld [vmem:[%s14419_s23 + $0xae4] sm:$0xf0] }
 0x2a6   : > { %v10432_v19 = vld [vmem:[%s14419_s23 + $0xcc8] sm:$0xf]  ;;  %v10177_v23 = vor.u32 %v13259_v17, %v10176_v54  ;;  %7118 = vmatpush.bf16.msrb.mxu0 %v9921_v45 }
 0x2a7   : > { %v13323_v9 = vld [vmem:[%s14419_s23 + $0xce4] sm:$0xf0] }
 0x2a8   : > { %v10688_v20 = vld [vmem:[%s14419_s23 + $0xec8] sm:$0xf]  ;;  %v10433_v25 = vor.u32 %v13323_v9, %v10432_v19  ;;  %7132 = vmatpush.bf16.msrb.mxu1 %v10177_v23 }
 0x2a9   : > { %v13387_v21 = vld [vmem:[%s14419_s23 + $0xee4] sm:$0xf0] }
 0x2aa   : > { %v9888_v26 = vld [vmem:[%s14419_s23 + $0x888] sm:$0xf]  ;;  %v10689_v29 = vor.u32 %v13387_v21, %v10688_v20  ;;  %7146 = vmatpush.bf16.msrb.mxu2 %v10433_v25 }
 0x2ab   : > { %v13187_v39 = vld [vmem:[%s14419_s23 + $0x8a4] sm:$0xf0] }
 0x2ac   : > { %v10144_v22 = vld [vmem:[%s14419_s23 + $0xa88] sm:$0xf]  ;;  %v9889_v31 = vor.u32 %v13187_v39, %v9888_v26  ;;  %7160 = vmatpush.bf16.msrb.mxu3 %v10689_v29 }
 0x2ad   : > { %v13251_v42 = vld [vmem:[%s14419_s23 + $0xaa4] sm:$0xf0] }
 0x2ae   : > { %v10400_v28 = vld [vmem:[%s14419_s23 + $0xc88] sm:$0xf]  ;;  %v10145_v32 = vor.u32 %v13251_v42, %v10144_v22  ;;  %7119 = vmatpush.bf16.msrb.mxu0 %v9889_v31 }
 0x2af   : > { %v13315_v10 = vld [vmem:[%s14419_s23 + $0xca4] sm:$0xf0] }
 0x2b0   : > { %v10656_v30 = vld [vmem:[%s14419_s23 + $0xe88] sm:$0xf]  ;;  %v10401_v33 = vor.u32 %v13315_v10, %v10400_v28  ;;  %7133 = vmatpush.bf16.msrb.mxu1 %v10145_v32 }
 0x2b1   : > { %v13379_v16 = vld [vmem:[%s14419_s23 + $0xea4] sm:$0xf0] }
 0x2b2   : > { %v9856_v35 = vld [vmem:[%s14419_s23 + $0x848] sm:$0xf]  ;;  %v10657_v38 = vor.u32 %v13379_v16, %v10656_v30  ;;  %7147 = vmatpush.bf16.msrb.mxu2 %v10401_v33 }
 0x2b3   : > { %v13179_v36 = vld [vmem:[%s14419_s23 + $0x864] sm:$0xf0] }
 0x2b4   : > { %v10112_v37 = vld [vmem:[%s14419_s23 + $0xa48] sm:$0xf]  ;;  %v9857_v46 = vor.u32 %v13179_v36, %v9856_v35  ;;  %7161 = vmatpush.bf16.msrb.mxu3 %v10657_v38 }
 0x2b5   : > { %v13243_v51 = vld [vmem:[%s14419_s23 + $0xa64] sm:$0xf0] }
 0x2b6   : > { %v10368_v41 = vld [vmem:[%s14419_s23 + $0xc48] sm:$0xf]  ;;  %v10113_v14 = vor.u32 %v13243_v51, %v10112_v37  ;;  %7120 = vmatpush.bf16.msrb.mxu0 %v9857_v46 }
 0x2b7   : > { %v13307_v3 = vld [vmem:[%s14419_s23 + $0xc64] sm:$0xf0] }
 0x2b8   : > { %v10624_v43 = vld [vmem:[%s14419_s23 + $0xe48] sm:$0xf]  ;;  %v10369_v24 = vor.u32 %v13307_v3, %v10368_v41  ;;  %7134 = vmatpush.bf16.msrb.mxu1 %v10113_v14 }
 0x2b9   : > { %v13371_v44 = vld [vmem:[%s14419_s23 + $0xe64] sm:$0xf0] }
 0x2ba   : > { %v9824_v47 = vld [vmem:[%s14419_s23 + $0x808] sm:$0xf]  ;;  %v10625_v2 = vor.u32 %v13371_v44, %v10624_v43  ;;  %7148 = vmatpush.bf16.msrb.mxu2 %v10369_v24 }
 0x2bb   : > { %v13171_v50 = vld [vmem:[%s14419_s23 + $0x824] sm:$0xf0] }
 0x2bc   : > { %v10080_v59 = vld [vmem:[%s14419_s23 + $0xa08] sm:$0xf]  ;;  %v9825_v15 = vor.u32 %v13171_v50, %v9824_v47  ;;  %7162 = vmatpush.bf16.msrb.mxu3 %v10625_v2 }
 0x2bd   : > { %v13235_v62 = vld [vmem:[%s14419_s23 + $0xa24] sm:$0xf0] }
 0x2be   : > { %v10336_v1 = vld [vmem:[%s14419_s23 + $0xc08] sm:$0xf]  ;;  %v10081_v17 = vor.u32 %v13235_v62, %v10080_v59  ;;  %7121 = vmatpush.bf16.msrb.mxu0 %v9825_v15 }
 0x2bf   : > { %v13299_v40 = vld [vmem:[%s14419_s23 + $0xc24] sm:$0xf0] }
 0x2c0   : > { %v10592_v4 = vld [vmem:[%s14419_s23 + $0xe08] sm:$0xf]  ;;  %v10337_v19 = vor.u32 %v13299_v40, %v10336_v1  ;;  %7135 = vmatpush.bf16.msrb.mxu1 %v10081_v17 }
 0x2c1   : > { %v13363_v5 = vld [vmem:[%s14419_s23 + $0xe24] sm:$0xf0]  ;;  %7122 = vmatmul.bf16.vlgmr.msrb.gmra.mxu0 %v14602_v56 }
 0x2c2   : > { %v11072_v8 = vld [vmem:[%s14419_s23 + $0x11c8] sm:$0xf]  ;;  %v10593_v21 = vor.u32 %v13363_v5, %v10592_v4  ;;  %7149 = vmatpush.bf16.msrb.mxu2 %v10337_v19 }
 0x2c3   : > { %v13483_v6 = vld [vmem:[%s14419_s23 + $0x11e4] sm:$0xf0]  ;;  %7136 = vmatmul.bf16.vlgmr.msrb.gmra.mxu1 %v14609_v61 }
 0x2c4   : > { %v11328_v7 = vld [vmem:[%s14419_s23 + $0x13c8] sm:$0xf]  ;;  %v11073_v45 = vor.u32 %v13483_v6, %v11072_v8  ;;  %7163 = vmatpush.bf16.msrb.mxu3 %v10593_v21 }
 0x2c5   : > { %v13547_v12 = vld [vmem:[%s14419_s23 + $0x13e4] sm:$0xf0]  ;;  %7150 = vmatmul.bf16.vlgmr.msrb.gmra.mxu2 %v14607_v60 }
 0x2c6   : > { %v11584_v54 = vld [vmem:[%s14419_s23 + $0x15c8] sm:$0xf]  ;;  %v11329_v23 = vor.u32 %v13547_v12, %v11328_v7  ;;  %7170 = vmatpush.bf16.msra.mxu0 %v11073_v45 }
 0x2c7   : > { %v13611_v13 = vld [vmem:[%s14419_s23 + $0x15e4] sm:$0xf0]  ;;  %7164 = vmatmul.bf16.vlgmr.msrb.gmra.mxu3 %v14613_v0 }
 0x2c8   : > { %v11840_v9 = vld [vmem:[%s14419_s23 + $0x17c8] sm:$0xf]  ;;  %v11585_v25 = vor.u32 %v13611_v13, %v11584_v54  ;;  %7184 = vmatpush.bf16.msra.mxu1 %v11329_v23  ;;  %v15260_v23 = vpop.f32.mrf.mxu1 }
 0x2c9   : > { %v13675_v20 = vld [vmem:[%s14419_s23 + $0x17e4] sm:$0xf0] }
 0x2ca   : > { %v11040_v26 = vld [vmem:[%s14419_s23 + $0x1188] sm:$0xf]  ;;  %v11841_v29 = vor.u32 %v13675_v20, %v11840_v9  ;;  %7198 = vmatpush.bf16.msra.mxu2 %v11585_v25  ;;  %v15256_v20 = vpop.f32.mrf.mxu0 }
 0x2cb   : > { %v13475_v39 = vld [vmem:[%s14419_s23 + $0x11a4] sm:$0xf0] }
 0x2cc   : > { %v11296_v22 = vld [vmem:[%s14419_s23 + $0x1388] sm:$0xf]  ;;  %v11041_v31 = vor.u32 %v13475_v39, %v11040_v26  ;;  %7212 = vmatpush.bf16.msra.mxu3 %v11841_v29 }
 0x2cd   : > { %v13539_v42 = vld [vmem:[%s14419_s23 + $0x13a4] sm:$0xf0] }
 0x2ce   : > { %v11552_v28 = vld [vmem:[%s14419_s23 + $0x1588] sm:$0xf]  ;;  %v11297_v32 = vor.u32 %v13539_v42, %v11296_v22  ;;  %7171 = vmatpush.bf16.msra.mxu0 %v11041_v31 }
 0x2cf   : > { %v13603_v10 = vld [vmem:[%s14419_s23 + $0x15a4] sm:$0xf0] }
 0x2d0   : > { %v11808_v30 = vld [vmem:[%s14419_s23 + $0x1788] sm:$0xf]  ;;  %v11553_v33 = vor.u32 %v13603_v10, %v11552_v28  ;;  %7185 = vmatpush.bf16.msra.mxu1 %v11297_v32 }
 0x2d1   : > { %v13667_v16 = vld [vmem:[%s14419_s23 + $0x17a4] sm:$0xf0] }
 0x2d2   : > { %v11008_v35 = vld [vmem:[%s14419_s23 + $0x1148] sm:$0xf]  ;;  %v11809_v38 = vor.u32 %v13667_v16, %v11808_v30  ;;  %7199 = vmatpush.bf16.msra.mxu2 %v11553_v33 }
 0x2d3   : > { %v13467_v36 = vld [vmem:[%s14419_s23 + $0x1164] sm:$0xf0] }
 0x2d4   : > { %v11264_v37 = vld [vmem:[%s14419_s23 + $0x1348] sm:$0xf]  ;;  %v11009_v46 = vor.u32 %v13467_v36, %v11008_v35  ;;  %7213 = vmatpush.bf16.msra.mxu3 %v11809_v38 }
 0x2d5   : > { %v13531_v51 = vld [vmem:[%s14419_s23 + $0x1364] sm:$0xf0] }
 0x2d6   : > { %v11520_v41 = vld [vmem:[%s14419_s23 + $0x1548] sm:$0xf]  ;;  %v11265_v47 = vor.u32 %v13531_v51, %v11264_v37  ;;  %7172 = vmatpush.bf16.msra.mxu0 %v11009_v46 }
 0x2d7   : > { %v13595_v3 = vld [vmem:[%s14419_s23 + $0x1564] sm:$0xf0] }
 0x2d8   : > { %v11776_v43 = vld [vmem:[%s14419_s23 + $0x1748] sm:$0xf]  ;;  %v11521_v50 = vor.u32 %v13595_v3, %v11520_v41  ;;  %7186 = vmatpush.bf16.msra.mxu1 %v11265_v47  ;;  %v15273_v41 = vpop.f32.mrf.mxu2  ;;  %v15278_v47 = vpop.f32.mrf.mxu3 }
 0x2d9   : > { %v13659_v44 = vld [vmem:[%s14419_s23 + $0x1764] sm:$0xf0] }
 0x2da   : > { %v10976_v14 = vld [vmem:[%s14419_s23 + $0x1108] sm:$0xf]  ;;  %v11777_v62 = vor.u32 %v13659_v44, %v11776_v43  ;;  %7200 = vmatpush.bf16.msra.mxu2 %v11521_v50 }
 0x2db   : > { %v13459_v24 = vld [vmem:[%s14419_s23 + $0x1124] sm:$0xf0] }
 0x2dc   : > { %v11232_v59 = vld [vmem:[%s14419_s23 + $0x1308] sm:$0xf]  ;;  %v10977_v8 = vor.u32 %v13459_v24, %v10976_v14  ;;  %7214 = vmatpush.bf16.msra.mxu3 %v11777_v62 }
 0x2dd   : > { %v13523_v1 = vld [vmem:[%s14419_s23 + $0x1324] sm:$0xf0] }
 0x2de   : > { %v11488_v2 = vld [vmem:[%s14419_s23 + $0x1508] sm:$0xf]  ;;  %v11233_v6 = vor.u32 %v13523_v1, %v11232_v59  ;;  %7173 = vmatpush.bf16.msra.mxu0 %v10977_v8  ;;  %v15284_v1 = vpop.f32.mrf.mxu0 }
 0x2df   : > { %v13587_v40 = vld [vmem:[%s14419_s23 + $0x1524] sm:$0xf0] }
 0x2e0   : > { %v11744_v4 = vld [vmem:[%s14419_s23 + $0x1708] sm:$0xf]  ;;  %v11489_v7 = vor.u32 %v13587_v40, %v11488_v2  ;;  %7187 = vmatpush.bf16.msra.mxu1 %v11233_v6  ;;  %v15289_v6 = vpop.f32.mrf.mxu1 }
 0x2e1   : > { %v13651_v5 = vld [vmem:[%s14419_s23 + $0x1724] sm:$0xf0] }
 0x2e2   : > { %v10944_v15 = vld [vmem:[%s14419_s23 + $0x10c8] sm:$0xf]  ;;  %v11745_v13 = vor.u32 %v13651_v5, %v11744_v4  ;;  %7201 = vmatpush.bf16.msra.mxu2 %v11489_v7 }
 0x2e3   : > { %v13451_v12 = vld [vmem:[%s14419_s23 + $0x10e4] sm:$0xf0] }
 0x2e4   : > { %v11200_v54 = vld [vmem:[%s14419_s23 + $0x12c8] sm:$0xf]  ;;  %v10945_v25 = vor.u32 %v13451_v12, %v10944_v15  ;;  %7215 = vmatpush.bf16.msra.mxu3 %v11745_v13 }
 0x2e5   : > { %v13515_v17 = vld [vmem:[%s14419_s23 + $0x12e4] sm:$0xf0] }
 0x2e6   : > { %v11456_v19 = vld [vmem:[%s14419_s23 + $0x14c8] sm:$0xf]  ;;  %v11201_v26 = vor.u32 %v13515_v17, %v11200_v54  ;;  %7174 = vmatpush.bf16.msra.mxu0 %v10945_v25 }
 0x2e7   : > { %v13579_v9 = vld [vmem:[%s14419_s23 + $0x14e4] sm:$0xf0] }
 0x2e8   : > { %v11712_v21 = vld [vmem:[%s14419_s23 + $0x16c8] sm:$0xf]  ;;  %v11457_v39 = vor.u32 %v13579_v9, %v11456_v19  ;;  %7188 = vmatpush.bf16.msra.mxu1 %v11201_v26 }
 0x2e9   : > { %v13643_v45 = vld [vmem:[%s14419_s23 + $0x16e4] sm:$0xf0] }
 0x2ea   : > { %v10912_v22 = vld [vmem:[%s14419_s23 + $0x1088] sm:$0xf]  ;;  %v11713_v28 = vor.u32 %v13643_v45, %v11712_v21  ;;  %7202 = vmatpush.bf16.msra.mxu2 %v11457_v39 }
 0x2eb   : > { %v13443_v29 = vld [vmem:[%s14419_s23 + $0x10a4] sm:$0xf0] }
 0x2ec   : > { %v11168_v42 = vld [vmem:[%s14419_s23 + $0x1288] sm:$0xf]  ;;  %v10913_v33 = vor.u32 %v13443_v29, %v10912_v22  ;;  %7216 = vmatpush.bf16.msra.mxu3 %v11713_v28 }
 0x2ed   : > { %v13507_v10 = vld [vmem:[%s14419_s23 + $0x12a4] sm:$0xf0] }
 0x2ee   : > { %v11424_v30 = vld [vmem:[%s14419_s23 + $0x1488] sm:$0xf]  ;;  %v11169_v35 = vor.u32 %v13507_v10, %v11168_v42  ;;  %7175 = vmatpush.bf16.msra.mxu0 %v10913_v33  ;;  %v15305_v33 = vpop.f32.mrf.mxu2 }
 0x2ef   : > { %v13571_v16 = vld [vmem:[%s14419_s23 + $0x14a4] sm:$0xf0] }
 0x2f0   : > { %v11680_v31 = vld [vmem:[%s14419_s23 + $0x1688] sm:$0xf]  ;;  %v11425_v36 = vor.u32 %v13571_v16, %v11424_v30  ;;  %7189 = vmatpush.bf16.msra.mxu1 %v11169_v35 }
 0x2f1   : > { %v13635_v32 = vld [vmem:[%s14419_s23 + $0x16a4] sm:$0xf0] }
 0x2f2   : > { %v10880_v37 = vld [vmem:[%s14419_s23 + $0x1048] sm:$0xf]  ;;  %v11681_v3 = vor.u32 %v13635_v32, %v11680_v31  ;;  %7203 = vmatpush.bf16.msra.mxu2 %v11425_v36 }
 0x2f3   : > { %v13435_v38 = vld [vmem:[%s14419_s23 + $0x1064] sm:$0xf0] }
 0x2f4   : > { %v11136_v51 = vld [vmem:[%s14419_s23 + $0x1248] sm:$0xf]  ;;  %v10881_v24 = vor.u32 %v13435_v38, %v10880_v37  ;;  %7217 = vmatpush.bf16.msra.mxu3 %v11681_v3 }
 0x2f5   : > { %v13499_v43 = vld [vmem:[%s14419_s23 + $0x1264] sm:$0xf0] }
 0x2f6   : > { %v11392_v44 = vld [vmem:[%s14419_s23 + $0x1448] sm:$0xf]  ;;  %v11137_v2 = vor.u32 %v13499_v43, %v11136_v51  ;;  %7176 = vmatpush.bf16.msra.mxu0 %v10881_v24  ;;  %v15310_v51 = vpop.f32.mrf.mxu3 }
 0x2f7   : > { %v13563_v46 = vld [vmem:[%s14419_s23 + $0x1464] sm:$0xf0] }
 0x2f8   : > { %v11648_v50 = vld [vmem:[%s14419_s23 + $0x1648] sm:$0xf]  ;;  %v11393_v40 = vor.u32 %v13563_v46, %v11392_v44  ;;  %7190 = vmatpush.bf16.msra.mxu1 %v11137_v2  ;;  %v6858_v46 = vadd.f32 %v15260_v23, %v15256_v20 }
 0x2f9   : > { %v13627_v14 = vld [vmem:[%s14419_s23 + $0x1664] sm:$0xf0] }
 0x2fa   : > { %v10848_v59 = vld [vmem:[%s14419_s23 + $0x1008] sm:$0xf]  ;;  %v11649_v7 = vor.u32 %v13627_v14, %v11648_v50  ;;  %7204 = vmatpush.bf16.msra.mxu2 %v11393_v40  ;;  %v6899_v50 = vpop.f32.mrf.mxu0  ;;  %v15319_v40 = vpop.f32.mrf.mxu1 }
 0x2fb   : > { %v13427_v62 = vld [vmem:[%s14419_s23 + $0x1024] sm:$0xf0] }
 0x2fc   : > { %v11104_v4 = vld [vmem:[%s14419_s23 + $0x1208] sm:$0xf]  ;;  %v10849_v9 = vor.u32 %v13427_v62, %v10848_v59  ;;  %7218 = vmatpush.bf16.msra.mxu3 %v11649_v7 }
 0x2fd   : > { %v13491_v5 = vld [vmem:[%s14419_s23 + $0x1224] sm:$0xf0] }
 0x2fe   : > { %v11360_v8 = vld [vmem:[%s14419_s23 + $0x1408] sm:$0xf]  ;;  %v11105_v26 = vor.u32 %v13491_v5, %v11104_v4  ;;  %7177 = vmatpush.bf16.msra.mxu0 %v10849_v9 }
 0x2ff   : > { %v13555_v15 = vld [vmem:[%s14419_s23 + $0x1424] sm:$0xf0] }
 0x300   : > { %v11616_v12 = vld [vmem:[%s14419_s23 + $0x1608] sm:$0xf]  ;;  %v11361_v39 = vor.u32 %v13555_v15, %v11360_v8  ;;  %7191 = vmatpush.bf16.msra.mxu1 %v11105_v26 }
 0x301   : > { %v13619_v54 = vld [vmem:[%s14419_s23 + $0x1624] sm:$0xf0]  ;;  %7178 = vmatmul.bf16.vlgmr.msra.gmra.mxu0 %v14686_v48 }
 0x302   : > { %v12096_v13 = vld [vmem:[%s14419_s23 + $0x19c8] sm:$0xf]  ;;  %v11617_v42 = vor.u32 %v13619_v54, %v11616_v12  ;;  %7205 = vmatpush.bf16.msra.mxu2 %v11361_v39  ;;  %v6872_v12 = vadd.f32 %v15273_v41, %v6858_v46  ;;  %v15339_v41 = vpop.f32.mrf.mxu2  ;;  %v15354_v46 = vpop.f32.mrf.mxu1 }
 0x303   : > { %v13739_v17 = vld [vmem:[%s14419_s23 + $0x19e4] sm:$0xf0]  ;;  %7192 = vmatmul.bf16.vlgmr.msra.gmra.mxu1 %v14693_v53 }
 0x304   : > { %v12352_v19 = vld [vmem:[%s14419_s23 + $0x1bc8] sm:$0xf]  ;;  %v12097_v28 = vor.u32 %v13739_v17, %v12096_v13  ;;  %7219 = vmatpush.bf16.msra.mxu3 %v11617_v42  ;;  %v6886_v42 = vadd.f32 %v15278_v47, %v6872_v12 }
 0x305   : > { %v13803_v21 = vld [vmem:[%s14419_s23 + $0x1be4] sm:$0xf0]  ;;  %7206 = vmatmul.bf16.vlgmr.msra.gmra.mxu2 %v14691_v52 }
 0x306   : > { %v12608_v45 = vld [vmem:[%s14419_s23 + $0x1dc8] sm:$0xf]  ;;  %v12353_v10 = vor.u32 %v13803_v21, %v12352_v19  ;;  %7226 = vmatpush.bf16.msrb.mxu0 %v12097_v28  ;;  %v15342_v28 = vpop.f32.mrf.mxu3 }
 0x307   : > { %v13867_v25 = vld [vmem:[%s14419_s23 + $0x1de4] sm:$0xf0]  ;;  %7220 = vmatmul.bf16.vlgmr.msra.gmra.mxu3 %v14697_v57 }
 0x308   : > { %v12864_v22 = vld [vmem:[%s14419_s23 + $0x1fc8] sm:$0xf]  ;;  %v12609_v30 = vor.u32 %v13867_v25, %v12608_v45  ;;  %7240 = vmatpush.bf16.msrb.mxu1 %v12353_v10 }
 0x309   : > { %v13931_v29 = vld [vmem:[%s14419_s23 + $0x1fe4] sm:$0xf0] }
 0x30a   : > { %v12064_v16 = vld [vmem:[%s14419_s23 + $0x1988] sm:$0xf]  ;;  %v12865_v35 = vor.u32 %v13931_v29, %v12864_v22  ;;  %7254 = vmatpush.bf16.msrb.mxu2 %v12609_v30 }
 0x30b   : > { %v13731_v31 = vld [vmem:[%s14419_s23 + $0x19a4] sm:$0xf0] }
 0x30c   : > { %v12320_v32 = vld [vmem:[%s14419_s23 + $0x1b88] sm:$0xf]  ;;  %v12065_v44 = vor.u32 %v13731_v31, %v12064_v16  ;;  %7268 = vmatpush.bf16.msrb.mxu3 %v12865_v35 }
 0x30d   : > { %v13795_v36 = vld [vmem:[%s14419_s23 + $0x1ba4] sm:$0xf0] }
 0x30e   : > { %v12576_v37 = vld [vmem:[%s14419_s23 + $0x1d88] sm:$0xf]  ;;  %v12321_v14 = vor.u32 %v13795_v36, %v12320_v32  ;;  %7227 = vmatpush.bf16.msrb.mxu0 %v12065_v44  ;;  %v6860_v44 = vadd.f32 %v15289_v6, %v15284_v1 }
 0x30f   : > { %v13859_v38 = vld [vmem:[%s14419_s23 + $0x1da4] sm:$0xf0] }
 0x310   : > { %v12832_v3 = vld [vmem:[%s14419_s23 + $0x1f88] sm:$0xf]  ;;  %v12577_v24 = vor.u32 %v13859_v38, %v12576_v37  ;;  %7241 = vmatpush.bf16.msrb.mxu1 %v12321_v14 }
 0x311   : > { %v13923_v43 = vld [vmem:[%s14419_s23 + $0x1fa4] sm:$0xf0] }
 0x312   : > { %v12032_v59 = vld [vmem:[%s14419_s23 + $0x1948] sm:$0xf]  ;;  %v12833_v4 = vor.u32 %v13923_v43, %v12832_v3  ;;  %7255 = vmatpush.bf16.msrb.mxu2 %v12577_v24  ;;  %v6901_v3 = vpop.f32.mrf.mxu0  ;;  %v6900_v24 = vadd.f32 %v6899_v50, %v6886_v42  ;;  %v6874_v50 = vadd.f32 %v15305_v33, %v6860_v44 }
 0x313   : > { %v13723_v62 = vld [vmem:[%s14419_s23 + $0x1964] sm:$0xf0] }
 0x314   : > { %v12288_v2 = vld [vmem:[%s14419_s23 + $0x1b48] sm:$0xf]  ;;  %v12033_v15 = vor.u32 %v13723_v62, %v12032_v59  ;;  %7269 = vmatpush.bf16.msrb.mxu3 %v12833_v4  ;;  %v6914_v12 = vadd.f32 %v15319_v40, %v6900_v24  ;;  %v6888_v42 = vadd.f32 %v15310_v51, %v6874_v50 }
 0x315   : > { %v13787_v5 = vld [vmem:[%s14419_s23 + $0x1b64] sm:$0xf0] }
 0x316   : > { %v12544_v20 = vld [vmem:[%s14419_s23 + $0x1d48] sm:$0xf]  ;;  %v12289_v54 = vor.u32 %v13787_v5, %v12288_v2  ;;  %7228 = vmatpush.bf16.msrb.mxu0 %v12033_v15  ;;  %v6902_v24 = vadd.f32 %v6901_v3, %v6888_v42  ;;  %v9794_v3 = vld [vmem:[%s14419_s23 + $0x7e8] sm:$0xf0] }
 0x317   : > { %v13851_v23 = vld [vmem:[%s14419_s23 + $0x1d64] sm:$0xf0] }
 0x318   : > { %v12800_v8 = vld [vmem:[%s14419_s23 + $0x1f48] sm:$0xf]  ;;  %v12545_v13 = vor.u32 %v13851_v23, %v12544_v20  ;;  %7242 = vmatpush.bf16.msrb.mxu1 %v12289_v54 }
 0x319   : > { %v13915_v7 = vld [vmem:[%s14419_s23 + $0x1f64] sm:$0xf0] }
 0x31a   : > { %v12000_v17 = vld [vmem:[%s14419_s23 + $0x1908] sm:$0xf]  ;;  %v12801_v21 = vor.u32 %v13915_v7, %v12800_v8  ;;  %7256 = vmatpush.bf16.msrb.mxu2 %v12545_v13  ;;  %v6955_v40 = vpop.f32.mrf.mxu0 }
 0x31b   : > { %v13715_v19 = vld [vmem:[%s14419_s23 + $0x1924] sm:$0xf0] }
 0x31c   : > { %v12256_v9 = vld [vmem:[%s14419_s23 + $0x1b08] sm:$0xf]  ;;  %v12001_v29 = vor.u32 %v13715_v19, %v12000_v17  ;;  %7270 = vmatpush.bf16.msrb.mxu3 %v12801_v21  ;;  %v6929_v21 = vpop.f32.mrf.mxu2 }
 0x31d   : > { %v13779_v45 = vld [vmem:[%s14419_s23 + $0x1b24] sm:$0xf0] }
 0x31e   : > { %v12512_v25 = vld [vmem:[%s14419_s23 + $0x1d08] sm:$0xf]  ;;  %v12257_v10 = vor.u32 %v13779_v45, %v12256_v9  ;;  %7229 = vmatpush.bf16.msrb.mxu0 %v12001_v29 }
 0x31f   : > { %v13843_v26 = vld [vmem:[%s14419_s23 + $0x1d24] sm:$0xf0] }
 0x320   : > { %v12768_v39 = vld [vmem:[%s14419_s23 + $0x1f08] sm:$0xf]  ;;  %v12513_v30 = vor.u32 %v13843_v26, %v12512_v25  ;;  %7243 = vmatpush.bf16.msrb.mxu1 %v12257_v10  ;;  %v6969_v10 = vpop.f32.mrf.mxu1 }
 0x321   : > { %v13907_v22 = vld [vmem:[%s14419_s23 + $0x1f24] sm:$0xf0] }
 0x322   : > { %v11968_v16 = vld [vmem:[%s14419_s23 + $0x18c8] sm:$0xf]  ;;  %v12769_v35 = vor.u32 %v13907_v22, %v12768_v39  ;;  %7257 = vmatpush.bf16.msrb.mxu2 %v12513_v30  ;;  %v15372_v39 = vpop.f32.mrf.mxu3  ;;  %v6957_v42 = vpop.f32.mrf.mxu0 }
 0x323   : > { %v13707_v31 = vld [vmem:[%s14419_s23 + $0x18e4] sm:$0xf0] }
 0x324   : > { %v12224_v32 = vld [vmem:[%s14419_s23 + $0x1ac8] sm:$0xf]  ;;  %v11969_v14 = vor.u32 %v13707_v31, %v11968_v16  ;;  %7271 = vmatpush.bf16.msrb.mxu3 %v12769_v35 }
 0x325   : > { %v13771_v36 = vld [vmem:[%s14419_s23 + $0x1ae4] sm:$0xf0] }
 0x326   : > { %v12480_v37 = vld [vmem:[%s14419_s23 + $0x1cc8] sm:$0xf]  ;;  %v12225_v59 = vor.u32 %v13771_v36, %v12224_v32  ;;  %7230 = vmatpush.bf16.msrb.mxu0 %v11969_v14  ;;  %v6928_v32 = vadd.f32 %v15339_v41, %v6914_v12  ;;  %v12967_v41 = vld [vmem:[%s14419_s23 + $0x1cc] sm:$0xf]  ;;  %v6916_v12 = vadd.f32 %v15354_v46, %v6902_v24 }
 0x327   : > { %v13835_v38 = vld [vmem:[%s14419_s23 + $0x1ce4] sm:$0xf0]  ;;  %v13151_v46 = vld [vmem:[%s14419_s23 + $0x78c] sm:$0xf] }
 0x328   : > { %v12736_v47 = vld [vmem:[%s14419_s23 + $0x1ec8] sm:$0xf]  ;;  %v12481_v62 = vor.u32 %v13835_v38, %v12480_v37  ;;  %7244 = vmatpush.bf16.msrb.mxu1 %v12225_v59  ;;  %v9026_v59 = vld [vmem:[%s14419_s23 + $0x1e8] sm:$0xf0] }
 0x329   : > { %v13899_v43 = vld [vmem:[%s14419_s23 + $0x1ee4] sm:$0xf0]  ;;  %v9730_v24 = vld [vmem:[%s14419_s23 + $0x768] sm:$0xf0] }
 0x32a   : > { %v11936_v2 = vld [vmem:[%s14419_s23 + $0x1888] sm:$0xf]  ;;  %v12737_v20 = vor.u32 %v13899_v43, %v12736_v47  ;;  %7258 = vmatpush.bf16.msrb.mxu2 %v12481_v62  ;;  %v13031_v62 = vld [vmem:[%s14419_s23 + $0x3cc] sm:$0xf] }
 0x32b   : > { %v13699_v4 = vld [vmem:[%s14419_s23 + $0x18a4] sm:$0xf0] }
 0x32c   : > { %v12192_v5 = vld [vmem:[%s14419_s23 + $0x1a88] sm:$0xf]  ;;  %v11937_v15 = vor.u32 %v13699_v4, %v11936_v2  ;;  %7272 = vmatpush.bf16.msrb.mxu3 %v12737_v20  ;;  %v9282_v4 = vld [vmem:[%s14419_s23 + $0x3e8] sm:$0xf0] }
 0x32d   : > { %v13763_v1 = vld [vmem:[%s14419_s23 + $0x1aa4] sm:$0xf0]  ;;  %v9538_v20 = vld [vmem:[%s14419_s23 + $0x5e8] sm:$0xf0] }
 0x32e   : > { %v12448_v6 = vld [vmem:[%s14419_s23 + $0x1c88] sm:$0xf]  ;;  %v12193_v54 = vor.u32 %v13763_v1, %v12192_v5  ;;  %7231 = vmatpush.bf16.msrb.mxu0 %v11937_v15  ;;  %v13095_v5 = vld [vmem:[%s14419_s23 + $0x5cc] sm:$0xf]  ;;  %v6942_v1 = vadd.f32 %v15342_v28, %v6928_v32  ;;  %v9029_v15 = vor.u32 %v12967_v41, %v9026_v59  ;;  %v6997_v28 = vpop.f32.mrf.mxu3 }
 0x32f   : > { %v13827_v23 = vld [vmem:[%s14419_s23 + $0x1ca4] sm:$0xf0]  ;;  %v12943_v59 = vld [vmem:[%s14419_s23 + $0x10c] sm:$0xf] }
 0x330   : > { %v12704_v8 = vld [vmem:[%s14419_s23 + $0x1e88] sm:$0xf]  ;;  %v12449_v13 = vor.u32 %v13827_v23, %v12448_v6  ;;  %7245 = vmatpush.bf16.msrb.mxu1 %v12193_v54  ;;  %v6956_v54 = vadd.f32 %v6955_v40, %v6942_v1  ;;  %v9762_v40 = vld [vmem:[%s14419_s23 + $0x7a8] sm:$0xf0] }
 0x331   : > { %v13891_v7 = vld [vmem:[%s14419_s23 + $0x1ea4] sm:$0xf0] }
 0x332   : > { %v11904_v17 = vld [vmem:[%s14419_s23 + $0x1848] sm:$0xf]  ;;  %v12705_v45 = vor.u32 %v13891_v7, %v12704_v8  ;;  %7259 = vmatpush.bf16.msrb.mxu2 %v12449_v13  ;;  %v13159_v8 = vld [vmem:[%s14419_s23 + $0x7cc] sm:$0xf]  ;;  %v6983_v7 = vpop.f32.mrf.mxu2  ;;  %v9285_v13 = vor.u32 %v13031_v62, %v9282_v4 }
 0x333   : > { %v13691_v19 = vld [vmem:[%s14419_s23 + $0x1864] sm:$0xf0]  ;;  %v8930_v4 = vld [vmem:[%s14419_s23 + $0x128] sm:$0xf0] }
 0x334   : > { %v12160_v9 = vld [vmem:[%s14419_s23 + $0x1a48] sm:$0xf]  ;;  %v11905_v30 = vor.u32 %v13691_v19, %v11904_v17  ;;  %7273 = vmatpush.bf16.msrb.mxu3 %v12705_v45  ;;  %v9541_v17 = vor.u32 %v13095_v5, %v9538_v20  ;;  %v12959_v19 = vld [vmem:[%s14419_s23 + $0x18c] sm:$0xf] }
 0x335   : > { %v13755_v33 = vld [vmem:[%s14419_s23 + $0x1a64] sm:$0xf0]  ;;  %v13023_v45 = vld [vmem:[%s14419_s23 + $0x38c] sm:$0xf] }
 0x336   : > { %v12416_v25 = vld [vmem:[%s14419_s23 + $0x1c48] sm:$0xf]  ;;  %v12161_v35 = vor.u32 %v13755_v33, %v12160_v9  ;;  %7232 = vmatpush.bf16.msrb.mxu0 %v11905_v30  ;;  %v8994_v9 = vld [vmem:[%s14419_s23 + $0x1a8] sm:$0xf0]  ;;  %v9797_v33 = vor.u32 %v13159_v8, %v9794_v3  ;;  %v6971_v30 = vpop.f32.mrf.mxu1 }
 0x337   : > { %v13819_v26 = vld [vmem:[%s14419_s23 + $0x1c64] sm:$0xf0]  ;;  %v13007_v5 = vld [vmem:[%s14419_s23 + $0x30c] sm:$0xf] }
 0x338   : > { %v12672_v22 = vld [vmem:[%s14419_s23 + $0x1e48] sm:$0xf]  ;;  %v12417_v36 = vor.u32 %v13819_v26, %v12416_v25  ;;  %7246 = vmatpush.bf16.msrb.mxu1 %v12161_v35  ;;  %v9250_v25 = vld [vmem:[%s14419_s23 + $0x3a8] sm:$0xf0] }
 0x339   : > { %v13883_v29 = vld [vmem:[%s14419_s23 + $0x1e64] sm:$0xf0]  ;;  %v13087_v26 = vld [vmem:[%s14419_s23 + $0x58c] sm:$0xf]  ;;  %v9253_v32 = vor.u32 %v13023_v45, %v9250_v25 }
 0x33a   : > { %v11872_v16 = vld [vmem:[%s14419_s23 + $0x1808] sm:$0xf]  ;;  %v12673_v47 = vor.u32 %v13883_v29, %v12672_v22  ;;  %7260 = vmatpush.bf16.msrb.mxu2 %v12417_v36  ;;  %v9506_v22 = vld [vmem:[%s14419_s23 + $0x5a8] sm:$0xf0]  ;;  %v6930_v29 = vadd.f32 %v6929_v21, %v6916_v12  ;;  %v6985_v1 = vpop.f32.mrf.mxu2 }
 0x33b   : > { %v13683_v31 = vld [vmem:[%s14419_s23 + $0x1824] sm:$0xf0]  ;;  %v9509_v21 = vor.u32 %v13087_v26, %v9506_v22  ;;  %v12951_v35 = vld [vmem:[%s14419_s23 + $0x14c] sm:$0xf] }
 0x33c   : > { %v12128_v51 = vld [vmem:[%s14419_s23 + $0x1a08] sm:$0xf]  ;;  %v11873_v2 = vor.u32 %v13683_v31, %v11872_v16  ;;  %7274 = vmatpush.bf16.msrb.mxu3 %v12673_v47  ;;  %v8997_v16 = vor.u32 %v12959_v19, %v8994_v9  ;;  %v6970_v31 = vadd.f32 %v6969_v10, %v6956_v54  ;;  %v8962_v36 = vld [vmem:[%s14419_s23 + $0x168] sm:$0xf0]  ;;  %v6944_v10 = vadd.f32 %v15372_v39, %v6930_v29 }
 0x33d   : > { %v13747_v37 = vld [vmem:[%s14419_s23 + $0x1a24] sm:$0xf0]  ;;  %v13079_v47 = vld [vmem:[%s14419_s23 + $0x54c] sm:$0xf]  ;;  %v8965_v41 = vor.u32 %v12951_v35, %v8962_v36  ;;  %v8933_v54 = vor.u32 %v12943_v59, %v8930_v4 }
 0x33e   : > { %v12384_v38 = vld [vmem:[%s14419_s23 + $0x1c08] sm:$0xf]  ;;  %v12129_v6 = vor.u32 %v13747_v37, %v12128_v51  ;;  %7233 = vmatpush.bf16.msrb.mxu0 %v11873_v2  ;;  %v13015_v51 = vld [vmem:[%s14419_s23 + $0x34c] sm:$0xf]  ;;  %v9765_v37 = vor.u32 %v13151_v46, %v9762_v40  ;;  %v6958_v62 = vadd.f32 %v6957_v42, %v6944_v10 }
 0x33f   : > { %v13811_v43 = vld [vmem:[%s14419_s23 + $0x1c24] sm:$0xf0]  ;;  %v9186_v20 = vld [vmem:[%s14419_s23 + $0x328] sm:$0xf0] }
 0x340   : > { %v12640_v44 = vld [vmem:[%s14419_s23 + $0x1e08] sm:$0xf]  ;;  %v12385_v23 = vor.u32 %v13811_v43, %v12384_v38  ;;  %7247 = vmatpush.bf16.msrb.mxu1 %v12129_v6  ;;  %v9218_v38 = vld [vmem:[%s14419_s23 + $0x368] sm:$0xf0]  ;;  %v6972_v19 = vadd.f32 %v6971_v30, %v6958_v62 }
 0x341   : > { %v13875_v14 = vld [vmem:[%s14419_s23 + $0x1e24] sm:$0xf0]  ;;  %7234 = vmatmul.bf16.vlgmr.msrb.gmra.mxu0 %v14770_v49  ;;  %v9474_v43 = vld [vmem:[%s14419_s23 + $0x568] sm:$0xf0]  ;;  %v9221_v39 = vor.u32 %v13015_v51, %v9218_v38 }
 0x342   : > { %v12641_v50 = vor.u32 %v13875_v14, %v12640_v44  ;;  %7261 = vmatpush.bf16.msrb.mxu2 %v12385_v23  ;;  %7282 = vmatpush.bf16.msra.mxu0 %v9029_v15  ;;  %v6984_v44 = vadd.f32 %v6983_v7, %v6970_v31  ;;  %v13143_v14 = vld [vmem:[%s14419_s23 + $0x74c] sm:$0xf]  ;;  %v9477_v2 = vor.u32 %v13079_v47, %v9474_v43  ;;  %v6999_v7 = vpop.f32.mrf.mxu3  ;;  %v7039_v47 = vpop.f32.mrf.mxu2 }
 0x343   : > { %7248 = vmatmul.bf16.vlgmr.msrb.gmra.mxu1 %v14777_v58  ;;  %v9733_v6 = vor.u32 %v13143_v14, %v9730_v24  ;;  %v13071_v23 = vld [vmem:[%s14419_s23 + $0x50c] sm:$0xf]  ;;  %v6986_v46 = vadd.f32 %v6985_v1, %v6972_v19 }
 0x344   : > { %7275 = vmatpush.bf16.msrb.mxu3 %v12641_v50  ;;  %7296 = vmatpush.bf16.msra.mxu1 %v9285_v13  ;;  %v9442_v8 = vld [vmem:[%s14419_s23 + $0x528] sm:$0xf0]  ;;  %v6998_v3 = vadd.f32 %v6997_v28, %v6984_v44  ;;  %v7011_v50 = vpop.f32.mrf.mxu0  ;;  %v9189_v13 = vor.u32 %v13007_v5, %v9186_v20 }
 0x345   : > { %7262 = vmatmul.bf16.vlgmr.msrb.gmra.mxu2 %v14775_v55  ;;  %v13135_v15 = vld [vmem:[%s14419_s23 + $0x70c] sm:$0xf]  ;;  %v9445_v28 = vor.u32 %v13071_v23, %v9442_v8  ;;  %v7000_v44 = vadd.f32 %v6999_v7, %v6986_v46 }
 0x346   : > { %7310 = vmatpush.bf16.msra.mxu2 %v9541_v17  ;;  %7283 = vmatpush.bf16.msra.mxu0 %v8997_v16  ;;  %v9698_v12 = vld [vmem:[%s14419_s23 + $0x728] sm:$0xf0]  ;;  %v7025_v17 = vpop.f32.mrf.mxu1  ;;  %v7012_v9 = vadd.f32 %v7011_v50, %v6998_v3 }
 0x347   : > { %7276 = vmatmul.bf16.vlgmr.msrb.gmra.mxu3 %v14781_v63  ;;  %v12935_v45 = vld [vmem:[%s14419_s23 + $0xcc] sm:$0xf]  ;;  %v9701_v26 = vor.u32 %v13135_v15, %v9698_v12 }
 0x348   : > { %7324 = vmatpush.bf16.msra.mxu3 %v9797_v33  ;;  %7297 = vmatpush.bf16.msra.mxu1 %v9253_v32  ;;  %v8898_v33 = vld [vmem:[%s14419_s23 + $0xe8] sm:$0xf0]  ;;  %v7026_v32 = vadd.f32 %v7025_v17, %v7012_v9 }
 0x349   : > { %v12999_v25 = vld [vmem:[%s14419_s23 + $0x2cc] sm:$0xf]  ;;  %v8901_v16 = vor.u32 %v12935_v45, %v8898_v33 }
 0x34a   : > { %7311 = vmatpush.bf16.msra.mxu2 %v9509_v21  ;;  %7284 = vmatpush.bf16.msra.mxu0 %v8965_v41  ;;  %v9154_v22 = vld [vmem:[%s14419_s23 + $0x2e8] sm:$0xf0]  ;;  %v7040_v14 = vadd.f32 %v7039_v47, %v7026_v32  ;;  %v7053_v41 = vpop.f32.mrf.mxu3  ;;  %v7041_v46 = vpop.f32.mrf.mxu2 }
 0x34b   : > { %v13063_v29 = vld [vmem:[%s14419_s23 + $0x4cc] sm:$0xf]  ;;  %v9157_v21 = vor.u32 %v12999_v25, %v9154_v22 }
 0x34c   : > { %7325 = vmatpush.bf16.msra.mxu3 %v9765_v37  ;;  %7298 = vmatpush.bf16.msra.mxu1 %v9221_v39  ;;  %v9410_v42 = vld [vmem:[%s14419_s23 + $0x4e8] sm:$0xf0]  ;;  %v7013_v24 = vpop.f32.mrf.mxu0  ;;  %v355_v39 = vld [vmem:[#allocation2] sm:$0xff]  ;;  %v7054_v20 = vadd.f32 %v7053_v41, %v7040_v14 }
 0x34d   : > { %v13127_v40 = vld [vmem:[%s14419_s23 + $0x6cc] sm:$0xf]  ;;  %v9413_v35 = vor.u32 %v13063_v29, %v9410_v42  ;;  %v7014_v5 = vadd.f32 %v7013_v24, %v7000_v44 }
 0x34e   : > { %7312 = vmatpush.bf16.msra.mxu2 %v9477_v2  ;;  %v9666_v30 = vld [vmem:[%s14419_s23 + $0x6e8] sm:$0xf0]  ;;  %7285 = vmatpush.bf16.msra.mxu0 %v8933_v54  ;;  %v7027_v7 = vpop.f32.mrf.mxu1  ;;  %v8403_v54 = vadd.f32 %v7054_v20, %v355_v39 }
 0x34f   : > { %v12927_v31 = vld [vmem:[%s14419_s23 + $0x8c] sm:$0xf]  ;;  %v9669_v38 = vor.u32 %v13127_v40, %v9666_v30  ;;  %v7028_v33 = vadd.f32 %v7027_v7, %v7014_v5  ;;  %v363_v40 = vld [vmem:[#allocation2 + $0x20] sm:$0xff] }
 0x350   : > { %7326 = vmatpush.bf16.msra.mxu3 %v9733_v6  ;;  %7299 = vmatpush.bf16.msra.mxu1 %v9189_v13  ;;  %v8866_v36 = vld [vmem:[%s14419_s23 + $0xa8] sm:$0xf0]  ;;  %8419 = vst [vmem:[#allocation2] sm:$0xff] %v8403_v54 }
 0x351   : > { %v12991_v51 = vld [vmem:[%s14419_s23 + $0x28c] sm:$0xf]  ;;  %v8869_v2 = vor.u32 %v12927_v31, %v8866_v36  ;;  %v7042_v32 = vadd.f32 %v7041_v46, %v7028_v33 }
 0x352   : > { %7313 = vmatpush.bf16.msra.mxu2 %v9445_v28  ;;  %v9122_v37 = vld [vmem:[%s14419_s23 + $0x2a8] sm:$0xf0]  ;;  %7286 = vmatpush.bf16.msra.mxu0 %v8901_v16 }
 0x353   : > { %v13055_v43 = vld [vmem:[%s14419_s23 + $0x48c] sm:$0xf]  ;;  %v9125_v4 = vor.u32 %v12991_v51, %v9122_v37 }
 0x354   : > { %7327 = vmatpush.bf16.msra.mxu3 %v9701_v26  ;;  %v9378_v10 = vld [vmem:[%s14419_s23 + $0x4a8] sm:$0xf0]  ;;  %7300 = vmatpush.bf16.msra.mxu1 %v9157_v21  ;;  %v7055_v21 = vpop.f32.mrf.mxu3 }
 0x355   : > { %v13119_v59 = vld [vmem:[%s14419_s23 + $0x68c] sm:$0xf]  ;;  %v9381_v1 = vor.u32 %v13055_v43, %v9378_v10  ;;  %v7056_v10 = vadd.f32 %v7055_v21, %v7042_v32 }
 0x356   : > { %v9634_v62 = vld [vmem:[%s14419_s23 + $0x6a8] sm:$0xf0]  ;;  %7314 = vmatpush.bf16.msra.mxu2 %v9413_v35  ;;  %7287 = vmatpush.bf16.msra.mxu0 %v8869_v2 }
 0x357   : > { %v12919_v6 = vld [vmem:[%s14419_s23 + $0x4c] sm:$0xf]  ;;  %v9637_v3 = vor.u32 %v13119_v59, %v9634_v62  ;;  %v8411_v39 = vadd.f32 %v7056_v10, %v363_v40 }
 0x358   : > { %v8834_v23 = vld [vmem:[%s14419_s23 + $0x68] sm:$0xf0]  ;;  %7328 = vmatpush.bf16.msra.mxu3 %v9669_v38  ;;  %7301 = vmatpush.bf16.msra.mxu1 %v9125_v4 }
 0x359   : > { %v12983_v8 = vld [vmem:[%s14419_s23 + $0x24c] sm:$0xf]  ;;  %v8837_v19 = vor.u32 %v12919_v6, %v8834_v23  ;;  %8427 = vst [vmem:[#allocation2 + $0x20] sm:$0xff] %v8411_v39 }
 0x35a   : > { %v9090_v50 = vld [vmem:[%s14419_s23 + $0x268] sm:$0xf0]  ;;  %7315 = vmatpush.bf16.msra.mxu2 %v9381_v1 }
 0x35b   : > { %v13047_v15 = vld [vmem:[%s14419_s23 + $0x44c] sm:$0xf]  ;;  %v9093_v25 = vor.u32 %v12983_v8, %v9090_v50  ;;  %7288 = vmatpush.bf16.msra.mxu0 %v8837_v19 }
 0x35c   : > { %v9346_v12 = vld [vmem:[%s14419_s23 + $0x468] sm:$0xf0]  ;;  %7329 = vmatpush.bf16.msra.mxu3 %v9637_v3 }
 0x35d   : > { %v13111_v13 = vld [vmem:[%s14419_s23 + $0x64c] sm:$0xf]  ;;  %v9349_v26 = vor.u32 %v13047_v15, %v9346_v12  ;;  %7302 = vmatpush.bf16.msra.mxu1 %v9093_v25 }
 0x35e   : > { %v9602_v17 = vld [vmem:[%s14419_s23 + $0x668] sm:$0xf0] }
 0x35f   : > { %v12911_v9 = vld [vmem:[%s14419_s23 + $0xc] sm:$0xf]  ;;  %v9605_v42 = vor.u32 %v13111_v13, %v9602_v17  ;;  %7316 = vmatpush.bf16.msra.mxu2 %v9349_v26 }
 0x360   : > { %v8802_v28 = vld [vmem:[%s14419_s23 + $0x28] sm:$0xf0] }
 0x361   : > { %v12975_v45 = vld [vmem:[%s14419_s23 + $0x20c] sm:$0xf]  ;;  %v8805_v37 = vor.u32 %v12911_v9, %v8802_v28  ;;  %7330 = vmatpush.bf16.msra.mxu3 %v9605_v42 }
 0x362   : > { %v9058_v22 = vld [vmem:[%s14419_s23 + $0x228] sm:$0xf0] }
 0x363   : > { %v13039_v29 = vld [vmem:[%s14419_s23 + $0x40c] sm:$0xf]  ;;  %v9061_v44 = vor.u32 %v12975_v45, %v9058_v22  ;;  %7289 = vmatpush.bf16.msra.mxu0 %v8805_v37 }
 0x364   : > { %v9314_v30 = vld [vmem:[%s14419_s23 + $0x428] sm:$0xf0] }
 0x365   : > { %v13103_v16 = vld [vmem:[%s14419_s23 + $0x60c] sm:$0xf]  ;;  %v9317_v14 = vor.u32 %v13039_v29, %v9314_v30  ;;  %7303 = vmatpush.bf16.msra.mxu1 %v9061_v44 }
 0x366   : > { %v9570_v31 = vld [vmem:[%s14419_s23 + $0x628] sm:$0xf0]  ;;  %7290 = vmatmul.bf16.vlgmr.msra.gmra.mxu0 %v14520_v11 }
 0x367   : > { %v13223_v35 = vld [vmem:[%s14419_s23 + $0x9cc] sm:$0xf]  ;;  %v9573_v59 = vor.u32 %v13103_v16, %v9570_v31  ;;  %7317 = vmatpush.bf16.msra.mxu2 %v9317_v14 }
 0x368   : > { %v10050_v36 = vld [vmem:[%s14419_s23 + $0x9e8] sm:$0xf0]  ;;  %7304 = vmatmul.bf16.vlgmr.msra.gmra.mxu1 %v14536_v27 }
 0x369   : > { %v13287_v51 = vld [vmem:[%s14419_s23 + $0xbcc] sm:$0xf]  ;;  %v10053_v62 = vor.u32 %v13223_v35, %v10050_v36  ;;  %7331 = vmatpush.bf16.msra.mxu3 %v9573_v59 }
 0x36a   : > { %v10306_v38 = vld [vmem:[%s14419_s23 + $0xbe8] sm:$0xf0]  ;;  %7318 = vmatmul.bf16.vlgmr.msra.gmra.mxu2 %v14526_v18 }
 0x36b   : > { %v13351_v47 = vld [vmem:[%s14419_s23 + $0xdcc] sm:$0xf]  ;;  %v10309_v2 = vor.u32 %v13287_v51, %v10306_v38  ;;  %7338 = vmatpush.bf16.msrb.mxu0 %v10053_v62 }
 0x36c   : > { %v10562_v43 = vld [vmem:[%s14419_s23 + $0xde8] sm:$0xf0]  ;;  %7332 = vmatmul.bf16.vlgmr.msra.gmra.mxu3 %v14542_v34 }
 0x36d   : > { %v13415_v24 = vld [vmem:[%s14419_s23 + $0xfcc] sm:$0xf]  ;;  %v10565_v4 = vor.u32 %v13351_v47, %v10562_v43  ;;  %7352 = vmatpush.bf16.msrb.mxu1 %v10309_v2 }
 0x36e   : > { %v10818_v41 = vld [vmem:[%s14419_s23 + $0xfe8] sm:$0xf0] }
 0x36f   : > { %v13215_v5 = vld [vmem:[%s14419_s23 + $0x98c] sm:$0xf]  ;;  %v10821_v6 = vor.u32 %v13415_v24, %v10818_v41  ;;  %7366 = vmatpush.bf16.msrb.mxu2 %v10565_v4 }
 0x370   : > { %v10018_v20 = vld [vmem:[%s14419_s23 + $0x9a8] sm:$0xf0] }
 0x371   : > { %v13279_v1 = vld [vmem:[%s14419_s23 + $0xb8c] sm:$0xf]  ;;  %v10021_v15 = vor.u32 %v13215_v5, %v10018_v20  ;;  %7380 = vmatpush.bf16.msrb.mxu3 %v10821_v6 }
 0x372   : > { %v10274_v23 = vld [vmem:[%s14419_s23 + $0xba8] sm:$0xf0] }
 0x373   : > { %v13343_v8 = vld [vmem:[%s14419_s23 + $0xd8c] sm:$0xf]  ;;  %v10277_v12 = vor.u32 %v13279_v1, %v10274_v23  ;;  %7339 = vmatpush.bf16.msrb.mxu0 %v10021_v15 }
 0x374   : > { %v10530_v3 = vld [vmem:[%s14419_s23 + $0xda8] sm:$0xf0] }
 0x375   : > { %v13407_v7 = vld [vmem:[%s14419_s23 + $0xf8c] sm:$0xf]  ;;  %v10533_v54 = vor.u32 %v13343_v8, %v10530_v3  ;;  %7353 = vmatpush.bf16.msrb.mxu1 %v10277_v12 }
 0x376   : > { %v10786_v50 = vld [vmem:[%s14419_s23 + $0xfa8] sm:$0xf0] }
 0x377   : > { %v13207_v13 = vld [vmem:[%s14419_s23 + $0x94c] sm:$0xf]  ;;  %v10789_v9 = vor.u32 %v13407_v7, %v10786_v50  ;;  %7367 = vmatpush.bf16.msrb.mxu2 %v10533_v54 }
 0x378   : > { %v9986_v17 = vld [vmem:[%s14419_s23 + $0x968] sm:$0xf0] }
 0x379   : > { %v13271_v19 = vld [vmem:[%s14419_s23 + $0xb4c] sm:$0xf]  ;;  %v9989_v22 = vor.u32 %v13207_v13, %v9986_v17  ;;  %7381 = vmatpush.bf16.msrb.mxu3 %v10789_v9 }
 0x37a   : > { %v10242_v28 = vld [vmem:[%s14419_s23 + $0xb68] sm:$0xf0] }
 0x37b   : > { %v13335_v45 = vld [vmem:[%s14419_s23 + $0xd4c] sm:$0xf]  ;;  %v10245_v29 = vor.u32 %v13271_v19, %v10242_v28  ;;  %7340 = vmatpush.bf16.msrb.mxu0 %v9989_v22 }
 0x37c   : > { %v10498_v33 = vld [vmem:[%s14419_s23 + $0xd68] sm:$0xf0] }
 0x37d   : > { %v13399_v25 = vld [vmem:[%s14419_s23 + $0xf4c] sm:$0xf]  ;;  %v10501_v42 = vor.u32 %v13335_v45, %v10498_v33  ;;  %7354 = vmatpush.bf16.msrb.mxu1 %v10245_v29 }
 0x37e   : > { %v10754_v26 = vld [vmem:[%s14419_s23 + $0xf68] sm:$0xf0] }
 0x37f   : > { %v13199_v46 = vld [vmem:[%s14419_s23 + $0x90c] sm:$0xf]  ;;  %v10757_v16 = vor.u32 %v13399_v25, %v10754_v26  ;;  %7368 = vmatpush.bf16.msrb.mxu2 %v10501_v42 }
 0x380   : > { %v9954_v40 = vld [vmem:[%s14419_s23 + $0x928] sm:$0xf0] }
 0x381   : > { %v13263_v30 = vld [vmem:[%s14419_s23 + $0xb0c] sm:$0xf]  ;;  %v9957_v51 = vor.u32 %v13199_v46, %v9954_v40  ;;  %7382 = vmatpush.bf16.msrb.mxu3 %v10757_v16 }
 0x382   : > { %v10210_v31 = vld [vmem:[%s14419_s23 + $0xb28] sm:$0xf0] }
 0x383   : > { %v13327_v32 = vld [vmem:[%s14419_s23 + $0xd0c] sm:$0xf]  ;;  %v10213_v37 = vor.u32 %v13263_v30, %v10210_v31  ;;  %7341 = vmatpush.bf16.msrb.mxu0 %v9957_v51 }
 0x384   : > { %v10466_v21 = vld [vmem:[%s14419_s23 + $0xd28] sm:$0xf0] }
 0x385   : > { %v13391_v35 = vld [vmem:[%s14419_s23 + $0xf0c] sm:$0xf]  ;;  %v10469_v38 = vor.u32 %v13327_v32, %v10466_v21  ;;  %7355 = vmatpush.bf16.msrb.mxu1 %v10213_v37 }
 0x386   : > { %v10722_v36 = vld [vmem:[%s14419_s23 + $0xf28] sm:$0xf0] }
 0x387   : > { %v13191_v47 = vld [vmem:[%s14419_s23 + $0x8cc] sm:$0xf]  ;;  %v10725_v44 = vor.u32 %v13391_v35, %v10722_v36  ;;  %7369 = vmatpush.bf16.msrb.mxu2 %v10469_v38 }
 0x388   : > { %v9922_v43 = vld [vmem:[%s14419_s23 + $0x8e8] sm:$0xf0] }
 0x389   : > { %v13255_v10 = vld [vmem:[%s14419_s23 + $0xacc] sm:$0xf]  ;;  %v9925_v39 = vor.u32 %v13191_v47, %v9922_v43  ;;  %7383 = vmatpush.bf16.msrb.mxu3 %v10725_v44 }
 0x38a   : > { %v10178_v14 = vld [vmem:[%s14419_s23 + $0xae8] sm:$0xf0] }
 0x38b   : > { %v13319_v24 = vld [vmem:[%s14419_s23 + $0xccc] sm:$0xf]  ;;  %v10181_v2 = vor.u32 %v13255_v10, %v10178_v14  ;;  %7342 = vmatpush.bf16.msrb.mxu0 %v9925_v39 }
 0x38c   : > { %v10434_v41 = vld [vmem:[%s14419_s23 + $0xce8] sm:$0xf0] }
 0x38d   : > { %v13383_v59 = vld [vmem:[%s14419_s23 + $0xecc] sm:$0xf]  ;;  %v10437_v4 = vor.u32 %v13319_v24, %v10434_v41  ;;  %7356 = vmatpush.bf16.msrb.mxu1 %v10181_v2 }
 0x38e   : > { %v10690_v62 = vld [vmem:[%s14419_s23 + $0xee8] sm:$0xf0] }
 0x38f   : > { %v13183_v5 = vld [vmem:[%s14419_s23 + $0x88c] sm:$0xf]  ;;  %v10693_v6 = vor.u32 %v13383_v59, %v10690_v62  ;;  %7370 = vmatpush.bf16.msrb.mxu2 %v10437_v4 }
 0x390   : > { %v9890_v20 = vld [vmem:[%s14419_s23 + $0x8a8] sm:$0xf0] }
 0x391   : > { %v13247_v1 = vld [vmem:[%s14419_s23 + $0xa8c] sm:$0xf]  ;;  %v9893_v15 = vor.u32 %v13183_v5, %v9890_v20  ;;  %7384 = vmatpush.bf16.msrb.mxu3 %v10693_v6 }
 0x392   : > { %v10146_v23 = vld [vmem:[%s14419_s23 + $0xaa8] sm:$0xf0] }
 0x393   : > { %v13311_v8 = vld [vmem:[%s14419_s23 + $0xc8c] sm:$0xf]  ;;  %v10149_v12 = vor.u32 %v13247_v1, %v10146_v23  ;;  %7343 = vmatpush.bf16.msrb.mxu0 %v9893_v15 }
 0x394   : > { %v10402_v3 = vld [vmem:[%s14419_s23 + $0xca8] sm:$0xf0] }
 0x395   : > { %v13375_v7 = vld [vmem:[%s14419_s23 + $0xe8c] sm:$0xf]  ;;  %v10405_v54 = vor.u32 %v13311_v8, %v10402_v3  ;;  %7357 = vmatpush.bf16.msrb.mxu1 %v10149_v12 }
 0x396   : > { %v10658_v50 = vld [vmem:[%s14419_s23 + $0xea8] sm:$0xf0] }
 0x397   : > { %v13175_v13 = vld [vmem:[%s14419_s23 + $0x84c] sm:$0xf]  ;;  %v10661_v9 = vor.u32 %v13375_v7, %v10658_v50  ;;  %7371 = vmatpush.bf16.msrb.mxu2 %v10405_v54 }
 0x398   : > { %v9858_v17 = vld [vmem:[%s14419_s23 + $0x868] sm:$0xf0] }
 0x399   : > { %v13239_v19 = vld [vmem:[%s14419_s23 + $0xa4c] sm:$0xf]  ;;  %v9861_v22 = vor.u32 %v13175_v13, %v9858_v17  ;;  %7385 = vmatpush.bf16.msrb.mxu3 %v10661_v9 }
 0x39a   : > { %v10114_v28 = vld [vmem:[%s14419_s23 + $0xa68] sm:$0xf0] }
 0x39b   : > { %v13303_v45 = vld [vmem:[%s14419_s23 + $0xc4c] sm:$0xf]  ;;  %v10117_v46 = vor.u32 %v13239_v19, %v10114_v28  ;;  %7344 = vmatpush.bf16.msrb.mxu0 %v9861_v22 }
 0x39c   : > { %v10370_v33 = vld [vmem:[%s14419_s23 + $0xc68] sm:$0xf0] }
 0x39d   : > { %v13367_v25 = vld [vmem:[%s14419_s23 + $0xe4c] sm:$0xf]  ;;  %v10373_v40 = vor.u32 %v13303_v45, %v10370_v33  ;;  %7358 = vmatpush.bf16.msrb.mxu1 %v10117_v46 }
 0x39e   : > { %v10626_v26 = vld [vmem:[%s14419_s23 + $0xe68] sm:$0xf0] }
 0x39f   : > { %v13167_v29 = vld [vmem:[%s14419_s23 + $0x80c] sm:$0xf]  ;;  %v10629_v32 = vor.u32 %v13367_v25, %v10626_v26  ;;  %7372 = vmatpush.bf16.msrb.mxu2 %v10373_v40 }
 0x3a0   : > { %v9826_v42 = vld [vmem:[%s14419_s23 + $0x828] sm:$0xf0] }
 0x3a1   : > { %v13231_v30 = vld [vmem:[%s14419_s23 + $0xa0c] sm:$0xf]  ;;  %v9829_v47 = vor.u32 %v13167_v29, %v9826_v42  ;;  %7386 = vmatpush.bf16.msrb.mxu3 %v10629_v32 }
 0x3a2   : > { %v10082_v16 = vld [vmem:[%s14419_s23 + $0xa28] sm:$0xf0] }
 0x3a3   : > { %v13295_v31 = vld [vmem:[%s14419_s23 + $0xc0c] sm:$0xf]  ;;  %v10085_v14 = vor.u32 %v13231_v30, %v10082_v16  ;;  %7345 = vmatpush.bf16.msrb.mxu0 %v9829_v47 }
 0x3a4   : > { %v10338_v21 = vld [vmem:[%s14419_s23 + $0xc28] sm:$0xf0] }
 0x3a5   : > { %v13359_v35 = vld [vmem:[%s14419_s23 + $0xe0c] sm:$0xf]  ;;  %v10341_v24 = vor.u32 %v13295_v31, %v10338_v21  ;;  %7359 = vmatpush.bf16.msrb.mxu1 %v10085_v14 }
 0x3a6   : > { %v10594_v36 = vld [vmem:[%s14419_s23 + $0xe28] sm:$0xf0]  ;;  %7346 = vmatmul.bf16.vlgmr.msrb.gmra.mxu0 %v14602_v56 }
 0x3a7   : > { %v13479_v51 = vld [vmem:[%s14419_s23 + $0x11cc] sm:$0xf]  ;;  %v10597_v62 = vor.u32 %v13359_v35, %v10594_v36  ;;  %7373 = vmatpush.bf16.msrb.mxu2 %v10341_v24 }
 0x3a8   : > { %v11074_v37 = vld [vmem:[%s14419_s23 + $0x11e8] sm:$0xf0]  ;;  %7360 = vmatmul.bf16.vlgmr.msrb.gmra.mxu1 %v14609_v61 }
 0x3a9   : > { %v13543_v38 = vld [vmem:[%s14419_s23 + $0x13cc] sm:$0xf]  ;;  %v11077_v39 = vor.u32 %v13479_v51, %v11074_v37  ;;  %7387 = vmatpush.bf16.msrb.mxu3 %v10597_v62 }
 0x3aa   : > { %v11330_v43 = vld [vmem:[%s14419_s23 + $0x13e8] sm:$0xf0]  ;;  %7374 = vmatmul.bf16.vlgmr.msrb.gmra.mxu2 %v14607_v60 }
 0x3ab   : > { %v13607_v10 = vld [vmem:[%s14419_s23 + $0x15cc] sm:$0xf]  ;;  %v11333_v2 = vor.u32 %v13543_v38, %v11330_v43  ;;  %7394 = vmatpush.bf16.msra.mxu0 %v11077_v39 }
 0x3ac   : > { %v11586_v44 = vld [vmem:[%s14419_s23 + $0x15e8] sm:$0xf0]  ;;  %7388 = vmatmul.bf16.vlgmr.msrb.gmra.mxu3 %v14613_v0 }
 0x3ad   : > { %v13671_v41 = vld [vmem:[%s14419_s23 + $0x17cc] sm:$0xf]  ;;  %v11589_v4 = vor.u32 %v13607_v10, %v11586_v44  ;;  %7408 = vmatpush.bf16.msra.mxu1 %v11333_v2  ;;  %v15571_v2 = vpop.f32.mrf.mxu1 }
 0x3ae   : > { %v11842_v59 = vld [vmem:[%s14419_s23 + $0x17e8] sm:$0xf0] }
 0x3af   : > { %v13471_v5 = vld [vmem:[%s14419_s23 + $0x118c] sm:$0xf]  ;;  %v11845_v6 = vor.u32 %v13671_v41, %v11842_v59  ;;  %7422 = vmatpush.bf16.msra.mxu2 %v11589_v4  ;;  %v15567_v59 = vpop.f32.mrf.mxu0 }
 0x3b0   : > { %v11042_v20 = vld [vmem:[%s14419_s23 + $0x11a8] sm:$0xf0] }
 0x3b1   : > { %v13535_v1 = vld [vmem:[%s14419_s23 + $0x138c] sm:$0xf]  ;;  %v11045_v15 = vor.u32 %v13471_v5, %v11042_v20  ;;  %7436 = vmatpush.bf16.msra.mxu3 %v11845_v6 }
 0x3b2   : > { %v11298_v23 = vld [vmem:[%s14419_s23 + $0x13a8] sm:$0xf0] }
 0x3b3   : > { %v13599_v8 = vld [vmem:[%s14419_s23 + $0x158c] sm:$0xf]  ;;  %v11301_v12 = vor.u32 %v13535_v1, %v11298_v23  ;;  %7395 = vmatpush.bf16.msra.mxu0 %v11045_v15 }
 0x3b4   : > { %v11554_v3 = vld [vmem:[%s14419_s23 + $0x15a8] sm:$0xf0] }
 0x3b5   : > { %v13663_v7 = vld [vmem:[%s14419_s23 + $0x178c] sm:$0xf]  ;;  %v11557_v54 = vor.u32 %v13599_v8, %v11554_v3  ;;  %7409 = vmatpush.bf16.msra.mxu1 %v11301_v12 }
 0x3b6   : > { %v11810_v50 = vld [vmem:[%s14419_s23 + $0x17a8] sm:$0xf0] }
 0x3b7   : > { %v13463_v13 = vld [vmem:[%s14419_s23 + $0x114c] sm:$0xf]  ;;  %v11813_v9 = vor.u32 %v13663_v7, %v11810_v50  ;;  %7423 = vmatpush.bf16.msra.mxu2 %v11557_v54 }
 0x3b8   : > { %v11010_v17 = vld [vmem:[%s14419_s23 + $0x1168] sm:$0xf0] }
 0x3b9   : > { %v13527_v19 = vld [vmem:[%s14419_s23 + $0x134c] sm:$0xf]  ;;  %v11013_v22 = vor.u32 %v13463_v13, %v11010_v17  ;;  %7437 = vmatpush.bf16.msra.mxu3 %v11813_v9 }
 0x3ba   : > { %v11266_v28 = vld [vmem:[%s14419_s23 + $0x1368] sm:$0xf0] }
 0x3bb   : > { %v13591_v45 = vld [vmem:[%s14419_s23 + $0x154c] sm:$0xf]  ;;  %v11269_v29 = vor.u32 %v13527_v19, %v11266_v28  ;;  %7396 = vmatpush.bf16.msra.mxu0 %v11013_v22 }
 0x3bc   : > { %v11522_v33 = vld [vmem:[%s14419_s23 + $0x1568] sm:$0xf0] }
 0x3bd   : > { %v13655_v25 = vld [vmem:[%s14419_s23 + $0x174c] sm:$0xf]  ;;  %v11525_v42 = vor.u32 %v13591_v45, %v11522_v33  ;;  %7410 = vmatpush.bf16.msra.mxu1 %v11269_v29  ;;  %v15584_v45 = vpop.f32.mrf.mxu2  ;;  %v15589_v29 = vpop.f32.mrf.mxu3 }
 0x3be   : > { %v11778_v26 = vld [vmem:[%s14419_s23 + $0x1768] sm:$0xf0] }
 0x3bf   : > { %v13455_v46 = vld [vmem:[%s14419_s23 + $0x110c] sm:$0xf]  ;;  %v11781_v16 = vor.u32 %v13655_v25, %v11778_v26  ;;  %7424 = vmatpush.bf16.msra.mxu2 %v11525_v42 }
 0x3c0   : > { %v10978_v40 = vld [vmem:[%s14419_s23 + $0x1128] sm:$0xf0] }
 0x3c1   : > { %v13519_v30 = vld [vmem:[%s14419_s23 + $0x130c] sm:$0xf]  ;;  %v10981_v51 = vor.u32 %v13455_v46, %v10978_v40  ;;  %7438 = vmatpush.bf16.msra.mxu3 %v11781_v16 }
 0x3c2   : > { %v11234_v31 = vld [vmem:[%s14419_s23 + $0x1328] sm:$0xf0] }
 0x3c3   : > { %v13583_v32 = vld [vmem:[%s14419_s23 + $0x150c] sm:$0xf]  ;;  %v11237_v37 = vor.u32 %v13519_v30, %v11234_v31  ;;  %7397 = vmatpush.bf16.msra.mxu0 %v10981_v51  ;;  %v15595_v31 = vpop.f32.mrf.mxu0 }
 0x3c4   : > { %v11490_v21 = vld [vmem:[%s14419_s23 + $0x1528] sm:$0xf0] }
 0x3c5   : > { %v13647_v35 = vld [vmem:[%s14419_s23 + $0x170c] sm:$0xf]  ;;  %v11493_v38 = vor.u32 %v13583_v32, %v11490_v21  ;;  %7411 = vmatpush.bf16.msra.mxu1 %v11237_v37  ;;  %v15600_v37 = vpop.f32.mrf.mxu1 }
 0x3c6   : > { %v11746_v36 = vld [vmem:[%s14419_s23 + $0x1728] sm:$0xf0] }
 0x3c7   : > { %v13447_v47 = vld [vmem:[%s14419_s23 + $0x10cc] sm:$0xf]  ;;  %v11749_v44 = vor.u32 %v13647_v35, %v11746_v36  ;;  %7425 = vmatpush.bf16.msra.mxu2 %v11493_v38 }
 0x3c8   : > { %v10946_v43 = vld [vmem:[%s14419_s23 + $0x10e8] sm:$0xf0] }
 0x3c9   : > { %v13511_v10 = vld [vmem:[%s14419_s23 + $0x12cc] sm:$0xf]  ;;  %v10949_v4 = vor.u32 %v13447_v47, %v10946_v43  ;;  %7439 = vmatpush.bf16.msra.mxu3 %v11749_v44 }
 0x3ca   : > { %v11202_v14 = vld [vmem:[%s14419_s23 + $0x12e8] sm:$0xf0] }
 0x3cb   : > { %v13575_v24 = vld [vmem:[%s14419_s23 + $0x14cc] sm:$0xf]  ;;  %v11205_v5 = vor.u32 %v13511_v10, %v11202_v14  ;;  %7398 = vmatpush.bf16.msra.mxu0 %v10949_v4 }
 0x3cc   : > { %v11458_v41 = vld [vmem:[%s14419_s23 + $0x14e8] sm:$0xf0] }
 0x3cd   : > { %v13639_v62 = vld [vmem:[%s14419_s23 + $0x16cc] sm:$0xf]  ;;  %v11461_v20 = vor.u32 %v13575_v24, %v11458_v41  ;;  %7412 = vmatpush.bf16.msra.mxu1 %v11205_v5 }
 0x3ce   : > { %v11714_v39 = vld [vmem:[%s14419_s23 + $0x16e8] sm:$0xf0] }
 0x3cf   : > { %v13439_v1 = vld [vmem:[%s14419_s23 + $0x108c] sm:$0xf]  ;;  %v11717_v8 = vor.u32 %v13639_v62, %v11714_v39  ;;  %7426 = vmatpush.bf16.msra.mxu2 %v11461_v20 }
 0x3d0   : > { %v10914_v6 = vld [vmem:[%s14419_s23 + $0x10a8] sm:$0xf0] }
 0x3d1   : > { %v13503_v23 = vld [vmem:[%s14419_s23 + $0x128c] sm:$0xf]  ;;  %v10917_v54 = vor.u32 %v13439_v1, %v10914_v6  ;;  %7440 = vmatpush.bf16.msra.mxu3 %v11717_v8 }
 0x3d2   : > { %v11170_v3 = vld [vmem:[%s14419_s23 + $0x12a8] sm:$0xf0] }
 0x3d3   : > { %v13567_v7 = vld [vmem:[%s14419_s23 + $0x148c] sm:$0xf]  ;;  %v11173_v13 = vor.u32 %v13503_v23, %v11170_v3  ;;  %7399 = vmatpush.bf16.msra.mxu0 %v10917_v54  ;;  %v15616_v54 = vpop.f32.mrf.mxu2 }
 0x3d4   : > { %v11426_v50 = vld [vmem:[%s14419_s23 + $0x14a8] sm:$0xf0] }
 0x3d5   : > { %v13631_v15 = vld [vmem:[%s14419_s23 + $0x168c] sm:$0xf]  ;;  %v11429_v17 = vor.u32 %v13567_v7, %v11426_v50  ;;  %7413 = vmatpush.bf16.msra.mxu1 %v11173_v13 }
 0x3d6   : > { %v11682_v12 = vld [vmem:[%s14419_s23 + $0x16a8] sm:$0xf0] }
 0x3d7   : > { %v13431_v19 = vld [vmem:[%s14419_s23 + $0x104c] sm:$0xf]  ;;  %v11685_v33 = vor.u32 %v13631_v15, %v11682_v12  ;;  %7427 = vmatpush.bf16.msra.mxu2 %v11429_v17 }
 0x3d8   : > { %v10882_v9 = vld [vmem:[%s14419_s23 + $0x1068] sm:$0xf0] }
 0x3d9   : > { %v13495_v28 = vld [vmem:[%s14419_s23 + $0x124c] sm:$0xf]  ;;  %v10885_v40 = vor.u32 %v13431_v19, %v10882_v9  ;;  %7441 = vmatpush.bf16.msra.mxu3 %v11685_v33 }
 0x3da   : > { %v11138_v25 = vld [vmem:[%s14419_s23 + $0x1268] sm:$0xf0] }
 0x3db   : > { %v13559_v26 = vld [vmem:[%s14419_s23 + $0x144c] sm:$0xf]  ;;  %v11141_v32 = vor.u32 %v13495_v28, %v11138_v25  ;;  %7400 = vmatpush.bf16.msra.mxu0 %v10885_v40  ;;  %v15621_v28 = vpop.f32.mrf.mxu3 }
 0x3dc   : > { %v11394_v22 = vld [vmem:[%s14419_s23 + $0x1468] sm:$0xf0] }
 0x3dd   : > { %v13623_v42 = vld [vmem:[%s14419_s23 + $0x164c] sm:$0xf]  ;;  %v11397_v21 = vor.u32 %v13559_v26, %v11394_v22  ;;  %7414 = vmatpush.bf16.msra.mxu1 %v11141_v32  ;;  %v7082_v22 = vadd.f32 %v15571_v2, %v15567_v59 }
 0x3de   : > { %v11650_v46 = vld [vmem:[%s14419_s23 + $0x1668] sm:$0xf0] }
 0x3df   : > { %v13423_v30 = vld [vmem:[%s14419_s23 + $0x100c] sm:$0xf]  ;;  %v11653_v38 = vor.u32 %v13623_v42, %v11650_v46  ;;  %7428 = vmatpush.bf16.msra.mxu2 %v11397_v21  ;;  %v7123_v42 = vpop.f32.mrf.mxu0  ;;  %v15630_v21 = vpop.f32.mrf.mxu1 }
 0x3e0   : > { %v10850_v16 = vld [vmem:[%s14419_s23 + $0x1028] sm:$0xf0] }
 0x3e1   : > { %v13487_v35 = vld [vmem:[%s14419_s23 + $0x120c] sm:$0xf]  ;;  %v10853_v41 = vor.u32 %v13423_v30, %v10850_v16  ;;  %7442 = vmatpush.bf16.msra.mxu3 %v11653_v38 }
 0x3e2   : > { %v11106_v36 = vld [vmem:[%s14419_s23 + $0x1228] sm:$0xf0] }
 0x3e3   : > { %v13551_v51 = vld [vmem:[%s14419_s23 + $0x140c] sm:$0xf]  ;;  %v11109_v5 = vor.u32 %v13487_v35, %v11106_v36  ;;  %7401 = vmatpush.bf16.msra.mxu0 %v10853_v41 }
 0x3e4   : > { %v11362_v47 = vld [vmem:[%s14419_s23 + $0x1428] sm:$0xf0] }
 0x3e5   : > { %v13615_v43 = vld [vmem:[%s14419_s23 + $0x160c] sm:$0xf]  ;;  %v11365_v20 = vor.u32 %v13551_v51, %v11362_v47  ;;  %7415 = vmatpush.bf16.msra.mxu1 %v11109_v5 }
 0x3e6   : > { %v11618_v10 = vld [vmem:[%s14419_s23 + $0x1628] sm:$0xf0]  ;;  %7402 = vmatmul.bf16.vlgmr.msra.gmra.mxu0 %v14686_v48 }
 0x3e7   : > { %v13735_v44 = vld [vmem:[%s14419_s23 + $0x19cc] sm:$0xf]  ;;  %v11621_v23 = vor.u32 %v13615_v43, %v11618_v10  ;;  %7429 = vmatpush.bf16.msra.mxu2 %v11365_v20  ;;  %v7096_v43 = vadd.f32 %v15584_v45, %v7082_v22  ;;  %v15650_v45 = vpop.f32.mrf.mxu2  ;;  %v15665_v22 = vpop.f32.mrf.mxu1 }
 0x3e8   : > { %v12098_v14 = vld [vmem:[%s14419_s23 + $0x19e8] sm:$0xf0]  ;;  %7416 = vmatmul.bf16.vlgmr.msra.gmra.mxu1 %v14693_v53 }
 0x3e9   : > { %v13799_v24 = vld [vmem:[%s14419_s23 + $0x1bcc] sm:$0xf]  ;;  %v12101_v8 = vor.u32 %v13735_v44, %v12098_v14  ;;  %7443 = vmatpush.bf16.msra.mxu3 %v11621_v23  ;;  %v7110_v23 = vadd.f32 %v15589_v29, %v7096_v43 }
 0x3ea   : > { %v12354_v62 = vld [vmem:[%s14419_s23 + $0x1be8] sm:$0xf0]  ;;  %7430 = vmatmul.bf16.vlgmr.msra.gmra.mxu2 %v14691_v52 }
 0x3eb   : > { %v13863_v39 = vld [vmem:[%s14419_s23 + $0x1dcc] sm:$0xf]  ;;  %v12357_v3 = vor.u32 %v13799_v24, %v12354_v62  ;;  %7450 = vmatpush.bf16.msrb.mxu0 %v12101_v8  ;;  %v15653_v8 = vpop.f32.mrf.mxu3 }
 0x3ec   : > { %v12610_v4 = vld [vmem:[%s14419_s23 + $0x1de8] sm:$0xf0]  ;;  %7444 = vmatmul.bf16.vlgmr.msra.gmra.mxu3 %v14697_v57 }
 0x3ed   : > { %v13927_v1 = vld [vmem:[%s14419_s23 + $0x1fcc] sm:$0xf]  ;;  %v12613_v7 = vor.u32 %v13863_v39, %v12610_v4  ;;  %7464 = vmatpush.bf16.msrb.mxu1 %v12357_v3 }
 0x3ee   : > { %v12866_v6 = vld [vmem:[%s14419_s23 + $0x1fe8] sm:$0xf0] }
 0x3ef   : > { %v13727_v50 = vld [vmem:[%s14419_s23 + $0x198c] sm:$0xf]  ;;  %v12869_v13 = vor.u32 %v13927_v1, %v12866_v6  ;;  %7478 = vmatpush.bf16.msrb.mxu2 %v12613_v7 }
 0x3f0   : > { %v12066_v15 = vld [vmem:[%s14419_s23 + $0x19a8] sm:$0xf0] }
 0x3f1   : > { %v13791_v12 = vld [vmem:[%s14419_s23 + $0x1b8c] sm:$0xf]  ;;  %v12069_v26 = vor.u32 %v13727_v50, %v12066_v15  ;;  %7492 = vmatpush.bf16.msrb.mxu3 %v12869_v13 }
 0x3f2   : > { %v12322_v17 = vld [vmem:[%s14419_s23 + $0x1ba8] sm:$0xf0] }
 0x3f3   : > { %v13855_v19 = vld [vmem:[%s14419_s23 + $0x1d8c] sm:$0xf]  ;;  %v12325_v46 = vor.u32 %v13791_v12, %v12322_v17  ;;  %7451 = vmatpush.bf16.msrb.mxu0 %v12069_v26  ;;  %v7084_v26 = vadd.f32 %v15600_v37, %v15595_v31 }
 0x3f4   : > { %v12578_v9 = vld [vmem:[%s14419_s23 + $0x1da8] sm:$0xf0] }
 0x3f5   : > { %v13919_v33 = vld [vmem:[%s14419_s23 + $0x1f8c] sm:$0xf]  ;;  %v12581_v40 = vor.u32 %v13855_v19, %v12578_v9  ;;  %7465 = vmatpush.bf16.msrb.mxu1 %v12325_v46 }
 0x3f6   : > { %v12834_v25 = vld [vmem:[%s14419_s23 + $0x1fa8] sm:$0xf0] }
 0x3f7   : > { %v13719_v30 = vld [vmem:[%s14419_s23 + $0x194c] sm:$0xf]  ;;  %v12837_v35 = vor.u32 %v13919_v33, %v12834_v25  ;;  %7479 = vmatpush.bf16.msrb.mxu2 %v12581_v40  ;;  %v7125_v33 = vpop.f32.mrf.mxu0  ;;  %v7124_v40 = vadd.f32 %v7123_v42, %v7110_v23  ;;  %v7098_v42 = vadd.f32 %v15616_v54, %v7084_v26 }
 0x3f8   : > { %v12034_v16 = vld [vmem:[%s14419_s23 + $0x1968] sm:$0xf0] }
 0x3f9   : > { %v13783_v32 = vld [vmem:[%s14419_s23 + $0x1b4c] sm:$0xf]  ;;  %v12037_v47 = vor.u32 %v13719_v30, %v12034_v16  ;;  %7493 = vmatpush.bf16.msrb.mxu3 %v12837_v35  ;;  %v7138_v43 = vadd.f32 %v15630_v21, %v7124_v40  ;;  %v7112_v23 = vadd.f32 %v15621_v28, %v7098_v42 }
 0x3fa   : > { %v12290_v36 = vld [vmem:[%s14419_s23 + $0x1b68] sm:$0xf0] }
 0x3fb   : > { %v13847_v59 = vld [vmem:[%s14419_s23 + $0x1d4c] sm:$0xf]  ;;  %v12293_v10 = vor.u32 %v13783_v32, %v12290_v36  ;;  %7452 = vmatpush.bf16.msrb.mxu0 %v12037_v47  ;;  %v7126_v40 = vadd.f32 %v7125_v33, %v7112_v23  ;;  %v13164_v33 = vld [vmem:[%s14419_s23 + $0x7ec] sm:$0xf0] }
 0x3fc   : > { %v12546_v2 = vld [vmem:[%s14419_s23 + $0x1d68] sm:$0xf0] }
 0x3fd   : > { %v13911_v51 = vld [vmem:[%s14419_s23 + $0x1f4c] sm:$0xf]  ;;  %v12549_v44 = vor.u32 %v13847_v59, %v12546_v2  ;;  %7466 = vmatpush.bf16.msrb.mxu1 %v12293_v10 }
 0x3fe   : > { %v12802_v38 = vld [vmem:[%s14419_s23 + $0x1f68] sm:$0xf0] }
 0x3ff   : > { %v13711_v14 = vld [vmem:[%s14419_s23 + $0x190c] sm:$0xf]  ;;  %v12805_v62 = vor.u32 %v13911_v51, %v12802_v38  ;;  %7480 = vmatpush.bf16.msrb.mxu2 %v12549_v44  ;;  %v7179_v21 = vpop.f32.mrf.mxu0 }
 0x400   : > { %v12002_v24 = vld [vmem:[%s14419_s23 + $0x1928] sm:$0xf0] }
 0x401   : > { %v13775_v41 = vld [vmem:[%s14419_s23 + $0x1b0c] sm:$0xf]  ;;  %v12005_v6 = vor.u32 %v13711_v14, %v12002_v24  ;;  %7494 = vmatpush.bf16.msrb.mxu3 %v12805_v62  ;;  %v7153_v62 = vpop.f32.mrf.mxu2 }
 0x402   : > { %v12258_v39 = vld [vmem:[%s14419_s23 + $0x1b28] sm:$0xf0] }
 0x403   : > { %v13839_v4 = vld [vmem:[%s14419_s23 + $0x1d0c] sm:$0xf]  ;;  %v12261_v3 = vor.u32 %v13775_v41, %v12258_v39  ;;  %7453 = vmatpush.bf16.msrb.mxu0 %v12005_v6 }
 0x404   : > { %v12514_v5 = vld [vmem:[%s14419_s23 + $0x1d28] sm:$0xf0] }
 0x405   : > { %v13903_v20 = vld [vmem:[%s14419_s23 + $0x1f0c] sm:$0xf]  ;;  %v12517_v7 = vor.u32 %v13839_v4, %v12514_v5  ;;  %7467 = vmatpush.bf16.msrb.mxu1 %v12261_v3  ;;  %v7193_v3 = vpop.f32.mrf.mxu1 }
 0x406   : > { %v12770_v1 = vld [vmem:[%s14419_s23 + $0x1f28] sm:$0xf0] }
 0x407   : > { %v13703_v50 = vld [vmem:[%s14419_s23 + $0x18cc] sm:$0xf]  ;;  %v12773_v13 = vor.u32 %v13903_v20, %v12770_v1  ;;  %7481 = vmatpush.bf16.msrb.mxu2 %v12517_v7  ;;  %v15683_v20 = vpop.f32.mrf.mxu3  ;;  %v7181_v23 = vpop.f32.mrf.mxu0 }
 0x408   : > { %v11970_v15 = vld [vmem:[%s14419_s23 + $0x18e8] sm:$0xf0] }
 0x409   : > { %v13767_v12 = vld [vmem:[%s14419_s23 + $0x1acc] sm:$0xf]  ;;  %v11973_v46 = vor.u32 %v13703_v50, %v11970_v15  ;;  %7495 = vmatpush.bf16.msrb.mxu3 %v12773_v13 }
 0x40a   : > { %v12226_v17 = vld [vmem:[%s14419_s23 + $0x1ae8] sm:$0xf0] }
 0x40b   : > { %v13831_v19 = vld [vmem:[%s14419_s23 + $0x1ccc] sm:$0xf]  ;;  %v12229_v30 = vor.u32 %v13767_v12, %v12226_v17  ;;  %7454 = vmatpush.bf16.msrb.mxu0 %v11973_v46  ;;  %v7152_v12 = vadd.f32 %v15650_v45, %v7138_v43  ;;  %v9032_v45 = vld [vmem:[%s14419_s23 + $0x1d0] sm:$0xf]  ;;  %v7140_v43 = vadd.f32 %v15665_v22, %v7126_v40 }
 0x40c   : > { %v12482_v9 = vld [vmem:[%s14419_s23 + $0x1ce8] sm:$0xf0]  ;;  %v9768_v22 = vld [vmem:[%s14419_s23 + $0x790] sm:$0xf] }
 0x40d   : > { %v13895_v29 = vld [vmem:[%s14419_s23 + $0x1ecc] sm:$0xf]  ;;  %v12485_v16 = vor.u32 %v13831_v19, %v12482_v9  ;;  %7468 = vmatpush.bf16.msrb.mxu1 %v12229_v30  ;;  %v12972_v30 = vld [vmem:[%s14419_s23 + $0x1ec] sm:$0xf0] }
 0x40e   : > { %v12738_v25 = vld [vmem:[%s14419_s23 + $0x1ee8] sm:$0xf0]  ;;  %v13148_v40 = vld [vmem:[%s14419_s23 + $0x76c] sm:$0xf0] }
 0x40f   : > { %v13695_v32 = vld [vmem:[%s14419_s23 + $0x188c] sm:$0xf]  ;;  %v12741_v59 = vor.u32 %v13895_v29, %v12738_v25  ;;  %7482 = vmatpush.bf16.msrb.mxu2 %v12485_v16  ;;  %v9288_v16 = vld [vmem:[%s14419_s23 + $0x3d0] sm:$0xf] }
 0x410   : > { %v11938_v35 = vld [vmem:[%s14419_s23 + $0x18a8] sm:$0xf0] }
 0x411   : > { %v13759_v36 = vld [vmem:[%s14419_s23 + $0x1a8c] sm:$0xf]  ;;  %v11941_v47 = vor.u32 %v13695_v32, %v11938_v35  ;;  %7496 = vmatpush.bf16.msrb.mxu3 %v12741_v59  ;;  %v13036_v35 = vld [vmem:[%s14419_s23 + $0x3ec] sm:$0xf0] }
 0x412   : > { %v12194_v31 = vld [vmem:[%s14419_s23 + $0x1aa8] sm:$0xf0]  ;;  %v13100_v59 = vld [vmem:[%s14419_s23 + $0x5ec] sm:$0xf0] }
 0x413   : > { %v13823_v37 = vld [vmem:[%s14419_s23 + $0x1c8c] sm:$0xf]  ;;  %v12197_v10 = vor.u32 %v13759_v36, %v12194_v31  ;;  %7455 = vmatpush.bf16.msrb.mxu0 %v11941_v47  ;;  %v9544_v36 = vld [vmem:[%s14419_s23 + $0x5d0] sm:$0xf]  ;;  %v7166_v31 = vadd.f32 %v15653_v8, %v7152_v12  ;;  %v9033_v47 = vor.u32 %v12972_v30, %v9032_v45  ;;  %v7221_v8 = vpop.f32.mrf.mxu3 }
 0x414   : > { %v12450_v2 = vld [vmem:[%s14419_s23 + $0x1ca8] sm:$0xf0]  ;;  %v8936_v30 = vld [vmem:[%s14419_s23 + $0x110] sm:$0xf] }
 0x415   : > { %v13887_v51 = vld [vmem:[%s14419_s23 + $0x1e8c] sm:$0xf]  ;;  %v12453_v44 = vor.u32 %v13823_v37, %v12450_v2  ;;  %7469 = vmatpush.bf16.msrb.mxu1 %v12197_v10  ;;  %v7180_v10 = vadd.f32 %v7179_v21, %v7166_v31  ;;  %v13156_v21 = vld [vmem:[%s14419_s23 + $0x7ac] sm:$0xf0] }
 0x416   : > { %v12706_v38 = vld [vmem:[%s14419_s23 + $0x1ea8] sm:$0xf0] }
 0x417   : > { %v13687_v14 = vld [vmem:[%s14419_s23 + $0x184c] sm:$0xf]  ;;  %v12709_v39 = vor.u32 %v13887_v51, %v12706_v38  ;;  %7483 = vmatpush.bf16.msrb.mxu2 %v12453_v44  ;;  %v9800_v51 = vld [vmem:[%s14419_s23 + $0x7d0] sm:$0xf]  ;;  %v7207_v38 = vpop.f32.mrf.mxu2  ;;  %v9289_v44 = vor.u32 %v13036_v35, %v9288_v16 }
 0x418   : > { %v11906_v24 = vld [vmem:[%s14419_s23 + $0x1868] sm:$0xf0]  ;;  %v12948_v35 = vld [vmem:[%s14419_s23 + $0x12c] sm:$0xf0] }
 0x419   : > { %v13751_v41 = vld [vmem:[%s14419_s23 + $0x1a4c] sm:$0xf]  ;;  %v11909_v7 = vor.u32 %v13687_v14, %v11906_v24  ;;  %7497 = vmatpush.bf16.msrb.mxu3 %v12709_v39  ;;  %v9545_v14 = vor.u32 %v13100_v59, %v9544_v36  ;;  %v9000_v24 = vld [vmem:[%s14419_s23 + $0x190] sm:$0xf] }
 0x41a   : > { %v12162_v54 = vld [vmem:[%s14419_s23 + $0x1a68] sm:$0xf0]  ;;  %v9256_v39 = vld [vmem:[%s14419_s23 + $0x390] sm:$0xf] }
 0x41b   : > { %v13815_v4 = vld [vmem:[%s14419_s23 + $0x1c4c] sm:$0xf]  ;;  %v12165_v13 = vor.u32 %v13751_v41, %v12162_v54  ;;  %7456 = vmatpush.bf16.msrb.mxu0 %v11909_v7  ;;  %v12964_v41 = vld [vmem:[%s14419_s23 + $0x1ac] sm:$0xf0]  ;;  %v9801_v54 = vor.u32 %v13164_v33, %v9800_v51  ;;  %v7195_v7 = vpop.f32.mrf.mxu1 }
 0x41c   : > { %v12418_v5 = vld [vmem:[%s14419_s23 + $0x1c68] sm:$0xf0]  ;;  %v9192_v36 = vld [vmem:[%s14419_s23 + $0x310] sm:$0xf] }
 0x41d   : > { %v13879_v1 = vld [vmem:[%s14419_s23 + $0x1e4c] sm:$0xf]  ;;  %v12421_v17 = vor.u32 %v13815_v4, %v12418_v5  ;;  %7470 = vmatpush.bf16.msrb.mxu1 %v12165_v13  ;;  %v13028_v4 = vld [vmem:[%s14419_s23 + $0x3ac] sm:$0xf0] }
 0x41e   : > { %v12674_v6 = vld [vmem:[%s14419_s23 + $0x1e68] sm:$0xf0]  ;;  %v9512_v5 = vld [vmem:[%s14419_s23 + $0x590] sm:$0xf]  ;;  %v9257_v12 = vor.u32 %v13028_v4, %v9256_v39 }
 0x41f   : > { %v13679_v50 = vld [vmem:[%s14419_s23 + $0x180c] sm:$0xf]  ;;  %v12677_v29 = vor.u32 %v13879_v1, %v12674_v6  ;;  %7484 = vmatpush.bf16.msrb.mxu2 %v12421_v17  ;;  %v13092_v1 = vld [vmem:[%s14419_s23 + $0x5ac] sm:$0xf0]  ;;  %v7154_v6 = vadd.f32 %v7153_v62, %v7140_v43  ;;  %v7209_v31 = vpop.f32.mrf.mxu2 }
 0x420   : > { %v11874_v15 = vld [vmem:[%s14419_s23 + $0x1828] sm:$0xf0]  ;;  %v9513_v62 = vor.u32 %v13092_v1, %v9512_v5  ;;  %v8968_v13 = vld [vmem:[%s14419_s23 + $0x150] sm:$0xf] }
 0x421   : > { %v13743_v28 = vld [vmem:[%s14419_s23 + $0x1a0c] sm:$0xf]  ;;  %v11877_v32 = vor.u32 %v13679_v50, %v11874_v15  ;;  %7498 = vmatpush.bf16.msrb.mxu3 %v12677_v29  ;;  %v9001_v50 = vor.u32 %v12964_v41, %v9000_v24  ;;  %v7194_v15 = vadd.f32 %v7193_v3, %v7180_v10  ;;  %v12956_v17 = vld [vmem:[%s14419_s23 + $0x16c] sm:$0xf0]  ;;  %v7168_v3 = vadd.f32 %v15683_v20, %v7154_v6 }
 0x422   : > { %v12130_v19 = vld [vmem:[%s14419_s23 + $0x1a28] sm:$0xf0]  ;;  %v9480_v29 = vld [vmem:[%s14419_s23 + $0x550] sm:$0xf]  ;;  %v8969_v45 = vor.u32 %v12956_v17, %v8968_v13  ;;  %v8937_v10 = vor.u32 %v12948_v35, %v8936_v30 }
 0x423   : > { %v13807_v9 = vld [vmem:[%s14419_s23 + $0x1c0c] sm:$0xf]  ;;  %v12133_v37 = vor.u32 %v13743_v28, %v12130_v19  ;;  %7457 = vmatpush.bf16.msrb.mxu0 %v11877_v32  ;;  %v9224_v28 = vld [vmem:[%s14419_s23 + $0x350] sm:$0xf]  ;;  %v9769_v19 = vor.u32 %v13156_v21, %v9768_v22  ;;  %v7182_v16 = vadd.f32 %v7181_v23, %v7168_v3 }
 0x424   : > { %v12386_v25 = vld [vmem:[%s14419_s23 + $0x1c28] sm:$0xf0]  ;;  %v13012_v59 = vld [vmem:[%s14419_s23 + $0x32c] sm:$0xf0] }
 0x425   : > { %v13871_v26 = vld [vmem:[%s14419_s23 + $0x1e0c] sm:$0xf]  ;;  %v12389_v2 = vor.u32 %v13807_v9, %v12386_v25  ;;  %7471 = vmatpush.bf16.msrb.mxu1 %v12133_v37  ;;  %v13020_v9 = vld [vmem:[%s14419_s23 + $0x36c] sm:$0xf0]  ;;  %v7196_v24 = vadd.f32 %v7195_v7, %v7182_v16 }
 0x426   : > { %v12642_v46 = vld [vmem:[%s14419_s23 + $0x1e28] sm:$0xf0]  ;;  %7458 = vmatmul.bf16.vlgmr.msrb.gmra.mxu0 %v14770_v49  ;;  %v13084_v25 = vld [vmem:[%s14419_s23 + $0x56c] sm:$0xf0]  ;;  %v9225_v20 = vor.u32 %v13020_v9, %v9224_v28 }
 0x427   : > { %v12645_v42 = vor.u32 %v13871_v26, %v12642_v46  ;;  %7485 = vmatpush.bf16.msrb.mxu2 %v12389_v2  ;;  %7506 = vmatpush.bf16.msra.mxu0 %v9033_v47  ;;  %v7208_v26 = vadd.f32 %v7207_v38, %v7194_v15  ;;  %v9736_v46 = vld [vmem:[%s14419_s23 + $0x750] sm:$0xf]  ;;  %v9481_v32 = vor.u32 %v13084_v25, %v9480_v29  ;;  %v7223_v38 = vpop.f32.mrf.mxu3  ;;  %v7263_v29 = vpop.f32.mrf.mxu2 }
 0x428   : > { %7472 = vmatmul.bf16.vlgmr.msrb.gmra.mxu1 %v14777_v58  ;;  %v9737_v37 = vor.u32 %v13148_v40, %v9736_v46  ;;  %v9448_v2 = vld [vmem:[%s14419_s23 + $0x510] sm:$0xf]  ;;  %v7210_v22 = vadd.f32 %v7209_v31, %v7196_v24 }
 0x429   : > { %7499 = vmatpush.bf16.msrb.mxu3 %v12645_v42  ;;  %7520 = vmatpush.bf16.msra.mxu1 %v9289_v44  ;;  %v13076_v51 = vld [vmem:[%s14419_s23 + $0x52c] sm:$0xf0]  ;;  %v7222_v33 = vadd.f32 %v7221_v8, %v7208_v26  ;;  %v7235_v42 = vpop.f32.mrf.mxu0  ;;  %v9193_v44 = vor.u32 %v13012_v59, %v9192_v36 }
 0x42a   : > { %7486 = vmatmul.bf16.vlgmr.msrb.gmra.mxu2 %v14775_v55  ;;  %v9704_v47 = vld [vmem:[%s14419_s23 + $0x710] sm:$0xf]  ;;  %v9449_v8 = vor.u32 %v13076_v51, %v9448_v2  ;;  %v7224_v26 = vadd.f32 %v7223_v38, %v7210_v22 }
 0x42b   : > { %7534 = vmatpush.bf16.msra.mxu2 %v9545_v14  ;;  %7507 = vmatpush.bf16.msra.mxu0 %v9001_v50  ;;  %v13140_v43 = vld [vmem:[%s14419_s23 + $0x72c] sm:$0xf0]  ;;  %v7249_v14 = vpop.f32.mrf.mxu1  ;;  %v7236_v41 = vadd.f32 %v7235_v42, %v7222_v33 }
 0x42c   : > { %7500 = vmatmul.bf16.vlgmr.msrb.gmra.mxu3 %v14781_v63  ;;  %v8904_v39 = vld [vmem:[%s14419_s23 + $0xd0] sm:$0xf]  ;;  %v9705_v5 = vor.u32 %v13140_v43, %v9704_v47 }
 0x42d   : > { %7548 = vmatpush.bf16.msra.mxu3 %v9801_v54  ;;  %7521 = vmatpush.bf16.msra.mxu1 %v9257_v12  ;;  %v12940_v54 = vld [vmem:[%s14419_s23 + $0xec] sm:$0xf0]  ;;  %v7250_v12 = vadd.f32 %v7249_v14, %v7236_v41 }
 0x42e   : > { %v9160_v4 = vld [vmem:[%s14419_s23 + $0x2d0] sm:$0xf]  ;;  %v8905_v50 = vor.u32 %v12940_v54, %v8904_v39 }
 0x42f   : > { %7535 = vmatpush.bf16.msra.mxu2 %v9513_v62  ;;  %7508 = vmatpush.bf16.msra.mxu0 %v8969_v45  ;;  %v13004_v1 = vld [vmem:[%s14419_s23 + $0x2ec] sm:$0xf0]  ;;  %v7264_v46 = vadd.f32 %v7263_v29, %v7250_v12  ;;  %v7277_v45 = vpop.f32.mrf.mxu3  ;;  %v7265_v22 = vpop.f32.mrf.mxu2 }
 0x430   : > { %v9416_v6 = vld [vmem:[%s14419_s23 + $0x4d0] sm:$0xf]  ;;  %v9161_v62 = vor.u32 %v13004_v1, %v9160_v4 }
 0x431   : > { %7549 = vmatpush.bf16.msra.mxu3 %v9769_v19  ;;  %7522 = vmatpush.bf16.msra.mxu1 %v9225_v20  ;;  %v13068_v23 = vld [vmem:[%s14419_s23 + $0x4ec] sm:$0xf0]  ;;  %v7237_v40 = vpop.f32.mrf.mxu0  ;;  %v356_v20 = vld [vmem:[#allocation2 + $0x58] sm:$0xff]  ;;  %v7278_v59 = vadd.f32 %v7277_v45, %v7264_v46 }
 0x432   : > { %v9672_v21 = vld [vmem:[%s14419_s23 + $0x6d0] sm:$0xf]  ;;  %v9417_v13 = vor.u32 %v13068_v23, %v9416_v6  ;;  %v7238_v36 = vadd.f32 %v7237_v40, %v7224_v26 }
 0x433   : > { %7536 = vmatpush.bf16.msra.mxu2 %v9481_v32  ;;  %v13132_v7 = vld [vmem:[%s14419_s23 + $0x6ec] sm:$0xf0]  ;;  %7509 = vmatpush.bf16.msra.mxu0 %v8937_v10  ;;  %v7251_v38 = vpop.f32.mrf.mxu1  ;;  %v8404_v10 = vadd.f32 %v7278_v59, %v356_v20 }
 0x434   : > { %v8872_v15 = vld [vmem:[%s14419_s23 + $0x90] sm:$0xf]  ;;  %v9673_v9 = vor.u32 %v13132_v7, %v9672_v21  ;;  %v7252_v54 = vadd.f32 %v7251_v38, %v7238_v36 }
 0x435   : > { %7550 = vmatpush.bf16.msra.mxu3 %v9737_v37  ;;  %7523 = vmatpush.bf16.msra.mxu1 %v9193_v44  ;;  %v12932_v17 = vld [vmem:[%s14419_s23 + $0xac] sm:$0xf0]  ;;  %8420 = vst [vmem:[#allocation2 + $0x58] sm:$0xff] %v8404_v10 }
 0x436   : > { %v9128_v28 = vld [vmem:[%s14419_s23 + $0x290] sm:$0xf]  ;;  %v8873_v32 = vor.u32 %v12932_v17, %v8872_v15  ;;  %v7266_v12 = vadd.f32 %v7265_v22, %v7252_v54 }
 0x437   : > { %7537 = vmatpush.bf16.msra.mxu2 %v9449_v8  ;;  %v12996_v19 = vld [vmem:[%s14419_s23 + $0x2ac] sm:$0xf0]  ;;  %7510 = vmatpush.bf16.msra.mxu0 %v8905_v50 }
 0x438   : > { %v9384_v25 = vld [vmem:[%s14419_s23 + $0x490] sm:$0xf]  ;;  %v9129_v35 = vor.u32 %v12996_v19, %v9128_v28 }
 0x439   : > { %7551 = vmatpush.bf16.msra.mxu3 %v9705_v5  ;;  %v13060_v3 = vld [vmem:[%s14419_s23 + $0x4ac] sm:$0xf0]  ;;  %7524 = vmatpush.bf16.msra.mxu1 %v9161_v62  ;;  %v7279_v62 = vpop.f32.mrf.mxu3 }
 0x43a   : > { %v9640_v30 = vld [vmem:[%s14419_s23 + $0x690] sm:$0xf]  ;;  %v9385_v31 = vor.u32 %v13060_v3, %v9384_v25  ;;  %v7280_v3 = vadd.f32 %v7279_v62, %v7266_v12 }
 0x43b   : > { %v13124_v16 = vld [vmem:[%s14419_s23 + $0x6ac] sm:$0xf0]  ;;  %7538 = vmatpush.bf16.msra.mxu2 %v9417_v13  ;;  %7511 = vmatpush.bf16.msra.mxu0 %v8873_v32 }
 0x43c   : > { %v8840_v37 = vld [vmem:[%s14419_s23 + $0x50] sm:$0xf]  ;;  %v9641_v33 = vor.u32 %v13124_v16, %v9640_v30 }
 0x43d   : > { %v12924_v2 = vld [vmem:[%s14419_s23 + $0x6c] sm:$0xf0]  ;;  %7552 = vmatpush.bf16.msra.mxu3 %v9673_v9  ;;  %7525 = vmatpush.bf16.msra.mxu1 %v9129_v35 }
 0x43e   : > { %v9096_v51 = vld [vmem:[%s14419_s23 + $0x250] sm:$0xf]  ;;  %v8841_v24 = vor.u32 %v12924_v2, %v8840_v37 }
 0x43f   : > { %v12988_v42 = vld [vmem:[%s14419_s23 + $0x26c] sm:$0xf0]  ;;  %7539 = vmatpush.bf16.msra.mxu2 %v9385_v31 }
 0x440   : > { %v9352_v47 = vld [vmem:[%s14419_s23 + $0x450] sm:$0xf]  ;;  %v9097_v4 = vor.u32 %v12988_v42, %v9096_v51  ;;  %7512 = vmatpush.bf16.msra.mxu0 %v8841_v24 }
 0x441   : > { %v13052_v43 = vld [vmem:[%s14419_s23 + $0x46c] sm:$0xf0]  ;;  %7553 = vmatpush.bf16.msra.mxu3 %v9641_v33 }
 0x442   : > { %v9608_v44 = vld [vmem:[%s14419_s23 + $0x650] sm:$0xf]  ;;  %v9353_v5 = vor.u32 %v13052_v43, %v9352_v47  ;;  %7526 = vmatpush.bf16.msra.mxu1 %v9097_v4 }
 0x443   : > { %v13116_v14 = vld [vmem:[%s14419_s23 + $0x66c] sm:$0xf0] }
 0x444   : > { %v8808_v41 = vld [vmem:[%s14419_s23 + $0x10] sm:$0xf]  ;;  %v9609_v23 = vor.u32 %v13116_v14, %v9608_v44  ;;  %7540 = vmatpush.bf16.msra.mxu2 %v9353_v5 }
 0x445   : > { %v12916_v8 = vld [vmem:[%s14419_s23 + $0x2c] sm:$0xf0] }
 0x446   : > { %v9064_v39 = vld [vmem:[%s14419_s23 + $0x210] sm:$0xf]  ;;  %v8809_v19 = vor.u32 %v12916_v8, %v8808_v41  ;;  %7554 = vmatpush.bf16.msra.mxu3 %v9609_v23 }
 0x447   : > { %v12980_v1 = vld [vmem:[%s14419_s23 + $0x22c] sm:$0xf0] }
 0x448   : > { %v9320_v6 = vld [vmem:[%s14419_s23 + $0x410] sm:$0xf]  ;;  %v9065_v26 = vor.u32 %v12980_v1, %v9064_v39  ;;  %7513 = vmatpush.bf16.msra.mxu0 %v8809_v19 }
 0x449   : > { %v364_v21 = vld [vmem:[#allocation2 + $0x10] sm:$0xff] }
 0x44a   : > { %v13044_v7 = vld [vmem:[%s14419_s23 + $0x42c] sm:$0xf0]  ;;  %v8412_v20 = vadd.f32 %v7280_v3, %v364_v21  ;;  %7527 = vmatpush.bf16.msra.mxu1 %v9065_v26 }
 0x44b   : > { %v9576_v50 = vld [vmem:[%s14419_s23 + $0x610] sm:$0xf]  ;;  %v9321_v46 = vor.u32 %v13044_v7, %v9320_v6  ;;  %7514 = vmatmul.bf16.vlgmr.msra.gmra.mxu0 %v14520_v11 }
 0x44c   : > { %v13108_v15 = vld [vmem:[%s14419_s23 + $0x62c] sm:$0xf0]  ;;  %8428 = vst [vmem:[#allocation2 + $0x10] sm:$0xff] %v8412_v20 }
 0x44d   : > { %v10056_v13 = vld [vmem:[%s14419_s23 + $0x9d0] sm:$0xf]  ;;  %v9577_v30 = vor.u32 %v13108_v15, %v9576_v50  ;;  %7541 = vmatpush.bf16.msra.mxu2 %v9321_v46  ;;  %7528 = vmatmul.bf16.vlgmr.msra.gmra.mxu1 %v14536_v27 }
 0x44e   : > { %v13228_v17 = vld [vmem:[%s14419_s23 + $0x9ec] sm:$0xf0] }
 0x44f   : > { %v10312_v28 = vld [vmem:[%s14419_s23 + $0xbd0] sm:$0xf]  ;;  %v10057_v16 = vor.u32 %v13228_v17, %v10056_v13  ;;  %7555 = vmatpush.bf16.msra.mxu3 %v9577_v30 }
 0x450   : > { %v13292_v9 = vld [vmem:[%s14419_s23 + $0xbec] sm:$0xf0]  ;;  %7542 = vmatmul.bf16.vlgmr.msra.gmra.mxu2 %v14526_v18 }
 0x451   : > { %v10568_v29 = vld [vmem:[%s14419_s23 + $0xdd0] sm:$0xf]  ;;  %v10313_v32 = vor.u32 %v13292_v9, %v10312_v28  ;;  %7562 = vmatpush.bf16.msrb.mxu0 %v10057_v16 }
 0x452   : > { %v13356_v25 = vld [vmem:[%s14419_s23 + $0xdec] sm:$0xf0]  ;;  %7556 = vmatmul.bf16.vlgmr.msra.gmra.mxu3 %v14542_v34 }
 0x453   : > { %v10824_v40 = vld [vmem:[%s14419_s23 + $0xfd0] sm:$0xf]  ;;  %v10569_v35 = vor.u32 %v13356_v25, %v10568_v29  ;;  %7576 = vmatpush.bf16.msrb.mxu1 %v10313_v32 }
 0x454   : > { %v13420_v45 = vld [vmem:[%s14419_s23 + $0xfec] sm:$0xf0] }
 0x455   : > { %v10024_v36 = vld [vmem:[%s14419_s23 + $0x990] sm:$0xf]  ;;  %v10825_v37 = vor.u32 %v13420_v45, %v10824_v40  ;;  %7590 = vmatpush.bf16.msrb.mxu2 %v10569_v35 }
 0x456   : > { %v13220_v59 = vld [vmem:[%s14419_s23 + $0x9ac] sm:$0xf0] }
 0x457   : > { %v10280_v31 = vld [vmem:[%s14419_s23 + $0xb90] sm:$0xf]  ;;  %v10025_v47 = vor.u32 %v13220_v59, %v10024_v36  ;;  %7604 = vmatpush.bf16.msrb.mxu3 %v10825_v37 }
 0x458   : > { %v13284_v2 = vld [vmem:[%s14419_s23 + $0xbac] sm:$0xf0] }
 0x459   : > { %v10536_v51 = vld [vmem:[%s14419_s23 + $0xd90] sm:$0xf]  ;;  %v10281_v43 = vor.u32 %v13284_v2, %v10280_v31  ;;  %7563 = vmatpush.bf16.msrb.mxu0 %v10025_v47 }
 0x45a   : > { %v13348_v33 = vld [vmem:[%s14419_s23 + $0xdac] sm:$0xf0] }
 0x45b   : > { %v10792_v38 = vld [vmem:[%s14419_s23 + $0xf90] sm:$0xf]  ;;  %v10537_v10 = vor.u32 %v13348_v33, %v10536_v51  ;;  %7577 = vmatpush.bf16.msrb.mxu1 %v10281_v43 }
 0x45c   : > { %v13412_v42 = vld [vmem:[%s14419_s23 + $0xfac] sm:$0xf0] }
 0x45d   : > { %v9992_v44 = vld [vmem:[%s14419_s23 + $0x950] sm:$0xf]  ;;  %v10793_v41 = vor.u32 %v13412_v42, %v10792_v38  ;;  %7591 = vmatpush.bf16.msrb.mxu2 %v10537_v10 }
 0x45e   : > { %v13212_v14 = vld [vmem:[%s14419_s23 + $0x96c] sm:$0xf0] }
 0x45f   : > { %v10248_v24 = vld [vmem:[%s14419_s23 + $0xb50] sm:$0xf]  ;;  %v9993_v1 = vor.u32 %v13212_v14, %v9992_v44  ;;  %7605 = vmatpush.bf16.msrb.mxu3 %v10793_v41 }
 0x460   : > { %v13276_v8 = vld [vmem:[%s14419_s23 + $0xb6c] sm:$0xf0] }
 0x461   : > { %v10504_v39 = vld [vmem:[%s14419_s23 + $0xd50] sm:$0xf]  ;;  %v10249_v6 = vor.u32 %v13276_v8, %v10248_v24  ;;  %7564 = vmatpush.bf16.msrb.mxu0 %v9993_v1 }
 0x462   : > { %v13340_v54 = vld [vmem:[%s14419_s23 + $0xd6c] sm:$0xf0] }
 0x463   : > { %v10760_v4 = vld [vmem:[%s14419_s23 + $0xf50] sm:$0xf]  ;;  %v10505_v23 = vor.u32 %v13340_v54, %v10504_v39  ;;  %7578 = vmatpush.bf16.msrb.mxu1 %v10249_v6 }
 0x464   : > { %v13404_v5 = vld [vmem:[%s14419_s23 + $0xf6c] sm:$0xf0] }
 0x465   : > { %v9960_v22 = vld [vmem:[%s14419_s23 + $0x910] sm:$0xf]  ;;  %v10761_v50 = vor.u32 %v13404_v5, %v10760_v4  ;;  %7592 = vmatpush.bf16.msrb.mxu2 %v10505_v23 }
 0x466   : > { %v13204_v21 = vld [vmem:[%s14419_s23 + $0x92c] sm:$0xf0] }
 0x467   : > { %v10216_v7 = vld [vmem:[%s14419_s23 + $0xb10] sm:$0xf]  ;;  %v9961_v28 = vor.u32 %v13204_v21, %v9960_v22  ;;  %7606 = vmatpush.bf16.msrb.mxu3 %v10761_v50 }
 0x468   : > { %v13268_v15 = vld [vmem:[%s14419_s23 + $0xb2c] sm:$0xf0] }
 0x469   : > { %v10472_v12 = vld [vmem:[%s14419_s23 + $0xd10] sm:$0xf]  ;;  %v10217_v19 = vor.u32 %v13268_v15, %v10216_v7  ;;  %7565 = vmatpush.bf16.msrb.mxu0 %v9961_v28 }
 0x46a   : > { %v13332_v62 = vld [vmem:[%s14419_s23 + $0xd2c] sm:$0xf0] }
 0x46b   : > { %v10728_v13 = vld [vmem:[%s14419_s23 + $0xf10] sm:$0xf]  ;;  %v10473_v9 = vor.u32 %v13332_v62, %v10472_v12  ;;  %7579 = vmatpush.bf16.msrb.mxu1 %v10217_v19 }
 0x46c   : > { %v13396_v17 = vld [vmem:[%s14419_s23 + $0xf2c] sm:$0xf0] }
 0x46d   : > { %v9928_v29 = vld [vmem:[%s14419_s23 + $0x8d0] sm:$0xf]  ;;  %v10729_v26 = vor.u32 %v13396_v17, %v10728_v13  ;;  %7593 = vmatpush.bf16.msrb.mxu2 %v10473_v9 }
 0x46e   : > { %v13196_v25 = vld [vmem:[%s14419_s23 + $0x8ec] sm:$0xf0] }
 0x46f   : > { %v10184_v3 = vld [vmem:[%s14419_s23 + $0xad0] sm:$0xf]  ;;  %v9929_v20 = vor.u32 %v13196_v25, %v9928_v29  ;;  %7607 = vmatpush.bf16.msrb.mxu3 %v10729_v26 }
 0x470   : > { %v13260_v46 = vld [vmem:[%s14419_s23 + $0xaec] sm:$0xf0] }
 0x471   : > { %v10440_v40 = vld [vmem:[%s14419_s23 + $0xcd0] sm:$0xf]  ;;  %v10185_v32 = vor.u32 %v13260_v46, %v10184_v3  ;;  %7566 = vmatpush.bf16.msrb.mxu0 %v9929_v20 }
 0x472   : > { %v13324_v45 = vld [vmem:[%s14419_s23 + $0xcec] sm:$0xf0] }
 0x473   : > { %v10696_v30 = vld [vmem:[%s14419_s23 + $0xed0] sm:$0xf]  ;;  %v10441_v35 = vor.u32 %v13324_v45, %v10440_v40  ;;  %7580 = vmatpush.bf16.msrb.mxu1 %v10185_v32 }
 0x474   : > { %v13388_v16 = vld [vmem:[%s14419_s23 + $0xeec] sm:$0xf0] }
 0x475   : > { %v9896_v36 = vld [vmem:[%s14419_s23 + $0x890] sm:$0xf]  ;;  %v10697_v37 = vor.u32 %v13388_v16, %v10696_v30  ;;  %7594 = vmatpush.bf16.msrb.mxu2 %v10441_v35 }
 0x476   : > { %v13188_v59 = vld [vmem:[%s14419_s23 + $0x8ac] sm:$0xf0] }
 0x477   : > { %v10152_v31 = vld [vmem:[%s14419_s23 + $0xa90] sm:$0xf]  ;;  %v9897_v47 = vor.u32 %v13188_v59, %v9896_v36  ;;  %7608 = vmatpush.bf16.msrb.mxu3 %v10697_v37 }
 0x478   : > { %v13252_v2 = vld [vmem:[%s14419_s23 + $0xaac] sm:$0xf0] }
 0x479   : > { %v10408_v51 = vld [vmem:[%s14419_s23 + $0xc90] sm:$0xf]  ;;  %v10153_v43 = vor.u32 %v13252_v2, %v10152_v31  ;;  %7567 = vmatpush.bf16.msrb.mxu0 %v9897_v47 }
 0x47a   : > { %v13316_v33 = vld [vmem:[%s14419_s23 + $0xcac] sm:$0xf0] }
 0x47b   : > { %v10664_v38 = vld [vmem:[%s14419_s23 + $0xe90] sm:$0xf]  ;;  %v10409_v10 = vor.u32 %v13316_v33, %v10408_v51  ;;  %7581 = vmatpush.bf16.msrb.mxu1 %v10153_v43 }
 0x47c   : > { %v13380_v42 = vld [vmem:[%s14419_s23 + $0xeac] sm:$0xf0] }
 0x47d   : > { %v9864_v44 = vld [vmem:[%s14419_s23 + $0x850] sm:$0xf]  ;;  %v10665_v41 = vor.u32 %v13380_v42, %v10664_v38  ;;  %7595 = vmatpush.bf16.msrb.mxu2 %v10409_v10 }
 0x47e   : > { %v13180_v14 = vld [vmem:[%s14419_s23 + $0x86c] sm:$0xf0] }
 0x47f   : > { %v10120_v24 = vld [vmem:[%s14419_s23 + $0xa50] sm:$0xf]  ;;  %v9865_v1 = vor.u32 %v13180_v14, %v9864_v44  ;;  %7609 = vmatpush.bf16.msrb.mxu3 %v10665_v41 }
 0x480   : > { %v13244_v8 = vld [vmem:[%s14419_s23 + $0xa6c] sm:$0xf0] }
 0x481   : > { %v10376_v39 = vld [vmem:[%s14419_s23 + $0xc50] sm:$0xf]  ;;  %v10121_v22 = vor.u32 %v13244_v8, %v10120_v24  ;;  %7568 = vmatpush.bf16.msrb.mxu0 %v9865_v1 }
 0x482   : > { %v13308_v54 = vld [vmem:[%s14419_s23 + $0xc6c] sm:$0xf0] }
 0x483   : > { %v10632_v4 = vld [vmem:[%s14419_s23 + $0xe50] sm:$0xf]  ;;  %v10377_v21 = vor.u32 %v13308_v54, %v10376_v39  ;;  %7582 = vmatpush.bf16.msrb.mxu1 %v10121_v22 }
 0x484   : > { %v13372_v5 = vld [vmem:[%s14419_s23 + $0xe6c] sm:$0xf0] }
 0x485   : > { %v9832_v6 = vld [vmem:[%s14419_s23 + $0x810] sm:$0xf]  ;;  %v10633_v12 = vor.u32 %v13372_v5, %v10632_v4  ;;  %7596 = vmatpush.bf16.msrb.mxu2 %v10377_v21 }
 0x486   : > { %v13172_v23 = vld [vmem:[%s14419_s23 + $0x82c] sm:$0xf0] }
 0x487   : > { %v10088_v7 = vld [vmem:[%s14419_s23 + $0xa10] sm:$0xf]  ;;  %v9833_v29 = vor.u32 %v13172_v23, %v9832_v6  ;;  %7610 = vmatpush.bf16.msrb.mxu3 %v10633_v12 }
 0x488   : > { %v13236_v50 = vld [vmem:[%s14419_s23 + $0xa2c] sm:$0xf0] }
 0x489   : > { %v10344_v15 = vld [vmem:[%s14419_s23 + $0xc10] sm:$0xf]  ;;  %v10089_v46 = vor.u32 %v13236_v50, %v10088_v7  ;;  %7569 = vmatpush.bf16.msrb.mxu0 %v9833_v29 }
 0x48a   : > { %v13300_v62 = vld [vmem:[%s14419_s23 + $0xc2c] sm:$0xf0] }
 0x48b   : > { %v10600_v13 = vld [vmem:[%s14419_s23 + $0xe10] sm:$0xf]  ;;  %v10345_v40 = vor.u32 %v13300_v62, %v10344_v15  ;;  %7583 = vmatpush.bf16.msrb.mxu1 %v10089_v46 }
 0x48c   : > { %v13364_v17 = vld [vmem:[%s14419_s23 + $0xe2c] sm:$0xf0]  ;;  %7570 = vmatmul.bf16.vlgmr.msrb.gmra.mxu0 %v14602_v56 }
 0x48d   : > { %v11080_v28 = vld [vmem:[%s14419_s23 + $0x11d0] sm:$0xf]  ;;  %v10601_v16 = vor.u32 %v13364_v17, %v10600_v13  ;;  %7597 = vmatpush.bf16.msrb.mxu2 %v10345_v40 }
 0x48e   : > { %v13484_v19 = vld [vmem:[%s14419_s23 + $0x11ec] sm:$0xf0]  ;;  %7584 = vmatmul.bf16.vlgmr.msrb.gmra.mxu1 %v14609_v61 }
 0x48f   : > { %v11336_v9 = vld [vmem:[%s14419_s23 + $0x13d0] sm:$0xf]  ;;  %v11081_v20 = vor.u32 %v13484_v19, %v11080_v28  ;;  %7611 = vmatpush.bf16.msrb.mxu3 %v10601_v16 }
 0x490   : > { %v13548_v25 = vld [vmem:[%s14419_s23 + $0x13ec] sm:$0xf0]  ;;  %7598 = vmatmul.bf16.vlgmr.msrb.gmra.mxu2 %v14607_v60 }
 0x491   : > { %v11592_v3 = vld [vmem:[%s14419_s23 + $0x15d0] sm:$0xf]  ;;  %v11337_v32 = vor.u32 %v13548_v25, %v11336_v9  ;;  %7618 = vmatpush.bf16.msra.mxu0 %v11081_v20 }
 0x492   : > { %v13612_v26 = vld [vmem:[%s14419_s23 + $0x15ec] sm:$0xf0]  ;;  %7612 = vmatmul.bf16.vlgmr.msrb.gmra.mxu3 %v14613_v0 }
 0x493   : > { %v11848_v45 = vld [vmem:[%s14419_s23 + $0x17d0] sm:$0xf]  ;;  %v11593_v35 = vor.u32 %v13612_v26, %v11592_v3  ;;  %7632 = vmatpush.bf16.msra.mxu1 %v11337_v32  ;;  %v15882_v32 = vpop.f32.mrf.mxu1 }
 0x494   : > { %v13676_v30 = vld [vmem:[%s14419_s23 + $0x17ec] sm:$0xf0] }
 0x495   : > { %v11048_v36 = vld [vmem:[%s14419_s23 + $0x1190] sm:$0xf]  ;;  %v11849_v37 = vor.u32 %v13676_v30, %v11848_v45  ;;  %7646 = vmatpush.bf16.msra.mxu2 %v11593_v35  ;;  %v15878_v30 = vpop.f32.mrf.mxu0 }
 0x496   : > { %v13476_v59 = vld [vmem:[%s14419_s23 + $0x11ac] sm:$0xf0] }
 0x497   : > { %v11304_v31 = vld [vmem:[%s14419_s23 + $0x1390] sm:$0xf]  ;;  %v11049_v47 = vor.u32 %v13476_v59, %v11048_v36  ;;  %7660 = vmatpush.bf16.msra.mxu3 %v11849_v37 }
 0x498   : > { %v13540_v2 = vld [vmem:[%s14419_s23 + $0x13ac] sm:$0xf0] }
 0x499   : > { %v11560_v51 = vld [vmem:[%s14419_s23 + $0x1590] sm:$0xf]  ;;  %v11305_v43 = vor.u32 %v13540_v2, %v11304_v31  ;;  %7619 = vmatpush.bf16.msra.mxu0 %v11049_v47 }
 0x49a   : > { %v13604_v33 = vld [vmem:[%s14419_s23 + $0x15ac] sm:$0xf0] }
 0x49b   : > { %v11816_v38 = vld [vmem:[%s14419_s23 + $0x1790] sm:$0xf]  ;;  %v11561_v10 = vor.u32 %v13604_v33, %v11560_v51  ;;  %7633 = vmatpush.bf16.msra.mxu1 %v11305_v43 }
 0x49c   : > { %v13668_v42 = vld [vmem:[%s14419_s23 + $0x17ac] sm:$0xf0] }
 0x49d   : > { %v11016_v44 = vld [vmem:[%s14419_s23 + $0x1150] sm:$0xf]  ;;  %v11817_v41 = vor.u32 %v13668_v42, %v11816_v38  ;;  %7647 = vmatpush.bf16.msra.mxu2 %v11561_v10 }
 0x49e   : > { %v13468_v14 = vld [vmem:[%s14419_s23 + $0x116c] sm:$0xf0] }
 0x49f   : > { %v11272_v24 = vld [vmem:[%s14419_s23 + $0x1350] sm:$0xf]  ;;  %v11017_v1 = vor.u32 %v13468_v14, %v11016_v44  ;;  %7661 = vmatpush.bf16.msra.mxu3 %v11817_v41 }
 0x4a0   : > { %v13532_v8 = vld [vmem:[%s14419_s23 + $0x136c] sm:$0xf0] }
 0x4a1   : > { %v11528_v39 = vld [vmem:[%s14419_s23 + $0x1550] sm:$0xf]  ;;  %v11273_v6 = vor.u32 %v13532_v8, %v11272_v24  ;;  %7620 = vmatpush.bf16.msra.mxu0 %v11017_v1 }
 0x4a2   : > { %v13596_v54 = vld [vmem:[%s14419_s23 + $0x156c] sm:$0xf0] }
 0x4a3   : > { %v11784_v4 = vld [vmem:[%s14419_s23 + $0x1750] sm:$0xf]  ;;  %v11529_v23 = vor.u32 %v13596_v54, %v11528_v39  ;;  %7634 = vmatpush.bf16.msra.mxu1 %v11273_v6  ;;  %v15895_v39 = vpop.f32.mrf.mxu2  ;;  %v15900_v6 = vpop.f32.mrf.mxu3 }
 0x4a4   : > { %v13660_v5 = vld [vmem:[%s14419_s23 + $0x176c] sm:$0xf0] }
 0x4a5   : > { %v10984_v22 = vld [vmem:[%s14419_s23 + $0x1110] sm:$0xf]  ;;  %v11785_v50 = vor.u32 %v13660_v5, %v11784_v4  ;;  %7648 = vmatpush.bf16.msra.mxu2 %v11529_v23 }
 0x4a6   : > { %v13460_v21 = vld [vmem:[%s14419_s23 + $0x112c] sm:$0xf0] }
 0x4a7   : > { %v11240_v7 = vld [vmem:[%s14419_s23 + $0x1310] sm:$0xf]  ;;  %v10985_v28 = vor.u32 %v13460_v21, %v10984_v22  ;;  %7662 = vmatpush.bf16.msra.mxu3 %v11785_v50 }
 0x4a8   : > { %v13524_v15 = vld [vmem:[%s14419_s23 + $0x132c] sm:$0xf0] }
 0x4a9   : > { %v11496_v12 = vld [vmem:[%s14419_s23 + $0x1510] sm:$0xf]  ;;  %v11241_v19 = vor.u32 %v13524_v15, %v11240_v7  ;;  %7621 = vmatpush.bf16.msra.mxu0 %v10985_v28  ;;  %v15906_v15 = vpop.f32.mrf.mxu0 }
 0x4aa   : > { %v13588_v62 = vld [vmem:[%s14419_s23 + $0x152c] sm:$0xf0] }
 0x4ab   : > { %v11752_v13 = vld [vmem:[%s14419_s23 + $0x1710] sm:$0xf]  ;;  %v11497_v9 = vor.u32 %v13588_v62, %v11496_v12  ;;  %7635 = vmatpush.bf16.msra.mxu1 %v11241_v19  ;;  %v15911_v19 = vpop.f32.mrf.mxu1 }
 0x4ac   : > { %v13652_v17 = vld [vmem:[%s14419_s23 + $0x172c] sm:$0xf0] }
 0x4ad   : > { %v10952_v29 = vld [vmem:[%s14419_s23 + $0x10d0] sm:$0xf]  ;;  %v11753_v26 = vor.u32 %v13652_v17, %v11752_v13  ;;  %7649 = vmatpush.bf16.msra.mxu2 %v11497_v9 }
 0x4ae   : > { %v13452_v25 = vld [vmem:[%s14419_s23 + $0x10ec] sm:$0xf0] }
 0x4af   : > { %v11208_v3 = vld [vmem:[%s14419_s23 + $0x12d0] sm:$0xf]  ;;  %v10953_v35 = vor.u32 %v13452_v25, %v10952_v29  ;;  %7663 = vmatpush.bf16.msra.mxu3 %v11753_v26 }
 0x4b0   : > { %v13516_v46 = vld [vmem:[%s14419_s23 + $0x12ec] sm:$0xf0] }
 0x4b1   : > { %v11464_v40 = vld [vmem:[%s14419_s23 + $0x14d0] sm:$0xf]  ;;  %v11209_v36 = vor.u32 %v13516_v46, %v11208_v3  ;;  %7622 = vmatpush.bf16.msra.mxu0 %v10953_v35 }
 0x4b2   : > { %v13580_v45 = vld [vmem:[%s14419_s23 + $0x14ec] sm:$0xf0] }
 0x4b3   : > { %v11720_v16 = vld [vmem:[%s14419_s23 + $0x16d0] sm:$0xf]  ;;  %v11465_v59 = vor.u32 %v13580_v45, %v11464_v40  ;;  %7636 = vmatpush.bf16.msra.mxu1 %v11209_v36 }
 0x4b4   : > { %v13644_v20 = vld [vmem:[%s14419_s23 + $0x16ec] sm:$0xf0] }
 0x4b5   : > { %v10920_v31 = vld [vmem:[%s14419_s23 + $0x1090] sm:$0xf]  ;;  %v11721_v51 = vor.u32 %v13644_v20, %v11720_v16  ;;  %7650 = vmatpush.bf16.msra.mxu2 %v11465_v59 }
 0x4b6   : > { %v13444_v37 = vld [vmem:[%s14419_s23 + $0x10ac] sm:$0xf0] }
 0x4b7   : > { %v11176_v2 = vld [vmem:[%s14419_s23 + $0x1290] sm:$0xf]  ;;  %v10921_v10 = vor.u32 %v13444_v37, %v10920_v31  ;;  %7664 = vmatpush.bf16.msra.mxu3 %v11721_v51 }
 0x4b8   : > { %v13508_v33 = vld [vmem:[%s14419_s23 + $0x12ac] sm:$0xf0] }
 0x4b9   : > { %v11432_v38 = vld [vmem:[%s14419_s23 + $0x1490] sm:$0xf]  ;;  %v11177_v44 = vor.u32 %v13508_v33, %v11176_v2  ;;  %7623 = vmatpush.bf16.msra.mxu0 %v10921_v10  ;;  %v15927_v10 = vpop.f32.mrf.mxu2 }
 0x4ba   : > { %v13572_v42 = vld [vmem:[%s14419_s23 + $0x14ac] sm:$0xf0] }
 0x4bb   : > { %v11688_v47 = vld [vmem:[%s14419_s23 + $0x1690] sm:$0xf]  ;;  %v11433_v14 = vor.u32 %v13572_v42, %v11432_v38  ;;  %7637 = vmatpush.bf16.msra.mxu1 %v11177_v44 }
 0x4bc   : > { %v13636_v43 = vld [vmem:[%s14419_s23 + $0x16ac] sm:$0xf0] }
 0x4bd   : > { %v10888_v24 = vld [vmem:[%s14419_s23 + $0x1050] sm:$0xf]  ;;  %v11689_v54 = vor.u32 %v13636_v43, %v11688_v47  ;;  %7651 = vmatpush.bf16.msra.mxu2 %v11433_v14 }
 0x4be   : > { %v13436_v41 = vld [vmem:[%s14419_s23 + $0x106c] sm:$0xf0] }
 0x4bf   : > { %v11144_v8 = vld [vmem:[%s14419_s23 + $0x1250] sm:$0xf]  ;;  %v10889_v21 = vor.u32 %v13436_v41, %v10888_v24  ;;  %7665 = vmatpush.bf16.msra.mxu3 %v11689_v54 }
 0x4c0   : > { %v13500_v4 = vld [vmem:[%s14419_s23 + $0x126c] sm:$0xf0] }
 0x4c1   : > { %v11400_v5 = vld [vmem:[%s14419_s23 + $0x1450] sm:$0xf]  ;;  %v11145_v12 = vor.u32 %v13500_v4, %v11144_v8  ;;  %7624 = vmatpush.bf16.msra.mxu0 %v10889_v21  ;;  %v15932_v8 = vpop.f32.mrf.mxu3 }
 0x4c2   : > { %v13564_v1 = vld [vmem:[%s14419_s23 + $0x146c] sm:$0xf0] }
 0x4c3   : > { %v11656_v23 = vld [vmem:[%s14419_s23 + $0x1650] sm:$0xf]  ;;  %v11401_v62 = vor.u32 %v13564_v1, %v11400_v5  ;;  %7638 = vmatpush.bf16.msra.mxu1 %v11145_v12  ;;  %v7306_v1 = vadd.f32 %v15882_v32, %v15878_v30 }
 0x4c4   : > { %v13628_v22 = vld [vmem:[%s14419_s23 + $0x166c] sm:$0xf0] }
 0x4c5   : > { %v10856_v7 = vld [vmem:[%s14419_s23 + $0x1010] sm:$0xf]  ;;  %v11657_v9 = vor.u32 %v13628_v22, %v11656_v23  ;;  %7652 = vmatpush.bf16.msra.mxu2 %v11401_v62  ;;  %v7347_v23 = vpop.f32.mrf.mxu0  ;;  %v15941_v62 = vpop.f32.mrf.mxu1 }
 0x4c6   : > { %v13428_v50 = vld [vmem:[%s14419_s23 + $0x102c] sm:$0xf0] }
 0x4c7   : > { %v11112_v13 = vld [vmem:[%s14419_s23 + $0x1210] sm:$0xf]  ;;  %v10857_v45 = vor.u32 %v13428_v50, %v10856_v7  ;;  %7666 = vmatpush.bf16.msra.mxu3 %v11657_v9 }
 0x4c8   : > { %v13492_v17 = vld [vmem:[%s14419_s23 + $0x122c] sm:$0xf0] }
 0x4c9   : > { %v11368_v28 = vld [vmem:[%s14419_s23 + $0x1410] sm:$0xf]  ;;  %v11113_v36 = vor.u32 %v13492_v17, %v11112_v13  ;;  %7625 = vmatpush.bf16.msra.mxu0 %v10857_v45 }
 0x4ca   : > { %v13556_v29 = vld [vmem:[%s14419_s23 + $0x142c] sm:$0xf0] }
 0x4cb   : > { %v11624_v25 = vld [vmem:[%s14419_s23 + $0x1610] sm:$0xf]  ;;  %v11369_v59 = vor.u32 %v13556_v29, %v11368_v28  ;;  %7639 = vmatpush.bf16.msra.mxu1 %v11113_v36 }
 0x4cc   : > { %v13620_v3 = vld [vmem:[%s14419_s23 + $0x162c] sm:$0xf0]  ;;  %7626 = vmatmul.bf16.vlgmr.msra.gmra.mxu0 %v14686_v48 }
 0x4cd   : > { %v12104_v26 = vld [vmem:[%s14419_s23 + $0x19d0] sm:$0xf]  ;;  %v11625_v2 = vor.u32 %v13620_v3, %v11624_v25  ;;  %7653 = vmatpush.bf16.msra.mxu2 %v11369_v59  ;;  %v7320_v25 = vadd.f32 %v15895_v39, %v7306_v1  ;;  %v15961_v39 = vpop.f32.mrf.mxu2  ;;  %v15976_v1 = vpop.f32.mrf.mxu1 }
 0x4ce   : > { %v13740_v46 = vld [vmem:[%s14419_s23 + $0x19ec] sm:$0xf0]  ;;  %7640 = vmatmul.bf16.vlgmr.msra.gmra.mxu1 %v14693_v53 }
 0x4cf   : > { %v12360_v40 = vld [vmem:[%s14419_s23 + $0x1bd0] sm:$0xf]  ;;  %v12105_v51 = vor.u32 %v13740_v46, %v12104_v26  ;;  %7667 = vmatpush.bf16.msra.mxu3 %v11625_v2  ;;  %v7334_v2 = vadd.f32 %v15900_v6, %v7320_v25 }
 0x4d0   : > { %v13804_v16 = vld [vmem:[%s14419_s23 + $0x1bec] sm:$0xf0]  ;;  %7654 = vmatmul.bf16.vlgmr.msra.gmra.mxu2 %v14691_v52 }
 0x4d1   : > { %v12616_v20 = vld [vmem:[%s14419_s23 + $0x1dd0] sm:$0xf]  ;;  %v12361_v33 = vor.u32 %v13804_v16, %v12360_v40  ;;  %7674 = vmatpush.bf16.msrb.mxu0 %v12105_v51  ;;  %v15964_v51 = vpop.f32.mrf.mxu3 }
 0x4d2   : > { %v13868_v35 = vld [vmem:[%s14419_s23 + $0x1dec] sm:$0xf0]  ;;  %7668 = vmatmul.bf16.vlgmr.msra.gmra.mxu3 %v14697_v57 }
 0x4d3   : > { %v12872_v31 = vld [vmem:[%s14419_s23 + $0x1fd0] sm:$0xf]  ;;  %v12617_v38 = vor.u32 %v13868_v35, %v12616_v20  ;;  %7688 = vmatpush.bf16.msrb.mxu1 %v12361_v33 }
 0x4d4   : > { %v13932_v37 = vld [vmem:[%s14419_s23 + $0x1fec] sm:$0xf0] }
 0x4d5   : > { %v12072_v42 = vld [vmem:[%s14419_s23 + $0x1990] sm:$0xf]  ;;  %v12873_v44 = vor.u32 %v13932_v37, %v12872_v31  ;;  %7702 = vmatpush.bf16.msrb.mxu2 %v12617_v38 }
 0x4d6   : > { %v13732_v47 = vld [vmem:[%s14419_s23 + $0x19ac] sm:$0xf0] }
 0x4d7   : > { %v12328_v43 = vld [vmem:[%s14419_s23 + $0x1b90] sm:$0xf]  ;;  %v12073_v5 = vor.u32 %v13732_v47, %v12072_v42  ;;  %7716 = vmatpush.bf16.msrb.mxu3 %v12873_v44 }
 0x4d8   : > { %v13796_v14 = vld [vmem:[%s14419_s23 + $0x1bac] sm:$0xf0] }
 0x4d9   : > { %v12584_v24 = vld [vmem:[%s14419_s23 + $0x1d90] sm:$0xf]  ;;  %v12329_v22 = vor.u32 %v13796_v14, %v12328_v43  ;;  %7675 = vmatpush.bf16.msrb.mxu0 %v12073_v5  ;;  %v7308_v5 = vadd.f32 %v15911_v19, %v15906_v15 }
 0x4da   : > { %v13860_v41 = vld [vmem:[%s14419_s23 + $0x1dac] sm:$0xf0] }
 0x4db   : > { %v12840_v54 = vld [vmem:[%s14419_s23 + $0x1f90] sm:$0xf]  ;;  %v12585_v21 = vor.u32 %v13860_v41, %v12584_v24  ;;  %7689 = vmatpush.bf16.msrb.mxu1 %v12329_v22 }
 0x4dc   : > { %v13924_v4 = vld [vmem:[%s14419_s23 + $0x1fac] sm:$0xf0] }
 0x4dd   : > { %v12040_v7 = vld [vmem:[%s14419_s23 + $0x1950] sm:$0xf]  ;;  %v12841_v13 = vor.u32 %v13924_v4, %v12840_v54  ;;  %7703 = vmatpush.bf16.msrb.mxu2 %v12585_v21  ;;  %v7349_v54 = vpop.f32.mrf.mxu0  ;;  %v7348_v21 = vadd.f32 %v7347_v23, %v7334_v2  ;;  %v7322_v23 = vadd.f32 %v15927_v10, %v7308_v5 }
 0x4de   : > { %v13724_v50 = vld [vmem:[%s14419_s23 + $0x196c] sm:$0xf0] }
 0x4df   : > { %v12296_v12 = vld [vmem:[%s14419_s23 + $0x1b50] sm:$0xf]  ;;  %v12041_v29 = vor.u32 %v13724_v50, %v12040_v7  ;;  %7717 = vmatpush.bf16.msrb.mxu3 %v12841_v13  ;;  %v7362_v25 = vadd.f32 %v15941_v62, %v7348_v21  ;;  %v7336_v2 = vadd.f32 %v15932_v8, %v7322_v23 }
 0x4e0   : > { %v13788_v17 = vld [vmem:[%s14419_s23 + $0x1b6c] sm:$0xf0] }
 0x4e1   : > { %v12552_v30 = vld [vmem:[%s14419_s23 + $0x1d50] sm:$0xf]  ;;  %v12297_v3 = vor.u32 %v13788_v17, %v12296_v12  ;;  %7676 = vmatpush.bf16.msrb.mxu0 %v12041_v29  ;;  %v7350_v21 = vadd.f32 %v7349_v54, %v7336_v2  ;;  %v9802_v54 = vld [vmem:[%s14419_s23 + $0x7f0] sm:$0xf0] }
 0x4e2   : > { %v13852_v32 = vld [vmem:[%s14419_s23 + $0x1d6c] sm:$0xf0] }
 0x4e3   : > { %v12808_v28 = vld [vmem:[%s14419_s23 + $0x1f50] sm:$0xf]  ;;  %v12553_v26 = vor.u32 %v13852_v32, %v12552_v30  ;;  %7690 = vmatpush.bf16.msrb.mxu1 %v12297_v3 }
 0x4e4   : > { %v13916_v9 = vld [vmem:[%s14419_s23 + $0x1f6c] sm:$0xf0] }
 0x4e5   : > { %v12008_v46 = vld [vmem:[%s14419_s23 + $0x1910] sm:$0xf]  ;;  %v12809_v16 = vor.u32 %v13916_v9, %v12808_v28  ;;  %7704 = vmatpush.bf16.msrb.mxu2 %v12553_v26  ;;  %v7403_v62 = vpop.f32.mrf.mxu0 }
 0x4e6   : > { %v13716_v40 = vld [vmem:[%s14419_s23 + $0x192c] sm:$0xf0] }
 0x4e7   : > { %v12264_v45 = vld [vmem:[%s14419_s23 + $0x1b10] sm:$0xf]  ;;  %v12009_v37 = vor.u32 %v13716_v40, %v12008_v46  ;;  %7718 = vmatpush.bf16.msrb.mxu3 %v12809_v16  ;;  %v7377_v16 = vpop.f32.mrf.mxu2 }
 0x4e8   : > { %v13780_v20 = vld [vmem:[%s14419_s23 + $0x1b2c] sm:$0xf0] }
 0x4e9   : > { %v12520_v35 = vld [vmem:[%s14419_s23 + $0x1d10] sm:$0xf]  ;;  %v12265_v33 = vor.u32 %v13780_v20, %v12264_v45  ;;  %7677 = vmatpush.bf16.msrb.mxu0 %v12009_v37 }
 0x4ea   : > { %v13844_v36 = vld [vmem:[%s14419_s23 + $0x1d2c] sm:$0xf0] }
 0x4eb   : > { %v12776_v59 = vld [vmem:[%s14419_s23 + $0x1f10] sm:$0xf]  ;;  %v12521_v38 = vor.u32 %v13844_v36, %v12520_v35  ;;  %7691 = vmatpush.bf16.msrb.mxu1 %v12265_v33  ;;  %v7417_v33 = vpop.f32.mrf.mxu1 }
 0x4ec   : > { %v13908_v31 = vld [vmem:[%s14419_s23 + $0x1f2c] sm:$0xf0] }
 0x4ed   : > { %v11976_v42 = vld [vmem:[%s14419_s23 + $0x18d0] sm:$0xf]  ;;  %v12777_v44 = vor.u32 %v13908_v31, %v12776_v59  ;;  %7705 = vmatpush.bf16.msrb.mxu2 %v12521_v38  ;;  %v15994_v59 = vpop.f32.mrf.mxu3  ;;  %v7405_v2 = vpop.f32.mrf.mxu0 }
 0x4ee   : > { %v13708_v47 = vld [vmem:[%s14419_s23 + $0x18ec] sm:$0xf0] }
 0x4ef   : > { %v12232_v43 = vld [vmem:[%s14419_s23 + $0x1ad0] sm:$0xf]  ;;  %v11977_v22 = vor.u32 %v13708_v47, %v11976_v42  ;;  %7719 = vmatpush.bf16.msrb.mxu3 %v12777_v44 }
 0x4f0   : > { %v13772_v14 = vld [vmem:[%s14419_s23 + $0x1aec] sm:$0xf0] }
 0x4f1   : > { %v12488_v24 = vld [vmem:[%s14419_s23 + $0x1cd0] sm:$0xf]  ;;  %v12233_v7 = vor.u32 %v13772_v14, %v12232_v43  ;;  %7678 = vmatpush.bf16.msrb.mxu0 %v11977_v22  ;;  %v7376_v43 = vadd.f32 %v15961_v39, %v7362_v25  ;;  %v12968_v39 = vld [vmem:[%s14419_s23 + $0x1d4] sm:$0xf]  ;;  %v7364_v25 = vadd.f32 %v15976_v1, %v7350_v21 }
 0x4f2   : > { %v13836_v41 = vld [vmem:[%s14419_s23 + $0x1cec] sm:$0xf0]  ;;  %v13152_v1 = vld [vmem:[%s14419_s23 + $0x794] sm:$0xf] }
 0x4f3   : > { %v12744_v6 = vld [vmem:[%s14419_s23 + $0x1ed0] sm:$0xf]  ;;  %v12489_v50 = vor.u32 %v13836_v41, %v12488_v24  ;;  %7692 = vmatpush.bf16.msrb.mxu1 %v12233_v7  ;;  %v9034_v7 = vld [vmem:[%s14419_s23 + $0x1f0] sm:$0xf0] }
 0x4f4   : > { %v13900_v4 = vld [vmem:[%s14419_s23 + $0x1eec] sm:$0xf0]  ;;  %v9738_v21 = vld [vmem:[%s14419_s23 + $0x770] sm:$0xf0] }
 0x4f5   : > { %v11944_v12 = vld [vmem:[%s14419_s23 + $0x1890] sm:$0xf]  ;;  %v12745_v30 = vor.u32 %v13900_v4, %v12744_v6  ;;  %7706 = vmatpush.bf16.msrb.mxu2 %v12489_v50  ;;  %v13032_v50 = vld [vmem:[%s14419_s23 + $0x3d4] sm:$0xf] }
 0x4f6   : > { %v13700_v13 = vld [vmem:[%s14419_s23 + $0x18ac] sm:$0xf0] }
 0x4f7   : > { %v12200_v17 = vld [vmem:[%s14419_s23 + $0x1a90] sm:$0xf]  ;;  %v11945_v29 = vor.u32 %v13700_v13, %v11944_v12  ;;  %7720 = vmatpush.bf16.msrb.mxu3 %v12745_v30  ;;  %v9290_v13 = vld [vmem:[%s14419_s23 + $0x3f0] sm:$0xf0] }
 0x4f8   : > { %v13764_v15 = vld [vmem:[%s14419_s23 + $0x1aac] sm:$0xf0]  ;;  %v9546_v30 = vld [vmem:[%s14419_s23 + $0x5f0] sm:$0xf0] }
 0x4f9   : > { %v12456_v19 = vld [vmem:[%s14419_s23 + $0x1c90] sm:$0xf]  ;;  %v12201_v3 = vor.u32 %v13764_v15, %v12200_v17  ;;  %7679 = vmatpush.bf16.msrb.mxu0 %v11945_v29  ;;  %v13096_v17 = vld [vmem:[%s14419_s23 + $0x5d4] sm:$0xf]  ;;  %v7390_v15 = vadd.f32 %v15964_v51, %v7376_v43  ;;  %v9037_v29 = vor.u32 %v12968_v39, %v9034_v7  ;;  %v7445_v51 = vpop.f32.mrf.mxu3 }
 0x4fa   : > { %v13828_v32 = vld [vmem:[%s14419_s23 + $0x1cac] sm:$0xf0]  ;;  %v12944_v7 = vld [vmem:[%s14419_s23 + $0x114] sm:$0xf] }
 0x4fb   : > { %v12712_v28 = vld [vmem:[%s14419_s23 + $0x1e90] sm:$0xf]  ;;  %v12457_v26 = vor.u32 %v13828_v32, %v12456_v19  ;;  %7693 = vmatpush.bf16.msrb.mxu1 %v12201_v3  ;;  %v7404_v3 = vadd.f32 %v7403_v62, %v7390_v15  ;;  %v9770_v62 = vld [vmem:[%s14419_s23 + $0x7b0] sm:$0xf0] }
 0x4fc   : > { %v13892_v9 = vld [vmem:[%s14419_s23 + $0x1eac] sm:$0xf0] }
 0x4fd   : > { %v11912_v46 = vld [vmem:[%s14419_s23 + $0x1850] sm:$0xf]  ;;  %v12713_v20 = vor.u32 %v13892_v9, %v12712_v28  ;;  %7707 = vmatpush.bf16.msrb.mxu2 %v12457_v26  ;;  %v13160_v28 = vld [vmem:[%s14419_s23 + $0x7d4] sm:$0xf]  ;;  %v7431_v9 = vpop.f32.mrf.mxu2  ;;  %v9293_v26 = vor.u32 %v13032_v50, %v9290_v13 }
 0x4fe   : > { %v13692_v40 = vld [vmem:[%s14419_s23 + $0x186c] sm:$0xf0]  ;;  %v8938_v13 = vld [vmem:[%s14419_s23 + $0x130] sm:$0xf0] }
 0x4ff   : > { %v12168_v45 = vld [vmem:[%s14419_s23 + $0x1a50] sm:$0xf]  ;;  %v11913_v38 = vor.u32 %v13692_v40, %v11912_v46  ;;  %7721 = vmatpush.bf16.msrb.mxu3 %v12713_v20  ;;  %v9549_v46 = vor.u32 %v13096_v17, %v9546_v30  ;;  %v12960_v40 = vld [vmem:[%s14419_s23 + $0x194] sm:$0xf] }
 0x500   : > { %v13756_v10 = vld [vmem:[%s14419_s23 + $0x1a6c] sm:$0xf0]  ;;  %v13024_v20 = vld [vmem:[%s14419_s23 + $0x394] sm:$0xf] }
 0x501   : > { %v12424_v35 = vld [vmem:[%s14419_s23 + $0x1c50] sm:$0xf]  ;;  %v12169_v44 = vor.u32 %v13756_v10, %v12168_v45  ;;  %7680 = vmatpush.bf16.msrb.mxu0 %v11913_v38  ;;  %v9002_v45 = vld [vmem:[%s14419_s23 + $0x1b0] sm:$0xf0]  ;;  %v9805_v10 = vor.u32 %v13160_v28, %v9802_v54  ;;  %v7419_v38 = vpop.f32.mrf.mxu1 }
 0x502   : > { %v13820_v36 = vld [vmem:[%s14419_s23 + $0x1c6c] sm:$0xf0]  ;;  %v13008_v17 = vld [vmem:[%s14419_s23 + $0x314] sm:$0xf] }
 0x503   : > { %v12680_v31 = vld [vmem:[%s14419_s23 + $0x1e50] sm:$0xf]  ;;  %v12425_v14 = vor.u32 %v13820_v36, %v12424_v35  ;;  %7694 = vmatpush.bf16.msrb.mxu1 %v12169_v44  ;;  %v9258_v35 = vld [vmem:[%s14419_s23 + $0x3b0] sm:$0xf0] }
 0x504   : > { %v13884_v37 = vld [vmem:[%s14419_s23 + $0x1e6c] sm:$0xf0]  ;;  %v13088_v36 = vld [vmem:[%s14419_s23 + $0x594] sm:$0xf]  ;;  %v9261_v43 = vor.u32 %v13024_v20, %v9258_v35 }
 0x505   : > { %v11880_v42 = vld [vmem:[%s14419_s23 + $0x1810] sm:$0xf]  ;;  %v12681_v6 = vor.u32 %v13884_v37, %v12680_v31  ;;  %7708 = vmatpush.bf16.msrb.mxu2 %v12425_v14  ;;  %v9514_v31 = vld [vmem:[%s14419_s23 + $0x5b0] sm:$0xf0]  ;;  %v7378_v37 = vadd.f32 %v7377_v16, %v7364_v25  ;;  %v7433_v15 = vpop.f32.mrf.mxu2 }
 0x506   : > { %v13684_v47 = vld [vmem:[%s14419_s23 + $0x182c] sm:$0xf0]  ;;  %v9517_v16 = vor.u32 %v13088_v36, %v9514_v31  ;;  %v12952_v44 = vld [vmem:[%s14419_s23 + $0x154] sm:$0xf] }
 0x507   : > { %v12136_v8 = vld [vmem:[%s14419_s23 + $0x1a10] sm:$0xf]  ;;  %v11881_v12 = vor.u32 %v13684_v47, %v11880_v42  ;;  %7722 = vmatpush.bf16.msrb.mxu3 %v12681_v6  ;;  %v9005_v42 = vor.u32 %v12960_v40, %v9002_v45  ;;  %v7418_v47 = vadd.f32 %v7417_v33, %v7404_v3  ;;  %v8970_v14 = vld [vmem:[%s14419_s23 + $0x170] sm:$0xf0]  ;;  %v7392_v33 = vadd.f32 %v15994_v59, %v7378_v37 }
 0x508   : > { %v13748_v24 = vld [vmem:[%s14419_s23 + $0x1a2c] sm:$0xf0]  ;;  %v13080_v6 = vld [vmem:[%s14419_s23 + $0x554] sm:$0xf]  ;;  %v8973_v39 = vor.u32 %v12952_v44, %v8970_v14  ;;  %v8941_v3 = vor.u32 %v12944_v7, %v8938_v13 }
 0x509   : > { %v12392_v41 = vld [vmem:[%s14419_s23 + $0x1c10] sm:$0xf]  ;;  %v12137_v19 = vor.u32 %v13748_v24, %v12136_v8  ;;  %7681 = vmatpush.bf16.msrb.mxu0 %v11881_v12  ;;  %v13016_v8 = vld [vmem:[%s14419_s23 + $0x354] sm:$0xf]  ;;  %v9773_v24 = vor.u32 %v13152_v1, %v9770_v62  ;;  %v7406_v50 = vadd.f32 %v7405_v2, %v7392_v33 }
 0x50a   : > { %v13812_v4 = vld [vmem:[%s14419_s23 + $0x1c2c] sm:$0xf0]  ;;  %v9194_v30 = vld [vmem:[%s14419_s23 + $0x330] sm:$0xf0] }
 0x50b   : > { %v12648_v5 = vld [vmem:[%s14419_s23 + $0x1e10] sm:$0xf]  ;;  %v12393_v32 = vor.u32 %v13812_v4, %v12392_v41  ;;  %7695 = vmatpush.bf16.msrb.mxu1 %v12137_v19  ;;  %v9226_v41 = vld [vmem:[%s14419_s23 + $0x370] sm:$0xf0]  ;;  %v7420_v40 = vadd.f32 %v7419_v38, %v7406_v50 }
 0x50c   : > { %v13876_v22 = vld [vmem:[%s14419_s23 + $0x1e2c] sm:$0xf0]  ;;  %7682 = vmatmul.bf16.vlgmr.msrb.gmra.mxu0 %v14770_v49  ;;  %v9482_v4 = vld [vmem:[%s14419_s23 + $0x570] sm:$0xf0]  ;;  %v9229_v59 = vor.u32 %v13016_v8, %v9226_v41 }
 0x50d   : > { %v12649_v23 = vor.u32 %v13876_v22, %v12648_v5  ;;  %7709 = vmatpush.bf16.msrb.mxu2 %v12393_v32  ;;  %7730 = vmatpush.bf16.msra.mxu0 %v9037_v29  ;;  %v7432_v5 = vadd.f32 %v7431_v9, %v7418_v47  ;;  %v13144_v22 = vld [vmem:[%s14419_s23 + $0x754] sm:$0xf]  ;;  %v9485_v12 = vor.u32 %v13080_v6, %v9482_v4  ;;  %v7447_v9 = vpop.f32.mrf.mxu3  ;;  %v7487_v6 = vpop.f32.mrf.mxu2 }
 0x50e   : > { %7696 = vmatmul.bf16.vlgmr.msrb.gmra.mxu1 %v14777_v58  ;;  %v9741_v19 = vor.u32 %v13144_v22, %v9738_v21  ;;  %v13072_v32 = vld [vmem:[%s14419_s23 + $0x514] sm:$0xf]  ;;  %v7434_v1 = vadd.f32 %v7433_v15, %v7420_v40 }
 0x50f   : > { %7723 = vmatpush.bf16.msrb.mxu3 %v12649_v23  ;;  %7744 = vmatpush.bf16.msra.mxu1 %v9293_v26  ;;  %v9450_v28 = vld [vmem:[%s14419_s23 + $0x530] sm:$0xf0]  ;;  %v7446_v54 = vadd.f32 %v7445_v51, %v7432_v5  ;;  %v7459_v23 = vpop.f32.mrf.mxu0  ;;  %v9197_v26 = vor.u32 %v13008_v17, %v9194_v30 }
 0x510   : > { %7710 = vmatmul.bf16.vlgmr.msrb.gmra.mxu2 %v14775_v55  ;;  %v13136_v29 = vld [vmem:[%s14419_s23 + $0x714] sm:$0xf]  ;;  %v9453_v51 = vor.u32 %v13072_v32, %v9450_v28  ;;  %v7448_v5 = vadd.f32 %v7447_v9, %v7434_v1 }
 0x511   : > { %7758 = vmatpush.bf16.msra.mxu2 %v9549_v46  ;;  %7731 = vmatpush.bf16.msra.mxu0 %v9005_v42  ;;  %v9706_v25 = vld [vmem:[%s14419_s23 + $0x730] sm:$0xf0]  ;;  %v7473_v46 = vpop.f32.mrf.mxu1  ;;  %v7460_v45 = vadd.f32 %v7459_v23, %v7446_v54 }
 0x512   : > { %7724 = vmatmul.bf16.vlgmr.msrb.gmra.mxu3 %v14781_v63  ;;  %v12936_v20 = vld [vmem:[%s14419_s23 + $0xd4] sm:$0xf]  ;;  %v9709_v36 = vor.u32 %v13136_v29, %v9706_v25 }
 0x513   : > { %7772 = vmatpush.bf16.msra.mxu3 %v9805_v10  ;;  %7745 = vmatpush.bf16.msra.mxu1 %v9261_v43  ;;  %v8906_v10 = vld [vmem:[%s14419_s23 + $0xf0] sm:$0xf0]  ;;  %v7474_v43 = vadd.f32 %v7473_v46, %v7460_v45 }
 0x514   : > { %v13000_v35 = vld [vmem:[%s14419_s23 + $0x2d4] sm:$0xf]  ;;  %v8909_v42 = vor.u32 %v12936_v20, %v8906_v10 }
 0x515   : > { %7759 = vmatpush.bf16.msra.mxu2 %v9517_v16  ;;  %7732 = vmatpush.bf16.msra.mxu0 %v8973_v39  ;;  %v9162_v31 = vld [vmem:[%s14419_s23 + $0x2f0] sm:$0xf0]  ;;  %v7488_v22 = vadd.f32 %v7487_v6, %v7474_v43  ;;  %v7501_v39 = vpop.f32.mrf.mxu3  ;;  %v7489_v1 = vpop.f32.mrf.mxu2 }
 0x516   : > { %v13064_v37 = vld [vmem:[%s14419_s23 + $0x4d4] sm:$0xf]  ;;  %v9165_v16 = vor.u32 %v13000_v35, %v9162_v31 }
 0x517   : > { %7773 = vmatpush.bf16.msra.mxu3 %v9773_v24  ;;  %7746 = vmatpush.bf16.msra.mxu1 %v9229_v59  ;;  %v9418_v2 = vld [vmem:[%s14419_s23 + $0x4f0] sm:$0xf0]  ;;  %v7461_v21 = vpop.f32.mrf.mxu0  ;;  %v357_v59 = vld [vmem:[#allocation2 + $0x18] sm:$0xff]  ;;  %v7502_v30 = vadd.f32 %v7501_v39, %v7488_v22 }
 0x518   : > { %v13128_v62 = vld [vmem:[%s14419_s23 + $0x6d4] sm:$0xf]  ;;  %v9421_v44 = vor.u32 %v13064_v37, %v9418_v2  ;;  %v7462_v17 = vadd.f32 %v7461_v21, %v7448_v5 }
 0x519   : > { %7760 = vmatpush.bf16.msra.mxu2 %v9485_v12  ;;  %v9674_v38 = vld [vmem:[%s14419_s23 + $0x6f0] sm:$0xf0]  ;;  %7733 = vmatpush.bf16.msra.mxu0 %v8941_v3  ;;  %v7475_v9 = vpop.f32.mrf.mxu1  ;;  %v8405_v3 = vadd.f32 %v7502_v30, %v357_v59 }
 0x51a   : > { %v12928_v47 = vld [vmem:[%s14419_s23 + $0x94] sm:$0xf]  ;;  %v9677_v41 = vor.u32 %v13128_v62, %v9674_v38  ;;  %v7476_v10 = vadd.f32 %v7475_v9, %v7462_v17  ;;  %v365_v62 = vld [vmem:[#allocation2 + $0x38] sm:$0xff] }
 0x51b   : > { %7774 = vmatpush.bf16.msra.mxu3 %v9741_v19  ;;  %7747 = vmatpush.bf16.msra.mxu1 %v9197_v26  ;;  %v8874_v14 = vld [vmem:[%s14419_s23 + $0xb0] sm:$0xf0]  ;;  %8421 = vst [vmem:[#allocation2 + $0x18] sm:$0xff] %v8405_v3 }
 0x51c   : > { %v12992_v8 = vld [vmem:[%s14419_s23 + $0x294] sm:$0xf]  ;;  %v8877_v12 = vor.u32 %v12928_v47, %v8874_v14  ;;  %v7490_v43 = vadd.f32 %v7489_v1, %v7476_v10 }
 0x51d   : > { %7761 = vmatpush.bf16.msra.mxu2 %v9453_v51  ;;  %v9130_v24 = vld [vmem:[%s14419_s23 + $0x2b0] sm:$0xf0]  ;;  %7734 = vmatpush.bf16.msra.mxu0 %v8909_v42 }
 0x51e   : > { %v13056_v4 = vld [vmem:[%s14419_s23 + $0x494] sm:$0xf]  ;;  %v9133_v13 = vor.u32 %v12992_v8, %v9130_v24 }
 0x51f   : > { %7775 = vmatpush.bf16.msra.mxu3 %v9709_v36  ;;  %v9386_v33 = vld [vmem:[%s14419_s23 + $0x4b0] sm:$0xf0]  ;;  %7748 = vmatpush.bf16.msra.mxu1 %v9165_v16  ;;  %v7503_v16 = vpop.f32.mrf.mxu3 }
 0x520   : > { %v13120_v7 = vld [vmem:[%s14419_s23 + $0x694] sm:$0xf]  ;;  %v9389_v15 = vor.u32 %v13056_v4, %v9386_v33  ;;  %v7504_v33 = vadd.f32 %v7503_v16, %v7490_v43 }
 0x521   : > { %v9642_v50 = vld [vmem:[%s14419_s23 + $0x6b0] sm:$0xf0]  ;;  %7762 = vmatpush.bf16.msra.mxu2 %v9421_v44  ;;  %7735 = vmatpush.bf16.msra.mxu0 %v8877_v12 }
 0x522   : > { %v12920_v19 = vld [vmem:[%s14419_s23 + $0x54] sm:$0xf]  ;;  %v9645_v54 = vor.u32 %v13120_v7, %v9642_v50  ;;  %v8413_v59 = vadd.f32 %v7504_v33, %v365_v62 }
 0x523   : > { %v8842_v32 = vld [vmem:[%s14419_s23 + $0x70] sm:$0xf0]  ;;  %7776 = vmatpush.bf16.msra.mxu3 %v9677_v41  ;;  %7749 = vmatpush.bf16.msra.mxu1 %v9133_v13 }
 0x524   : > { %v12984_v28 = vld [vmem:[%s14419_s23 + $0x254] sm:$0xf]  ;;  %v8845_v40 = vor.u32 %v12920_v19, %v8842_v32  ;;  %8429 = vst [vmem:[#allocation2 + $0x38] sm:$0xff] %v8413_v59 }
 0x525   : > { %v9098_v23 = vld [vmem:[%s14419_s23 + $0x270] sm:$0xf0]  ;;  %7763 = vmatpush.bf16.msra.mxu2 %v9389_v15 }
 0x526   : > { %v13048_v29 = vld [vmem:[%s14419_s23 + $0x454] sm:$0xf]  ;;  %v9101_v35 = vor.u32 %v12984_v28, %v9098_v23  ;;  %7736 = vmatpush.bf16.msra.mxu0 %v8845_v40 }
 0x527   : > { %v9354_v25 = vld [vmem:[%s14419_s23 + $0x470] sm:$0xf0]  ;;  %7777 = vmatpush.bf16.msra.mxu3 %v9645_v54 }
 0x528   : > { %v13112_v26 = vld [vmem:[%s14419_s23 + $0x654] sm:$0xf]  ;;  %v9357_v36 = vor.u32 %v13048_v29, %v9354_v25  ;;  %7750 = vmatpush.bf16.msra.mxu1 %v9101_v35 }
 0x529   : > { %v9610_v46 = vld [vmem:[%s14419_s23 + $0x670] sm:$0xf0] }
 0x52a   : > { %v12912_v45 = vld [vmem:[%s14419_s23 + $0x14] sm:$0xf]  ;;  %v9613_v2 = vor.u32 %v13112_v26, %v9610_v46  ;;  %7764 = vmatpush.bf16.msra.mxu2 %v9357_v36 }
 0x52b   : > { %v8810_v51 = vld [vmem:[%s14419_s23 + $0x30] sm:$0xf0] }
 0x52c   : > { %v12976_v20 = vld [vmem:[%s14419_s23 + $0x214] sm:$0xf]  ;;  %v8813_v24 = vor.u32 %v12912_v45, %v8810_v51  ;;  %7778 = vmatpush.bf16.msra.mxu3 %v9613_v2 }
 0x52d   : > { %v9066_v31 = vld [vmem:[%s14419_s23 + $0x230] sm:$0xf0] }
 0x52e   : > { %v13040_v37 = vld [vmem:[%s14419_s23 + $0x414] sm:$0xf]  ;;  %v9069_v5 = vor.u32 %v12976_v20, %v9066_v31  ;;  %7737 = vmatpush.bf16.msra.mxu0 %v8813_v24 }
 0x52f   : > { %v9322_v38 = vld [vmem:[%s14419_s23 + $0x430] sm:$0xf0] }
 0x530   : > { %v13104_v42 = vld [vmem:[%s14419_s23 + $0x614] sm:$0xf]  ;;  %v9325_v22 = vor.u32 %v13040_v37, %v9322_v38  ;;  %7751 = vmatpush.bf16.msra.mxu1 %v9069_v5 }
 0x531   : > { %v9578_v47 = vld [vmem:[%s14419_s23 + $0x630] sm:$0xf0]  ;;  %7738 = vmatmul.bf16.vlgmr.msra.gmra.mxu0 %v14520_v11 }
 0x532   : > { %v13224_v44 = vld [vmem:[%s14419_s23 + $0x9d4] sm:$0xf]  ;;  %v9581_v7 = vor.u32 %v13104_v42, %v9578_v47  ;;  %7765 = vmatpush.bf16.msra.mxu2 %v9325_v22 }
 0x533   : > { %v10058_v14 = vld [vmem:[%s14419_s23 + $0x9f0] sm:$0xf0]  ;;  %7752 = vmatmul.bf16.vlgmr.msra.gmra.mxu1 %v14536_v27 }
 0x534   : > { %v13288_v8 = vld [vmem:[%s14419_s23 + $0xbd4] sm:$0xf]  ;;  %v10061_v50 = vor.u32 %v13224_v44, %v10058_v14  ;;  %7779 = vmatpush.bf16.msra.mxu3 %v9581_v7 }
 0x535   : > { %v10314_v41 = vld [vmem:[%s14419_s23 + $0xbf0] sm:$0xf0]  ;;  %7766 = vmatmul.bf16.vlgmr.msra.gmra.mxu2 %v14526_v18 }
 0x536   : > { %v13352_v6 = vld [vmem:[%s14419_s23 + $0xdd4] sm:$0xf]  ;;  %v10317_v12 = vor.u32 %v13288_v8, %v10314_v41  ;;  %7786 = vmatpush.bf16.msrb.mxu0 %v10061_v50 }
 0x537   : > { %v10570_v4 = vld [vmem:[%s14419_s23 + $0xdf0] sm:$0xf0]  ;;  %7780 = vmatmul.bf16.vlgmr.msra.gmra.mxu3 %v14542_v34 }
 0x538   : > { %v13416_v21 = vld [vmem:[%s14419_s23 + $0xfd4] sm:$0xf]  ;;  %v10573_v13 = vor.u32 %v13352_v6, %v10570_v4  ;;  %7800 = vmatpush.bf16.msrb.mxu1 %v10317_v12 }
 0x539   : > { %v10826_v39 = vld [vmem:[%s14419_s23 + $0xff0] sm:$0xf0] }
 0x53a   : > { %v13216_v17 = vld [vmem:[%s14419_s23 + $0x994] sm:$0xf]  ;;  %v10829_v19 = vor.u32 %v13416_v21, %v10826_v39  ;;  %7814 = vmatpush.bf16.msrb.mxu2 %v10573_v13 }
 0x53b   : > { %v10026_v30 = vld [vmem:[%s14419_s23 + $0x9b0] sm:$0xf0] }
 0x53c   : > { %v13280_v15 = vld [vmem:[%s14419_s23 + $0xb94] sm:$0xf]  ;;  %v10029_v29 = vor.u32 %v13216_v17, %v10026_v30  ;;  %7828 = vmatpush.bf16.msrb.mxu3 %v10829_v19 }
 0x53d   : > { %v10282_v32 = vld [vmem:[%s14419_s23 + $0xbb0] sm:$0xf0] }
 0x53e   : > { %v13344_v28 = vld [vmem:[%s14419_s23 + $0xd94] sm:$0xf]  ;;  %v10285_v25 = vor.u32 %v13280_v15, %v10282_v32  ;;  %7787 = vmatpush.bf16.msrb.mxu0 %v10029_v29 }
 0x53f   : > { %v10538_v54 = vld [vmem:[%s14419_s23 + $0xdb0] sm:$0xf0] }
 0x540   : > { %v13408_v9 = vld [vmem:[%s14419_s23 + $0xf94] sm:$0xf]  ;;  %v10541_v3 = vor.u32 %v13344_v28, %v10538_v54  ;;  %7801 = vmatpush.bf16.msrb.mxu1 %v10285_v25 }
 0x541   : > { %v10794_v23 = vld [vmem:[%s14419_s23 + $0xfb0] sm:$0xf0] }
 0x542   : > { %v13208_v26 = vld [vmem:[%s14419_s23 + $0x954] sm:$0xf]  ;;  %v10797_v45 = vor.u32 %v13408_v9, %v10794_v23  ;;  %7815 = vmatpush.bf16.msrb.mxu2 %v10541_v3 }
 0x543   : > { %v9994_v46 = vld [vmem:[%s14419_s23 + $0x970] sm:$0xf0] }
 0x544   : > { %v13272_v40 = vld [vmem:[%s14419_s23 + $0xb54] sm:$0xf]  ;;  %v9997_v31 = vor.u32 %v13208_v26, %v9994_v46  ;;  %7829 = vmatpush.bf16.msrb.mxu3 %v10797_v45 }
 0x545   : > { %v10250_v51 = vld [vmem:[%s14419_s23 + $0xb70] sm:$0xf0] }
 0x546   : > { %v13336_v20 = vld [vmem:[%s14419_s23 + $0xd54] sm:$0xf]  ;;  %v10253_v37 = vor.u32 %v13272_v40, %v10250_v51  ;;  %7788 = vmatpush.bf16.msrb.mxu0 %v9997_v31 }
 0x547   : > { %v10506_v10 = vld [vmem:[%s14419_s23 + $0xd70] sm:$0xf0] }
 0x548   : > { %v13400_v35 = vld [vmem:[%s14419_s23 + $0xf54] sm:$0xf]  ;;  %v10509_v2 = vor.u32 %v13336_v20, %v10506_v10  ;;  %7802 = vmatpush.bf16.msrb.mxu1 %v10253_v37 }
 0x549   : > { %v10762_v36 = vld [vmem:[%s14419_s23 + $0xf70] sm:$0xf0] }
 0x54a   : > { %v13200_v1 = vld [vmem:[%s14419_s23 + $0x914] sm:$0xf]  ;;  %v10765_v42 = vor.u32 %v13400_v35, %v10762_v36  ;;  %7816 = vmatpush.bf16.msrb.mxu2 %v10509_v2 }
 0x54b   : > { %v9962_v62 = vld [vmem:[%s14419_s23 + $0x930] sm:$0xf0] }
 0x54c   : > { %v13264_v38 = vld [vmem:[%s14419_s23 + $0xb14] sm:$0xf]  ;;  %v9965_v8 = vor.u32 %v13200_v1, %v9962_v62  ;;  %7830 = vmatpush.bf16.msrb.mxu3 %v10765_v42 }
 0x54d   : > { %v10218_v47 = vld [vmem:[%s14419_s23 + $0xb30] sm:$0xf0] }
 0x54e   : > { %v13328_v43 = vld [vmem:[%s14419_s23 + $0xd14] sm:$0xf]  ;;  %v10221_v24 = vor.u32 %v13264_v38, %v10218_v47  ;;  %7789 = vmatpush.bf16.msrb.mxu0 %v9965_v8 }
 0x54f   : > { %v10474_v16 = vld [vmem:[%s14419_s23 + $0xd30] sm:$0xf0] }
 0x550   : > { %v13392_v44 = vld [vmem:[%s14419_s23 + $0xf14] sm:$0xf]  ;;  %v10477_v41 = vor.u32 %v13328_v43, %v10474_v16  ;;  %7803 = vmatpush.bf16.msrb.mxu1 %v10221_v24 }
 0x551   : > { %v10730_v14 = vld [vmem:[%s14419_s23 + $0xf30] sm:$0xf0] }
 0x552   : > { %v13192_v6 = vld [vmem:[%s14419_s23 + $0x8d4] sm:$0xf]  ;;  %v10733_v5 = vor.u32 %v13392_v44, %v10730_v14  ;;  %7817 = vmatpush.bf16.msrb.mxu2 %v10477_v41 }
 0x553   : > { %v9930_v4 = vld [vmem:[%s14419_s23 + $0x8f0] sm:$0xf0] }
 0x554   : > { %v13256_v33 = vld [vmem:[%s14419_s23 + $0xad4] sm:$0xf]  ;;  %v9933_v59 = vor.u32 %v13192_v6, %v9930_v4  ;;  %7831 = vmatpush.bf16.msrb.mxu3 %v10733_v5 }
 0x555   : > { %v10186_v22 = vld [vmem:[%s14419_s23 + $0xaf0] sm:$0xf0] }
 0x556   : > { %v13320_v21 = vld [vmem:[%s14419_s23 + $0xcd4] sm:$0xf]  ;;  %v10189_v12 = vor.u32 %v13256_v33, %v10186_v22  ;;  %7790 = vmatpush.bf16.msrb.mxu0 %v9933_v59 }
 0x557   : > { %v10442_v39 = vld [vmem:[%s14419_s23 + $0xcf0] sm:$0xf0] }
 0x558   : > { %v13384_v7 = vld [vmem:[%s14419_s23 + $0xed4] sm:$0xf]  ;;  %v10445_v13 = vor.u32 %v13320_v21, %v10442_v39  ;;  %7804 = vmatpush.bf16.msrb.mxu1 %v10189_v12 }
 0x559   : > { %v10698_v50 = vld [vmem:[%s14419_s23 + $0xef0] sm:$0xf0] }
 0x55a   : > { %v13184_v17 = vld [vmem:[%s14419_s23 + $0x894] sm:$0xf]  ;;  %v10701_v19 = vor.u32 %v13384_v7, %v10698_v50  ;;  %7818 = vmatpush.bf16.msrb.mxu2 %v10445_v13 }
 0x55b   : > { %v9898_v30 = vld [vmem:[%s14419_s23 + $0x8b0] sm:$0xf0] }
 0x55c   : > { %v13248_v15 = vld [vmem:[%s14419_s23 + $0xa94] sm:$0xf]  ;;  %v9901_v29 = vor.u32 %v13184_v17, %v9898_v30  ;;  %7832 = vmatpush.bf16.msrb.mxu3 %v10701_v19 }
 0x55d   : > { %v10154_v32 = vld [vmem:[%s14419_s23 + $0xab0] sm:$0xf0] }
 0x55e   : > { %v13312_v28 = vld [vmem:[%s14419_s23 + $0xc94] sm:$0xf]  ;;  %v10157_v25 = vor.u32 %v13248_v15, %v10154_v32  ;;  %7791 = vmatpush.bf16.msrb.mxu0 %v9901_v29 }
 0x55f   : > { %v10410_v54 = vld [vmem:[%s14419_s23 + $0xcb0] sm:$0xf0] }
 0x560   : > { %v13376_v9 = vld [vmem:[%s14419_s23 + $0xe94] sm:$0xf]  ;;  %v10413_v3 = vor.u32 %v13312_v28, %v10410_v54  ;;  %7805 = vmatpush.bf16.msrb.mxu1 %v10157_v25 }
 0x561   : > { %v10666_v23 = vld [vmem:[%s14419_s23 + $0xeb0] sm:$0xf0] }
 0x562   : > { %v13176_v26 = vld [vmem:[%s14419_s23 + $0x854] sm:$0xf]  ;;  %v10669_v45 = vor.u32 %v13376_v9, %v10666_v23  ;;  %7819 = vmatpush.bf16.msrb.mxu2 %v10413_v3 }
 0x563   : > { %v9866_v46 = vld [vmem:[%s14419_s23 + $0x870] sm:$0xf0] }
 0x564   : > { %v13240_v40 = vld [vmem:[%s14419_s23 + $0xa54] sm:$0xf]  ;;  %v9869_v31 = vor.u32 %v13176_v26, %v9866_v46  ;;  %7833 = vmatpush.bf16.msrb.mxu3 %v10669_v45 }
 0x565   : > { %v10122_v51 = vld [vmem:[%s14419_s23 + $0xa70] sm:$0xf0] }
 0x566   : > { %v13304_v20 = vld [vmem:[%s14419_s23 + $0xc54] sm:$0xf]  ;;  %v10125_v1 = vor.u32 %v13240_v40, %v10122_v51  ;;  %7792 = vmatpush.bf16.msrb.mxu0 %v9869_v31 }
 0x567   : > { %v10378_v10 = vld [vmem:[%s14419_s23 + $0xc70] sm:$0xf0] }
 0x568   : > { %v13368_v35 = vld [vmem:[%s14419_s23 + $0xe54] sm:$0xf]  ;;  %v10381_v62 = vor.u32 %v13304_v20, %v10378_v10  ;;  %7806 = vmatpush.bf16.msrb.mxu1 %v10125_v1 }
 0x569   : > { %v10634_v36 = vld [vmem:[%s14419_s23 + $0xe70] sm:$0xf0] }
 0x56a   : > { %v13168_v37 = vld [vmem:[%s14419_s23 + $0x814] sm:$0xf]  ;;  %v10637_v43 = vor.u32 %v13368_v35, %v10634_v36  ;;  %7820 = vmatpush.bf16.msrb.mxu2 %v10381_v62 }
 0x56b   : > { %v9834_v2 = vld [vmem:[%s14419_s23 + $0x830] sm:$0xf0] }
 0x56c   : > { %v13232_v38 = vld [vmem:[%s14419_s23 + $0xa14] sm:$0xf]  ;;  %v9837_v6 = vor.u32 %v13168_v37, %v9834_v2  ;;  %7834 = vmatpush.bf16.msrb.mxu3 %v10637_v43 }
 0x56d   : > { %v10090_v42 = vld [vmem:[%s14419_s23 + $0xa30] sm:$0xf0] }
 0x56e   : > { %v13296_v47 = vld [vmem:[%s14419_s23 + $0xc14] sm:$0xf]  ;;  %v10093_v22 = vor.u32 %v13232_v38, %v10090_v42  ;;  %7793 = vmatpush.bf16.msrb.mxu0 %v9837_v6 }
 0x56f   : > { %v10346_v16 = vld [vmem:[%s14419_s23 + $0xc30] sm:$0xf0] }
 0x570   : > { %v13360_v44 = vld [vmem:[%s14419_s23 + $0xe14] sm:$0xf]  ;;  %v10349_v21 = vor.u32 %v13296_v47, %v10346_v16  ;;  %7807 = vmatpush.bf16.msrb.mxu1 %v10093_v22 }
 0x571   : > { %v10602_v14 = vld [vmem:[%s14419_s23 + $0xe30] sm:$0xf0]  ;;  %7794 = vmatmul.bf16.vlgmr.msrb.gmra.mxu0 %v14602_v56 }
 0x572   : > { %v13480_v8 = vld [vmem:[%s14419_s23 + $0x11d4] sm:$0xf]  ;;  %v10605_v50 = vor.u32 %v13360_v44, %v10602_v14  ;;  %7821 = vmatpush.bf16.msrb.mxu2 %v10349_v21 }
 0x573   : > { %v11082_v24 = vld [vmem:[%s14419_s23 + $0x11f0] sm:$0xf0]  ;;  %7808 = vmatmul.bf16.vlgmr.msrb.gmra.mxu1 %v14609_v61 }
 0x574   : > { %v13544_v41 = vld [vmem:[%s14419_s23 + $0x13d4] sm:$0xf]  ;;  %v11085_v59 = vor.u32 %v13480_v8, %v11082_v24  ;;  %7835 = vmatpush.bf16.msrb.mxu3 %v10605_v50 }
 0x575   : > { %v11338_v4 = vld [vmem:[%s14419_s23 + $0x13f0] sm:$0xf0]  ;;  %7822 = vmatmul.bf16.vlgmr.msrb.gmra.mxu2 %v14607_v60 }
 0x576   : > { %v13608_v33 = vld [vmem:[%s14419_s23 + $0x15d4] sm:$0xf]  ;;  %v11341_v12 = vor.u32 %v13544_v41, %v11338_v4  ;;  %7842 = vmatpush.bf16.msra.mxu0 %v11085_v59 }
 0x577   : > { %v11594_v5 = vld [vmem:[%s14419_s23 + $0x15f0] sm:$0xf0]  ;;  %7836 = vmatmul.bf16.vlgmr.msrb.gmra.mxu3 %v14613_v0 }
 0x578   : > { %v13672_v39 = vld [vmem:[%s14419_s23 + $0x17d4] sm:$0xf]  ;;  %v11597_v13 = vor.u32 %v13608_v33, %v11594_v5  ;;  %7856 = vmatpush.bf16.msra.mxu1 %v11341_v12  ;;  %v16193_v12 = vpop.f32.mrf.mxu1 }
 0x579   : > { %v11850_v7 = vld [vmem:[%s14419_s23 + $0x17f0] sm:$0xf0] }
 0x57a   : > { %v13472_v17 = vld [vmem:[%s14419_s23 + $0x1194] sm:$0xf]  ;;  %v11853_v19 = vor.u32 %v13672_v39, %v11850_v7  ;;  %7870 = vmatpush.bf16.msra.mxu2 %v11597_v13  ;;  %v16189_v7 = vpop.f32.mrf.mxu0 }
 0x57b   : > { %v11050_v30 = vld [vmem:[%s14419_s23 + $0x11b0] sm:$0xf0] }
 0x57c   : > { %v13536_v15 = vld [vmem:[%s14419_s23 + $0x1394] sm:$0xf]  ;;  %v11053_v29 = vor.u32 %v13472_v17, %v11050_v30  ;;  %7884 = vmatpush.bf16.msra.mxu3 %v11853_v19 }
 0x57d   : > { %v11306_v32 = vld [vmem:[%s14419_s23 + $0x13b0] sm:$0xf0] }
 0x57e   : > { %v13600_v28 = vld [vmem:[%s14419_s23 + $0x1594] sm:$0xf]  ;;  %v11309_v25 = vor.u32 %v13536_v15, %v11306_v32  ;;  %7843 = vmatpush.bf16.msra.mxu0 %v11053_v29 }
 0x57f   : > { %v11562_v54 = vld [vmem:[%s14419_s23 + $0x15b0] sm:$0xf0] }
 0x580   : > { %v13664_v9 = vld [vmem:[%s14419_s23 + $0x1794] sm:$0xf]  ;;  %v11565_v3 = vor.u32 %v13600_v28, %v11562_v54  ;;  %7857 = vmatpush.bf16.msra.mxu1 %v11309_v25 }
 0x581   : > { %v11818_v23 = vld [vmem:[%s14419_s23 + $0x17b0] sm:$0xf0] }
 0x582   : > { %v13464_v26 = vld [vmem:[%s14419_s23 + $0x1154] sm:$0xf]  ;;  %v11821_v45 = vor.u32 %v13664_v9, %v11818_v23  ;;  %7871 = vmatpush.bf16.msra.mxu2 %v11565_v3 }
 0x583   : > { %v11018_v46 = vld [vmem:[%s14419_s23 + $0x1170] sm:$0xf0] }
 0x584   : > { %v13528_v40 = vld [vmem:[%s14419_s23 + $0x1354] sm:$0xf]  ;;  %v11021_v31 = vor.u32 %v13464_v26, %v11018_v46  ;;  %7885 = vmatpush.bf16.msra.mxu3 %v11821_v45 }
 0x585   : > { %v11274_v51 = vld [vmem:[%s14419_s23 + $0x1370] sm:$0xf0] }
 0x586   : > { %v13592_v20 = vld [vmem:[%s14419_s23 + $0x1554] sm:$0xf]  ;;  %v11277_v37 = vor.u32 %v13528_v40, %v11274_v51  ;;  %7844 = vmatpush.bf16.msra.mxu0 %v11021_v31 }
 0x587   : > { %v11530_v10 = vld [vmem:[%s14419_s23 + $0x1570] sm:$0xf0] }
 0x588   : > { %v13656_v35 = vld [vmem:[%s14419_s23 + $0x1754] sm:$0xf]  ;;  %v11533_v2 = vor.u32 %v13592_v20, %v11530_v10  ;;  %7858 = vmatpush.bf16.msra.mxu1 %v11277_v37  ;;  %v16206_v20 = vpop.f32.mrf.mxu2  ;;  %v16211_v37 = vpop.f32.mrf.mxu3 }
 0x589   : > { %v11786_v36 = vld [vmem:[%s14419_s23 + $0x1770] sm:$0xf0] }
 0x58a   : > { %v13456_v1 = vld [vmem:[%s14419_s23 + $0x1114] sm:$0xf]  ;;  %v11789_v42 = vor.u32 %v13656_v35, %v11786_v36  ;;  %7872 = vmatpush.bf16.msra.mxu2 %v11533_v2 }
 0x58b   : > { %v10986_v62 = vld [vmem:[%s14419_s23 + $0x1130] sm:$0xf0] }
 0x58c   : > { %v13520_v38 = vld [vmem:[%s14419_s23 + $0x1314] sm:$0xf]  ;;  %v10989_v8 = vor.u32 %v13456_v1, %v10986_v62  ;;  %7886 = vmatpush.bf16.msra.mxu3 %v11789_v42 }
 0x58d   : > { %v11242_v47 = vld [vmem:[%s14419_s23 + $0x1330] sm:$0xf0] }
 0x58e   : > { %v13584_v43 = vld [vmem:[%s14419_s23 + $0x1514] sm:$0xf]  ;;  %v11245_v24 = vor.u32 %v13520_v38, %v11242_v47  ;;  %7845 = vmatpush.bf16.msra.mxu0 %v10989_v8  ;;  %v16217_v47 = vpop.f32.mrf.mxu0 }
 0x58f   : > { %v11498_v16 = vld [vmem:[%s14419_s23 + $0x1530] sm:$0xf0] }
 0x590   : > { %v13648_v44 = vld [vmem:[%s14419_s23 + $0x1714] sm:$0xf]  ;;  %v11501_v41 = vor.u32 %v13584_v43, %v11498_v16  ;;  %7859 = vmatpush.bf16.msra.mxu1 %v11245_v24  ;;  %v16222_v24 = vpop.f32.mrf.mxu1 }
 0x591   : > { %v11754_v14 = vld [vmem:[%s14419_s23 + $0x1730] sm:$0xf0] }
 0x592   : > { %v13448_v6 = vld [vmem:[%s14419_s23 + $0x10d4] sm:$0xf]  ;;  %v11757_v5 = vor.u32 %v13648_v44, %v11754_v14  ;;  %7873 = vmatpush.bf16.msra.mxu2 %v11501_v41 }
 0x593   : > { %v10954_v4 = vld [vmem:[%s14419_s23 + $0x10f0] sm:$0xf0] }
 0x594   : > { %v13512_v33 = vld [vmem:[%s14419_s23 + $0x12d4] sm:$0xf]  ;;  %v10957_v13 = vor.u32 %v13448_v6, %v10954_v4  ;;  %7887 = vmatpush.bf16.msra.mxu3 %v11757_v5 }
 0x595   : > { %v11210_v22 = vld [vmem:[%s14419_s23 + $0x12f0] sm:$0xf0] }
 0x596   : > { %v13576_v21 = vld [vmem:[%s14419_s23 + $0x14d4] sm:$0xf]  ;;  %v11213_v17 = vor.u32 %v13512_v33, %v11210_v22  ;;  %7846 = vmatpush.bf16.msra.mxu0 %v10957_v13 }
 0x597   : > { %v11466_v39 = vld [vmem:[%s14419_s23 + $0x14f0] sm:$0xf0] }
 0x598   : > { %v13640_v50 = vld [vmem:[%s14419_s23 + $0x16d4] sm:$0xf]  ;;  %v11469_v30 = vor.u32 %v13576_v21, %v11466_v39  ;;  %7860 = vmatpush.bf16.msra.mxu1 %v11213_v17 }
 0x599   : > { %v11722_v59 = vld [vmem:[%s14419_s23 + $0x16f0] sm:$0xf0] }
 0x59a   : > { %v13440_v15 = vld [vmem:[%s14419_s23 + $0x1094] sm:$0xf]  ;;  %v11725_v28 = vor.u32 %v13640_v50, %v11722_v59  ;;  %7874 = vmatpush.bf16.msra.mxu2 %v11469_v30 }
 0x59b   : > { %v10922_v19 = vld [vmem:[%s14419_s23 + $0x10b0] sm:$0xf0] }
 0x59c   : > { %v13504_v32 = vld [vmem:[%s14419_s23 + $0x1294] sm:$0xf]  ;;  %v10925_v3 = vor.u32 %v13440_v15, %v10922_v19  ;;  %7888 = vmatpush.bf16.msra.mxu3 %v11725_v28 }
 0x59d   : > { %v11178_v54 = vld [vmem:[%s14419_s23 + $0x12b0] sm:$0xf0] }
 0x59e   : > { %v13568_v9 = vld [vmem:[%s14419_s23 + $0x1494] sm:$0xf]  ;;  %v11181_v26 = vor.u32 %v13504_v32, %v11178_v54  ;;  %7847 = vmatpush.bf16.msra.mxu0 %v10925_v3  ;;  %v16238_v3 = vpop.f32.mrf.mxu2 }
 0x59f   : > { %v11434_v23 = vld [vmem:[%s14419_s23 + $0x14b0] sm:$0xf0] }
 0x5a0   : > { %v13632_v29 = vld [vmem:[%s14419_s23 + $0x1694] sm:$0xf]  ;;  %v11437_v46 = vor.u32 %v13568_v9, %v11434_v23  ;;  %7861 = vmatpush.bf16.msra.mxu1 %v11181_v26 }
 0x5a1   : > { %v11690_v25 = vld [vmem:[%s14419_s23 + $0x16b0] sm:$0xf0] }
 0x5a2   : > { %v13432_v40 = vld [vmem:[%s14419_s23 + $0x1054] sm:$0xf]  ;;  %v11693_v10 = vor.u32 %v13632_v29, %v11690_v25  ;;  %7875 = vmatpush.bf16.msra.mxu2 %v11437_v46 }
 0x5a3   : > { %v10890_v45 = vld [vmem:[%s14419_s23 + $0x1070] sm:$0xf0] }
 0x5a4   : > { %v13496_v51 = vld [vmem:[%s14419_s23 + $0x1254] sm:$0xf]  ;;  %v10893_v62 = vor.u32 %v13432_v40, %v10890_v45  ;;  %7889 = vmatpush.bf16.msra.mxu3 %v11693_v10 }
 0x5a5   : > { %v11146_v35 = vld [vmem:[%s14419_s23 + $0x1270] sm:$0xf0] }
 0x5a6   : > { %v13560_v36 = vld [vmem:[%s14419_s23 + $0x1454] sm:$0xf]  ;;  %v11149_v43 = vor.u32 %v13496_v51, %v11146_v35  ;;  %7848 = vmatpush.bf16.msra.mxu0 %v10893_v62  ;;  %v16243_v51 = vpop.f32.mrf.mxu3 }
 0x5a7   : > { %v11402_v31 = vld [vmem:[%s14419_s23 + $0x1470] sm:$0xf0] }
 0x5a8   : > { %v13624_v2 = vld [vmem:[%s14419_s23 + $0x1654] sm:$0xf]  ;;  %v11405_v16 = vor.u32 %v13560_v36, %v11402_v31  ;;  %7862 = vmatpush.bf16.msra.mxu1 %v11149_v43  ;;  %v7530_v31 = vadd.f32 %v16193_v12, %v16189_v7 }
 0x5a9   : > { %v11658_v1 = vld [vmem:[%s14419_s23 + $0x1670] sm:$0xf0] }
 0x5aa   : > { %v13424_v38 = vld [vmem:[%s14419_s23 + $0x1014] sm:$0xf]  ;;  %v11661_v41 = vor.u32 %v13624_v2, %v11658_v1  ;;  %7876 = vmatpush.bf16.msra.mxu2 %v11405_v16  ;;  %v7571_v2 = vpop.f32.mrf.mxu0  ;;  %v16252_v16 = vpop.f32.mrf.mxu1 }
 0x5ab   : > { %v10858_v42 = vld [vmem:[%s14419_s23 + $0x1030] sm:$0xf0] }
 0x5ac   : > { %v13488_v44 = vld [vmem:[%s14419_s23 + $0x1214] sm:$0xf]  ;;  %v10861_v39 = vor.u32 %v13424_v38, %v10858_v42  ;;  %7890 = vmatpush.bf16.msra.mxu3 %v11661_v41 }
 0x5ad   : > { %v11114_v14 = vld [vmem:[%s14419_s23 + $0x1230] sm:$0xf0] }
 0x5ae   : > { %v13552_v8 = vld [vmem:[%s14419_s23 + $0x1414] sm:$0xf]  ;;  %v11117_v17 = vor.u32 %v13488_v44, %v11114_v14  ;;  %7849 = vmatpush.bf16.msra.mxu0 %v10861_v39 }
 0x5af   : > { %v11370_v6 = vld [vmem:[%s14419_s23 + $0x1430] sm:$0xf0] }
 0x5b0   : > { %v13616_v4 = vld [vmem:[%s14419_s23 + $0x1614] sm:$0xf]  ;;  %v11373_v30 = vor.u32 %v13552_v8, %v11370_v6  ;;  %7863 = vmatpush.bf16.msra.mxu1 %v11117_v17 }
 0x5b1   : > { %v11626_v33 = vld [vmem:[%s14419_s23 + $0x1630] sm:$0xf0]  ;;  %7850 = vmatmul.bf16.vlgmr.msra.gmra.mxu0 %v14686_v48 }
 0x5b2   : > { %v13736_v5 = vld [vmem:[%s14419_s23 + $0x19d4] sm:$0xf]  ;;  %v11629_v32 = vor.u32 %v13616_v4, %v11626_v33  ;;  %7877 = vmatpush.bf16.msra.mxu2 %v11373_v30  ;;  %v7544_v4 = vadd.f32 %v16206_v20, %v7530_v31  ;;  %v16272_v20 = vpop.f32.mrf.mxu2  ;;  %v16287_v31 = vpop.f32.mrf.mxu1 }
 0x5b3   : > { %v12106_v22 = vld [vmem:[%s14419_s23 + $0x19f0] sm:$0xf0]  ;;  %7864 = vmatmul.bf16.vlgmr.msra.gmra.mxu1 %v14693_v53 }
 0x5b4   : > { %v13800_v21 = vld [vmem:[%s14419_s23 + $0x1bd4] sm:$0xf]  ;;  %v12109_v28 = vor.u32 %v13736_v5, %v12106_v22  ;;  %7891 = vmatpush.bf16.msra.mxu3 %v11629_v32  ;;  %v7558_v32 = vadd.f32 %v16211_v37, %v7544_v4 }
 0x5b5   : > { %v12362_v50 = vld [vmem:[%s14419_s23 + $0x1bf0] sm:$0xf0]  ;;  %7878 = vmatmul.bf16.vlgmr.msra.gmra.mxu2 %v14691_v52 }
 0x5b6   : > { %v13864_v59 = vld [vmem:[%s14419_s23 + $0x1dd4] sm:$0xf]  ;;  %v12365_v54 = vor.u32 %v13800_v21, %v12362_v50  ;;  %7898 = vmatpush.bf16.msrb.mxu0 %v12109_v28  ;;  %v16275_v28 = vpop.f32.mrf.mxu3 }
 0x5b7   : > { %v12618_v13 = vld [vmem:[%s14419_s23 + $0x1df0] sm:$0xf0]  ;;  %7892 = vmatmul.bf16.vlgmr.msra.gmra.mxu3 %v14697_v57 }
 0x5b8   : > { %v13928_v15 = vld [vmem:[%s14419_s23 + $0x1fd4] sm:$0xf]  ;;  %v12621_v9 = vor.u32 %v13864_v59, %v12618_v13  ;;  %7912 = vmatpush.bf16.msrb.mxu1 %v12365_v54 }
 0x5b9   : > { %v12874_v19 = vld [vmem:[%s14419_s23 + $0x1ff0] sm:$0xf0] }
 0x5ba   : > { %v13728_v23 = vld [vmem:[%s14419_s23 + $0x1994] sm:$0xf]  ;;  %v12877_v26 = vor.u32 %v13928_v15, %v12874_v19  ;;  %7926 = vmatpush.bf16.msrb.mxu2 %v12621_v9 }
 0x5bb   : > { %v12074_v29 = vld [vmem:[%s14419_s23 + $0x19b0] sm:$0xf0] }
 0x5bc   : > { %v13792_v25 = vld [vmem:[%s14419_s23 + $0x1b94] sm:$0xf]  ;;  %v12077_v36 = vor.u32 %v13728_v23, %v12074_v29  ;;  %7940 = vmatpush.bf16.msrb.mxu3 %v12877_v26 }
 0x5bd   : > { %v12330_v46 = vld [vmem:[%s14419_s23 + $0x1bb0] sm:$0xf0] }
 0x5be   : > { %v13856_v40 = vld [vmem:[%s14419_s23 + $0x1d94] sm:$0xf]  ;;  %v12333_v1 = vor.u32 %v13792_v25, %v12330_v46  ;;  %7899 = vmatpush.bf16.msrb.mxu0 %v12077_v36  ;;  %v7532_v36 = vadd.f32 %v16222_v24, %v16217_v47 }
 0x5bf   : > { %v12586_v45 = vld [vmem:[%s14419_s23 + $0x1db0] sm:$0xf0] }
 0x5c0   : > { %v13920_v10 = vld [vmem:[%s14419_s23 + $0x1f94] sm:$0xf]  ;;  %v12589_v62 = vor.u32 %v13856_v40, %v12586_v45  ;;  %7913 = vmatpush.bf16.msrb.mxu1 %v12333_v1 }
 0x5c1   : > { %v12842_v35 = vld [vmem:[%s14419_s23 + $0x1fb0] sm:$0xf0] }
 0x5c2   : > { %v13720_v38 = vld [vmem:[%s14419_s23 + $0x1954] sm:$0xf]  ;;  %v12845_v44 = vor.u32 %v13920_v10, %v12842_v35  ;;  %7927 = vmatpush.bf16.msrb.mxu2 %v12589_v62  ;;  %v7573_v10 = vpop.f32.mrf.mxu0  ;;  %v7572_v62 = vadd.f32 %v7571_v2, %v7558_v32  ;;  %v7546_v2 = vadd.f32 %v16238_v3, %v7532_v36 }
 0x5c3   : > { %v12042_v42 = vld [vmem:[%s14419_s23 + $0x1970] sm:$0xf0] }
 0x5c4   : > { %v13784_v43 = vld [vmem:[%s14419_s23 + $0x1b54] sm:$0xf]  ;;  %v12045_v6 = vor.u32 %v13720_v38, %v12042_v42  ;;  %7941 = vmatpush.bf16.msrb.mxu3 %v12845_v44  ;;  %v7586_v4 = vadd.f32 %v16252_v16, %v7572_v62  ;;  %v7560_v32 = vadd.f32 %v16243_v51, %v7546_v2 }
 0x5c5   : > { %v12298_v14 = vld [vmem:[%s14419_s23 + $0x1b70] sm:$0xf0] }
 0x5c6   : > { %v13848_v7 = vld [vmem:[%s14419_s23 + $0x1d54] sm:$0xf]  ;;  %v12301_v33 = vor.u32 %v13784_v43, %v12298_v14  ;;  %7900 = vmatpush.bf16.msrb.mxu0 %v12045_v6  ;;  %v7574_v62 = vadd.f32 %v7573_v10, %v7560_v32  ;;  %v13165_v10 = vld [vmem:[%s14419_s23 + $0x7f4] sm:$0xf0] }
 0x5c7   : > { %v12554_v12 = vld [vmem:[%s14419_s23 + $0x1d70] sm:$0xf0] }
 0x5c8   : > { %v13912_v8 = vld [vmem:[%s14419_s23 + $0x1f54] sm:$0xf]  ;;  %v12557_v5 = vor.u32 %v13848_v7, %v12554_v12  ;;  %7914 = vmatpush.bf16.msrb.mxu1 %v12301_v33 }
 0x5c9   : > { %v12810_v41 = vld [vmem:[%s14419_s23 + $0x1f70] sm:$0xf0] }
 0x5ca   : > { %v13712_v22 = vld [vmem:[%s14419_s23 + $0x1914] sm:$0xf]  ;;  %v12813_v50 = vor.u32 %v13912_v8, %v12810_v41  ;;  %7928 = vmatpush.bf16.msrb.mxu2 %v12557_v5  ;;  %v7627_v16 = vpop.f32.mrf.mxu0 }
 0x5cb   : > { %v12010_v21 = vld [vmem:[%s14419_s23 + $0x1930] sm:$0xf0] }
 0x5cc   : > { %v13776_v39 = vld [vmem:[%s14419_s23 + $0x1b14] sm:$0xf]  ;;  %v12013_v19 = vor.u32 %v13712_v22, %v12010_v21  ;;  %7942 = vmatpush.bf16.msrb.mxu3 %v12813_v50  ;;  %v7601_v50 = vpop.f32.mrf.mxu2 }
 0x5cd   : > { %v12266_v59 = vld [vmem:[%s14419_s23 + $0x1b30] sm:$0xf0] }
 0x5ce   : > { %v13840_v13 = vld [vmem:[%s14419_s23 + $0x1d14] sm:$0xf]  ;;  %v12269_v54 = vor.u32 %v13776_v39, %v12266_v59  ;;  %7901 = vmatpush.bf16.msrb.mxu0 %v12013_v19 }
 0x5cf   : > { %v12522_v17 = vld [vmem:[%s14419_s23 + $0x1d30] sm:$0xf0] }
 0x5d0   : > { %v13904_v30 = vld [vmem:[%s14419_s23 + $0x1f14] sm:$0xf]  ;;  %v12525_v9 = vor.u32 %v13840_v13, %v12522_v17  ;;  %7915 = vmatpush.bf16.msrb.mxu1 %v12269_v54  ;;  %v7641_v54 = vpop.f32.mrf.mxu1 }
 0x5d1   : > { %v12778_v15 = vld [vmem:[%s14419_s23 + $0x1f30] sm:$0xf0] }
 0x5d2   : > { %v13704_v23 = vld [vmem:[%s14419_s23 + $0x18d4] sm:$0xf]  ;;  %v12781_v26 = vor.u32 %v13904_v30, %v12778_v15  ;;  %7929 = vmatpush.bf16.msrb.mxu2 %v12525_v9  ;;  %v16305_v30 = vpop.f32.mrf.mxu3  ;;  %v7629_v32 = vpop.f32.mrf.mxu0 }
 0x5d3   : > { %v11978_v29 = vld [vmem:[%s14419_s23 + $0x18f0] sm:$0xf0] }
 0x5d4   : > { %v13768_v25 = vld [vmem:[%s14419_s23 + $0x1ad4] sm:$0xf]  ;;  %v11981_v1 = vor.u32 %v13704_v23, %v11978_v29  ;;  %7943 = vmatpush.bf16.msrb.mxu3 %v12781_v26 }
 0x5d5   : > { %v12234_v46 = vld [vmem:[%s14419_s23 + $0x1af0] sm:$0xf0] }
 0x5d6   : > { %v13832_v40 = vld [vmem:[%s14419_s23 + $0x1cd4] sm:$0xf]  ;;  %v12237_v38 = vor.u32 %v13768_v25, %v12234_v46  ;;  %7902 = vmatpush.bf16.msrb.mxu0 %v11981_v1  ;;  %v7600_v25 = vadd.f32 %v16272_v20, %v7586_v4  ;;  %v9040_v20 = vld [vmem:[%s14419_s23 + $0x1d8] sm:$0xf]  ;;  %v7588_v4 = vadd.f32 %v16287_v31, %v7574_v62 }
 0x5d7   : > { %v12490_v45 = vld [vmem:[%s14419_s23 + $0x1cf0] sm:$0xf0]  ;;  %v9776_v31 = vld [vmem:[%s14419_s23 + $0x798] sm:$0xf] }
 0x5d8   : > { %v13896_v37 = vld [vmem:[%s14419_s23 + $0x1ed4] sm:$0xf]  ;;  %v12493_v42 = vor.u32 %v13832_v40, %v12490_v45  ;;  %7916 = vmatpush.bf16.msrb.mxu1 %v12237_v38  ;;  %v12973_v38 = vld [vmem:[%s14419_s23 + $0x1f4] sm:$0xf0] }
 0x5d9   : > { %v12746_v35 = vld [vmem:[%s14419_s23 + $0x1ef0] sm:$0xf0]  ;;  %v13149_v62 = vld [vmem:[%s14419_s23 + $0x774] sm:$0xf0] }
 0x5da   : > { %v13696_v43 = vld [vmem:[%s14419_s23 + $0x1894] sm:$0xf]  ;;  %v12749_v7 = vor.u32 %v13896_v37, %v12746_v35  ;;  %7930 = vmatpush.bf16.msrb.mxu2 %v12493_v42  ;;  %v9296_v42 = vld [vmem:[%s14419_s23 + $0x3d8] sm:$0xf] }
 0x5db   : > { %v11946_v44 = vld [vmem:[%s14419_s23 + $0x18b0] sm:$0xf0] }
 0x5dc   : > { %v13760_v14 = vld [vmem:[%s14419_s23 + $0x1a94] sm:$0xf]  ;;  %v11949_v6 = vor.u32 %v13696_v43, %v11946_v44  ;;  %7944 = vmatpush.bf16.msrb.mxu3 %v12749_v7  ;;  %v13037_v44 = vld [vmem:[%s14419_s23 + $0x3f4] sm:$0xf0] }
 0x5dd   : > { %v12202_v47 = vld [vmem:[%s14419_s23 + $0x1ab0] sm:$0xf0]  ;;  %v13101_v7 = vld [vmem:[%s14419_s23 + $0x5f4] sm:$0xf0] }
 0x5de   : > { %v13824_v24 = vld [vmem:[%s14419_s23 + $0x1c94] sm:$0xf]  ;;  %v12205_v33 = vor.u32 %v13760_v14, %v12202_v47  ;;  %7903 = vmatpush.bf16.msrb.mxu0 %v11949_v6  ;;  %v9552_v14 = vld [vmem:[%s14419_s23 + $0x5d8] sm:$0xf]  ;;  %v7614_v47 = vadd.f32 %v16275_v28, %v7600_v25  ;;  %v9041_v6 = vor.u32 %v12973_v38, %v9040_v20  ;;  %v7669_v28 = vpop.f32.mrf.mxu3 }
 0x5df   : > { %v12458_v12 = vld [vmem:[%s14419_s23 + $0x1cb0] sm:$0xf0]  ;;  %v8944_v38 = vld [vmem:[%s14419_s23 + $0x118] sm:$0xf] }
 0x5e0   : > { %v13888_v8 = vld [vmem:[%s14419_s23 + $0x1e94] sm:$0xf]  ;;  %v12461_v5 = vor.u32 %v13824_v24, %v12458_v12  ;;  %7917 = vmatpush.bf16.msrb.mxu1 %v12205_v33  ;;  %v7628_v33 = vadd.f32 %v7627_v16, %v7614_v47  ;;  %v13157_v16 = vld [vmem:[%s14419_s23 + $0x7b4] sm:$0xf0] }
 0x5e1   : > { %v12714_v41 = vld [vmem:[%s14419_s23 + $0x1eb0] sm:$0xf0] }
 0x5e2   : > { %v13688_v22 = vld [vmem:[%s14419_s23 + $0x1854] sm:$0xf]  ;;  %v12717_v59 = vor.u32 %v13888_v8, %v12714_v41  ;;  %7931 = vmatpush.bf16.msrb.mxu2 %v12461_v5  ;;  %v9808_v8 = vld [vmem:[%s14419_s23 + $0x7d8] sm:$0xf]  ;;  %v7655_v41 = vpop.f32.mrf.mxu2  ;;  %v9297_v5 = vor.u32 %v13037_v44, %v9296_v42 }
 0x5e3   : > { %v11914_v21 = vld [vmem:[%s14419_s23 + $0x1870] sm:$0xf0]  ;;  %v12949_v44 = vld [vmem:[%s14419_s23 + $0x134] sm:$0xf0] }
 0x5e4   : > { %v13752_v39 = vld [vmem:[%s14419_s23 + $0x1a54] sm:$0xf]  ;;  %v11917_v9 = vor.u32 %v13688_v22, %v11914_v21  ;;  %7945 = vmatpush.bf16.msrb.mxu3 %v12717_v59  ;;  %v9553_v22 = vor.u32 %v13101_v7, %v9552_v14  ;;  %v9008_v21 = vld [vmem:[%s14419_s23 + $0x198] sm:$0xf] }
 0x5e5   : > { %v12170_v3 = vld [vmem:[%s14419_s23 + $0x1a70] sm:$0xf0]  ;;  %v9264_v59 = vld [vmem:[%s14419_s23 + $0x398] sm:$0xf] }
 0x5e6   : > { %v13816_v13 = vld [vmem:[%s14419_s23 + $0x1c54] sm:$0xf]  ;;  %v12173_v26 = vor.u32 %v13752_v39, %v12170_v3  ;;  %7904 = vmatpush.bf16.msrb.mxu0 %v11917_v9  ;;  %v12965_v39 = vld [vmem:[%s14419_s23 + $0x1b4] sm:$0xf0]  ;;  %v9809_v3 = vor.u32 %v13165_v10, %v9808_v8  ;;  %v7643_v9 = vpop.f32.mrf.mxu1 }
 0x5e7   : > { %v12426_v17 = vld [vmem:[%s14419_s23 + $0x1c70] sm:$0xf0]  ;;  %v9200_v14 = vld [vmem:[%s14419_s23 + $0x318] sm:$0xf] }
 0x5e8   : > { %v13880_v15 = vld [vmem:[%s14419_s23 + $0x1e54] sm:$0xf]  ;;  %v12429_v46 = vor.u32 %v13816_v13, %v12426_v17  ;;  %7918 = vmatpush.bf16.msrb.mxu1 %v12173_v26  ;;  %v13029_v13 = vld [vmem:[%s14419_s23 + $0x3b4] sm:$0xf0] }
 0x5e9   : > { %v12682_v19 = vld [vmem:[%s14419_s23 + $0x1e70] sm:$0xf0]  ;;  %v9520_v17 = vld [vmem:[%s14419_s23 + $0x598] sm:$0xf]  ;;  %v9265_v25 = vor.u32 %v13029_v13, %v9264_v59 }
 0x5ea   : > { %v13680_v23 = vld [vmem:[%s14419_s23 + $0x1814] sm:$0xf]  ;;  %v12685_v37 = vor.u32 %v13880_v15, %v12682_v19  ;;  %7932 = vmatpush.bf16.msrb.mxu2 %v12429_v46  ;;  %v13093_v15 = vld [vmem:[%s14419_s23 + $0x5b4] sm:$0xf0]  ;;  %v7602_v19 = vadd.f32 %v7601_v50, %v7588_v4  ;;  %v7657_v47 = vpop.f32.mrf.mxu2 }
 0x5eb   : > { %v11882_v29 = vld [vmem:[%s14419_s23 + $0x1830] sm:$0xf0]  ;;  %v9521_v50 = vor.u32 %v13093_v15, %v9520_v17  ;;  %v8976_v26 = vld [vmem:[%s14419_s23 + $0x158] sm:$0xf] }
 0x5ec   : > { %v13744_v51 = vld [vmem:[%s14419_s23 + $0x1a14] sm:$0xf]  ;;  %v11885_v43 = vor.u32 %v13680_v23, %v11882_v29  ;;  %7946 = vmatpush.bf16.msrb.mxu3 %v12685_v37  ;;  %v9009_v23 = vor.u32 %v12965_v39, %v9008_v21  ;;  %v7642_v29 = vadd.f32 %v7641_v54, %v7628_v33  ;;  %v12957_v46 = vld [vmem:[%s14419_s23 + $0x174] sm:$0xf0]  ;;  %v7616_v54 = vadd.f32 %v16305_v30, %v7602_v19 }
 0x5ed   : > { %v12138_v40 = vld [vmem:[%s14419_s23 + $0x1a30] sm:$0xf0]  ;;  %v9488_v37 = vld [vmem:[%s14419_s23 + $0x558] sm:$0xf]  ;;  %v8977_v20 = vor.u32 %v12957_v46, %v8976_v26  ;;  %v8945_v33 = vor.u32 %v12949_v44, %v8944_v38 }
 0x5ee   : > { %v13808_v45 = vld [vmem:[%s14419_s23 + $0x1c14] sm:$0xf]  ;;  %v12141_v24 = vor.u32 %v13744_v51, %v12138_v40  ;;  %7905 = vmatpush.bf16.msrb.mxu0 %v11885_v43  ;;  %v9232_v51 = vld [vmem:[%s14419_s23 + $0x358] sm:$0xf]  ;;  %v9777_v40 = vor.u32 %v13157_v16, %v9776_v31  ;;  %v7630_v42 = vadd.f32 %v7629_v32, %v7616_v54 }
 0x5ef   : > { %v12394_v35 = vld [vmem:[%s14419_s23 + $0x1c30] sm:$0xf0]  ;;  %v13013_v7 = vld [vmem:[%s14419_s23 + $0x334] sm:$0xf0] }
 0x5f0   : > { %v13872_v36 = vld [vmem:[%s14419_s23 + $0x1e14] sm:$0xf]  ;;  %v12397_v12 = vor.u32 %v13808_v45, %v12394_v35  ;;  %7919 = vmatpush.bf16.msrb.mxu1 %v12141_v24  ;;  %v13021_v45 = vld [vmem:[%s14419_s23 + $0x374] sm:$0xf0]  ;;  %v7644_v21 = vadd.f32 %v7643_v9, %v7630_v42 }
 0x5f1   : > { %v12650_v1 = vld [vmem:[%s14419_s23 + $0x1e30] sm:$0xf0]  ;;  %7906 = vmatmul.bf16.vlgmr.msrb.gmra.mxu0 %v14770_v49  ;;  %v13085_v35 = vld [vmem:[%s14419_s23 + $0x574] sm:$0xf0]  ;;  %v9233_v30 = vor.u32 %v13021_v45, %v9232_v51 }
 0x5f2   : > { %v12653_v2 = vor.u32 %v13872_v36, %v12650_v1  ;;  %7933 = vmatpush.bf16.msrb.mxu2 %v12397_v12  ;;  %7954 = vmatpush.bf16.msra.mxu0 %v9041_v6  ;;  %v7656_v36 = vadd.f32 %v7655_v41, %v7642_v29  ;;  %v9744_v1 = vld [vmem:[%s14419_s23 + $0x758] sm:$0xf]  ;;  %v9489_v43 = vor.u32 %v13085_v35, %v9488_v37  ;;  %v7671_v41 = vpop.f32.mrf.mxu3  ;;  %v7711_v37 = vpop.f32.mrf.mxu2 }
 0x5f3   : > { %7920 = vmatmul.bf16.vlgmr.msrb.gmra.mxu1 %v14777_v58  ;;  %v9745_v24 = vor.u32 %v13149_v62, %v9744_v1  ;;  %v9456_v12 = vld [vmem:[%s14419_s23 + $0x518] sm:$0xf]  ;;  %v7658_v31 = vadd.f32 %v7657_v47, %v7644_v21 }
 0x5f4   : > { %7947 = vmatpush.bf16.msrb.mxu3 %v12653_v2  ;;  %7968 = vmatpush.bf16.msra.mxu1 %v9297_v5  ;;  %v13077_v8 = vld [vmem:[%s14419_s23 + $0x534] sm:$0xf0]  ;;  %v7670_v10 = vadd.f32 %v7669_v28, %v7656_v36  ;;  %v7683_v2 = vpop.f32.mrf.mxu0  ;;  %v9201_v5 = vor.u32 %v13013_v7, %v9200_v14 }
 0x5f5   : > { %7934 = vmatmul.bf16.vlgmr.msrb.gmra.mxu2 %v14775_v55  ;;  %v9712_v6 = vld [vmem:[%s14419_s23 + $0x718] sm:$0xf]  ;;  %v9457_v28 = vor.u32 %v13077_v8, %v9456_v12  ;;  %v7672_v36 = vadd.f32 %v7671_v41, %v7658_v31 }
 0x5f6   : > { %7982 = vmatpush.bf16.msra.mxu2 %v9553_v22  ;;  %7955 = vmatpush.bf16.msra.mxu0 %v9009_v23  ;;  %v13141_v4 = vld [vmem:[%s14419_s23 + $0x734] sm:$0xf0]  ;;  %v7697_v22 = vpop.f32.mrf.mxu1  ;;  %v7684_v39 = vadd.f32 %v7683_v2, %v7670_v10 }
 0x5f7   : > { %7948 = vmatmul.bf16.vlgmr.msrb.gmra.mxu3 %v14781_v63  ;;  %v8912_v59 = vld [vmem:[%s14419_s23 + $0xd8] sm:$0xf]  ;;  %v9713_v17 = vor.u32 %v13141_v4, %v9712_v6 }
 0x5f8   : > { %7996 = vmatpush.bf16.msra.mxu3 %v9809_v3  ;;  %7969 = vmatpush.bf16.msra.mxu1 %v9265_v25  ;;  %v12941_v3 = vld [vmem:[%s14419_s23 + $0xf4] sm:$0xf0]  ;;  %v7698_v25 = vadd.f32 %v7697_v22, %v7684_v39 }
 0x5f9   : > { %v9168_v13 = vld [vmem:[%s14419_s23 + $0x2d8] sm:$0xf]  ;;  %v8913_v23 = vor.u32 %v12941_v3, %v8912_v59 }
 0x5fa   : > { %7983 = vmatpush.bf16.msra.mxu2 %v9521_v50  ;;  %7956 = vmatpush.bf16.msra.mxu0 %v8977_v20  ;;  %v13005_v15 = vld [vmem:[%s14419_s23 + $0x2f4] sm:$0xf0]  ;;  %v7712_v1 = vadd.f32 %v7711_v37, %v7698_v25  ;;  %v7725_v20 = vpop.f32.mrf.mxu3  ;;  %v7713_v31 = vpop.f32.mrf.mxu2 }
 0x5fb   : > { %v9424_v19 = vld [vmem:[%s14419_s23 + $0x4d8] sm:$0xf]  ;;  %v9169_v50 = vor.u32 %v13005_v15, %v9168_v13 }
 0x5fc   : > { %7997 = vmatpush.bf16.msra.mxu3 %v9777_v40  ;;  %7970 = vmatpush.bf16.msra.mxu1 %v9233_v30  ;;  %v13069_v32 = vld [vmem:[%s14419_s23 + $0x4f4] sm:$0xf0]  ;;  %v7685_v62 = vpop.f32.mrf.mxu0  ;;  %v358_v30 = vld [vmem:[#allocation2 + $0x50] sm:$0xff]  ;;  %v7726_v7 = vadd.f32 %v7725_v20, %v7712_v1 }
 0x5fd   : > { %v9680_v16 = vld [vmem:[%s14419_s23 + $0x6d8] sm:$0xf]  ;;  %v9425_v26 = vor.u32 %v13069_v32, %v9424_v19  ;;  %v7686_v14 = vadd.f32 %v7685_v62, %v7672_v36 }
 0x5fe   : > { %7984 = vmatpush.bf16.msra.mxu2 %v9489_v43  ;;  %v13133_v9 = vld [vmem:[%s14419_s23 + $0x6f4] sm:$0xf0]  ;;  %7957 = vmatpush.bf16.msra.mxu0 %v8945_v33  ;;  %v7699_v41 = vpop.f32.mrf.mxu1  ;;  %v8406_v33 = vadd.f32 %v7726_v7, %v358_v30 }
 0x5ff   : > { %v8880_v29 = vld [vmem:[%s14419_s23 + $0x98] sm:$0xf]  ;;  %v9681_v45 = vor.u32 %v13133_v9, %v9680_v16  ;;  %v7700_v3 = vadd.f32 %v7699_v41, %v7686_v14  ;;  %v366_v16 = vld [vmem:[#allocation2 + $0x60] sm:$0xff] }
 0x600   : > { %7998 = vmatpush.bf16.msra.mxu3 %v9745_v24  ;;  %7971 = vmatpush.bf16.msra.mxu1 %v9201_v5  ;;  %v12933_v46 = vld [vmem:[%s14419_s23 + $0xb4] sm:$0xf0]  ;;  %8422 = vst [vmem:[#allocation2 + $0x50] sm:$0xff] %v8406_v33 }
 0x601   : > { %v9136_v51 = vld [vmem:[%s14419_s23 + $0x298] sm:$0xf]  ;;  %v8881_v43 = vor.u32 %v12933_v46, %v8880_v29  ;;  %v7714_v25 = vadd.f32 %v7713_v31, %v7700_v3 }
 0x602   : > { %7985 = vmatpush.bf16.msra.mxu2 %v9457_v28  ;;  %v12997_v40 = vld [vmem:[%s14419_s23 + $0x2b4] sm:$0xf0]  ;;  %7958 = vmatpush.bf16.msra.mxu0 %v8913_v23 }
 0x603   : > { %v9392_v35 = vld [vmem:[%s14419_s23 + $0x498] sm:$0xf]  ;;  %v9137_v44 = vor.u32 %v12997_v40, %v9136_v51 }
 0x604   : > { %7999 = vmatpush.bf16.msra.mxu3 %v9713_v17  ;;  %v13061_v54 = vld [vmem:[%s14419_s23 + $0x4b4] sm:$0xf0]  ;;  %7972 = vmatpush.bf16.msra.mxu1 %v9169_v50  ;;  %v7727_v50 = vpop.f32.mrf.mxu3 }
 0x605   : > { %v9648_v38 = vld [vmem:[%s14419_s23 + $0x698] sm:$0xf]  ;;  %v9393_v47 = vor.u32 %v13061_v54, %v9392_v35  ;;  %v7728_v54 = vadd.f32 %v7727_v50, %v7714_v25 }
 0x606   : > { %v13125_v42 = vld [vmem:[%s14419_s23 + $0x6b4] sm:$0xf0]  ;;  %7986 = vmatpush.bf16.msra.mxu2 %v9425_v26  ;;  %7959 = vmatpush.bf16.msra.mxu0 %v8881_v43 }
 0x607   : > { %v8848_v24 = vld [vmem:[%s14419_s23 + $0x58] sm:$0xf]  ;;  %v9649_v10 = vor.u32 %v13125_v42, %v9648_v38  ;;  %v8414_v30 = vadd.f32 %v7728_v54, %v366_v16 }
 0x608   : > { %v12925_v12 = vld [vmem:[%s14419_s23 + $0x74] sm:$0xf0]  ;;  %8000 = vmatpush.bf16.msra.mxu3 %v9681_v45  ;;  %7973 = vmatpush.bf16.msra.mxu1 %v9137_v44 }
 0x609   : > { %v9104_v8 = vld [vmem:[%s14419_s23 + $0x258] sm:$0xf]  ;;  %v8849_v21 = vor.u32 %v12925_v12, %v8848_v24  ;;  %8430 = vst [vmem:[#allocation2 + $0x60] sm:$0xff] %v8414_v30 }
 0x60a   : > { %v12989_v2 = vld [vmem:[%s14419_s23 + $0x274] sm:$0xf0]  ;;  %7987 = vmatpush.bf16.msra.mxu2 %v9393_v47 }
 0x60b   : > { %v9360_v6 = vld [vmem:[%s14419_s23 + $0x458] sm:$0xf]  ;;  %v9105_v13 = vor.u32 %v12989_v2, %v9104_v8  ;;  %7960 = vmatpush.bf16.msra.mxu0 %v8849_v21 }
 0x60c   : > { %v13053_v4 = vld [vmem:[%s14419_s23 + $0x474] sm:$0xf0]  ;;  %8001 = vmatpush.bf16.msra.mxu3 %v9649_v10 }
 0x60d   : > { %v9616_v5 = vld [vmem:[%s14419_s23 + $0x658] sm:$0xf]  ;;  %v9361_v17 = vor.u32 %v13053_v4, %v9360_v6  ;;  %7974 = vmatpush.bf16.msra.mxu1 %v9105_v13 }
 0x60e   : > { %v13117_v22 = vld [vmem:[%s14419_s23 + $0x674] sm:$0xf0] }
 0x60f   : > { %v8816_v39 = vld [vmem:[%s14419_s23 + $0x18] sm:$0xf]  ;;  %v9617_v32 = vor.u32 %v13117_v22, %v9616_v5  ;;  %7988 = vmatpush.bf16.msra.mxu2 %v9361_v17 }
 0x610   : > { %v12917_v28 = vld [vmem:[%s14419_s23 + $0x34] sm:$0xf0] }
 0x611   : > { %v9072_v59 = vld [vmem:[%s14419_s23 + $0x218] sm:$0xf]  ;;  %v8817_v40 = vor.u32 %v12917_v28, %v8816_v39  ;;  %8002 = vmatpush.bf16.msra.mxu3 %v9617_v32 }
 0x612   : > { %v12981_v15 = vld [vmem:[%s14419_s23 + $0x234] sm:$0xf0] }
 0x613   : > { %v9328_v19 = vld [vmem:[%s14419_s23 + $0x418] sm:$0xf]  ;;  %v9073_v36 = vor.u32 %v12981_v15, %v9072_v59  ;;  %7961 = vmatpush.bf16.msra.mxu0 %v8817_v40 }
 0x614   : > { %v13045_v9 = vld [vmem:[%s14419_s23 + $0x434] sm:$0xf0] }
 0x615   : > { %v9584_v23 = vld [vmem:[%s14419_s23 + $0x618] sm:$0xf]  ;;  %v9329_v1 = vor.u32 %v13045_v9, %v9328_v19  ;;  %7975 = vmatpush.bf16.msra.mxu1 %v9073_v36 }
 0x616   : > { %v13109_v29 = vld [vmem:[%s14419_s23 + $0x634] sm:$0xf0]  ;;  %7962 = vmatmul.bf16.vlgmr.msra.gmra.mxu0 %v14520_v11 }
 0x617   : > { %v10064_v26 = vld [vmem:[%s14419_s23 + $0x9d8] sm:$0xf]  ;;  %v9585_v38 = vor.u32 %v13109_v29, %v9584_v23  ;;  %7989 = vmatpush.bf16.msra.mxu2 %v9329_v1 }
 0x618   : > { %v13229_v46 = vld [vmem:[%s14419_s23 + $0x9f4] sm:$0xf0]  ;;  %7976 = vmatmul.bf16.vlgmr.msra.gmra.mxu1 %v14536_v27 }
 0x619   : > { %v10320_v51 = vld [vmem:[%s14419_s23 + $0xbd8] sm:$0xf]  ;;  %v10065_v42 = vor.u32 %v13229_v46, %v10064_v26  ;;  %8003 = vmatpush.bf16.msra.mxu3 %v9585_v38 }
 0x61a   : > { %v13293_v45 = vld [vmem:[%s14419_s23 + $0xbf4] sm:$0xf0]  ;;  %7990 = vmatmul.bf16.vlgmr.msra.gmra.mxu2 %v14526_v18 }
 0x61b   : > { %v10576_v37 = vld [vmem:[%s14419_s23 + $0xdd8] sm:$0xf]  ;;  %v10321_v43 = vor.u32 %v13293_v45, %v10320_v51  ;;  %8010 = vmatpush.bf16.msrb.mxu0 %v10065_v42 }
 0x61c   : > { %v13357_v35 = vld [vmem:[%s14419_s23 + $0xdf4] sm:$0xf0]  ;;  %8004 = vmatmul.bf16.vlgmr.msra.gmra.mxu3 %v14542_v34 }
 0x61d   : > { %v10832_v62 = vld [vmem:[%s14419_s23 + $0xfd8] sm:$0xf]  ;;  %v10577_v44 = vor.u32 %v13357_v35, %v10576_v37  ;;  %8024 = vmatpush.bf16.msrb.mxu1 %v10321_v43 }
 0x61e   : > { %v13421_v20 = vld [vmem:[%s14419_s23 + $0xff4] sm:$0xf0] }
 0x61f   : > { %v10032_v14 = vld [vmem:[%s14419_s23 + $0x998] sm:$0xf]  ;;  %v10833_v24 = vor.u32 %v13421_v20, %v10832_v62  ;;  %8038 = vmatpush.bf16.msrb.mxu2 %v10577_v44 }
 0x620   : > { %v13221_v7 = vld [vmem:[%s14419_s23 + $0x9b4] sm:$0xf0] }
 0x621   : > { %v10288_v47 = vld [vmem:[%s14419_s23 + $0xb98] sm:$0xf]  ;;  %v10033_v6 = vor.u32 %v13221_v7, %v10032_v14  ;;  %8052 = vmatpush.bf16.msrb.mxu3 %v10833_v24 }
 0x622   : > { %v13285_v12 = vld [vmem:[%s14419_s23 + $0xbb4] sm:$0xf0] }
 0x623   : > { %v10544_v8 = vld [vmem:[%s14419_s23 + $0xd98] sm:$0xf]  ;;  %v10289_v4 = vor.u32 %v13285_v12, %v10288_v47  ;;  %8011 = vmatpush.bf16.msrb.mxu0 %v10033_v6 }
 0x624   : > { %v13349_v10 = vld [vmem:[%s14419_s23 + $0xdb4] sm:$0xf0] }
 0x625   : > { %v10800_v41 = vld [vmem:[%s14419_s23 + $0xf98] sm:$0xf]  ;;  %v10545_v33 = vor.u32 %v13349_v10, %v10544_v8  ;;  %8025 = vmatpush.bf16.msrb.mxu1 %v10289_v4 }
 0x626   : > { %v13413_v2 = vld [vmem:[%s14419_s23 + $0xfb4] sm:$0xf0] }
 0x627   : > { %v10000_v5 = vld [vmem:[%s14419_s23 + $0x958] sm:$0xf]  ;;  %v10801_v39 = vor.u32 %v13413_v2, %v10800_v41  ;;  %8039 = vmatpush.bf16.msrb.mxu2 %v10545_v33 }
 0x628   : > { %v13213_v22 = vld [vmem:[%s14419_s23 + $0x974] sm:$0xf0] }
 0x629   : > { %v10256_v21 = vld [vmem:[%s14419_s23 + $0xb58] sm:$0xf]  ;;  %v10001_v15 = vor.u32 %v13213_v22, %v10000_v5  ;;  %8053 = vmatpush.bf16.msrb.mxu3 %v10801_v39 }
 0x62a   : > { %v13277_v28 = vld [vmem:[%s14419_s23 + $0xb74] sm:$0xf0] }
 0x62b   : > { %v10512_v59 = vld [vmem:[%s14419_s23 + $0xd58] sm:$0xf]  ;;  %v10257_v19 = vor.u32 %v13277_v28, %v10256_v21  ;;  %8012 = vmatpush.bf16.msrb.mxu0 %v10001_v15 }
 0x62c   : > { %v13341_v3 = vld [vmem:[%s14419_s23 + $0xd74] sm:$0xf0] }
 0x62d   : > { %v10768_v13 = vld [vmem:[%s14419_s23 + $0xf58] sm:$0xf]  ;;  %v10513_v32 = vor.u32 %v13341_v3, %v10512_v59  ;;  %8026 = vmatpush.bf16.msrb.mxu1 %v10257_v19 }
 0x62e   : > { %v13405_v17 = vld [vmem:[%s14419_s23 + $0xf74] sm:$0xf0] }
 0x62f   : > { %v9968_v31 = vld [vmem:[%s14419_s23 + $0x918] sm:$0xf]  ;;  %v10769_v23 = vor.u32 %v13405_v17, %v10768_v13  ;;  %8040 = vmatpush.bf16.msrb.mxu2 %v10513_v32 }
 0x630   : > { %v13205_v16 = vld [vmem:[%s14419_s23 + $0x934] sm:$0xf0] }
 0x631   : > { %v10224_v9 = vld [vmem:[%s14419_s23 + $0xb18] sm:$0xf]  ;;  %v9969_v51 = vor.u32 %v13205_v16, %v9968_v31  ;;  %8054 = vmatpush.bf16.msrb.mxu3 %v10769_v23 }
 0x632   : > { %v13269_v29 = vld [vmem:[%s14419_s23 + $0xb34] sm:$0xf0] }
 0x633   : > { %v10480_v25 = vld [vmem:[%s14419_s23 + $0xd18] sm:$0xf]  ;;  %v10225_v40 = vor.u32 %v13269_v29, %v10224_v9  ;;  %8013 = vmatpush.bf16.msrb.mxu0 %v9969_v51 }
 0x634   : > { %v13333_v50 = vld [vmem:[%s14419_s23 + $0xd34] sm:$0xf0] }
 0x635   : > { %v10736_v26 = vld [vmem:[%s14419_s23 + $0xf18] sm:$0xf]  ;;  %v10481_v45 = vor.u32 %v13333_v50, %v10480_v25  ;;  %8027 = vmatpush.bf16.msrb.mxu1 %v10225_v40 }
 0x636   : > { %v13397_v46 = vld [vmem:[%s14419_s23 + $0xf34] sm:$0xf0] }
 0x637   : > { %v9936_v37 = vld [vmem:[%s14419_s23 + $0x8d8] sm:$0xf]  ;;  %v10737_v36 = vor.u32 %v13397_v46, %v10736_v26  ;;  %8041 = vmatpush.bf16.msrb.mxu2 %v10481_v45 }
 0x638   : > { %v13197_v35 = vld [vmem:[%s14419_s23 + $0x8f4] sm:$0xf0] }
 0x639   : > { %v10192_v54 = vld [vmem:[%s14419_s23 + $0xad8] sm:$0xf]  ;;  %v9937_v30 = vor.u32 %v13197_v35, %v9936_v37  ;;  %8055 = vmatpush.bf16.msrb.mxu3 %v10737_v36 }
 0x63a   : > { %v13261_v1 = vld [vmem:[%s14419_s23 + $0xaf4] sm:$0xf0] }
 0x63b   : > { %v10448_v62 = vld [vmem:[%s14419_s23 + $0xcd8] sm:$0xf]  ;;  %v10193_v43 = vor.u32 %v13261_v1, %v10192_v54  ;;  %8014 = vmatpush.bf16.msrb.mxu0 %v9937_v30 }
 0x63c   : > { %v13325_v20 = vld [vmem:[%s14419_s23 + $0xcf4] sm:$0xf0] }
 0x63d   : > { %v10704_v38 = vld [vmem:[%s14419_s23 + $0xed8] sm:$0xf]  ;;  %v10449_v44 = vor.u32 %v13325_v20, %v10448_v62  ;;  %8028 = vmatpush.bf16.msrb.mxu1 %v10193_v43 }
 0x63e   : > { %v13389_v42 = vld [vmem:[%s14419_s23 + $0xef4] sm:$0xf0] }
 0x63f   : > { %v9904_v14 = vld [vmem:[%s14419_s23 + $0x898] sm:$0xf]  ;;  %v10705_v24 = vor.u32 %v13389_v42, %v10704_v38  ;;  %8042 = vmatpush.bf16.msrb.mxu2 %v10449_v44 }
 0x640   : > { %v13189_v7 = vld [vmem:[%s14419_s23 + $0x8b4] sm:$0xf0] }
 0x641   : > { %v10160_v47 = vld [vmem:[%s14419_s23 + $0xa98] sm:$0xf]  ;;  %v9905_v6 = vor.u32 %v13189_v7, %v9904_v14  ;;  %8056 = vmatpush.bf16.msrb.mxu3 %v10705_v24 }
 0x642   : > { %v13253_v12 = vld [vmem:[%s14419_s23 + $0xab4] sm:$0xf0] }
 0x643   : > { %v10416_v8 = vld [vmem:[%s14419_s23 + $0xc98] sm:$0xf]  ;;  %v10161_v4 = vor.u32 %v13253_v12, %v10160_v47  ;;  %8015 = vmatpush.bf16.msrb.mxu0 %v9905_v6 }
 0x644   : > { %v13317_v10 = vld [vmem:[%s14419_s23 + $0xcb4] sm:$0xf0] }
 0x645   : > { %v10672_v41 = vld [vmem:[%s14419_s23 + $0xe98] sm:$0xf]  ;;  %v10417_v33 = vor.u32 %v13317_v10, %v10416_v8  ;;  %8029 = vmatpush.bf16.msrb.mxu1 %v10161_v4 }
 0x646   : > { %v13381_v2 = vld [vmem:[%s14419_s23 + $0xeb4] sm:$0xf0] }
 0x647   : > { %v9872_v5 = vld [vmem:[%s14419_s23 + $0x858] sm:$0xf]  ;;  %v10673_v39 = vor.u32 %v13381_v2, %v10672_v41  ;;  %8043 = vmatpush.bf16.msrb.mxu2 %v10417_v33 }
 0x648   : > { %v13181_v22 = vld [vmem:[%s14419_s23 + $0x874] sm:$0xf0] }
 0x649   : > { %v10128_v21 = vld [vmem:[%s14419_s23 + $0xa58] sm:$0xf]  ;;  %v9873_v15 = vor.u32 %v13181_v22, %v9872_v5  ;;  %8057 = vmatpush.bf16.msrb.mxu3 %v10673_v39 }
 0x64a   : > { %v13245_v28 = vld [vmem:[%s14419_s23 + $0xa74] sm:$0xf0] }
 0x64b   : > { %v10384_v59 = vld [vmem:[%s14419_s23 + $0xc58] sm:$0xf]  ;;  %v10129_v31 = vor.u32 %v13245_v28, %v10128_v21  ;;  %8016 = vmatpush.bf16.msrb.mxu0 %v9873_v15 }
 0x64c   : > { %v13309_v3 = vld [vmem:[%s14419_s23 + $0xc74] sm:$0xf0] }
 0x64d   : > { %v10640_v13 = vld [vmem:[%s14419_s23 + $0xe58] sm:$0xf]  ;;  %v10385_v16 = vor.u32 %v13309_v3, %v10384_v59  ;;  %8030 = vmatpush.bf16.msrb.mxu1 %v10129_v31 }
 0x64e   : > { %v13373_v17 = vld [vmem:[%s14419_s23 + $0xe74] sm:$0xf0] }
 0x64f   : > { %v9840_v19 = vld [vmem:[%s14419_s23 + $0x818] sm:$0xf]  ;;  %v10641_v25 = vor.u32 %v13373_v17, %v10640_v13  ;;  %8044 = vmatpush.bf16.msrb.mxu2 %v10385_v16 }
 0x650   : > { %v13173_v32 = vld [vmem:[%s14419_s23 + $0x834] sm:$0xf0] }
 0x651   : > { %v10096_v9 = vld [vmem:[%s14419_s23 + $0xa18] sm:$0xf]  ;;  %v9841_v37 = vor.u32 %v13173_v32, %v9840_v19  ;;  %8058 = vmatpush.bf16.msrb.mxu3 %v10641_v25 }
 0x652   : > { %v13237_v23 = vld [vmem:[%s14419_s23 + $0xa34] sm:$0xf0] }
 0x653   : > { %v10352_v29 = vld [vmem:[%s14419_s23 + $0xc18] sm:$0xf]  ;;  %v10097_v1 = vor.u32 %v13237_v23, %v10096_v9  ;;  %8017 = vmatpush.bf16.msrb.mxu0 %v9841_v37 }
 0x654   : > { %v13301_v50 = vld [vmem:[%s14419_s23 + $0xc34] sm:$0xf0] }
 0x655   : > { %v10608_v26 = vld [vmem:[%s14419_s23 + $0xe18] sm:$0xf]  ;;  %v10353_v62 = vor.u32 %v13301_v50, %v10352_v29  ;;  %8031 = vmatpush.bf16.msrb.mxu1 %v10097_v1 }
 0x656   : > { %v13365_v46 = vld [vmem:[%s14419_s23 + $0xe34] sm:$0xf0]  ;;  %8018 = vmatmul.bf16.vlgmr.msrb.gmra.mxu0 %v14602_v56 }
 0x657   : > { %v11088_v51 = vld [vmem:[%s14419_s23 + $0x11d8] sm:$0xf]  ;;  %v10609_v42 = vor.u32 %v13365_v46, %v10608_v26  ;;  %8045 = vmatpush.bf16.msrb.mxu2 %v10353_v62 }
 0x658   : > { %v13485_v40 = vld [vmem:[%s14419_s23 + $0x11f4] sm:$0xf0]  ;;  %8032 = vmatmul.bf16.vlgmr.msrb.gmra.mxu1 %v14609_v61 }
 0x659   : > { %v11344_v45 = vld [vmem:[%s14419_s23 + $0x13d8] sm:$0xf]  ;;  %v11089_v30 = vor.u32 %v13485_v40, %v11088_v51  ;;  %8059 = vmatpush.bf16.msrb.mxu3 %v10609_v42 }
 0x65a   : > { %v13549_v35 = vld [vmem:[%s14419_s23 + $0x13f4] sm:$0xf0]  ;;  %8046 = vmatmul.bf16.vlgmr.msrb.gmra.mxu2 %v14607_v60 }
 0x65b   : > { %v11600_v54 = vld [vmem:[%s14419_s23 + $0x15d8] sm:$0xf]  ;;  %v11345_v43 = vor.u32 %v13549_v35, %v11344_v45  ;;  %8066 = vmatpush.bf16.msra.mxu0 %v11089_v30 }
 0x65c   : > { %v13613_v36 = vld [vmem:[%s14419_s23 + $0x15f4] sm:$0xf0]  ;;  %8060 = vmatmul.bf16.vlgmr.msrb.gmra.mxu3 %v14613_v0 }
 0x65d   : > { %v11856_v20 = vld [vmem:[%s14419_s23 + $0x17d8] sm:$0xf]  ;;  %v11601_v44 = vor.u32 %v13613_v36, %v11600_v54  ;;  %8080 = vmatpush.bf16.msra.mxu1 %v11345_v43  ;;  %v16504_v43 = vpop.f32.mrf.mxu1 }
 0x65e   : > { %v13677_v38 = vld [vmem:[%s14419_s23 + $0x17f4] sm:$0xf0] }
 0x65f   : > { %v11056_v14 = vld [vmem:[%s14419_s23 + $0x1198] sm:$0xf]  ;;  %v11857_v24 = vor.u32 %v13677_v38, %v11856_v20  ;;  %8094 = vmatpush.bf16.msra.mxu2 %v11601_v44  ;;  %v16500_v38 = vpop.f32.mrf.mxu0 }
 0x660   : > { %v13477_v7 = vld [vmem:[%s14419_s23 + $0x11b4] sm:$0xf0] }
 0x661   : > { %v11312_v47 = vld [vmem:[%s14419_s23 + $0x1398] sm:$0xf]  ;;  %v11057_v6 = vor.u32 %v13477_v7, %v11056_v14  ;;  %8108 = vmatpush.bf16.msra.mxu3 %v11857_v24 }
 0x662   : > { %v13541_v12 = vld [vmem:[%s14419_s23 + $0x13b4] sm:$0xf0] }
 0x663   : > { %v11568_v8 = vld [vmem:[%s14419_s23 + $0x1598] sm:$0xf]  ;;  %v11313_v4 = vor.u32 %v13541_v12, %v11312_v47  ;;  %8067 = vmatpush.bf16.msra.mxu0 %v11057_v6 }
 0x664   : > { %v13605_v10 = vld [vmem:[%s14419_s23 + $0x15b4] sm:$0xf0] }
 0x665   : > { %v11824_v41 = vld [vmem:[%s14419_s23 + $0x1798] sm:$0xf]  ;;  %v11569_v33 = vor.u32 %v13605_v10, %v11568_v8  ;;  %8081 = vmatpush.bf16.msra.mxu1 %v11313_v4 }
 0x666   : > { %v13669_v2 = vld [vmem:[%s14419_s23 + $0x17b4] sm:$0xf0] }
 0x667   : > { %v11024_v5 = vld [vmem:[%s14419_s23 + $0x1158] sm:$0xf]  ;;  %v11825_v39 = vor.u32 %v13669_v2, %v11824_v41  ;;  %8095 = vmatpush.bf16.msra.mxu2 %v11569_v33 }
 0x668   : > { %v13469_v22 = vld [vmem:[%s14419_s23 + $0x1174] sm:$0xf0] }
 0x669   : > { %v11280_v21 = vld [vmem:[%s14419_s23 + $0x1358] sm:$0xf]  ;;  %v11025_v15 = vor.u32 %v13469_v22, %v11024_v5  ;;  %8109 = vmatpush.bf16.msra.mxu3 %v11825_v39 }
 0x66a   : > { %v13533_v28 = vld [vmem:[%s14419_s23 + $0x1374] sm:$0xf0] }
 0x66b   : > { %v11536_v59 = vld [vmem:[%s14419_s23 + $0x1558] sm:$0xf]  ;;  %v11281_v19 = vor.u32 %v13533_v28, %v11280_v21  ;;  %8068 = vmatpush.bf16.msra.mxu0 %v11025_v15 }
 0x66c   : > { %v13597_v3 = vld [vmem:[%s14419_s23 + $0x1574] sm:$0xf0] }
 0x66d   : > { %v11792_v13 = vld [vmem:[%s14419_s23 + $0x1758] sm:$0xf]  ;;  %v11537_v32 = vor.u32 %v13597_v3, %v11536_v59  ;;  %8082 = vmatpush.bf16.msra.mxu1 %v11281_v19  ;;  %v16517_v59 = vpop.f32.mrf.mxu2  ;;  %v16522_v19 = vpop.f32.mrf.mxu3 }
 0x66e   : > { %v13661_v17 = vld [vmem:[%s14419_s23 + $0x1774] sm:$0xf0] }
 0x66f   : > { %v10992_v31 = vld [vmem:[%s14419_s23 + $0x1118] sm:$0xf]  ;;  %v11793_v23 = vor.u32 %v13661_v17, %v11792_v13  ;;  %8096 = vmatpush.bf16.msra.mxu2 %v11537_v32 }
 0x670   : > { %v13461_v16 = vld [vmem:[%s14419_s23 + $0x1134] sm:$0xf0] }
 0x671   : > { %v11248_v9 = vld [vmem:[%s14419_s23 + $0x1318] sm:$0xf]  ;;  %v10993_v51 = vor.u32 %v13461_v16, %v10992_v31  ;;  %8110 = vmatpush.bf16.msra.mxu3 %v11793_v23 }
 0x672   : > { %v13525_v29 = vld [vmem:[%s14419_s23 + $0x1334] sm:$0xf0] }
 0x673   : > { %v11504_v25 = vld [vmem:[%s14419_s23 + $0x1518] sm:$0xf]  ;;  %v11249_v40 = vor.u32 %v13525_v29, %v11248_v9  ;;  %8069 = vmatpush.bf16.msra.mxu0 %v10993_v51  ;;  %v16528_v29 = vpop.f32.mrf.mxu0 }
 0x674   : > { %v13589_v50 = vld [vmem:[%s14419_s23 + $0x1534] sm:$0xf0] }
 0x675   : > { %v11760_v26 = vld [vmem:[%s14419_s23 + $0x1718] sm:$0xf]  ;;  %v11505_v45 = vor.u32 %v13589_v50, %v11504_v25  ;;  %8083 = vmatpush.bf16.msra.mxu1 %v11249_v40  ;;  %v16533_v40 = vpop.f32.mrf.mxu1 }
 0x676   : > { %v13653_v46 = vld [vmem:[%s14419_s23 + $0x1734] sm:$0xf0] }
 0x677   : > { %v10960_v37 = vld [vmem:[%s14419_s23 + $0x10d8] sm:$0xf]  ;;  %v11761_v36 = vor.u32 %v13653_v46, %v11760_v26  ;;  %8097 = vmatpush.bf16.msra.mxu2 %v11505_v45 }
 0x678   : > { %v13453_v35 = vld [vmem:[%s14419_s23 + $0x10f4] sm:$0xf0] }
 0x679   : > { %v11216_v54 = vld [vmem:[%s14419_s23 + $0x12d8] sm:$0xf]  ;;  %v10961_v44 = vor.u32 %v13453_v35, %v10960_v37  ;;  %8111 = vmatpush.bf16.msra.mxu3 %v11761_v36 }
 0x67a   : > { %v13517_v1 = vld [vmem:[%s14419_s23 + $0x12f4] sm:$0xf0] }
 0x67b   : > { %v11472_v62 = vld [vmem:[%s14419_s23 + $0x14d8] sm:$0xf]  ;;  %v11217_v14 = vor.u32 %v13517_v1, %v11216_v54  ;;  %8070 = vmatpush.bf16.msra.mxu0 %v10961_v44 }
 0x67c   : > { %v13581_v20 = vld [vmem:[%s14419_s23 + $0x14f4] sm:$0xf0] }
 0x67d   : > { %v11728_v42 = vld [vmem:[%s14419_s23 + $0x16d8] sm:$0xf]  ;;  %v11473_v7 = vor.u32 %v13581_v20, %v11472_v62  ;;  %8084 = vmatpush.bf16.msra.mxu1 %v11217_v14 }
 0x67e   : > { %v13645_v30 = vld [vmem:[%s14419_s23 + $0x16f4] sm:$0xf0] }
 0x67f   : > { %v10928_v47 = vld [vmem:[%s14419_s23 + $0x1098] sm:$0xf]  ;;  %v11729_v8 = vor.u32 %v13645_v30, %v11728_v42  ;;  %8098 = vmatpush.bf16.msra.mxu2 %v11473_v7 }
 0x680   : > { %v13445_v24 = vld [vmem:[%s14419_s23 + $0x10b4] sm:$0xf0] }
 0x681   : > { %v11184_v12 = vld [vmem:[%s14419_s23 + $0x1298] sm:$0xf]  ;;  %v10929_v33 = vor.u32 %v13445_v24, %v10928_v47  ;;  %8112 = vmatpush.bf16.msra.mxu3 %v11729_v8 }
 0x682   : > { %v13509_v10 = vld [vmem:[%s14419_s23 + $0x12b4] sm:$0xf0] }
 0x683   : > { %v11440_v41 = vld [vmem:[%s14419_s23 + $0x1498] sm:$0xf]  ;;  %v11185_v5 = vor.u32 %v13509_v10, %v11184_v12  ;;  %8071 = vmatpush.bf16.msra.mxu0 %v10929_v33  ;;  %v16549_v33 = vpop.f32.mrf.mxu2 }
 0x684   : > { %v13573_v2 = vld [vmem:[%s14419_s23 + $0x14b4] sm:$0xf0] }
 0x685   : > { %v11696_v6 = vld [vmem:[%s14419_s23 + $0x1698] sm:$0xf]  ;;  %v11441_v22 = vor.u32 %v13573_v2, %v11440_v41  ;;  %8085 = vmatpush.bf16.msra.mxu1 %v11185_v5 }
 0x686   : > { %v13637_v4 = vld [vmem:[%s14419_s23 + $0x16b4] sm:$0xf0] }
 0x687   : > { %v10896_v21 = vld [vmem:[%s14419_s23 + $0x1058] sm:$0xf]  ;;  %v11697_v3 = vor.u32 %v13637_v4, %v11696_v6  ;;  %8099 = vmatpush.bf16.msra.mxu2 %v11441_v22 }
 0x688   : > { %v13437_v39 = vld [vmem:[%s14419_s23 + $0x1074] sm:$0xf0] }
 0x689   : > { %v11152_v28 = vld [vmem:[%s14419_s23 + $0x1258] sm:$0xf]  ;;  %v10897_v16 = vor.u32 %v13437_v39, %v10896_v21  ;;  %8113 = vmatpush.bf16.msra.mxu3 %v11697_v3 }
 0x68a   : > { %v13501_v13 = vld [vmem:[%s14419_s23 + $0x1274] sm:$0xf0] }
 0x68b   : > { %v11408_v17 = vld [vmem:[%s14419_s23 + $0x1458] sm:$0xf]  ;;  %v11153_v25 = vor.u32 %v13501_v13, %v11152_v28  ;;  %8072 = vmatpush.bf16.msra.mxu0 %v10897_v16  ;;  %v16554_v28 = vpop.f32.mrf.mxu3 }
 0x68c   : > { %v13565_v15 = vld [vmem:[%s14419_s23 + $0x1474] sm:$0xf0] }
 0x68d   : > { %v11664_v32 = vld [vmem:[%s14419_s23 + $0x1658] sm:$0xf]  ;;  %v11409_v50 = vor.u32 %v13565_v15, %v11408_v17  ;;  %8086 = vmatpush.bf16.msra.mxu1 %v11153_v25  ;;  %v7754_v15 = vadd.f32 %v16504_v43, %v16500_v38 }
 0x68e   : > { %v13629_v31 = vld [vmem:[%s14419_s23 + $0x1674] sm:$0xf0] }
 0x68f   : > { %v10864_v9 = vld [vmem:[%s14419_s23 + $0x1018] sm:$0xf]  ;;  %v11665_v45 = vor.u32 %v13629_v31, %v11664_v32  ;;  %8100 = vmatpush.bf16.msra.mxu2 %v11409_v50  ;;  %v7795_v32 = vpop.f32.mrf.mxu0  ;;  %v16563_v50 = vpop.f32.mrf.mxu1 }
 0x690   : > { %v13429_v23 = vld [vmem:[%s14419_s23 + $0x1034] sm:$0xf0] }
 0x691   : > { %v11120_v26 = vld [vmem:[%s14419_s23 + $0x1218] sm:$0xf]  ;;  %v10865_v20 = vor.u32 %v13429_v23, %v10864_v9  ;;  %8114 = vmatpush.bf16.msra.mxu3 %v11665_v45 }
 0x692   : > { %v13493_v46 = vld [vmem:[%s14419_s23 + $0x1234] sm:$0xf0] }
 0x693   : > { %v11376_v51 = vld [vmem:[%s14419_s23 + $0x1418] sm:$0xf]  ;;  %v11121_v14 = vor.u32 %v13493_v46, %v11120_v26  ;;  %8073 = vmatpush.bf16.msra.mxu0 %v10865_v20 }
 0x694   : > { %v13557_v37 = vld [vmem:[%s14419_s23 + $0x1434] sm:$0xf0] }
 0x695   : > { %v11632_v35 = vld [vmem:[%s14419_s23 + $0x1618] sm:$0xf]  ;;  %v11377_v7 = vor.u32 %v13557_v37, %v11376_v51  ;;  %8087 = vmatpush.bf16.msra.mxu1 %v11121_v14 }
 0x696   : > { %v13621_v54 = vld [vmem:[%s14419_s23 + $0x1634] sm:$0xf0]  ;;  %8074 = vmatmul.bf16.vlgmr.msra.gmra.mxu0 %v14686_v48 }
 0x697   : > { %v12112_v36 = vld [vmem:[%s14419_s23 + $0x19d8] sm:$0xf]  ;;  %v11633_v12 = vor.u32 %v13621_v54, %v11632_v35  ;;  %8101 = vmatpush.bf16.msra.mxu2 %v11377_v7  ;;  %v7768_v35 = vadd.f32 %v16517_v59, %v7754_v15  ;;  %v16583_v59 = vpop.f32.mrf.mxu2  ;;  %v16598_v15 = vpop.f32.mrf.mxu1 }
 0x698   : > { %v13741_v1 = vld [vmem:[%s14419_s23 + $0x19f4] sm:$0xf0]  ;;  %8088 = vmatmul.bf16.vlgmr.msra.gmra.mxu1 %v14693_v53 }
 0x699   : > { %v12368_v62 = vld [vmem:[%s14419_s23 + $0x1bd8] sm:$0xf]  ;;  %v12113_v8 = vor.u32 %v13741_v1, %v12112_v36  ;;  %8115 = vmatpush.bf16.msra.mxu3 %v11633_v12  ;;  %v7782_v12 = vadd.f32 %v16522_v19, %v7768_v35 }
 0x69a   : > { %v13805_v42 = vld [vmem:[%s14419_s23 + $0x1bf4] sm:$0xf0]  ;;  %8102 = vmatmul.bf16.vlgmr.msra.gmra.mxu2 %v14691_v52 }
 0x69b   : > { %v12624_v30 = vld [vmem:[%s14419_s23 + $0x1dd8] sm:$0xf]  ;;  %v12369_v10 = vor.u32 %v13805_v42, %v12368_v62  ;;  %8122 = vmatpush.bf16.msrb.mxu0 %v12113_v8  ;;  %v16586_v8 = vpop.f32.mrf.mxu3 }
 0x69c   : > { %v13869_v44 = vld [vmem:[%s14419_s23 + $0x1df4] sm:$0xf0]  ;;  %8116 = vmatmul.bf16.vlgmr.msra.gmra.mxu3 %v14697_v57 }
 0x69d   : > { %v12880_v47 = vld [vmem:[%s14419_s23 + $0x1fd8] sm:$0xf]  ;;  %v12625_v41 = vor.u32 %v13869_v44, %v12624_v30  ;;  %8136 = vmatpush.bf16.msrb.mxu1 %v12369_v10 }
 0x69e   : > { %v13933_v24 = vld [vmem:[%s14419_s23 + $0x1ff4] sm:$0xf0] }
 0x69f   : > { %v12080_v2 = vld [vmem:[%s14419_s23 + $0x1998] sm:$0xf]  ;;  %v12881_v5 = vor.u32 %v13933_v24, %v12880_v47  ;;  %8150 = vmatpush.bf16.msrb.mxu2 %v12625_v41 }
 0x6a0   : > { %v13733_v6 = vld [vmem:[%s14419_s23 + $0x19b4] sm:$0xf0] }
 0x6a1   : > { %v12336_v4 = vld [vmem:[%s14419_s23 + $0x1b98] sm:$0xf]  ;;  %v12081_v17 = vor.u32 %v13733_v6, %v12080_v2  ;;  %8164 = vmatpush.bf16.msrb.mxu3 %v12881_v5 }
 0x6a2   : > { %v13797_v22 = vld [vmem:[%s14419_s23 + $0x1bb4] sm:$0xf0] }
 0x6a3   : > { %v12592_v21 = vld [vmem:[%s14419_s23 + $0x1d98] sm:$0xf]  ;;  %v12337_v31 = vor.u32 %v13797_v22, %v12336_v4  ;;  %8123 = vmatpush.bf16.msrb.mxu0 %v12081_v17  ;;  %v7756_v17 = vadd.f32 %v16533_v40, %v16528_v29 }
 0x6a4   : > { %v13861_v39 = vld [vmem:[%s14419_s23 + $0x1db4] sm:$0xf0] }
 0x6a5   : > { %v12848_v3 = vld [vmem:[%s14419_s23 + $0x1f98] sm:$0xf]  ;;  %v12593_v16 = vor.u32 %v13861_v39, %v12592_v21  ;;  %8137 = vmatpush.bf16.msrb.mxu1 %v12337_v31 }
 0x6a6   : > { %v13925_v13 = vld [vmem:[%s14419_s23 + $0x1fb4] sm:$0xf0] }
 0x6a7   : > { %v12048_v9 = vld [vmem:[%s14419_s23 + $0x1958] sm:$0xf]  ;;  %v12849_v26 = vor.u32 %v13925_v13, %v12848_v3  ;;  %8151 = vmatpush.bf16.msrb.mxu2 %v12593_v16  ;;  %v7797_v3 = vpop.f32.mrf.mxu0  ;;  %v7796_v16 = vadd.f32 %v7795_v32, %v7782_v12  ;;  %v7770_v32 = vadd.f32 %v16549_v33, %v7756_v17 }
 0x6a8   : > { %v13725_v23 = vld [vmem:[%s14419_s23 + $0x1974] sm:$0xf0] }
 0x6a9   : > { %v12304_v25 = vld [vmem:[%s14419_s23 + $0x1b58] sm:$0xf]  ;;  %v12049_v37 = vor.u32 %v13725_v23, %v12048_v9  ;;  %8165 = vmatpush.bf16.msrb.mxu3 %v12849_v26  ;;  %v7810_v35 = vadd.f32 %v16563_v50, %v7796_v16  ;;  %v7784_v12 = vadd.f32 %v16554_v28, %v7770_v32 }
 0x6aa   : > { %v13789_v46 = vld [vmem:[%s14419_s23 + $0x1b74] sm:$0xf0] }
 0x6ab   : > { %v12560_v38 = vld [vmem:[%s14419_s23 + $0x1d58] sm:$0xf]  ;;  %v12305_v54 = vor.u32 %v13789_v46, %v12304_v25  ;;  %8124 = vmatpush.bf16.msrb.mxu0 %v12049_v37  ;;  %v7798_v16 = vadd.f32 %v7797_v3, %v7784_v12  ;;  %v9810_v3 = vld [vmem:[%s14419_s23 + $0x7f8] sm:$0xf0] }
 0x6ac   : > { %v13853_v43 = vld [vmem:[%s14419_s23 + $0x1d74] sm:$0xf0] }
 0x6ad   : > { %v12816_v51 = vld [vmem:[%s14419_s23 + $0x1f58] sm:$0xf]  ;;  %v12561_v36 = vor.u32 %v13853_v43, %v12560_v38  ;;  %8138 = vmatpush.bf16.msrb.mxu1 %v12305_v54 }
 0x6ae   : > { %v13917_v45 = vld [vmem:[%s14419_s23 + $0x1f74] sm:$0xf0] }
 0x6af   : > { %v12016_v1 = vld [vmem:[%s14419_s23 + $0x1918] sm:$0xf]  ;;  %v12817_v42 = vor.u32 %v13917_v45, %v12816_v51  ;;  %8152 = vmatpush.bf16.msrb.mxu2 %v12561_v36  ;;  %v7851_v50 = vpop.f32.mrf.mxu0 }
 0x6b0   : > { %v13717_v62 = vld [vmem:[%s14419_s23 + $0x1934] sm:$0xf0] }
 0x6b1   : > { %v12272_v20 = vld [vmem:[%s14419_s23 + $0x1b18] sm:$0xf]  ;;  %v12017_v24 = vor.u32 %v13717_v62, %v12016_v1  ;;  %8166 = vmatpush.bf16.msrb.mxu3 %v12817_v42  ;;  %v7825_v42 = vpop.f32.mrf.mxu2 }
 0x6b2   : > { %v13781_v30 = vld [vmem:[%s14419_s23 + $0x1b34] sm:$0xf0] }
 0x6b3   : > { %v12528_v44 = vld [vmem:[%s14419_s23 + $0x1d18] sm:$0xf]  ;;  %v12273_v10 = vor.u32 %v13781_v30, %v12272_v20  ;;  %8125 = vmatpush.bf16.msrb.mxu0 %v12017_v24 }
 0x6b4   : > { %v13845_v14 = vld [vmem:[%s14419_s23 + $0x1d34] sm:$0xf0] }
 0x6b5   : > { %v12784_v7 = vld [vmem:[%s14419_s23 + $0x1f18] sm:$0xf]  ;;  %v12529_v41 = vor.u32 %v13845_v14, %v12528_v44  ;;  %8139 = vmatpush.bf16.msrb.mxu1 %v12273_v10  ;;  %v7865_v10 = vpop.f32.mrf.mxu1 }
 0x6b6   : > { %v13909_v47 = vld [vmem:[%s14419_s23 + $0x1f34] sm:$0xf0] }
 0x6b7   : > { %v11984_v2 = vld [vmem:[%s14419_s23 + $0x18d8] sm:$0xf]  ;;  %v12785_v5 = vor.u32 %v13909_v47, %v12784_v7  ;;  %8153 = vmatpush.bf16.msrb.mxu2 %v12529_v41  ;;  %v16616_v7 = vpop.f32.mrf.mxu3  ;;  %v7853_v12 = vpop.f32.mrf.mxu0 }
 0x6b8   : > { %v13709_v6 = vld [vmem:[%s14419_s23 + $0x18f4] sm:$0xf0] }
 0x6b9   : > { %v12240_v4 = vld [vmem:[%s14419_s23 + $0x1ad8] sm:$0xf]  ;;  %v11985_v31 = vor.u32 %v13709_v6, %v11984_v2  ;;  %8167 = vmatpush.bf16.msrb.mxu3 %v12785_v5 }
 0x6ba   : > { %v13773_v22 = vld [vmem:[%s14419_s23 + $0x1af4] sm:$0xf0] }
 0x6bb   : > { %v12496_v21 = vld [vmem:[%s14419_s23 + $0x1cd8] sm:$0xf]  ;;  %v12241_v9 = vor.u32 %v13773_v22, %v12240_v4  ;;  %8126 = vmatpush.bf16.msrb.mxu0 %v11985_v31  ;;  %v7824_v4 = vadd.f32 %v16583_v59, %v7810_v35  ;;  %v12969_v59 = vld [vmem:[%s14419_s23 + $0x1dc] sm:$0xf]  ;;  %v7812_v35 = vadd.f32 %v16598_v15, %v7798_v16 }
 0x6bc   : > { %v13837_v39 = vld [vmem:[%s14419_s23 + $0x1cf4] sm:$0xf0]  ;;  %v13153_v15 = vld [vmem:[%s14419_s23 + $0x79c] sm:$0xf] }
 0x6bd   : > { %v12752_v19 = vld [vmem:[%s14419_s23 + $0x1ed8] sm:$0xf]  ;;  %v12497_v23 = vor.u32 %v13837_v39, %v12496_v21  ;;  %8140 = vmatpush.bf16.msrb.mxu1 %v12241_v9  ;;  %v9042_v9 = vld [vmem:[%s14419_s23 + $0x1f8] sm:$0xf0] }
 0x6be   : > { %v13901_v13 = vld [vmem:[%s14419_s23 + $0x1ef4] sm:$0xf0]  ;;  %v9746_v16 = vld [vmem:[%s14419_s23 + $0x778] sm:$0xf0] }
 0x6bf   : > { %v11952_v25 = vld [vmem:[%s14419_s23 + $0x1898] sm:$0xf]  ;;  %v12753_v38 = vor.u32 %v13901_v13, %v12752_v19  ;;  %8154 = vmatpush.bf16.msrb.mxu2 %v12497_v23  ;;  %v13033_v23 = vld [vmem:[%s14419_s23 + $0x3dc] sm:$0xf] }
 0x6c0   : > { %v13701_v26 = vld [vmem:[%s14419_s23 + $0x18b4] sm:$0xf0] }
 0x6c1   : > { %v12208_v46 = vld [vmem:[%s14419_s23 + $0x1a98] sm:$0xf]  ;;  %v11953_v37 = vor.u32 %v13701_v26, %v11952_v25  ;;  %8168 = vmatpush.bf16.msrb.mxu3 %v12753_v38  ;;  %v9298_v26 = vld [vmem:[%s14419_s23 + $0x3f8] sm:$0xf0] }
 0x6c2   : > { %v13765_v29 = vld [vmem:[%s14419_s23 + $0x1ab4] sm:$0xf0]  ;;  %v9554_v38 = vld [vmem:[%s14419_s23 + $0x5f8] sm:$0xf0] }
 0x6c3   : > { %v12464_v40 = vld [vmem:[%s14419_s23 + $0x1c98] sm:$0xf]  ;;  %v12209_v54 = vor.u32 %v13765_v29, %v12208_v46  ;;  %8127 = vmatpush.bf16.msrb.mxu0 %v11953_v37  ;;  %v13097_v46 = vld [vmem:[%s14419_s23 + $0x5dc] sm:$0xf]  ;;  %v7838_v29 = vadd.f32 %v16586_v8, %v7824_v4  ;;  %v9045_v37 = vor.u32 %v12969_v59, %v9042_v9  ;;  %v7893_v8 = vpop.f32.mrf.mxu3 }
 0x6c4   : > { %v13829_v43 = vld [vmem:[%s14419_s23 + $0x1cb4] sm:$0xf0]  ;;  %v12945_v9 = vld [vmem:[%s14419_s23 + $0x11c] sm:$0xf] }
 0x6c5   : > { %v12720_v51 = vld [vmem:[%s14419_s23 + $0x1e98] sm:$0xf]  ;;  %v12465_v36 = vor.u32 %v13829_v43, %v12464_v40  ;;  %8141 = vmatpush.bf16.msrb.mxu1 %v12209_v54  ;;  %v7852_v54 = vadd.f32 %v7851_v50, %v7838_v29  ;;  %v9778_v50 = vld [vmem:[%s14419_s23 + $0x7b8] sm:$0xf0] }
 0x6c6   : > { %v13893_v45 = vld [vmem:[%s14419_s23 + $0x1eb4] sm:$0xf0] }
 0x6c7   : > { %v11920_v1 = vld [vmem:[%s14419_s23 + $0x1858] sm:$0xf]  ;;  %v12721_v30 = vor.u32 %v13893_v45, %v12720_v51  ;;  %8155 = vmatpush.bf16.msrb.mxu2 %v12465_v36  ;;  %v13161_v51 = vld [vmem:[%s14419_s23 + $0x7dc] sm:$0xf]  ;;  %v7879_v45 = vpop.f32.mrf.mxu2  ;;  %v9301_v36 = vor.u32 %v13033_v23, %v9298_v26 }
 0x6c8   : > { %v13693_v62 = vld [vmem:[%s14419_s23 + $0x1874] sm:$0xf0]  ;;  %v8946_v26 = vld [vmem:[%s14419_s23 + $0x138] sm:$0xf0] }
 0x6c9   : > { %v12176_v20 = vld [vmem:[%s14419_s23 + $0x1a58] sm:$0xf]  ;;  %v11921_v41 = vor.u32 %v13693_v62, %v11920_v1  ;;  %8169 = vmatpush.bf16.msrb.mxu3 %v12721_v30  ;;  %v9557_v1 = vor.u32 %v13097_v46, %v9554_v38  ;;  %v12961_v62 = vld [vmem:[%s14419_s23 + $0x19c] sm:$0xf] }
 0x6ca   : > { %v13757_v33 = vld [vmem:[%s14419_s23 + $0x1a74] sm:$0xf0]  ;;  %v13025_v30 = vld [vmem:[%s14419_s23 + $0x39c] sm:$0xf] }
 0x6cb   : > { %v12432_v44 = vld [vmem:[%s14419_s23 + $0x1c58] sm:$0xf]  ;;  %v12177_v5 = vor.u32 %v13757_v33, %v12176_v20  ;;  %8128 = vmatpush.bf16.msrb.mxu0 %v11921_v41  ;;  %v9010_v20 = vld [vmem:[%s14419_s23 + $0x1b8] sm:$0xf0]  ;;  %v9813_v33 = vor.u32 %v13161_v51, %v9810_v3  ;;  %v7867_v41 = vpop.f32.mrf.mxu1 }
 0x6cc   : > { %v13821_v14 = vld [vmem:[%s14419_s23 + $0x1c74] sm:$0xf0]  ;;  %v13009_v46 = vld [vmem:[%s14419_s23 + $0x31c] sm:$0xf] }
 0x6cd   : > { %v12688_v47 = vld [vmem:[%s14419_s23 + $0x1e58] sm:$0xf]  ;;  %v12433_v22 = vor.u32 %v13821_v14, %v12432_v44  ;;  %8142 = vmatpush.bf16.msrb.mxu1 %v12177_v5  ;;  %v9266_v44 = vld [vmem:[%s14419_s23 + $0x3b8] sm:$0xf0] }
 0x6ce   : > { %v13885_v24 = vld [vmem:[%s14419_s23 + $0x1e74] sm:$0xf0]  ;;  %v13089_v14 = vld [vmem:[%s14419_s23 + $0x59c] sm:$0xf]  ;;  %v9269_v4 = vor.u32 %v13025_v30, %v9266_v44 }
 0x6cf   : > { %v11888_v2 = vld [vmem:[%s14419_s23 + $0x1818] sm:$0xf]  ;;  %v12689_v19 = vor.u32 %v13885_v24, %v12688_v47  ;;  %8156 = vmatpush.bf16.msrb.mxu2 %v12433_v22  ;;  %v9522_v47 = vld [vmem:[%s14419_s23 + $0x5b8] sm:$0xf0]  ;;  %v7826_v24 = vadd.f32 %v7825_v42, %v7812_v35  ;;  %v7881_v29 = vpop.f32.mrf.mxu2 }
 0x6d0   : > { %v13685_v6 = vld [vmem:[%s14419_s23 + $0x1834] sm:$0xf0]  ;;  %v9525_v42 = vor.u32 %v13089_v14, %v9522_v47  ;;  %v12953_v5 = vld [vmem:[%s14419_s23 + $0x15c] sm:$0xf] }
 0x6d1   : > { %v12144_v28 = vld [vmem:[%s14419_s23 + $0x1a18] sm:$0xf]  ;;  %v11889_v25 = vor.u32 %v13685_v6, %v11888_v2  ;;  %8170 = vmatpush.bf16.msrb.mxu3 %v12689_v19  ;;  %v9013_v2 = vor.u32 %v12961_v62, %v9010_v20  ;;  %v7866_v6 = vadd.f32 %v7865_v10, %v7852_v54  ;;  %v8978_v22 = vld [vmem:[%s14419_s23 + $0x178] sm:$0xf0]  ;;  %v7840_v10 = vadd.f32 %v16616_v7, %v7826_v24 }
 0x6d2   : > { %v13749_v21 = vld [vmem:[%s14419_s23 + $0x1a34] sm:$0xf0]  ;;  %v13081_v19 = vld [vmem:[%s14419_s23 + $0x55c] sm:$0xf]  ;;  %v8981_v59 = vor.u32 %v12953_v5, %v8978_v22  ;;  %v8949_v54 = vor.u32 %v12945_v9, %v8946_v26 }
 0x6d3   : > { %v12400_v39 = vld [vmem:[%s14419_s23 + $0x1c18] sm:$0xf]  ;;  %v12145_v40 = vor.u32 %v13749_v21, %v12144_v28  ;;  %8129 = vmatpush.bf16.msrb.mxu0 %v11889_v25  ;;  %v13017_v28 = vld [vmem:[%s14419_s23 + $0x35c] sm:$0xf]  ;;  %v9781_v21 = vor.u32 %v13153_v15, %v9778_v50  ;;  %v7854_v23 = vadd.f32 %v7853_v12, %v7840_v10 }
 0x6d4   : > { %v13813_v13 = vld [vmem:[%s14419_s23 + $0x1c34] sm:$0xf0]  ;;  %v9202_v38 = vld [vmem:[%s14419_s23 + $0x338] sm:$0xf0] }
 0x6d5   : > { %v12656_v17 = vld [vmem:[%s14419_s23 + $0x1e18] sm:$0xf]  ;;  %v12401_v43 = vor.u32 %v13813_v13, %v12400_v39  ;;  %8143 = vmatpush.bf16.msrb.mxu1 %v12145_v40  ;;  %v9234_v39 = vld [vmem:[%s14419_s23 + $0x378] sm:$0xf0]  ;;  %v7868_v62 = vadd.f32 %v7867_v41, %v7854_v23 }
 0x6d6   : > { %v13877_v31 = vld [vmem:[%s14419_s23 + $0x1e34] sm:$0xf0]  ;;  %8130 = vmatmul.bf16.vlgmr.msrb.gmra.mxu0 %v14770_v49  ;;  %v9490_v13 = vld [vmem:[%s14419_s23 + $0x578] sm:$0xf0]  ;;  %v9237_v7 = vor.u32 %v13017_v28, %v9234_v39 }
 0x6d7   : > { %v12657_v32 = vor.u32 %v13877_v31, %v12656_v17  ;;  %8157 = vmatpush.bf16.msrb.mxu2 %v12401_v43  ;;  %8178 = vmatpush.bf16.msra.mxu0 %v9045_v37  ;;  %v7880_v17 = vadd.f32 %v7879_v45, %v7866_v6  ;;  %v13145_v31 = vld [vmem:[%s14419_s23 + $0x75c] sm:$0xf]  ;;  %v9493_v25 = vor.u32 %v13081_v19, %v9490_v13  ;;  %v7895_v45 = vpop.f32.mrf.mxu3  ;;  %v7935_v19 = vpop.f32.mrf.mxu2 }
 0x6d8   : > { %8144 = vmatmul.bf16.vlgmr.msrb.gmra.mxu1 %v14777_v58  ;;  %v9749_v40 = vor.u32 %v13145_v31, %v9746_v16  ;;  %v13073_v43 = vld [vmem:[%s14419_s23 + $0x51c] sm:$0xf]  ;;  %v7882_v15 = vadd.f32 %v7881_v29, %v7868_v62 }
 0x6d9   : > { %8171 = vmatpush.bf16.msrb.mxu3 %v12657_v32  ;;  %8192 = vmatpush.bf16.msra.mxu1 %v9301_v36  ;;  %v9458_v51 = vld [vmem:[%s14419_s23 + $0x538] sm:$0xf0]  ;;  %v7894_v3 = vadd.f32 %v7893_v8, %v7880_v17  ;;  %v7907_v32 = vpop.f32.mrf.mxu0  ;;  %v9205_v36 = vor.u32 %v13009_v46, %v9202_v38 }
 0x6da   : > { %8158 = vmatmul.bf16.vlgmr.msrb.gmra.mxu2 %v14775_v55  ;;  %v13137_v37 = vld [vmem:[%s14419_s23 + $0x71c] sm:$0xf]  ;;  %v9461_v8 = vor.u32 %v13073_v43, %v9458_v51  ;;  %v7896_v17 = vadd.f32 %v7895_v45, %v7882_v15 }
 0x6db   : > { %8206 = vmatpush.bf16.msra.mxu2 %v9557_v1  ;;  %8179 = vmatpush.bf16.msra.mxu0 %v9013_v2  ;;  %v9714_v35 = vld [vmem:[%s14419_s23 + $0x738] sm:$0xf0]  ;;  %v7921_v1 = vpop.f32.mrf.mxu1  ;;  %v7908_v20 = vadd.f32 %v7907_v32, %v7894_v3 }
 0x6dc   : > { %8172 = vmatmul.bf16.vlgmr.msrb.gmra.mxu3 %v14781_v63  ;;  %v12937_v30 = vld [vmem:[%s14419_s23 + $0xdc] sm:$0xf]  ;;  %v9717_v14 = vor.u32 %v13137_v37, %v9714_v35 }
 0x6dd   : > { %8220 = vmatpush.bf16.msra.mxu3 %v9813_v33  ;;  %8193 = vmatpush.bf16.msra.mxu1 %v9269_v4  ;;  %v8914_v33 = vld [vmem:[%s14419_s23 + $0xf8] sm:$0xf0]  ;;  %v7922_v4 = vadd.f32 %v7921_v1, %v7908_v20 }
 0x6de   : > { %v13001_v44 = vld [vmem:[%s14419_s23 + $0x2dc] sm:$0xf]  ;;  %v8917_v2 = vor.u32 %v12937_v30, %v8914_v33 }
 0x6df   : > { %8207 = vmatpush.bf16.msra.mxu2 %v9525_v42  ;;  %8180 = vmatpush.bf16.msra.mxu0 %v8981_v59  ;;  %v9170_v47 = vld [vmem:[%s14419_s23 + $0x2f8] sm:$0xf0]  ;;  %v7936_v31 = vadd.f32 %v7935_v19, %v7922_v4  ;;  %v7949_v59 = vpop.f32.mrf.mxu3  ;;  %v7937_v15 = vpop.f32.mrf.mxu2 }
 0x6e0   : > { %v13065_v24 = vld [vmem:[%s14419_s23 + $0x4dc] sm:$0xf]  ;;  %v9173_v42 = vor.u32 %v13001_v44, %v9170_v47 }
 0x6e1   : > { %8221 = vmatpush.bf16.msra.mxu3 %v9781_v21  ;;  %8194 = vmatpush.bf16.msra.mxu1 %v9237_v7  ;;  %v9426_v12 = vld [vmem:[%s14419_s23 + $0x4f8] sm:$0xf0]  ;;  %v7909_v16 = vpop.f32.mrf.mxu0  ;;  %v359_v7 = vld [vmem:[#allocation2 + $0x68] sm:$0xff]  ;;  %v7950_v38 = vadd.f32 %v7949_v59, %v7936_v31 }
 0x6e2   : > { %v13129_v50 = vld [vmem:[%s14419_s23 + $0x6dc] sm:$0xf]  ;;  %v9429_v5 = vor.u32 %v13065_v24, %v9426_v12  ;;  %v7910_v46 = vadd.f32 %v7909_v16, %v7896_v17 }
 0x6e3   : > { %8208 = vmatpush.bf16.msra.mxu2 %v9493_v25  ;;  %v9682_v41 = vld [vmem:[%s14419_s23 + $0x6f8] sm:$0xf0]  ;;  %8181 = vmatpush.bf16.msra.mxu0 %v8949_v54  ;;  %v7923_v45 = vpop.f32.mrf.mxu1  ;;  %v8407_v54 = vadd.f32 %v7950_v38, %v359_v7 }
 0x6e4   : > { %v12929_v6 = vld [vmem:[%s14419_s23 + $0x9c] sm:$0xf]  ;;  %v9685_v39 = vor.u32 %v13129_v50, %v9682_v41  ;;  %v7924_v33 = vadd.f32 %v7923_v45, %v7910_v46  ;;  %v367_v50 = vld [vmem:[#allocation2 + $0x70] sm:$0xff] }
 0x6e5   : > { %8222 = vmatpush.bf16.msra.mxu3 %v9749_v40  ;;  %8195 = vmatpush.bf16.msra.mxu1 %v9205_v36  ;;  %v8882_v22 = vld [vmem:[%s14419_s23 + $0xb8] sm:$0xf0]  ;;  %8423 = vst [vmem:[#allocation2 + $0x68] sm:$0xff] %v8407_v54 }
 0x6e6   : > { %v12993_v28 = vld [vmem:[%s14419_s23 + $0x29c] sm:$0xf]  ;;  %v8885_v25 = vor.u32 %v12929_v6, %v8882_v22  ;;  %v7938_v4 = vadd.f32 %v7937_v15, %v7924_v33 }
 0x6e7   : > { %8209 = vmatpush.bf16.msra.mxu2 %v9461_v8  ;;  %v9138_v21 = vld [vmem:[%s14419_s23 + $0x2b8] sm:$0xf0]  ;;  %8182 = vmatpush.bf16.msra.mxu0 %v8917_v2 }
 0x6e8   : > { %v13057_v13 = vld [vmem:[%s14419_s23 + $0x49c] sm:$0xf]  ;;  %v9141_v26 = vor.u32 %v12993_v28, %v9138_v21 }
 0x6e9   : > { %8223 = vmatpush.bf16.msra.mxu3 %v9717_v14  ;;  %v9394_v10 = vld [vmem:[%s14419_s23 + $0x4b8] sm:$0xf0]  ;;  %8196 = vmatpush.bf16.msra.mxu1 %v9173_v42  ;;  %v7951_v42 = vpop.f32.mrf.mxu3 }
 0x6ea   : > { %v13121_v9 = vld [vmem:[%s14419_s23 + $0x69c] sm:$0xf]  ;;  %v9397_v29 = vor.u32 %v13057_v13, %v9394_v10  ;;  %v7952_v10 = vadd.f32 %v7951_v42, %v7938_v4 }
 0x6eb   : > { %v9650_v23 = vld [vmem:[%s14419_s23 + $0x6b8] sm:$0xf0]  ;;  %8210 = vmatpush.bf16.msra.mxu2 %v9429_v5  ;;  %8183 = vmatpush.bf16.msra.mxu0 %v8885_v25 }
 0x6ec   : > { %v12921_v40 = vld [vmem:[%s14419_s23 + $0x5c] sm:$0xf]  ;;  %v9653_v3 = vor.u32 %v13121_v9, %v9650_v23  ;;  %v8415_v7 = vadd.f32 %v7952_v10, %v367_v50 }
 0x6ed   : > { %v8850_v43 = vld [vmem:[%s14419_s23 + $0x78] sm:$0xf0]  ;;  %8224 = vmatpush.bf16.msra.mxu3 %v9685_v39  ;;  %8197 = vmatpush.bf16.msra.mxu1 %v9141_v26 }
 0x6ee   : > { %v12985_v51 = vld [vmem:[%s14419_s23 + $0x25c] sm:$0xf]  ;;  %v8853_v62 = vor.u32 %v12921_v40, %v8850_v43  ;;  %8431 = vst [vmem:[#allocation2 + $0x70] sm:$0xff] %v8415_v7 }
 0x6ef   : > { %v9106_v32 = vld [vmem:[%s14419_s23 + $0x278] sm:$0xf0]  ;;  %8211 = vmatpush.bf16.msra.mxu2 %v9397_v29 }
 0x6f0   : > { %v13049_v37 = vld [vmem:[%s14419_s23 + $0x45c] sm:$0xf]  ;;  %v9109_v44 = vor.u32 %v12985_v51, %v9106_v32  ;;  %8184 = vmatpush.bf16.msra.mxu0 %v8853_v62 }
 0x6f1   : > { %v9362_v35 = vld [vmem:[%s14419_s23 + $0x478] sm:$0xf0]  ;;  %8225 = vmatpush.bf16.msra.mxu3 %v9653_v3 }
 0x6f2   : > { %v13113_v36 = vld [vmem:[%s14419_s23 + $0x65c] sm:$0xf]  ;;  %v9365_v14 = vor.u32 %v13049_v37, %v9362_v35  ;;  %8198 = vmatpush.bf16.msra.mxu1 %v9109_v44 }
 0x6f3   : > { %v9618_v1 = vld [vmem:[%s14419_s23 + $0x678] sm:$0xf0] }
 0x6f4   : > { %v12913_v20 = vld [vmem:[%s14419_s23 + $0x1c] sm:$0xf]  ;;  %v9621_v12 = vor.u32 %v13113_v36, %v9618_v1  ;;  %8212 = vmatpush.bf16.msra.mxu2 %v9365_v14 }
 0x6f5   : > { %v8818_v8 = vld [vmem:[%s14419_s23 + $0x38] sm:$0xf0] }
 0x6f6   : > { %v12977_v30 = vld [vmem:[%s14419_s23 + $0x21c] sm:$0xf]  ;;  %v8821_v21 = vor.u32 %v12913_v20, %v8818_v8  ;;  %8226 = vmatpush.bf16.msra.mxu3 %v9621_v12 }
 0x6f7   : > { %v9074_v47 = vld [vmem:[%s14419_s23 + $0x238] sm:$0xf0] }
 0x6f8   : > { %v13041_v24 = vld [vmem:[%s14419_s23 + $0x41c] sm:$0xf]  ;;  %v9077_v17 = vor.u32 %v12977_v30, %v9074_v47  ;;  %8185 = vmatpush.bf16.msra.mxu0 %v8821_v21 }
 0x6f9   : > { %v9330_v41 = vld [vmem:[%s14419_s23 + $0x438] sm:$0xf0] }
 0x6fa   : > { %v13105_v2 = vld [vmem:[%s14419_s23 + $0x61c] sm:$0xf]  ;;  %v9333_v31 = vor.u32 %v13041_v24, %v9330_v41  ;;  %8199 = vmatpush.bf16.msra.mxu1 %v9077_v17 }
 0x6fb   : > { %v9586_v6 = vld [vmem:[%s14419_s23 + $0x638] sm:$0xf0]  ;;  %8186 = vmatmul.bf16.vlgmr.msra.gmra.mxu0 %v14520_v11 }
 0x6fc   : > { %v13225_v5 = vld [vmem:[%s14419_s23 + $0x9dc] sm:$0xf]  ;;  %v9589_v9 = vor.u32 %v13105_v2, %v9586_v6  ;;  %8213 = vmatpush.bf16.msra.mxu2 %v9333_v31 }
 0x6fd   : > { %v10066_v22 = vld [vmem:[%s14419_s23 + $0x9f8] sm:$0xf0]  ;;  %8200 = vmatmul.bf16.vlgmr.msra.gmra.mxu1 %v14536_v27 }
 0x6fe   : > { %v13289_v28 = vld [vmem:[%s14419_s23 + $0xbdc] sm:$0xf]  ;;  %v10069_v23 = vor.u32 %v13225_v5, %v10066_v22  ;;  %8227 = vmatpush.bf16.msra.mxu3 %v9589_v9 }
 0x6ff   : > { %v10322_v39 = vld [vmem:[%s14419_s23 + $0xbf8] sm:$0xf0]  ;;  %8214 = vmatmul.bf16.vlgmr.msra.gmra.mxu2 %v14526_v18 }
 0x700   : > { %v13353_v19 = vld [vmem:[%s14419_s23 + $0xddc] sm:$0xf]  ;;  %v10325_v25 = vor.u32 %v13289_v28, %v10322_v39  ;;  %8234 = vmatpush.bf16.msrb.mxu0 %v10069_v23 }
 0x701   : > { %v10578_v13 = vld [vmem:[%s14419_s23 + $0xdf8] sm:$0xf0]  ;;  %8228 = vmatmul.bf16.vlgmr.msra.gmra.mxu3 %v14542_v34 }
 0x702   : > { %v13417_v16 = vld [vmem:[%s14419_s23 + $0xfdc] sm:$0xf]  ;;  %v10581_v26 = vor.u32 %v13353_v19, %v10578_v13  ;;  %8248 = vmatpush.bf16.msrb.mxu1 %v10325_v25 }
 0x703   : > { %v10834_v59 = vld [vmem:[%s14419_s23 + $0xff8] sm:$0xf0] }
 0x704   : > { %v13217_v46 = vld [vmem:[%s14419_s23 + $0x99c] sm:$0xf]  ;;  %v10837_v40 = vor.u32 %v13417_v16, %v10834_v59  ;;  %8262 = vmatpush.bf16.msrb.mxu2 %v10581_v26 }
 0x705   : > { %v10034_v38 = vld [vmem:[%s14419_s23 + $0x9b8] sm:$0xf0] }
 0x706   : > { %v13281_v29 = vld [vmem:[%s14419_s23 + $0xb9c] sm:$0xf]  ;;  %v10037_v37 = vor.u32 %v13217_v46, %v10034_v38  ;;  %8276 = vmatpush.bf16.msrb.mxu3 %v10837_v40 }
 0x707   : > { %v10290_v43 = vld [vmem:[%s14419_s23 + $0xbb8] sm:$0xf0] }
 0x708   : > { %v13345_v51 = vld [vmem:[%s14419_s23 + $0xd9c] sm:$0xf]  ;;  %v10293_v35 = vor.u32 %v13281_v29, %v10290_v43  ;;  %8235 = vmatpush.bf16.msrb.mxu0 %v10037_v37 }
 0x709   : > { %v10546_v3 = vld [vmem:[%s14419_s23 + $0xdb8] sm:$0xf0] }
 0x70a   : > { %v13409_v45 = vld [vmem:[%s14419_s23 + $0xf9c] sm:$0xf]  ;;  %v10549_v54 = vor.u32 %v13345_v51, %v10546_v3  ;;  %8249 = vmatpush.bf16.msrb.mxu1 %v10293_v35 }
 0x70b   : > { %v10802_v32 = vld [vmem:[%s14419_s23 + $0xfb8] sm:$0xf0] }
 0x70c   : > { %v13209_v36 = vld [vmem:[%s14419_s23 + $0x95c] sm:$0xf]  ;;  %v10805_v20 = vor.u32 %v13409_v45, %v10802_v32  ;;  %8263 = vmatpush.bf16.msrb.mxu2 %v10549_v54 }
 0x70d   : > { %v10002_v1 = vld [vmem:[%s14419_s23 + $0x978] sm:$0xf0] }
 0x70e   : > { %v13273_v62 = vld [vmem:[%s14419_s23 + $0xb5c] sm:$0xf]  ;;  %v10005_v47 = vor.u32 %v13209_v36, %v10002_v1  ;;  %8277 = vmatpush.bf16.msrb.mxu3 %v10805_v20 }
 0x70f   : > { %v10258_v8 = vld [vmem:[%s14419_s23 + $0xb78] sm:$0xf0] }
 0x710   : > { %v13337_v30 = vld [vmem:[%s14419_s23 + $0xd5c] sm:$0xf]  ;;  %v10261_v24 = vor.u32 %v13273_v62, %v10258_v8  ;;  %8236 = vmatpush.bf16.msrb.mxu0 %v10005_v47 }
 0x711   : > { %v10514_v33 = vld [vmem:[%s14419_s23 + $0xd78] sm:$0xf0] }
 0x712   : > { %v13401_v44 = vld [vmem:[%s14419_s23 + $0xf5c] sm:$0xf]  ;;  %v10517_v12 = vor.u32 %v13337_v30, %v10514_v33  ;;  %8250 = vmatpush.bf16.msrb.mxu1 %v10261_v24 }
 0x713   : > { %v10770_v14 = vld [vmem:[%s14419_s23 + $0xf78] sm:$0xf0] }
 0x714   : > { %v13201_v11 = vld [vmem:[%s14419_s23 + $0x91c] sm:$0xf]  ;;  %v10773_v18 = vor.u32 %v13401_v44, %v10770_v14  ;;  %8264 = vmatpush.bf16.msrb.mxu2 %v10517_v12 }
 0x715   : > { %v9970_v15 = vld [vmem:[%s14419_s23 + $0x938] sm:$0xf0] }
 0x716   : > { %v13265_v50 = vld [vmem:[%s14419_s23 + $0xb1c] sm:$0xf]  ;;  %v9973_v4 = vor.u32 %v13201_v11, %v9970_v15  ;;  %8278 = vmatpush.bf16.msrb.mxu3 %v10773_v18 }
 0x717   : > { %v10226_v41 = vld [vmem:[%s14419_s23 + $0xb38] sm:$0xf0] }
 0x718   : > { %v13329_v27 = vld [vmem:[%s14419_s23 + $0xd1c] sm:$0xf]  ;;  %v10229_v42 = vor.u32 %v13265_v50, %v10226_v41  ;;  %8237 = vmatpush.bf16.msrb.mxu0 %v9973_v4 }
 0x719   : > { %v10482_v2 = vld [vmem:[%s14419_s23 + $0xd38] sm:$0xf0] }
 0x71a   : > { %v13393_v6 = vld [vmem:[%s14419_s23 + $0xf1c] sm:$0xf]  ;;  %v10485_v5 = vor.u32 %v13329_v27, %v10482_v2  ;;  %8251 = vmatpush.bf16.msrb.mxu1 %v10229_v42 }
 0x71b   : > { %v10738_v34 = vld [vmem:[%s14419_s23 + $0xf38] sm:$0xf0] }
 0x71c   : > { %v13193_v22 = vld [vmem:[%s14419_s23 + $0x8dc] sm:$0xf]  ;;  %v10741_v39 = vor.u32 %v13393_v6, %v10738_v34  ;;  %8265 = vmatpush.bf16.msrb.mxu2 %v10485_v5 }
 0x71d   : > { %v9938_v28 = vld [vmem:[%s14419_s23 + $0x8f8] sm:$0xf0] }
 0x71e   : > { %v13257_v21 = vld [vmem:[%s14419_s23 + $0xadc] sm:$0xf]  ;;  %v9941_v16 = vor.u32 %v13193_v22, %v9938_v28  ;;  %8279 = vmatpush.bf16.msrb.mxu3 %v10741_v39 }
 0x71f   : > { %v10194_v19 = vld [vmem:[%s14419_s23 + $0xaf8] sm:$0xf0] }
 0x720   : > { %v13321_v13 = vld [vmem:[%s14419_s23 + $0xcdc] sm:$0xf]  ;;  %v10197_v59 = vor.u32 %v13257_v21, %v10194_v19  ;;  %8238 = vmatpush.bf16.msrb.mxu0 %v9941_v16 }
 0x721   : > { %v10450_v10 = vld [vmem:[%s14419_s23 + $0xcf8] sm:$0xf0] }
 0x722   : > { %v13385_v17 = vld [vmem:[%s14419_s23 + $0xedc] sm:$0xf]  ;;  %v10453_v9 = vor.u32 %v13321_v13, %v10450_v10  ;;  %8252 = vmatpush.bf16.msrb.mxu1 %v10197_v59 }
 0x723   : > { %v10706_v31 = vld [vmem:[%s14419_s23 + $0xef8] sm:$0xf0] }
 0x724   : > { %v13185_v23 = vld [vmem:[%s14419_s23 + $0x89c] sm:$0xf]  ;;  %v10709_v26 = vor.u32 %v13385_v17, %v10706_v31  ;;  %8266 = vmatpush.bf16.msrb.mxu2 %v10453_v9 }
 0x725   : > { %v9906_v7 = vld [vmem:[%s14419_s23 + $0x8b8] sm:$0xf0] }
 0x726   : > { %v13249_v25 = vld [vmem:[%s14419_s23 + $0xa9c] sm:$0xf]  ;;  %v9909_v51 = vor.u32 %v13185_v23, %v9906_v7  ;;  %8280 = vmatpush.bf16.msrb.mxu3 %v10709_v26 }
 0x727   : > { %v10162_v46 = vld [vmem:[%s14419_s23 + $0xab8] sm:$0xf0] }
 0x728   : > { %v13313_v38 = vld [vmem:[%s14419_s23 + $0xc9c] sm:$0xf]  ;;  %v10165_v3 = vor.u32 %v13249_v25, %v10162_v46  ;;  %8239 = vmatpush.bf16.msrb.mxu0 %v9909_v51 }
 0x729   : > { %v10418_v29 = vld [vmem:[%s14419_s23 + $0xcb8] sm:$0xf0] }
 0x72a   : > { %v13377_v40 = vld [vmem:[%s14419_s23 + $0xe9c] sm:$0xf]  ;;  %v10421_v45 = vor.u32 %v13313_v38, %v10418_v29  ;;  %8253 = vmatpush.bf16.msrb.mxu1 %v10165_v3 }
 0x72b   : > { %v10674_v43 = vld [vmem:[%s14419_s23 + $0xeb8] sm:$0xf0] }
 0x72c   : > { %v13177_v32 = vld [vmem:[%s14419_s23 + $0x85c] sm:$0xf]  ;;  %v10677_v54 = vor.u32 %v13377_v40, %v10674_v43  ;;  %8267 = vmatpush.bf16.msrb.mxu2 %v10421_v45 }
 0x72d   : > { %v9874_v37 = vld [vmem:[%s14419_s23 + $0x878] sm:$0xf0] }
 0x72e   : > { %v13241_v35 = vld [vmem:[%s14419_s23 + $0xa5c] sm:$0xf]  ;;  %v9877_v30 = vor.u32 %v13177_v32, %v9874_v37  ;;  %8281 = vmatpush.bf16.msrb.mxu3 %v10677_v54 }
 0x72f   : > { %v10130_v36 = vld [vmem:[%s14419_s23 + $0xa78] sm:$0xf0] }
 0x730   : > { %v13305_v1 = vld [vmem:[%s14419_s23 + $0xc5c] sm:$0xf]  ;;  %v10133_v14 = vor.u32 %v13241_v35, %v10130_v36  ;;  %8240 = vmatpush.bf16.msrb.mxu0 %v9877_v30 }
 0x731   : > { %v10386_v62 = vld [vmem:[%s14419_s23 + $0xc78] sm:$0xf0] }
 0x732   : > { %v13369_v20 = vld [vmem:[%s14419_s23 + $0xe5c] sm:$0xf]  ;;  %v10389_v47 = vor.u32 %v13305_v1, %v10386_v62  ;;  %8254 = vmatpush.bf16.msrb.mxu1 %v10133_v14 }
 0x733   : > { %v10642_v8 = vld [vmem:[%s14419_s23 + $0xe78] sm:$0xf0] }
 0x734   : > { %v13169_v33 = vld [vmem:[%s14419_s23 + $0x81c] sm:$0xf]  ;;  %v10645_v15 = vor.u32 %v13369_v20, %v10642_v8  ;;  %8268 = vmatpush.bf16.msrb.mxu2 %v10389_v47 }
 0x735   : > { %v9842_v44 = vld [vmem:[%s14419_s23 + $0x838] sm:$0xf0] }
 0x736   : > { %v13233_v24 = vld [vmem:[%s14419_s23 + $0xa1c] sm:$0xf]  ;;  %v9845_v34 = vor.u32 %v13169_v33, %v9842_v44  ;;  %8282 = vmatpush.bf16.msrb.mxu3 %v10645_v15 }
 0x737   : > { %v10098_v12 = vld [vmem:[%s14419_s23 + $0xa38] sm:$0xf0] }
 0x738   : > { %v13297_v11 = vld [vmem:[%s14419_s23 + $0xc1c] sm:$0xf]  ;;  %v10101_v22 = vor.u32 %v13233_v24, %v10098_v12  ;;  %8241 = vmatpush.bf16.msrb.mxu0 %v9845_v34 }
 0x739   : > { %v10354_v50 = vld [vmem:[%s14419_s23 + $0xc38] sm:$0xf0] }
 0x73a   : > { %v13361_v18 = vld [vmem:[%s14419_s23 + $0xe1c] sm:$0xf]  ;;  %v10357_v28 = vor.u32 %v13297_v11, %v10354_v50  ;;  %8255 = vmatpush.bf16.msrb.mxu1 %v10101_v22 }
 0x73b   : > { %v10610_v41 = vld [vmem:[%s14419_s23 + $0xe38] sm:$0xf0]  ;;  %8242 = vmatmul.bf16.vlgmr.msrb.gmra.mxu0 %v14602_v56 }
 0x73c   : > { %v13481_v27 = vld [vmem:[%s14419_s23 + $0x11dc] sm:$0xf]  ;;  %v10613_v19 = vor.u32 %v13361_v18, %v10610_v41  ;;  %8269 = vmatpush.bf16.msrb.mxu2 %v10357_v28 }
 0x73d   : > { %v11090_v2 = vld [vmem:[%s14419_s23 + $0x11f8] sm:$0xf0]  ;;  %8256 = vmatmul.bf16.vlgmr.msrb.gmra.mxu1 %v14609_v61 }
 0x73e   : > { %v13545_v6 = vld [vmem:[%s14419_s23 + $0x13dc] sm:$0xf]  ;;  %v11093_v13 = vor.u32 %v13481_v27, %v11090_v2  ;;  %8283 = vmatpush.bf16.msrb.mxu3 %v10613_v19 }
 0x73f   : > { %v11346_v4 = vld [vmem:[%s14419_s23 + $0x13f8] sm:$0xf0]  ;;  %8270 = vmatmul.bf16.vlgmr.msrb.gmra.mxu2 %v14607_v60 }
 0x740   : > { %v13609_v42 = vld [vmem:[%s14419_s23 + $0x15dc] sm:$0xf]  ;;  %v11349_v10 = vor.u32 %v13545_v6, %v11346_v4  ;;  %8290 = vmatpush.bf16.msra.mxu0 %v11093_v13  ;;  %v16811_v6 = vpop.f32.mrf.mxu0 }
 0x741   : > { %v11602_v5 = vld [vmem:[%s14419_s23 + $0x15f8] sm:$0xf0]  ;;  %8284 = vmatmul.bf16.vlgmr.msrb.gmra.mxu3 %v14613_v0 }
 0x742   : > { %v13673_v21 = vld [vmem:[%s14419_s23 + $0x17dc] sm:$0xf]  ;;  %v11605_v17 = vor.u32 %v13609_v42, %v11602_v5  ;;  %8304 = vmatpush.bf16.msra.mxu1 %v11349_v10  ;;  %v16815_v42 = vpop.f32.mrf.mxu1 }
 0x743   : > { %v11858_v39 = vld [vmem:[%s14419_s23 + $0x17f8] sm:$0xf0] }
 0x744   : > { %v13473_v31 = vld [vmem:[%s14419_s23 + $0x119c] sm:$0xf]  ;;  %v11861_v9 = vor.u32 %v13673_v21, %v11858_v39  ;;  %8318 = vmatpush.bf16.msra.mxu2 %v11605_v17 }
 0x745   : > { %v11058_v16 = vld [vmem:[%s14419_s23 + $0x11b8] sm:$0xf0] }
 0x746   : > { %v13537_v59 = vld [vmem:[%s14419_s23 + $0x139c] sm:$0xf]  ;;  %v11061_v38 = vor.u32 %v13473_v31, %v11058_v16  ;;  %8332 = vmatpush.bf16.msra.mxu3 %v11861_v9 }
 0x747   : > { %v11314_v23 = vld [vmem:[%s14419_s23 + $0x13b8] sm:$0xf0] }
 0x748   : > { %v13601_v7 = vld [vmem:[%s14419_s23 + $0x159c] sm:$0xf]  ;;  %v11317_v29 = vor.u32 %v13537_v59, %v11314_v23  ;;  %8291 = vmatpush.bf16.msra.mxu0 %v11061_v38  ;;  %v16828_v38 = vpop.f32.mrf.mxu2 }
 0x749   : > { %v11570_v25 = vld [vmem:[%s14419_s23 + $0x15b8] sm:$0xf0] }
 0x74a   : > { %v13665_v26 = vld [vmem:[%s14419_s23 + $0x179c] sm:$0xf]  ;;  %v11573_v40 = vor.u32 %v13601_v7, %v11570_v25  ;;  %8305 = vmatpush.bf16.msra.mxu1 %v11317_v29 }
 0x74b   : > { %v11826_v46 = vld [vmem:[%s14419_s23 + $0x17b8] sm:$0xf0] }
 0x74c   : > { %v13465_v43 = vld [vmem:[%s14419_s23 + $0x115c] sm:$0xf]  ;;  %v11829_v45 = vor.u32 %v13665_v26, %v11826_v46  ;;  %8319 = vmatpush.bf16.msra.mxu2 %v11573_v40 }
 0x74d   : > { %v11026_v51 = vld [vmem:[%s14419_s23 + $0x1178] sm:$0xf0] }
 0x74e   : > { %v13529_v3 = vld [vmem:[%s14419_s23 + $0x135c] sm:$0xf]  ;;  %v11029_v56 = vor.u32 %v13465_v43, %v11026_v51  ;;  %8333 = vmatpush.bf16.msra.mxu3 %v11829_v45 }
 0x74f   : > { %v11282_v32 = vld [vmem:[%s14419_s23 + $0x1378] sm:$0xf0] }
 0x750   : > { %v13593_v37 = vld [vmem:[%s14419_s23 + $0x155c] sm:$0xf]  ;;  %v11285_v1 = vor.u32 %v13529_v3, %v11282_v32  ;;  %8292 = vmatpush.bf16.msra.mxu0 %v11029_v56  ;;  %v16833_v3 = vpop.f32.mrf.mxu3 }
 0x751   : > { %v11538_v35 = vld [vmem:[%s14419_s23 + $0x1578] sm:$0xf0] }
 0x752   : > { %v13657_v54 = vld [vmem:[%s14419_s23 + $0x175c] sm:$0xf]  ;;  %v11541_v62 = vor.u32 %v13593_v37, %v11538_v35  ;;  %8306 = vmatpush.bf16.msra.mxu1 %v11285_v1 }
 0x753   : > { %v11794_v36 = vld [vmem:[%s14419_s23 + $0x1778] sm:$0xf0] }
 0x754   : > { %v13457_v20 = vld [vmem:[%s14419_s23 + $0x111c] sm:$0xf]  ;;  %v11797_v61 = vor.u32 %v13657_v54, %v11794_v36  ;;  %8320 = vmatpush.bf16.msra.mxu2 %v11541_v62  ;;  %v16839_v36 = vpop.f32.mrf.mxu0 }
 0x755   : > { %v10994_v60 = vld [vmem:[%s14419_s23 + $0x1138] sm:$0xf0] }
 0x756   : > { %v13521_v8 = vld [vmem:[%s14419_s23 + $0x131c] sm:$0xf]  ;;  %v10997_v47 = vor.u32 %v13457_v20, %v10994_v60  ;;  %8334 = vmatpush.bf16.msra.mxu3 %v11797_v61 }
 0x757   : > { %v11250_v30 = vld [vmem:[%s14419_s23 + $0x1338] sm:$0xf0] }
 0x758   : > { %v13585_v33 = vld [vmem:[%s14419_s23 + $0x151c] sm:$0xf]  ;;  %v11253_v24 = vor.u32 %v13521_v8, %v11250_v30  ;;  %8293 = vmatpush.bf16.msra.mxu0 %v10997_v47  ;;  %v16844_v8 = vpop.f32.mrf.mxu1 }
 0x759   : > { %v11506_v0 = vld [vmem:[%s14419_s23 + $0x1538] sm:$0xf0] }
 0x75a   : > { %v13649_v44 = vld [vmem:[%s14419_s23 + $0x171c] sm:$0xf]  ;;  %v11509_v12 = vor.u32 %v13585_v33, %v11506_v0  ;;  %8307 = vmatpush.bf16.msra.mxu1 %v11253_v24 }
 0x75b   : > { %v11762_v14 = vld [vmem:[%s14419_s23 + $0x1738] sm:$0xf0] }
 0x75c   : > { %v13449_v11 = vld [vmem:[%s14419_s23 + $0x10dc] sm:$0xf]  ;;  %v11765_v18 = vor.u32 %v13649_v44, %v11762_v14  ;;  %8321 = vmatpush.bf16.msra.mxu2 %v11509_v12 }
 0x75d   : > { %v10962_v15 = vld [vmem:[%s14419_s23 + $0x10f8] sm:$0xf0] }
 0x75e   : > { %v13513_v50 = vld [vmem:[%s14419_s23 + $0x12dc] sm:$0xf]  ;;  %v10965_v5 = vor.u32 %v13449_v11, %v10962_v15  ;;  %8335 = vmatpush.bf16.msra.mxu3 %v11765_v18 }
 0x75f   : > { %v11218_v41 = vld [vmem:[%s14419_s23 + $0x12f8] sm:$0xf0] }
 0x760   : > { %v13577_v27 = vld [vmem:[%s14419_s23 + $0x14dc] sm:$0xf]  ;;  %v11221_v22 = vor.u32 %v13513_v50, %v11218_v41  ;;  %8294 = vmatpush.bf16.msra.mxu0 %v10965_v5 }
 0x761   : > { %v11474_v2 = vld [vmem:[%s14419_s23 + $0x14f8] sm:$0xf0] }
 0x762   : > { %v13641_v34 = vld [vmem:[%s14419_s23 + $0x16dc] sm:$0xf]  ;;  %v11477_v28 = vor.u32 %v13577_v27, %v11474_v2  ;;  %8308 = vmatpush.bf16.msra.mxu1 %v11221_v22 }
 0x763   : > { %v11730_v4 = vld [vmem:[%s14419_s23 + $0x16f8] sm:$0xf0] }
 0x764   : > { %v13441_v21 = vld [vmem:[%s14419_s23 + $0x109c] sm:$0xf]  ;;  %v11733_v13 = vor.u32 %v13641_v34, %v11730_v4  ;;  %8322 = vmatpush.bf16.msra.mxu2 %v11477_v28 }
 0x765   : > { %v10930_v39 = vld [vmem:[%s14419_s23 + $0x10b8] sm:$0xf0] }
 0x766   : > { %v13505_v19 = vld [vmem:[%s14419_s23 + $0x129c] sm:$0xf]  ;;  %v10933_v9 = vor.u32 %v13441_v21, %v10930_v39  ;;  %8336 = vmatpush.bf16.msra.mxu3 %v11733_v13  ;;  %v16860_v39 = vpop.f32.mrf.mxu2 }
 0x767   : > { %v11186_v10 = vld [vmem:[%s14419_s23 + $0x12b8] sm:$0xf0] }
 0x768   : > { %v13569_v17 = vld [vmem:[%s14419_s23 + $0x149c] sm:$0xf]  ;;  %v11189_v23 = vor.u32 %v13505_v19, %v11186_v10  ;;  %8295 = vmatpush.bf16.msra.mxu0 %v10933_v9 }
 0x769   : > { %v11442_v31 = vld [vmem:[%s14419_s23 + $0x14b8] sm:$0xf0] }
 0x76a   : > { %v13633_v16 = vld [vmem:[%s14419_s23 + $0x169c] sm:$0xf]  ;;  %v11445_v7 = vor.u32 %v13569_v17, %v11442_v31  ;;  %8309 = vmatpush.bf16.msra.mxu1 %v11189_v23  ;;  %v16865_v31 = vpop.f32.mrf.mxu3  ;;  %v7978_v23 = vadd.f32 %v16815_v42, %v16811_v6 }
 0x76b   : > { %v11698_v59 = vld [vmem:[%s14419_s23 + $0x16b8] sm:$0xf0] }
 0x76c   : > { %v13433_v25 = vld [vmem:[%s14419_s23 + $0x105c] sm:$0xf]  ;;  %v11701_v29 = vor.u32 %v13633_v16, %v11698_v59  ;;  %8323 = vmatpush.bf16.msra.mxu2 %v11445_v7  ;;  %v8019_v7 = vpop.f32.mrf.mxu0 }
 0x76d   : > { %v10898_v26 = vld [vmem:[%s14419_s23 + $0x1078] sm:$0xf0] }
 0x76e   : > { %v13497_v46 = vld [vmem:[%s14419_s23 + $0x125c] sm:$0xf]  ;;  %v10901_v37 = vor.u32 %v13433_v25, %v10898_v26  ;;  %8337 = vmatpush.bf16.msra.mxu3 %v11701_v29 }
 0x76f   : > { %v11154_v40 = vld [vmem:[%s14419_s23 + $0x1278] sm:$0xf0] }
 0x770   : > { %v13561_v43 = vld [vmem:[%s14419_s23 + $0x145c] sm:$0xf]  ;;  %v11157_v56 = vor.u32 %v13497_v46, %v11154_v40  ;;  %8296 = vmatpush.bf16.msra.mxu0 %v10901_v37 }
 0x771   : > { %v11410_v51 = vld [vmem:[%s14419_s23 + $0x1478] sm:$0xf0] }
 0x772   : > { %v13625_v45 = vld [vmem:[%s14419_s23 + $0x165c] sm:$0xf]  ;;  %v11413_v1 = vor.u32 %v13561_v43, %v11410_v51  ;;  %8310 = vmatpush.bf16.msra.mxu1 %v11157_v56  ;;  %v16874_v43 = vpop.f32.mrf.mxu1 }
 0x773   : > { %v11666_v32 = vld [vmem:[%s14419_s23 + $0x1678] sm:$0xf0] }
 0x774   : > { %v13425_v35 = vld [vmem:[%s14419_s23 + $0x101c] sm:$0xf]  ;;  %v11669_v61 = vor.u32 %v13625_v45, %v11666_v32  ;;  %8324 = vmatpush.bf16.msra.mxu2 %v11413_v1 }
 0x775   : > { %v10866_v54 = vld [vmem:[%s14419_s23 + $0x1038] sm:$0xf0] }
 0x776   : > { %v13489_v62 = vld [vmem:[%s14419_s23 + $0x121c] sm:$0xf]  ;;  %v10869_v24 = vor.u32 %v13425_v35, %v10866_v54  ;;  %8338 = vmatpush.bf16.msra.mxu3 %v11669_v61  ;;  %v7992_v35 = vadd.f32 %v16828_v38, %v7978_v23  ;;  %v16894_v38 = vpop.f32.mrf.mxu2 }
 0x777   : > { %v11122_v20 = vld [vmem:[%s14419_s23 + $0x1238] sm:$0xf0] }
 0x778   : > { %v13553_v60 = vld [vmem:[%s14419_s23 + $0x141c] sm:$0xf]  ;;  %v11125_v50 = vor.u32 %v13489_v62, %v11122_v20  ;;  %8297 = vmatpush.bf16.msra.mxu0 %v10869_v24 }
 0x779   : > { %v11378_v30 = vld [vmem:[%s14419_s23 + $0x1438] sm:$0xf0] }
 0x77a   : > { %v13617_v33 = vld [vmem:[%s14419_s23 + $0x161c] sm:$0xf]  ;;  %v11381_v18 = vor.u32 %v13553_v60, %v11378_v30  ;;  %8311 = vmatpush.bf16.msra.mxu1 %v11125_v50 }
 0x77b   : > { %v11634_v0 = vld [vmem:[%s14419_s23 + $0x1638] sm:$0xf0]  ;;  %8298 = vmatmul.bf16.vlgmr.msra.gmra.mxu0 %v14686_v48 }
 0x77c   : > { %v13737_v44 = vld [vmem:[%s14419_s23 + $0x19dc] sm:$0xf]  ;;  %v11637_v2 = vor.u32 %v13617_v33, %v11634_v0  ;;  %8325 = vmatpush.bf16.msra.mxu2 %v11381_v18  ;;  %v8006_v0 = vadd.f32 %v16833_v3, %v7992_v35 }
 0x77d   : > { %v12114_v14 = vld [vmem:[%s14419_s23 + $0x19f8] sm:$0xf0]  ;;  %8312 = vmatmul.bf16.vlgmr.msra.gmra.mxu1 %v14693_v53 }
 0x77e   : > { %v13801_v47 = vld [vmem:[%s14419_s23 + $0x1bdc] sm:$0xf]  ;;  %v12117_v34 = vor.u32 %v13737_v44, %v12114_v14  ;;  %8339 = vmatpush.bf16.msra.mxu3 %v11637_v2  ;;  %v16897_v44 = vpop.f32.mrf.mxu3 }
 0x77f   : > { %v12370_v12 = vld [vmem:[%s14419_s23 + $0x1bf8] sm:$0xf0]  ;;  %8326 = vmatmul.bf16.vlgmr.msra.gmra.mxu2 %v14691_v52 }
 0x780   : > { %v13865_v11 = vld [vmem:[%s14419_s23 + $0x1ddc] sm:$0xf]  ;;  %v12373_v4 = vor.u32 %v13801_v47, %v12370_v12  ;;  %8346 = vmatpush.bf16.msrb.mxu0 %v12117_v34  ;;  %v7980_v34 = vadd.f32 %v16844_v8, %v16839_v36 }
 0x781   : > { %v12626_v15 = vld [vmem:[%s14419_s23 + $0x1df8] sm:$0xf0]  ;;  %8340 = vmatmul.bf16.vlgmr.msra.gmra.mxu3 %v14697_v57 }
 0x782   : > { %v13929_v41 = vld [vmem:[%s14419_s23 + $0x1fdc] sm:$0xf]  ;;  %v12629_v5 = vor.u32 %v13865_v11, %v12626_v15  ;;  %8360 = vmatpush.bf16.msrb.mxu1 %v12373_v4  ;;  %v16909_v4 = vpop.f32.mrf.mxu1  ;;  %v7994_v23 = vadd.f32 %v16860_v39, %v7980_v34 }
 0x783   : > { %v12882_v27 = vld [vmem:[%s14419_s23 + $0x1ff8] sm:$0xf0] }
 0x784   : > { %v13729_v22 = vld [vmem:[%s14419_s23 + $0x199c] sm:$0xf]  ;;  %v12885_v19 = vor.u32 %v13929_v41, %v12882_v27  ;;  %8374 = vmatpush.bf16.msrb.mxu2 %v12629_v5  ;;  %v8021_v27 = vpop.f32.mrf.mxu0 }
 0x785   : > { %v12082_v28 = vld [vmem:[%s14419_s23 + $0x19b8] sm:$0xf0] }
 0x786   : > { %v13793_v21 = vld [vmem:[%s14419_s23 + $0x1b9c] sm:$0xf]  ;;  %v12085_v9 = vor.u32 %v13729_v22, %v12082_v28  ;;  %8388 = vmatpush.bf16.msrb.mxu3 %v12885_v19  ;;  %v8020_v22 = vadd.f32 %v8019_v7, %v8006_v0 }
 0x787   : > { %v12338_v13 = vld [vmem:[%s14419_s23 + $0x1bb8] sm:$0xf0] }
 0x788   : > { %v13857_v10 = vld [vmem:[%s14419_s23 + $0x1d9c] sm:$0xf]  ;;  %v12341_v25 = vor.u32 %v13793_v21, %v12338_v13  ;;  %8347 = vmatpush.bf16.msrb.mxu0 %v12085_v9 }
 0x789   : > { %v12594_v17 = vld [vmem:[%s14419_s23 + $0x1db8] sm:$0xf0] }
 0x78a   : > { %v13921_v16 = vld [vmem:[%s14419_s23 + $0x1f9c] sm:$0xf]  ;;  %v12597_v26 = vor.u32 %v13857_v10, %v12594_v17  ;;  %8361 = vmatpush.bf16.msrb.mxu1 %v12341_v25  ;;  %v8034_v25 = vadd.f32 %v16874_v43, %v8020_v22 }
 0x78b   : > { %v12850_v59 = vld [vmem:[%s14419_s23 + $0x1fb8] sm:$0xf0] }
 0x78c   : > { %v13721_v46 = vld [vmem:[%s14419_s23 + $0x195c] sm:$0xf]  ;;  %v12853_v51 = vor.u32 %v13921_v16, %v12850_v59  ;;  %8375 = vmatpush.bf16.msrb.mxu2 %v12597_v26  ;;  %v8075_v43 = vpop.f32.mrf.mxu0 }
 0x78d   : > { %v12050_v29 = vld [vmem:[%s14419_s23 + $0x1978] sm:$0xf0] }
 0x78e   : > { %v13785_v40 = vld [vmem:[%s14419_s23 + $0x1b5c] sm:$0xf]  ;;  %v12053_v48 = vor.u32 %v13721_v46, %v12050_v29  ;;  %8389 = vmatpush.bf16.msrb.mxu3 %v12853_v51 }
 0x78f   : > { %v12306_v45 = vld [vmem:[%s14419_s23 + $0x1b78] sm:$0xf0] }
 0x790   : > { %v13849_v6 = vld [vmem:[%s14419_s23 + $0x1d5c] sm:$0xf]  ;;  %v12309_v54 = vor.u32 %v13785_v40, %v12306_v45  ;;  %8348 = vmatpush.bf16.msrb.mxu0 %v12053_v48  ;;  %v8049_v45 = vpop.f32.mrf.mxu2 }
 0x791   : > { %v12562_v42 = vld [vmem:[%s14419_s23 + $0x1d78] sm:$0xf0] }
 0x792   : > { %v13913_v32 = vld [vmem:[%s14419_s23 + $0x1f5c] sm:$0xf]  ;;  %v12565_v56 = vor.u32 %v13849_v6, %v12562_v42  ;;  %8362 = vmatpush.bf16.msrb.mxu1 %v12309_v54  ;;  %v8008_v54 = vadd.f32 %v16865_v31, %v7994_v23 }
 0x793   : > { %v12818_v37 = vld [vmem:[%s14419_s23 + $0x1f78] sm:$0xf0] }
 0x794   : > { %v13713_v52 = vld [vmem:[%s14419_s23 + $0x191c] sm:$0xf]  ;;  %v12821_v62 = vor.u32 %v13913_v32, %v12818_v37  ;;  %8376 = vmatpush.bf16.msrb.mxu2 %v12565_v56  ;;  %v8063_v37 = vpop.f32.mrf.mxu3  ;;  %v8089_v56 = vpop.f32.mrf.mxu1  ;;  %v8022_v0 = vadd.f32 %v8021_v27, %v8008_v54 }
 0x795   : > { %v12018_v1 = vld [vmem:[%s14419_s23 + $0x1938] sm:$0xf0]  ;;  %v8077_v27 = vpop.f32.mrf.mxu0 }
 0x796   : > { %v13777_v53 = vld [vmem:[%s14419_s23 + $0x1b1c] sm:$0xf]  ;;  %v12021_v33 = vor.u32 %v13713_v52, %v12018_v1  ;;  %8390 = vmatpush.bf16.msrb.mxu3 %v12821_v62  ;;  %v8048_v1 = vadd.f32 %v16894_v38, %v8034_v25 }
 0x797   : > { %v12274_v20 = vld [vmem:[%s14419_s23 + $0x1b38] sm:$0xf0] }
 0x798   : > { %v13841_v57 = vld [vmem:[%s14419_s23 + $0x1d1c] sm:$0xf]  ;;  %v12277_v14 = vor.u32 %v13777_v53, %v12274_v20  ;;  %8349 = vmatpush.bf16.msrb.mxu0 %v12021_v33 }
 0x799   : > { %v12530_v60 = vld [vmem:[%s14419_s23 + $0x1d38] sm:$0xf0] }
 0x79a   : > { %v13905_v61 = vld [vmem:[%s14419_s23 + $0x1f1c] sm:$0xf]  ;;  %v12533_v47 = vor.u32 %v13841_v57, %v12530_v60  ;;  %8363 = vmatpush.bf16.msrb.mxu1 %v12277_v14 }
 0x79b   : > { %v12786_v30 = vld [vmem:[%s14419_s23 + $0x1f38] sm:$0xf0] }
 0x79c   : > { %v13705_v24 = vld [vmem:[%s14419_s23 + $0x18dc] sm:$0xf]  ;;  %v12789_v15 = vor.u32 %v13905_v61, %v12786_v30  ;;  %8377 = vmatpush.bf16.msrb.mxu2 %v12533_v47  ;;  %v8091_v34 = vpop.f32.mrf.mxu1 }
 0x79d   : > { %v11986_v12 = vld [vmem:[%s14419_s23 + $0x18f8] sm:$0xf0] }
 0x79e   : > { %v13769_v11 = vld [vmem:[%s14419_s23 + $0x1adc] sm:$0xf]  ;;  %v11989_v5 = vor.u32 %v13705_v24, %v11986_v12  ;;  %8391 = vmatpush.bf16.msrb.mxu3 %v12789_v15  ;;  %v8062_v12 = vadd.f32 %v16897_v44, %v8048_v1  ;;  %v8103_v15 = vpop.f32.mrf.mxu2 }
 0x79f   : > { %v12242_v50 = vld [vmem:[%s14419_s23 + $0x1af8] sm:$0xf0] }
 0x7a0   : > { %v13833_v18 = vld [vmem:[%s14419_s23 + $0x1cdc] sm:$0xf]  ;;  %v12245_v28 = vor.u32 %v13769_v11, %v12242_v50  ;;  %8350 = vmatpush.bf16.msrb.mxu0 %v11989_v5 }
 0x7a1   : > { %v12498_v41 = vld [vmem:[%s14419_s23 + $0x1cf8] sm:$0xf0] }
 0x7a2   : > { %v13897_v3 = vld [vmem:[%s14419_s23 + $0x1edc] sm:$0xf]  ;;  %v12501_v21 = vor.u32 %v13833_v18, %v12498_v41  ;;  %8364 = vmatpush.bf16.msrb.mxu1 %v12245_v28  ;;  %v8036_v18 = vadd.f32 %v16909_v4, %v8022_v0  ;;  %v8076_v41 = vadd.f32 %v8075_v43, %v8062_v12 }
 0x7a3   : > { %v12754_v2 = vld [vmem:[%s14419_s23 + $0x1ef8] sm:$0xf0] }
 0x7a4   : > { %v13697_v19 = vld [vmem:[%s14419_s23 + $0x189c] sm:$0xf]  ;;  %v12757_v17 = vor.u32 %v13897_v3, %v12754_v2  ;;  %8378 = vmatpush.bf16.msrb.mxu2 %v12501_v21  ;;  %v8117_v3 = vpop.f32.mrf.mxu3  ;;  %v8050_v2 = vadd.f32 %v8049_v45, %v8036_v18  ;;  %v8090_v5 = vadd.f32 %v8089_v56, %v8076_v41 }
 0x7a5   : > { %v11954_v13 = vld [vmem:[%s14419_s23 + $0x18b8] sm:$0xf0] }
 0x7a6   : > { %v13761_v10 = vld [vmem:[%s14419_s23 + $0x1a9c] sm:$0xf]  ;;  %v11957_v7 = vor.u32 %v13697_v19, %v11954_v13  ;;  %8392 = vmatpush.bf16.msrb.mxu3 %v12757_v17  ;;  %v8064_v44 = vadd.f32 %v8063_v37, %v8050_v2  ;;  %v8104_v22 = vadd.f32 %v8103_v15, %v8090_v5  ;;  %v8105_v28 = vpop.f32.mrf.mxu2  ;;  %v8131_v13 = vpop.f32.mrf.mxu0 }
 0x7a7   : > { %v12210_v36 = vld [vmem:[%s14419_s23 + $0x1ab8] sm:$0xf0] }
 0x7a8   : > { %v13825_v8 = vld [vmem:[%s14419_s23 + $0x1c9c] sm:$0xf]  ;;  %v12213_v26 = vor.u32 %v13761_v10, %v12210_v36  ;;  %8351 = vmatpush.bf16.msrb.mxu0 %v11957_v7  ;;  %v8078_v4 = vadd.f32 %v8077_v27, %v8064_v44  ;;  %v8118_v21 = vadd.f32 %v8117_v3, %v8104_v22  ;;  %v8145_v10 = vpop.f32.mrf.mxu1 }
 0x7a9   : > { %v12466_v16 = vld [vmem:[%s14419_s23 + $0x1cb8] sm:$0xf0] }
 0x7aa   : > { %v13889_v59 = vld [vmem:[%s14419_s23 + $0x1e9c] sm:$0xf]  ;;  %v12469_v46 = vor.u32 %v13825_v8, %v12466_v16  ;;  %8365 = vmatpush.bf16.msrb.mxu1 %v12213_v26  ;;  %v8092_v17 = vadd.f32 %v8091_v34, %v8078_v4  ;;  %v8132_v36 = vadd.f32 %v8131_v13, %v8118_v21 }
 0x7ab   : > { %v12722_v9 = vld [vmem:[%s14419_s23 + $0x1eb8] sm:$0xf0] }
 0x7ac   : > { %v13689_v29 = vld [vmem:[%s14419_s23 + $0x185c] sm:$0xf]  ;;  %v12725_v6 = vor.u32 %v13889_v59, %v12722_v9  ;;  %8379 = vmatpush.bf16.msrb.mxu2 %v12469_v46  ;;  %v8119_v19 = vpop.f32.mrf.mxu3  ;;  %v8106_v8 = vadd.f32 %v8105_v28, %v8092_v17  ;;  %v8146_v16 = vadd.f32 %v8145_v10, %v8132_v36 }
 0x7ad   : > { %v11922_v40 = vld [vmem:[%s14419_s23 + $0x1878] sm:$0xf0] }
 0x7ae   : > { %v13753_v51 = vld [vmem:[%s14419_s23 + $0x1a5c] sm:$0xf]  ;;  %v11925_v52 = vor.u32 %v13689_v29, %v11922_v40  ;;  %8393 = vmatpush.bf16.msrb.mxu3 %v12725_v6  ;;  %v8159_v59 = vpop.f32.mrf.mxu2 }
 0x7af   : > { %v12178_v42 = vld [vmem:[%s14419_s23 + $0x1a78] sm:$0xf0]  ;;  %v8160_v9 = vadd.f32 %v8159_v59, %v8146_v16 }
 0x7b0   : > { %v13817_v39 = vld [vmem:[%s14419_s23 + $0x1c5c] sm:$0xf]  ;;  %v12181_v53 = vor.u32 %v13753_v51, %v12178_v42  ;;  %8352 = vmatpush.bf16.msrb.mxu0 %v11925_v52  ;;  %v8147_v26 = vpop.f32.mrf.mxu1 }
 0x7b1   : > { %v12434_v32 = vld [vmem:[%s14419_s23 + $0x1c78] sm:$0xf0] }
 0x7b2   : > { %v13881_v48 = vld [vmem:[%s14419_s23 + $0x1e5c] sm:$0xf]  ;;  %v12437_v62 = vor.u32 %v13817_v39, %v12434_v32  ;;  %8366 = vmatpush.bf16.msrb.mxu1 %v12181_v53 }
 0x7b3   : > { %v12690_v35 = vld [vmem:[%s14419_s23 + $0x1e78] sm:$0xf0] }
 0x7b4   : > { %v13681_v20 = vld [vmem:[%s14419_s23 + $0x181c] sm:$0xf]  ;;  %v12693_v61 = vor.u32 %v13881_v48, %v12690_v35  ;;  %8380 = vmatpush.bf16.msrb.mxu2 %v12437_v62  ;;  %v8173_v23 = vpop.f32.mrf.mxu3 }
 0x7b5   : > { %v11890_v57 = vld [vmem:[%s14419_s23 + $0x1838] sm:$0xf0]  ;;  %v8174_v25 = vadd.f32 %v8173_v23, %v8160_v9 }
 0x7b6   : > { %v13745_v60 = vld [vmem:[%s14419_s23 + $0x1a1c] sm:$0xf]  ;;  %v11893_v24 = vor.u32 %v13681_v20, %v11890_v57  ;;  %8394 = vmatpush.bf16.msrb.mxu3 %v12693_v61  ;;  %v8161_v29 = vpop.f32.mrf.mxu2 }
 0x7b7   : > { %v12146_v30 = vld [vmem:[%s14419_s23 + $0x1a38] sm:$0xf0] }
 0x7b8   : > { %v13809_v33 = vld [vmem:[%s14419_s23 + $0x1c1c] sm:$0xf]  ;;  %v12149_v38 = vor.u32 %v13745_v60, %v12146_v30  ;;  %8353 = vmatpush.bf16.msrb.mxu0 %v11893_v24  ;;  %v8201_v32 = vpop.f32.mrf.mxu1 }
 0x7b9   : > { %v12402_v31 = vld [vmem:[%s14419_s23 + $0x1c38] sm:$0xf0] }
 0x7ba   : > { %v13873_v14 = vld [vmem:[%s14419_s23 + $0x1e1c] sm:$0xf]  ;;  %v12405_v11 = vor.u32 %v13809_v33, %v12402_v31  ;;  %8367 = vmatpush.bf16.msrb.mxu1 %v12149_v38 }
 0x7bb   : > { %v12658_v47 = vld [vmem:[%s14419_s23 + $0x1e38] sm:$0xf0]  ;;  %8354 = vmatmul.bf16.vlgmr.msrb.gmra.mxu0 %v14770_v49  ;;  %v8120_v49 = vadd.f32 %v8119_v19, %v8106_v8 }
 0x7bc   : > { %v12661_v50 = vor.u32 %v13873_v14, %v12658_v47  ;;  %8381 = vmatpush.bf16.msrb.mxu2 %v12405_v11  ;;  %v8175_v51 = vpop.f32.mrf.mxu3  ;;  %v368_v45 = vld [vmem:[#allocation2 + $0x78] sm:$0xff] }
 0x7bd   : > { %8368 = vmatmul.bf16.vlgmr.msrb.gmra.mxu1 %v14777_v58  ;;  %v8133_v58 = vpop.f32.mrf.mxu0 }
 0x7be   : > { %8395 = vmatpush.bf16.msrb.mxu3 %v12661_v50  ;;  %v8134_v7 = vadd.f32 %v8133_v58, %v8120_v49  ;;  %v8215_v37 = vpop.f32.mrf.mxu2 }
 0x7bf   : > { %8382 = vmatmul.bf16.vlgmr.msrb.gmra.mxu2 %v14775_v55  ;;  %v360_v55 = vld [vmem:[#allocation2 + $0x8] sm:$0xff] }
 0x7c0   : > { %v8148_v46 = vadd.f32 %v8147_v26, %v8134_v7  ;;  %v8203_v35 = vpop.f32.mrf.mxu1 }
 0x7c1   : > { %8396 = vmatmul.bf16.vlgmr.msrb.gmra.mxu3 %v14781_v63  ;;  %v8408_v63 = vadd.f32 %v8174_v25, %v360_v55  ;;  %v361_v25 = vld [vmem:[#allocation2 + $0x48] sm:$0xff] }
 0x7c2   : > { %v8162_v40 = vadd.f32 %v8161_v29, %v8148_v46 }
 0x7c3   : > { %8424 = vst [vmem:[#allocation2 + $0x8] sm:$0xff] %v8408_v63 }
 0x7c4   : > { %v8176_v6 = vadd.f32 %v8175_v51, %v8162_v40  ;;  %v8229_v43 = vpop.f32.mrf.mxu3 }
 0x7c5   : > { %v8187_v39 = vpop.f32.mrf.mxu0 }
 0x7c6   : > { %v8416_v42 = vadd.f32 %v8176_v6, %v368_v45  ;;  %v8217_v54 = vpop.f32.mrf.mxu2  ;;  %v8202_v52 = vadd.f32 %v8201_v32, %v8187_v39  ;;  %v369_v6 = vld [vmem:[#allocation2 + $0x28] sm:$0xff] }
 0x7c8   : > { %8432 = vst [vmem:[#allocation2 + $0x78] sm:$0xff] %v8416_v42  ;;  %v8257_v53 = vpop.f32.mrf.mxu1  ;;  %v8216_v62 = vadd.f32 %v8215_v37, %v8202_v52 }
 0x7ca   : > { %v8230_v57 = vadd.f32 %v8229_v43, %v8216_v62 }
 0x7cc   : > { %v8231_v56 = vpop.f32.mrf.mxu3 }
 0x7cd   : > { %v8189_v48 = vpop.f32.mrf.mxu0 }
 0x7ce   : > { %v8271_v20 = vpop.f32.mrf.mxu2  ;;  %v8204_v30 = vadd.f32 %v8203_v35, %v8189_v48 }
 0x7d0   : > { %v8259_v31 = vpop.f32.mrf.mxu1  ;;  %v8218_v0 = vadd.f32 %v8217_v54, %v8204_v30 }
 0x7d2   : > { %v8232_v38 = vadd.f32 %v8231_v56, %v8218_v0 }
 0x7d4   : > { %v8285_v60 = vpop.f32.mrf.mxu3 }
 0x7d5   : > { %v8243_v1 = vpop.f32.mrf.mxu0 }
 0x7d6   : > { %v8244_v33 = vadd.f32 %v8243_v1, %v8230_v57  ;;  %v8273_v47 = vpop.f32.mrf.mxu2 }
 0x7d8   : > { %v8258_v14 = vadd.f32 %v8257_v53, %v8244_v33 }
 0x7da   : > { %v8272_v11 = vadd.f32 %v8271_v20, %v8258_v14 }
 0x7dc   : > { %v8287_v24 = vpop.f32.mrf.mxu3  ;;  %v8286_v18 = vadd.f32 %v8285_v60, %v8272_v11 }
 0x7dd   : > { %v8245_v61 = vpop.f32.mrf.mxu0 }
 0x7de   : > { %v8246_v50 = vadd.f32 %v8245_v61, %v8232_v38 }
 0x7e0   : > { %v8260_v3 = vadd.f32 %v8259_v31, %v8246_v50 }
 0x7e2   : > { %v8274_v34 = vadd.f32 %v8273_v47, %v8260_v3 }
 0x7e4   : > { %v8288_v4 = vadd.f32 %v8287_v24, %v8274_v34 }
 0x7f8   : > { %v8299_v12 = vpop.f32.mrf.mxu0 }
 0x7f9   : > { %v8300_v2 = vadd.f32 %v8299_v12, %v8286_v18 }
 0x7fa   : > { %v8313_v15 = vpop.f32.mrf.mxu1 }
 0x7fb   : > { %v8314_v44 = vadd.f32 %v8313_v15, %v8300_v2 }
 0x800   : > { %v8301_v5 = vpop.f32.mrf.mxu0 }
 0x801   : > { %v8302_v21 = vadd.f32 %v8301_v5, %v8288_v4 }
 0x802   : > { %v8327_v41 = vpop.f32.mrf.mxu2  ;;  %v8315_v22 = vpop.f32.mrf.mxu1 }
 0x803   : > { %v8328_v28 = vadd.f32 %v8327_v41, %v8314_v44  ;;  %v8316_v36 = vadd.f32 %v8315_v22, %v8302_v21 }
 0x804   : > { %v8341_v27 = vpop.f32.mrf.mxu3 }
 0x805   : > { %v8342_v13 = vadd.f32 %v8341_v27, %v8328_v28 }
 0x80a   : > { %v8329_v19 = vpop.f32.mrf.mxu2 }
 0x80b   : > { %v8330_v59 = vadd.f32 %v8329_v19, %v8316_v36 }
 0x80c   : > { %v8343_v10 = vpop.f32.mrf.mxu3 }
 0x80d   : > { %v8344_v58 = vadd.f32 %v8343_v10, %v8330_v59 }
 0x838   : > { %v8355_v17 = vpop.f32.mrf.mxu0 }
 0x839   : > { %v8356_v8 = vadd.f32 %v8355_v17, %v8342_v13 }
 0x83a   : > { %v8369_v16 = vpop.f32.mrf.mxu1 }
 0x83b   : > { %v8370_v49 = vadd.f32 %v8369_v16, %v8356_v8 }
 0x840   : > { %v8357_v7 = vpop.f32.mrf.mxu0 }
 0x841   : > { %v8358_v63 = vadd.f32 %v8357_v7, %v8344_v58 }
 0x842   : > { %v8383_v9 = vpop.f32.mrf.mxu2  ;;  %v8371_v29 = vpop.f32.mrf.mxu1 }
 0x843   : > { %v8384_v23 = vadd.f32 %v8383_v9, %v8370_v49  ;;  %v8372_v40 = vadd.f32 %v8371_v29, %v8358_v63 }
 0x844   : > { %v8397_v55 = vpop.f32.mrf.mxu3 }
 0x845   : > { %v8398_v26 = vadd.f32 %v8397_v55, %v8384_v23 }
 0x847   : > { %v8409_v46 = vadd.f32 %v8398_v26, %v361_v25 }
 0x849   : > { %8425 = vst [vmem:[#allocation2 + $0x48] sm:$0xff] %v8409_v46 }
 0x84a   : > { %v8385_v51 = vpop.f32.mrf.mxu2 }
 0x84b   : > { %v8386_v45 = vadd.f32 %v8385_v51, %v8372_v40 }
 0x84c   : > { %v8399_v42 = vpop.f32.mrf.mxu3 }
 0x84d   : > { %v8400_v39 = vadd.f32 %v8399_v42, %v8386_v45  ;;  %8437 = sbr.rel (%p12886_p10) target bundleno = 2153 (0x869), region = 71 }
 0x84f   : > { %v8417_v32 = vadd.f32 %v8400_v39, %v369_v6 }
 0x851   : > { %8433 = vst [vmem:[#allocation2 + $0x28] sm:$0xff] %v8417_v32 }
 0x852   : > { %v8438_v37 = vld [vmem:[#allocation2 + $0x30] sm:$0xff]  ;;  %v8454_v43 = vld [vmem:[%s14426_s4] sm:$0xff]  ;;  %v8440_v56 = vld [vmem:[#allocation2 + $0x58] sm:$0xff] }
 0x853   : > { %v8439_v48 = vld [vmem:[#allocation2] sm:$0xff]  ;;  %v8456_v35 = vperm.slane %v8454_v43, 0  ;;  %v8457_v54 = vperm.slane %v8454_v43, 1  ;;  %v8458_v52 = vperm.slane %v8454_v43, 2  ;;  %v8441_v1 = vld [vmem:[#allocation2 + $0x18] sm:$0xff]  ;;  %v8459_v53 = vperm.slane %v8454_v43, 3 }
 0x854   : > { %v8442_v62 = vld [vmem:[#allocation2 + $0x50] sm:$0xff]  ;;  %v8460_v20 = vperm.slane %v8454_v43, 4  ;;  %v8443_v57 = vld [vmem:[#allocation2 + $0x68] sm:$0xff]  ;;  %v8461_v60 = vperm.slane %v8454_v43, 5  ;;  %v8462_v30 = vperm.slane %v8454_v43, 6  ;;  %v8463_v38 = vperm.slane %v8454_v43, 7 }
 0x855   : > { %v8444_v61 = vld [vmem:[#allocation2 + $0x8] sm:$0xff]  ;;  %v8472_v33 = vadd.f32 %v8456_v35, %v8438_v37  ;;  %v8473_v31 = vadd.f32 %v8457_v54, %v8439_v48  ;;  %v8474_v0 = vadd.f32 %v8458_v52, %v8440_v56  ;;  %v8475_v14 = vadd.f32 %v8459_v53, %v8441_v1  ;;  %v8446_v11 = vld [vmem:[#allocation2 + $0x40] sm:$0xff]  ;;  %v8448_v34 = vld [vmem:[#allocation2 + $0x10] sm:$0xff] }
 0x856   : > { %v8445_v47 = vld [vmem:[#allocation2 + $0x48] sm:$0xff]  ;;  %v8476_v24 = vadd.f32 %v8460_v20, %v8442_v62  ;;  %v8477_v12 = vadd.f32 %v8461_v60, %v8443_v57  ;;  %v8478_v41 = vadd.f32 %v8462_v30, %v8444_v61  ;;  %v8447_v3 = vld [vmem:[#allocation2 + $0x20] sm:$0xff]  ;;  %v8480_v44 = vadd.f32 %v8456_v35, %v8446_v11  ;;  %v8449_v22 = vld [vmem:[#allocation2 + $0x38] sm:$0xff] }
 0x857   : > { %v8488_v15 = vmax.f32 %v8472_v33, 0.0  ;;  %v8489_v50 = vmax.f32 %v8473_v31, 0.0  ;;  %v8490_v18 = vmax.f32 %v8474_v0, 0.0  ;;  %v8491_v2 = vmax.f32 %v8475_v14, 0.0  ;;  %v8450_v21 = vld [vmem:[#allocation2 + $0x60] sm:$0xff]  ;;  %v8451_v10 = vld [vmem:[#allocation2 + $0x70] sm:$0xff] }
 0x858   : > { %v8479_v27 = vadd.f32 %v8463_v38, %v8445_v47  ;;  %v8492_v5 = vmax.f32 %v8476_v24, 0.0  ;;  %v8493_v4 = vmax.f32 %v8477_v12, 0.0  ;;  %v8481_v28 = vadd.f32 %v8457_v54, %v8447_v3  ;;  %v8452_v8 = vld [vmem:[#allocation2 + $0x78] sm:$0xff]  ;;  %v8453_v49 = vld [vmem:[#allocation2 + $0x28] sm:$0xff] }
 0x859   : > { %8504 = vst [vmem:[%s14432_s12] sm:$0xff] %v8488_v15  ;;  %v8494_v19 = vmax.f32 %v8478_v41, 0.0  ;;  %v8482_v13 = vadd.f32 %v8458_v52, %v8448_v34  ;;  %v8483_v36 = vadd.f32 %v8459_v53, %v8449_v22  ;;  %v8496_v16 = vmax.f32 %v8480_v44, 0.0 }
 0x85a   : > { %8505 = vst [vmem:[%s14432_s12 + $0x8] sm:$0xff] %v8489_v50  ;;  %v8495_v17 = vmax.f32 %v8479_v27, 0.0  ;;  %v8484_v59 = vadd.f32 %v8460_v20, %v8450_v21  ;;  %v8497_v9 = vmax.f32 %v8481_v28, 0.0  ;;  %v8485_v58 = vadd.f32 %v8461_v60, %v8451_v10 }
 0x85b   : > { %8506 = vst [vmem:[%s14432_s12 + $0x10] sm:$0xff] %v8490_v18  ;;  %v8498_v23 = vmax.f32 %v8482_v13, 0.0  ;;  %v8486_v55 = vadd.f32 %v8462_v30, %v8452_v8  ;;  %v8499_v7 = vmax.f32 %v8483_v36, 0.0  ;;  %v8487_v25 = vadd.f32 %v8463_v38, %v8453_v49 }
 0x85c   : > { %8507 = vst [vmem:[%s14432_s12 + $0x18] sm:$0xff] %v8491_v2  ;;  %v8500_v26 = vmax.f32 %v8484_v59, 0.0  ;;  %v8501_v63 = vmax.f32 %v8485_v58, 0.0 }
 0x85d   : > { %8508 = vst [vmem:[%s14432_s12 + $0x20] sm:$0xff] %v8492_v5  ;;  %v8502_v46 = vmax.f32 %v8486_v55, 0.0  ;;  %v8503_v29 = vmax.f32 %v8487_v25, 0.0 }
 0x85e   : > { %8509 = vst [vmem:[%s14432_s12 + $0x28] sm:$0xff] %v8493_v4 }
 0x85f   : > { %8510 = vst [vmem:[%s14432_s12 + $0x30] sm:$0xff] %v8494_v19 }
 0x860   : > { %8511 = vst [vmem:[%s14432_s12 + $0x38] sm:$0xff] %v8495_v17 }
 0x861   : > { %8512 = vst [vmem:[%s14432_s12 + $0x40] sm:$0xff] %v8496_v16 }
 0x862   : > { %8513 = vst [vmem:[%s14432_s12 + $0x48] sm:$0xff] %v8497_v9 }
 0x863   : > { %8514 = vst [vmem:[%s14432_s12 + $0x50] sm:$0xff] %v8498_v23 }
 0x864   : > { %8515 = vst [vmem:[%s14432_s12 + $0x58] sm:$0xff] %v8499_v7 }
 0x865   : > { %8516 = vst [vmem:[%s14432_s12 + $0x60] sm:$0xff] %v8500_v26 }
 0x866   : > { %8517 = vst [vmem:[%s14432_s12 + $0x68] sm:$0xff] %v8501_v63 }
 0x867   : > { %8518 = vst [vmem:[%s14432_s12 + $0x70] sm:$0xff] %v8502_v46 }
 0x868   : > { %8519 = vst [vmem:[%s14432_s12 + $0x78] sm:$0xff] %v8503_v29 }
 0x869 PF: > { %8526 = sbr.rel (!%p14369_p6) target bundleno = 2177 (0x881), region = 75  ;;  %s17062_s10 = sld [smem:[#allocation13_spill]] (%p14369_p6)  ;;  %v8545_v40 = vld [vmem:[%s14432_s12] sm:$0xff] (%p14369_p6)  ;;  %v8547_v51 = vld [vmem:[%s14432_s12 + $0x8] sm:$0xff] (%p14369_p6)  ;;  %v8549_v45 = vld [vmem:[%s14432_s12 + $0x10] sm:$0xff] (%p14369_p6) }
 0x86a   : > { %s17063_s30 = sld [smem:[#allocation23_spill]] (%p14369_p6)  ;;  %v8551_v6 = vld [vmem:[%s14432_s12 + $0x18] sm:$0xff] (%p14369_p6)  ;;  %v8553_v42 = vld [vmem:[%s14432_s12 + $0x20] sm:$0xff] (%p14369_p6)  ;;  %v8555_v39 = vld [vmem:[%s14432_s12 + $0x28] sm:$0xff] (%p14369_p6) }
 0x86b   : > { %v8557_v32 = vld [vmem:[%s14432_s12 + $0x30] sm:$0xff] (%p14369_p6)  ;;  %v8559_v37 = vld [vmem:[%s14432_s12 + $0x38] sm:$0xff] (%p14369_p6)  ;;  %v8561_v43 = vld [vmem:[%s14432_s12 + $0x40] sm:$0xff] (%p14369_p6) }
 0x86c   : > { %v8563_v48 = vld [vmem:[%s14432_s12 + $0x48] sm:$0xff] (%p14369_p6)  ;;  %v8565_v35 = vld [vmem:[%s14432_s12 + $0x50] sm:$0xff] (%p14369_p6)  ;;  %v8567_v54 = vld [vmem:[%s14432_s12 + $0x58] sm:$0xff] (%p14369_p6) }
 0x86d   : > { %v8569_v56 = vld [vmem:[%s14432_s12 + $0x60] sm:$0xff] (%p14369_p6)  ;;  %v8571_v52 = vld [vmem:[%s14432_s12 + $0x68] sm:$0xff] (%p14369_p6) }
 0x86e   : > { %v8573_v1 = vld [vmem:[%s14432_s12 + $0x70] sm:$0xff] }
 0x86f   : > { %s13934_s29 = sshll.u32 %s17062_s10, 6  ;;  %v8575_v53 = vld [vmem:[%s14432_s12 + $0x78] sm:$0xff] }
 0x870   : > { %s8532_s7 = scalar_lea.vmem %s17063_s30, %s13934_s29 }
 0x871   : > { %8546 = vst [vmem:[%s8532_s7] sm:$0xff] %v8545_v40 }
 0x872   : > { %8548 = vst [vmem:[%s8532_s7 + $0x8] sm:$0xff] %v8547_v51 }
 0x873   : > { %8550 = vst [vmem:[%s8532_s7 + $0x10] sm:$0xff] %v8549_v45 }
 0x874   : > { %8552 = vst [vmem:[%s8532_s7 + $0x18] sm:$0xff] %v8551_v6 }
 0x875   : > { %8554 = vst [vmem:[%s8532_s7 + $0x20] sm:$0xff] %v8553_v42 }
 0x876   : > { %8556 = vst [vmem:[%s8532_s7 + $0x28] sm:$0xff] %v8555_v39 }
 0x877   : > { %8558 = vst [vmem:[%s8532_s7 + $0x30] sm:$0xff] %v8557_v32 }
 0x878   : > { %8560 = vst [vmem:[%s8532_s7 + $0x38] sm:$0xff] %v8559_v37 }
 0x879   : > { %8562 = vst [vmem:[%s8532_s7 + $0x100] sm:$0xff] %v8561_v43 }
 0x87a   : > { %8564 = vst [vmem:[%s8532_s7 + $0x108] sm:$0xff] %v8563_v48 }
 0x87b   : > { %8566 = vst [vmem:[%s8532_s7 + $0x110] sm:$0xff] %v8565_v35 }
 0x87c   : > { %8568 = vst [vmem:[%s8532_s7 + $0x118] sm:$0xff] %v8567_v54 }
 0x87d   : > { %8570 = vst [vmem:[%s8532_s7 + $0x120] sm:$0xff] %v8569_v56 }
 0x87e   : > { %8572 = vst [vmem:[%s8532_s7 + $0x128] sm:$0xff] %v8571_v52 }
 0x87f   : > { %8574 = vst [vmem:[%s8532_s7 + $0x130] sm:$0xff] %v8573_v1 }
 0x880   : > { %8576 = vst [vmem:[%s8532_s7 + $0x138] sm:$0xff] %v8575_v53 }
 0x881 PF: > { %s19_s24 = sadd.s32 1, %s14213_s24   ;;  %s17065_s6 = sld [smem:[#allocation20_spill]] }
 0x882   : > { %p16986_p11 = scmp.ge.s32.totalorder %s19_s24, 10   ;;  %s17066_s11 = sld [smem:[#allocation11_spill]] }
 0x883   : > { %s17067_s17 = sld [smem:[#allocation19_spill]]  ;;  %s17074_s12 = smov %s14169_s13 }
 0x884   : > { %s17068_s18 = sld [smem:[#allocation12_spill]]  ;;  %s17075_s13 = smov %s14173_s14 }
 0x885   : > { %s17069_s19 = sld [smem:[#allocation18_spill]]  ;;  %s17077_s15 = smov %s14181_s16 }
 0x886   : > { %s17070_s20 = sld [smem:[#allocation14_spill]]  ;;  %18 = sbr.rel (!%p16986_p11) target bundleno = 13 (0xd), region = 147 }
 0x887   : > { %s17071_s21 = sld [smem:[#allocation15_spill]]  ;;  %s17076_s14 = smov %s17065_s6 }
 0x888   : > { %s17072_s22 = sld [smem:[#allocation16_spill]]  ;;  %s17078_s16 = smov %s17066_s11 }
 0x889   : > { %s17073_s23 = sld [smem:[#allocation17_spill]] }
 0x88b   :  { %8592 = vsyncpa [#allocation5], 1 }
 0x88c   :  { %8594 = vsyncpa [#allocation5 + $0x1], 1 }
 0x88d   :  { %8595 = vsyncpa [#allocation7], 1 }
 0x88e   :  { %8597 = vsyncpa [#allocation7 + $0x1], 1 }

</bundles_post_ra>
